<compile_context>
chip_gen: v7x
topology: tpu7x:2x2x1
jax: 0.10.0
libtpu: 0.0.40
codegen_flags: <defaults>
</compile_context>

<pallas_src>
import functools
import math

import jax
import jax.numpy as jnp
import numpy as np
from jax import lax
from jax.experimental import pallas as pl
from jax.experimental.pallas import tpu as pltpu


def _round_up(x, m):
    return (x + m - 1) // m * m


def _ddense_fused_kernel(x_ref, w1_ref, b1_ref, w2_ref, b2_ref, a_ref,
                         o_ref, xpad_ref, hpad_ref,
                         *, H, W, Cin, Cout, k, dk, dil, leaky, cat):
    """One batch image per grid step; both convs + activations + concat fused.

    x_ref : (1, H, W, Cin)        input tile (f32)
    w1_ref: (k*k,  Cin,  Cout)    conv1 weights, per-tap layout (bf16)
    b1_ref: (1, Cout)             conv1 bias (f32)
    w2_ref: (dk*dk, Cout, Cout)   conv2 weights, per-tap layout (bf16)
    b2_ref: (1, Cout)             conv2 bias (f32)
    a_ref : (1, Cout)             PReLU alpha (f32)
    o_ref : (1, H, W, Cin+Cout) if cat else (1, H, W, Cout)
    xpad_ref: (H+2*p1, lp1+W+p1, Cin)  bf16 zero-padded input scratch
    hpad_ref: (H+2*p2, lp2+W+p2, Cout) bf16 zero-padded intermediate scratch
    """
    pad1 = (k - 1) // 2
    pad2 = (dk - 1) * dil // 2
    lp1 = _round_up(pad1, 8)          # left halo rounded to a sublane tile
    lp2 = _round_up(pad2, 8)

    # Scratches persist across grid steps.  Halo bands only ever hold zeros and
    # the interior rectangle is fully overwritten every step, so zeroing once
    # on the first step is sufficient (the grid axis is "arbitrary", i.e. runs
    # sequentially on one core, so step 0 is always executed first).
    @pl.when(pl.program_id(0) == 0)
    def _():
        xpad_ref[...] = jnp.zeros_like(xpad_ref)
        hpad_ref[...] = jnp.zeros_like(hpad_ref)

    x = x_ref[0]                                            # (H, W, Cin) f32
    # sublane-aligned interior store (offset lp1 is a multiple of 8)
    xpad_ref[pad1:pad1 + H, lp1:lp1 + W, :] = x.astype(xpad_ref.dtype)

    # ---- conv1 (k x k, dilation 1): k*k per-tap dots, f32 accumulation ----
    h = None
    for t in range(k * k):
        i, j = divmod(t, k)
        tap = xpad_ref[i:i + H, lp1 - pad1 + j:lp1 - pad1 + j + W, :]
        part = lax.dot_general(tap, w1_ref[t],
                               dimension_numbers=(((2,), (0,)), ((), ())),
                               preferred_element_type=jnp.float32)
        h = part if h is None else h + part                 # (H, W, Cout) f32
    h = h + b1_ref[0]
    h = jnp.where(h >= 0, h, leaky * h)                     # LeakyReLU(0.2)

    # intermediate never leaves VMEM; stored bf16 (matches MXU operand rounding)
    hpad_ref[pad2:pad2 + H, lp2:lp2 + W, :] = h.astype(hpad_ref.dtype)

    # ---- conv2 (dk x dk, dilation d): dk*dk per-tap dots ----
    f = None
    for t in range(dk * dk):
        i, j = divmod(t, dk)
        r0 = i * dil
        c0 = lp2 - pad2 + j * dil
        tap = hpad_ref[r0:r0 + H, c0:c0 + W, :]
        part = lax.dot_general(tap, w2_ref[t],
                               dimension_numbers=(((2,), (0,)), ((), ())),
                               preferred_element_type=jnp.float32)
        f = part if f is None else f + part                 # (H, W, Cout) f32
    f = f + b2_ref[0]
    f = jnp.where(f >= 0, f, a_ref[0] * f)                  # PReLU

    if cat:
        # concat fused into the output block: channels [0:Cin]=x, [Cin:]=f.
        o_ref[0] = jnp.concatenate([x, f], axis=-1).astype(o_ref.dtype)
    else:
        o_ref[0] = f.astype(o_ref.dtype)


def ddense_unit_forward(x_nhwc, w1t, b1, w2t, b2, prelu_a, *,
                        k, dk, d, leaky, cat_input=True):
    """Fused Conv_S -> LeakyReLU -> dilated Conv_S -> PReLU (-> concat), NHWC."""
    N, H, W, Cin = x_nhwc.shape
    Cout = b1.shape[-1]
    pad1 = (k - 1) // 2
    pad2 = (dk - 1) * d // 2
    lp1 = _round_up(pad1, 8)
    lp2 = _round_up(pad2, 8)
    Ctot = Cin + Cout if cat_input else Cout

    kernel = functools.partial(_ddense_fused_kernel, H=H, W=W, Cin=Cin,
                               Cout=Cout, k=k, dk=dk, dil=d,
                               leaky=float(leaky), cat=cat_input)

    xpad_shape = (H + 2 * pad1, lp1 + W + pad1, Cin)
    hpad_shape = (H + 2 * pad2, lp2 + W + pad2, Cout)

    flops = 2 * N * H * W * Cout * (k * k * Cin + dk * dk * Cout)
    bytes_accessed = (x_nhwc.size * x_nhwc.dtype.itemsize
                      + (w1t.size + w2t.size) * 2
                      + (b1.size + b2.size + prelu_a.size) * 4
                      + N * H * W * Ctot * x_nhwc.dtype.itemsize)

    vmem_need = (2 * H * W * Cin * 4                      # double-buffered input block
                 + 2 * H * W * Ctot * 4                   # double-buffered output block
                 + (int(np.prod(xpad_shape)) + int(np.prod(hpad_shape))) * 2
                 + (w1t.size + w2t.size) * 2
                 + (b1.size + b2.size + prelu_a.size) * 4)
    try:    # ~75% of this chip's VMEM (v7x: ~48 MiB, v5e/v6e: ~96 MiB)
        vmem_cap = int(0.75 * pltpu.get_tpu_info().vmem_capacity_bytes)
    except Exception:                                      # conservative fallback
        vmem_cap = 48 * 2 ** 20
    vmem_limit = int(min(vmem_cap, max(32 * 2 ** 20, 2 * vmem_need)))

    out = pl.pallas_call(
        kernel,
        out_shape=jax.ShapeDtypeStruct((N, H, W, Ctot), x_nhwc.dtype),
        grid_spec=pltpu.PrefetchScalarGridSpec(
            num_scalar_prefetch=0,
            grid=(N,),
            in_specs=[
                pl.BlockSpec((1, H, W, Cin), lambda n: (n, 0, 0, 0)),
                pl.BlockSpec((k * k, Cin, Cout), lambda n: (0, 0, 0)),
                pl.BlockSpec((1, Cout), lambda n: (0, 0)),
                pl.BlockSpec((dk * dk, Cout, Cout), lambda n: (0, 0, 0)),
                pl.BlockSpec((1, Cout), lambda n: (0, 0)),
                pl.BlockSpec((1, Cout), lambda n: (0, 0)),
            ],
            out_specs=pl.BlockSpec((1, H, W, Ctot), lambda n: (n, 0, 0, 0)),
            scratch_shapes=[
                pltpu.VMEM(xpad_shape, jnp.bfloat16),
                pltpu.VMEM(hpad_shape, jnp.bfloat16),
            ],
        ),
        # "arbitrary" keeps the zero-once scratch init valid on multi-core parts.
        compiler_params=pltpu.CompilerParams(
            dimension_semantics=("arbitrary",),
            vmem_limit_bytes=vmem_limit),
        cost_estimate=pl.CostEstimate(flops=flops, transcendentals=0,
                                      bytes_accessed=bytes_accessed),
    )(x_nhwc, w1t, b1, w2t, b2, prelu_a)
    return out


class DDenseUnitPallas:
    """JAX/Pallas port of DDense_Unit(inC, outC, k, dk, d)."""

    def __init__(self, inC, outC, k, dk, d=1, *, key):
        assert k % 2 == 1 and dk % 2 == 1, "Conv_S 'same' padding assumes odd kernels"
        self.inC, self.outC, self.k, self.dk, self.d = inC, outC, k, dk, d
        k1, k2, k3, k4 = jax.random.split(key, 4)

        # PyTorch Conv2d default init: U(-b, b), b = 1/sqrt(fan_in)
        bnd1 = 1.0 / math.sqrt(inC * k * k)
        w1 = jax.random.uniform(k1, (outC, inC, k, k), jnp.float32, -bnd1, bnd1)
        bias1 = jax.random.uniform(k2, (outC,), jnp.float32, -bnd1, bnd1)

        bnd2 = 1.0 / math.sqrt(outC * dk * dk)
        w2 = jax.random.uniform(k3, (outC, outC, dk, dk), jnp.float32, -bnd2, bnd2)
        bias2 = jax.random.uniform(k4, (outC,), jnp.float32, -bnd2, bnd2)

        # OIHW -> HWIO -> per-tap (k*k, Cin, Cout), stored bf16 for the MXU
        self.w1t = (jnp.transpose(w1, (2, 3, 1, 0))
                    .reshape(k * k, inC, outC).astype(jnp.bfloat16))
        self.w2t = (jnp.transpose(w2, (2, 3, 1, 0))
                    .reshape(dk * dk, outC, outC).astype(jnp.bfloat16))
        self.b1 = bias1.reshape(1, outC)
        self.b2 = bias2.reshape(1, outC)

        self.leaky_slope = 0.2                       # nn.LeakyReLU(0.2)
        # nn.PReLU() default: single learnable 0.25, broadcast per channel here
        # (so per-channel trained weights could also be loaded).
        self.prelu_a = jnp.full((1, outC), 0.25, jnp.float32)

    def forward_nhwc(self, x_nhwc, cat_input=True):
        """Preferred entry point for chained units (no layout round-trips)."""
        return ddense_unit_forward(x_nhwc, self.w1t, self.b1, self.w2t, self.b2,
                                   self.prelu_a, k=self.k, dk=self.dk, d=self.d,
                                   leaky=self.leaky_slope, cat_input=cat_input)

    def __call__(self, x_nchw, cat_input=True):
        # NCHW boundary transposes kept only for drop-in parity with PyTorch.
        x_nhwc = jnp.transpose(x_nchw, (0, 2, 3, 1))
        out_nhwc = self.forward_nhwc(x_nhwc, cat_input=cat_input)
        return jnp.transpose(out_nhwc, (0, 3, 1, 2))


def _reference(mod, x_nchw, cat_input=True):
    """Pure-JAX (XLA conv) reference with bf16 operand rounding emulated."""
    w1 = mod.w1t.astype(jnp.float32).reshape(mod.k, mod.k, mod.inC, mod.outC)
    w2 = mod.w2t.astype(jnp.float32).reshape(mod.dk, mod.dk, mod.outC, mod.outC)

    def conv(x, w, b, dil, kk):
        pad = (kk - 1) * dil // 2
        xq = x.astype(jnp.bfloat16).astype(jnp.float32)   # emulate bf16 MXU operands
        y = lax.conv_general_dilated(
            xq, w, window_strides=(1, 1), padding=((pad, pad), (pad, pad)),
            rhs_dilation=(dil, dil),
            dimension_numbers=("NCHW", "HWIO", "NCHW"),
            preferred_element_type=jnp.float32)
        return y + b.reshape(1, -1, 1, 1)

    h = conv(x_nchw, w1, mod.b1, 1, mod.k)
    h = jnp.where(h >= 0, h, mod.leaky_slope * h)
    f = conv(h, w2, mod.b2, mod.d, mod.dk)
    a = mod.prelu_a.reshape(1, -1, 1, 1)
    f = jnp.where(f >= 0, f, a * f)
    if cat_input:
        return jnp.concatenate([x_nchw, f], axis=1)
    return f


if __name__ == "__main__":
    key = jax.random.PRNGKey(0)
    kx, kp = jax.random.split(key)

    inC, outC, k, dk, d = 4, 8, 3, 3, 2
    x = jax.random.normal(kx, (2, inC, 16, 16), jnp.float32)   # NCHW like PyTorch

    mod = DDenseUnitPallas(inC, outC, k, dk, d, key=kp)

    out = jax.block_until_ready(mod(x, cat_input=True))
    assert out.shape == (2, inC + outC, 16, 16), out.shape

    ref = jax.block_until_ready(_reference(mod, x, cat_input=True))
    # bf16 operand rounding is emulated in the reference too; the remaining
    # difference is f32 accumulation order plus rare bf16 boundary flips of h.
    np.testing.assert_allclose(np.asarray(out), np.asarray(ref),
                               rtol=5e-3, atol=5e-3)

    out_f = jax.block_until_ready(mod(x, cat_input=False))
    assert out_f.shape == (2, outC, 16, 16), out_f.shape
    np.testing.assert_allclose(np.asarray(out_f), np.asarray(ref)[:, inC:],
                               rtol=5e-3, atol=5e-3)

    print("KERNEL_OK")
</pallas_src>

<mosaic_0001>
module attributes {stable_mosaic.version = 11 : i64} {
  func.func @_ddense_fused_kernel(%arg0: i32, %arg1: memref<1x16x16x4xf32, #tpu.memory_space<vmem>>, %arg2: memref<9x4x8xbf16, #tpu.memory_space<vmem>>, %arg3: memref<1x8xf32, #tpu.memory_space<vmem>>, %arg4: memref<9x8x8xbf16, #tpu.memory_space<vmem>>, %arg5: memref<1x8xf32, #tpu.memory_space<vmem>>, %arg6: memref<1x8xf32, #tpu.memory_space<vmem>>, %arg7: memref<1x16x16x12xf32, #tpu.memory_space<vmem>>, %arg8: memref<18x25x4xbf16, #tpu.memory_space<vmem>>, %arg9: memref<20x26x8xbf16, #tpu.memory_space<vmem>>) attributes {dimension_semantics = [#tpu.dimension_semantics<arbitrary>], iteration_bounds = array<i64: 2>, scalar_prefetch = 0 : i64, scratch_operands = 2 : i64, tpu.core_type = #tpu.core_type<tc>, window_params = [{transform_indices = @transform_0, window_bounds = array<i64: 1, 16, 16, 4>}, {pipeline_mode = #tpu.pipeline_mode<synchronous>, transform_indices = @transform_1, window_bounds = array<i64: 9, 4, 8>}, {pipeline_mode = #tpu.pipeline_mode<synchronous>, transform_indices = @transform_2, window_bounds = array<i64: 1, 8>}, {pipeline_mode = #tpu.pipeline_mode<synchronous>, transform_indices = @transform_3, window_bounds = array<i64: 9, 8, 8>}, {pipeline_mode = #tpu.pipeline_mode<synchronous>, transform_indices = @transform_4, window_bounds = array<i64: 1, 8>}, {pipeline_mode = #tpu.pipeline_mode<synchronous>, transform_indices = @transform_5, window_bounds = array<i64: 1, 8>}, {transform_indices = @transform_6, window_bounds = array<i64: 1, 16, 16, 12>}]} {
    %c0_i32 = arith.constant 0 : i32
    %0 = arith.cmpi eq, %arg0, %c0_i32 : i32
    %1 = arith.extui %0 : i1 to i32
    %c0_i32_0 = arith.constant 0 : i32
    %2 = arith.cmpi ne, %1, %c0_i32_0 : i32
    scf.if %2 {
      %cst_138 = arith.constant 0.000000e+00 : bf16
      %124 = vector.broadcast %cst_138 : bf16 to vector<18x25x4xbf16>
      %c0_139 = arith.constant 0 : index
      %c0_140 = arith.constant 0 : index
      %c0_141 = arith.constant 0 : index
      %125 = vector.load %arg8[%c0_139, %c0_140, %c0_141] : memref<18x25x4xbf16, #tpu.memory_space<vmem>>, vector<18x25x4xbf16>
      tpu.vector_store %arg8[%c0_139, %c0_140, %c0_141], %124 {strides = array<i32>} : memref<18x25x4xbf16, #tpu.memory_space<vmem>>, vector<18x25x4xbf16>,
      %cst_142 = arith.constant 0.000000e+00 : bf16
      %126 = vector.broadcast %cst_142 : bf16 to vector<20x26x8xbf16>
      %c0_143 = arith.constant 0 : index
      %c0_144 = arith.constant 0 : index
      %c0_145 = arith.constant 0 : index
      %127 = vector.load %arg9[%c0_143, %c0_144, %c0_145] : memref<20x26x8xbf16, #tpu.memory_space<vmem>>, vector<20x26x8xbf16>
      tpu.vector_store %arg9[%c0_143, %c0_144, %c0_145], %126 {strides = array<i32>} : memref<20x26x8xbf16, #tpu.memory_space<vmem>>, vector<20x26x8xbf16>,
    } else {
    }
    %c0 = arith.constant 0 : index
    %c0_1 = arith.constant 0 : index
    %c0_2 = arith.constant 0 : index
    %c0_3 = arith.constant 0 : index
    %3 = vector.load %arg1[%c0, %c0_1, %c0_2, %c0_3] : memref<1x16x16x4xf32, #tpu.memory_space<vmem>>, vector<1x16x16x4xf32>
    %4 = vector.shape_cast %3 : vector<1x16x16x4xf32> to vector<16x16x4xf32>
    %5 = arith.truncf %4 : vector<16x16x4xf32> to vector<16x16x4xbf16>
    %c1 = arith.constant 1 : index
    %c8 = arith.constant 8 : index
    %c0_4 = arith.constant 0 : index
    %6 = vector.load %arg8[%c1, %c8, %c0_4] : memref<18x25x4xbf16, #tpu.memory_space<vmem>>, vector<16x16x4xbf16>
    tpu.vector_store %arg8[%c1, %c8, %c0_4], %5 {strides = array<i32>} : memref<18x25x4xbf16, #tpu.memory_space<vmem>>, vector<16x16x4xbf16>,
    %c0_5 = arith.constant 0 : index
    %c7 = arith.constant 7 : index
    %c0_6 = arith.constant 0 : index
    %7 = vector.load %arg8[%c0_5, %c7, %c0_6] : memref<18x25x4xbf16, #tpu.memory_space<vmem>>, vector<16x16x4xbf16>
    %c0_7 = arith.constant 0 : index
    %c0_8 = arith.constant 0 : index
    %c0_9 = arith.constant 0 : index
    %8 = vector.load %arg2[%c0_7, %c0_8, %c0_9] : memref<9x4x8xbf16, #tpu.memory_space<vmem>>, vector<1x4x8xbf16>
    %9 = vector.shape_cast %8 : vector<1x4x8xbf16> to vector<4x8xbf16>
    %cst = arith.constant dense<0.000000e+00> : vector<16x16x8xf32>
    %10 = tpu.matmul %7, %9, %cst {dimension_numbers = #tpu.dot_dimension_numbers<[2], [0], [0, 1], [1], [0, 0, 0, 1, 1, 1], [], []>} : vector<16x16x4xbf16>, vector<4x8xbf16>, vector<16x16x8xf32> -> vector<16x16x8xf32>
    %c0_10 = arith.constant 0 : index
    %c8_11 = arith.constant 8 : index
    %c0_12 = arith.constant 0 : index
    %11 = vector.load %arg8[%c0_10, %c8_11, %c0_12] : memref<18x25x4xbf16, #tpu.memory_space<vmem>>, vector<16x16x4xbf16>
    %c1_13 = arith.constant 1 : index
    %c0_14 = arith.constant 0 : index
    %c0_15 = arith.constant 0 : index
    %12 = vector.load %arg2[%c1_13, %c0_14, %c0_15] : memref<9x4x8xbf16, #tpu.memory_space<vmem>>, vector<1x4x8xbf16>
    %13 = vector.shape_cast %12 : vector<1x4x8xbf16> to vector<4x8xbf16>
    %cst_16 = arith.constant dense<0.000000e+00> : vector<16x16x8xf32>
    %14 = tpu.matmul %11, %13, %cst_16 {dimension_numbers = #tpu.dot_dimension_numbers<[2], [0], [0, 1], [1], [0, 0, 0, 1, 1, 1], [], []>} : vector<16x16x4xbf16>, vector<4x8xbf16>, vector<16x16x8xf32> -> vector<16x16x8xf32>
    %15 = arith.addf %10, %14 : vector<16x16x8xf32>
    %c0_17 = arith.constant 0 : index
    %c9 = arith.constant 9 : index
    %c0_18 = arith.constant 0 : index
    %16 = vector.load %arg8[%c0_17, %c9, %c0_18] : memref<18x25x4xbf16, #tpu.memory_space<vmem>>, vector<16x16x4xbf16>
    %c2 = arith.constant 2 : index
    %c0_19 = arith.constant 0 : index
    %c0_20 = arith.constant 0 : index
    %17 = vector.load %arg2[%c2, %c0_19, %c0_20] : memref<9x4x8xbf16, #tpu.memory_space<vmem>>, vector<1x4x8xbf16>
    %18 = vector.shape_cast %17 : vector<1x4x8xbf16> to vector<4x8xbf16>
    %cst_21 = arith.constant dense<0.000000e+00> : vector<16x16x8xf32>
    %19 = tpu.matmul %16, %18, %cst_21 {dimension_numbers = #tpu.dot_dimension_numbers<[2], [0], [0, 1], [1], [0, 0, 0, 1, 1, 1], [], []>} : vector<16x16x4xbf16>, vector<4x8xbf16>, vector<16x16x8xf32> -> vector<16x16x8xf32>
    %20 = arith.addf %15, %19 : vector<16x16x8xf32>
    %c1_22 = arith.constant 1 : index
    %c7_23 = arith.constant 7 : index
    %c0_24 = arith.constant 0 : index
    %21 = vector.load %arg8[%c1_22, %c7_23, %c0_24] : memref<18x25x4xbf16, #tpu.memory_space<vmem>>, vector<16x16x4xbf16>
    %c3 = arith.constant 3 : index
    %c0_25 = arith.constant 0 : index
    %c0_26 = arith.constant 0 : index
    %22 = vector.load %arg2[%c3, %c0_25, %c0_26] : memref<9x4x8xbf16, #tpu.memory_space<vmem>>, vector<1x4x8xbf16>
    %23 = vector.shape_cast %22 : vector<1x4x8xbf16> to vector<4x8xbf16>
    %cst_27 = arith.constant dense<0.000000e+00> : vector<16x16x8xf32>
    %24 = tpu.matmul %21, %23, %cst_27 {dimension_numbers = #tpu.dot_dimension_numbers<[2], [0], [0, 1], [1], [0, 0, 0, 1, 1, 1], [], []>} : vector<16x16x4xbf16>, vector<4x8xbf16>, vector<16x16x8xf32> -> vector<16x16x8xf32>
    %25 = arith.addf %20, %24 : vector<16x16x8xf32>
    %c1_28 = arith.constant 1 : index
    %c8_29 = arith.constant 8 : index
    %c0_30 = arith.constant 0 : index
    %26 = vector.load %arg8[%c1_28, %c8_29, %c0_30] : memref<18x25x4xbf16, #tpu.memory_space<vmem>>, vector<16x16x4xbf16>
    %c4 = arith.constant 4 : index
    %c0_31 = arith.constant 0 : index
    %c0_32 = arith.constant 0 : index
    %27 = vector.load %arg2[%c4, %c0_31, %c0_32] : memref<9x4x8xbf16, #tpu.memory_space<vmem>>, vector<1x4x8xbf16>
    %28 = vector.shape_cast %27 : vector<1x4x8xbf16> to vector<4x8xbf16>
    %cst_33 = arith.constant dense<0.000000e+00> : vector<16x16x8xf32>
    %29 = tpu.matmul %26, %28, %cst_33 {dimension_numbers = #tpu.dot_dimension_numbers<[2], [0], [0, 1], [1], [0, 0, 0, 1, 1, 1], [], []>} : vector<16x16x4xbf16>, vector<4x8xbf16>, vector<16x16x8xf32> -> vector<16x16x8xf32>
    %30 = arith.addf %25, %29 : vector<16x16x8xf32>
    %c1_34 = arith.constant 1 : index
    %c9_35 = arith.constant 9 : index
    %c0_36 = arith.constant 0 : index
    %31 = vector.load %arg8[%c1_34, %c9_35, %c0_36] : memref<18x25x4xbf16, #tpu.memory_space<vmem>>, vector<16x16x4xbf16>
    %c5 = arith.constant 5 : index
    %c0_37 = arith.constant 0 : index
    %c0_38 = arith.constant 0 : index
    %32 = vector.load %arg2[%c5, %c0_37, %c0_38] : memref<9x4x8xbf16, #tpu.memory_space<vmem>>, vector<1x4x8xbf16>
    %33 = vector.shape_cast %32 : vector<1x4x8xbf16> to vector<4x8xbf16>
    %cst_39 = arith.constant dense<0.000000e+00> : vector<16x16x8xf32>
    %34 = tpu.matmul %31, %33, %cst_39 {dimension_numbers = #tpu.dot_dimension_numbers<[2], [0], [0, 1], [1], [0, 0, 0, 1, 1, 1], [], []>} : vector<16x16x4xbf16>, vector<4x8xbf16>, vector<16x16x8xf32> -> vector<16x16x8xf32>
    %35 = arith.addf %30, %34 : vector<16x16x8xf32>
    %c2_40 = arith.constant 2 : index
    %c7_41 = arith.constant 7 : index
    %c0_42 = arith.constant 0 : index
    %36 = vector.load %arg8[%c2_40, %c7_41, %c0_42] : memref<18x25x4xbf16, #tpu.memory_space<vmem>>, vector<16x16x4xbf16>
    %c6 = arith.constant 6 : index
    %c0_43 = arith.constant 0 : index
    %c0_44 = arith.constant 0 : index
    %37 = vector.load %arg2[%c6, %c0_43, %c0_44] : memref<9x4x8xbf16, #tpu.memory_space<vmem>>, vector<1x4x8xbf16>
    %38 = vector.shape_cast %37 : vector<1x4x8xbf16> to vector<4x8xbf16>
    %cst_45 = arith.constant dense<0.000000e+00> : vector<16x16x8xf32>
    %39 = tpu.matmul %36, %38, %cst_45 {dimension_numbers = #tpu.dot_dimension_numbers<[2], [0], [0, 1], [1], [0, 0, 0, 1, 1, 1], [], []>} : vector<16x16x4xbf16>, vector<4x8xbf16>, vector<16x16x8xf32> -> vector<16x16x8xf32>
    %40 = arith.addf %35, %39 : vector<16x16x8xf32>
    %c2_46 = arith.constant 2 : index
    %c8_47 = arith.constant 8 : index
    %c0_48 = arith.constant 0 : index
    %41 = vector.load %arg8[%c2_46, %c8_47, %c0_48] : memref<18x25x4xbf16, #tpu.memory_space<vmem>>, vector<16x16x4xbf16>
    %c7_49 = arith.constant 7 : index
    %c0_50 = arith.constant 0 : index
    %c0_51 = arith.constant 0 : index
    %42 = vector.load %arg2[%c7_49, %c0_50, %c0_51] : memref<9x4x8xbf16, #tpu.memory_space<vmem>>, vector<1x4x8xbf16>
    %43 = vector.shape_cast %42 : vector<1x4x8xbf16> to vector<4x8xbf16>
    %cst_52 = arith.constant dense<0.000000e+00> : vector<16x16x8xf32>
    %44 = tpu.matmul %41, %43, %cst_52 {dimension_numbers = #tpu.dot_dimension_numbers<[2], [0], [0, 1], [1], [0, 0, 0, 1, 1, 1], [], []>} : vector<16x16x4xbf16>, vector<4x8xbf16>, vector<16x16x8xf32> -> vector<16x16x8xf32>
    %45 = arith.addf %40, %44 : vector<16x16x8xf32>
    %c2_53 = arith.constant 2 : index
    %c9_54 = arith.constant 9 : index
    %c0_55 = arith.constant 0 : index
    %46 = vector.load %arg8[%c2_53, %c9_54, %c0_55] : memref<18x25x4xbf16, #tpu.memory_space<vmem>>, vector<16x16x4xbf16>
    %c8_56 = arith.constant 8 : index
    %c0_57 = arith.constant 0 : index
    %c0_58 = arith.constant 0 : index
    %47 = vector.load %arg2[%c8_56, %c0_57, %c0_58] : memref<9x4x8xbf16, #tpu.memory_space<vmem>>, vector<1x4x8xbf16>
    %48 = vector.shape_cast %47 : vector<1x4x8xbf16> to vector<4x8xbf16>
    %cst_59 = arith.constant dense<0.000000e+00> : vector<16x16x8xf32>
    %49 = tpu.matmul %46, %48, %cst_59 {dimension_numbers = #tpu.dot_dimension_numbers<[2], [0], [0, 1], [1], [0, 0, 0, 1, 1, 1], [], []>} : vector<16x16x4xbf16>, vector<4x8xbf16>, vector<16x16x8xf32> -> vector<16x16x8xf32>
    %50 = arith.addf %45, %49 : vector<16x16x8xf32>
    %c0_60 = arith.constant 0 : index
    %c0_61 = arith.constant 0 : index
    %51 = vector.load %arg3[%c0_60, %c0_61] : memref<1x8xf32, #tpu.memory_space<vmem>>, vector<1x8xf32>
    %52 = vector.shape_cast %51 : vector<1x8xf32> to vector<8xf32>
    %53 = vector.shape_cast %52 : vector<8xf32> to vector<1x1x8xf32>
    %54 = vector.broadcast %53 : vector<1x1x8xf32> to vector<16x16x8xf32>
    %55 = arith.addf %50, %54 : vector<16x16x8xf32>
    %cst_62 = arith.constant 0.000000e+00 : f32
    %56 = vector.broadcast %cst_62 : f32 to vector<16x16x8xf32>
    %57 = arith.cmpf oge, %55, %56 : vector<16x16x8xf32>
    %cst_63 = arith.constant 2.000000e-01 : f32
    %58 = vector.broadcast %cst_63 : f32 to vector<16x16x8xf32>
    %59 = arith.mulf %58, %55 : vector<16x16x8xf32>
    %60 = arith.select %57, %55, %59 : vector<16x16x8xi1>, vector<16x16x8xf32>
    %61 = arith.truncf %60 : vector<16x16x8xf32> to vector<16x16x8xbf16>
    %c2_64 = arith.constant 2 : index
    %c8_65 = arith.constant 8 : index
    %c0_66 = arith.constant 0 : index
    %62 = vector.load %arg9[%c2_64, %c8_65, %c0_66] : memref<20x26x8xbf16, #tpu.memory_space<vmem>>, vector<16x16x8xbf16>
    tpu.vector_store %arg9[%c2_64, %c8_65, %c0_66], %61 {strides = array<i32>} : memref<20x26x8xbf16, #tpu.memory_space<vmem>>, vector<16x16x8xbf16>,
    %c0_67 = arith.constant 0 : index
    %c6_68 = arith.constant 6 : index
    %c0_69 = arith.constant 0 : index
    %63 = vector.load %arg9[%c0_67, %c6_68, %c0_69] : memref<20x26x8xbf16, #tpu.memory_space<vmem>>, vector<16x16x8xbf16>
    %c0_70 = arith.constant 0 : index
    %c0_71 = arith.constant 0 : index
    %c0_72 = arith.constant 0 : index
    %64 = vector.load %arg4[%c0_70, %c0_71, %c0_72] : memref<9x8x8xbf16, #tpu.memory_space<vmem>>, vector<1x8x8xbf16>
    %65 = vector.shape_cast %64 : vector<1x8x8xbf16> to vector<8x8xbf16>
    %cst_73 = arith.constant dense<0.000000e+00> : vector<16x16x8xf32>
    %66 = tpu.matmul %63, %65, %cst_73 {dimension_numbers = #tpu.dot_dimension_numbers<[2], [0], [0, 1], [1], [0, 0, 0, 1, 1, 1], [], []>} : vector<16x16x8xbf16>, vector<8x8xbf16>, vector<16x16x8xf32> -> vector<16x16x8xf32>
    %c0_74 = arith.constant 0 : index
    %c8_75 = arith.constant 8 : index
    %c0_76 = arith.constant 0 : index
    %67 = vector.load %arg9[%c0_74, %c8_75, %c0_76] : memref<20x26x8xbf16, #tpu.memory_space<vmem>>, vector<16x16x8xbf16>
    %c1_77 = arith.constant 1 : index
    %c0_78 = arith.constant 0 : index
    %c0_79 = arith.constant 0 : index
    %68 = vector.load %arg4[%c1_77, %c0_78, %c0_79] : memref<9x8x8xbf16, #tpu.memory_space<vmem>>, vector<1x8x8xbf16>
    %69 = vector.shape_cast %68 : vector<1x8x8xbf16> to vector<8x8xbf16>
    %cst_80 = arith.constant dense<0.000000e+00> : vector<16x16x8xf32>
    %70 = tpu.matmul %67, %69, %cst_80 {dimension_numbers = #tpu.dot_dimension_numbers<[2], [0], [0, 1], [1], [0, 0, 0, 1, 1, 1], [], []>} : vector<16x16x8xbf16>, vector<8x8xbf16>, vector<16x16x8xf32> -> vector<16x16x8xf32>
    %71 = arith.addf %66, %70 : vector<16x16x8xf32>
    %c0_81 = arith.constant 0 : index
    %c10 = arith.constant 10 : index
    %c0_82 = arith.constant 0 : index
    %72 = vector.load %arg9[%c0_81, %c10, %c0_82] : memref<20x26x8xbf16, #tpu.memory_space<vmem>>, vector<16x16x8xbf16>
    %c2_83 = arith.constant 2 : index
    %c0_84 = arith.constant 0 : index
    %c0_85 = arith.constant 0 : index
    %73 = vector.load %arg4[%c2_83, %c0_84, %c0_85] : memref<9x8x8xbf16, #tpu.memory_space<vmem>>, vector<1x8x8xbf16>
    %74 = vector.shape_cast %73 : vector<1x8x8xbf16> to vector<8x8xbf16>
    %cst_86 = arith.constant dense<0.000000e+00> : vector<16x16x8xf32>
    %75 = tpu.matmul %72, %74, %cst_86 {dimension_numbers = #tpu.dot_dimension_numbers<[2], [0], [0, 1], [1], [0, 0, 0, 1, 1, 1], [], []>} : vector<16x16x8xbf16>, vector<8x8xbf16>, vector<16x16x8xf32> -> vector<16x16x8xf32>
    %76 = arith.addf %71, %75 : vector<16x16x8xf32>
    %c2_87 = arith.constant 2 : index
    %c6_88 = arith.constant 6 : index
    %c0_89 = arith.constant 0 : index
    %77 = vector.load %arg9[%c2_87, %c6_88, %c0_89] : memref<20x26x8xbf16, #tpu.memory_space<vmem>>, vector<16x16x8xbf16>
    %c3_90 = arith.constant 3 : index
    %c0_91 = arith.constant 0 : index
    %c0_92 = arith.constant 0 : index
    %78 = vector.load %arg4[%c3_90, %c0_91, %c0_92] : memref<9x8x8xbf16, #tpu.memory_space<vmem>>, vector<1x8x8xbf16>
    %79 = vector.shape_cast %78 : vector<1x8x8xbf16> to vector<8x8xbf16>
    %cst_93 = arith.constant dense<0.000000e+00> : vector<16x16x8xf32>
    %80 = tpu.matmul %77, %79, %cst_93 {dimension_numbers = #tpu.dot_dimension_numbers<[2], [0], [0, 1], [1], [0, 0, 0, 1, 1, 1], [], []>} : vector<16x16x8xbf16>, vector<8x8xbf16>, vector<16x16x8xf32> -> vector<16x16x8xf32>
    %81 = arith.addf %76, %80 : vector<16x16x8xf32>
    %c2_94 = arith.constant 2 : index
    %c8_95 = arith.constant 8 : index
    %c0_96 = arith.constant 0 : index
    %82 = vector.load %arg9[%c2_94, %c8_95, %c0_96] : memref<20x26x8xbf16, #tpu.memory_space<vmem>>, vector<16x16x8xbf16>
    %c4_97 = arith.constant 4 : index
    %c0_98 = arith.constant 0 : index
    %c0_99 = arith.constant 0 : index
    %83 = vector.load %arg4[%c4_97, %c0_98, %c0_99] : memref<9x8x8xbf16, #tpu.memory_space<vmem>>, vector<1x8x8xbf16>
    %84 = vector.shape_cast %83 : vector<1x8x8xbf16> to vector<8x8xbf16>
    %cst_100 = arith.constant dense<0.000000e+00> : vector<16x16x8xf32>
    %85 = tpu.matmul %82, %84, %cst_100 {dimension_numbers = #tpu.dot_dimension_numbers<[2], [0], [0, 1], [1], [0, 0, 0, 1, 1, 1], [], []>} : vector<16x16x8xbf16>, vector<8x8xbf16>, vector<16x16x8xf32> -> vector<16x16x8xf32>
    %86 = arith.addf %81, %85 : vector<16x16x8xf32>
    %c2_101 = arith.constant 2 : index
    %c10_102 = arith.constant 10 : index
    %c0_103 = arith.constant 0 : index
    %87 = vector.load %arg9[%c2_101, %c10_102, %c0_103] : memref<20x26x8xbf16, #tpu.memory_space<vmem>>, vector<16x16x8xbf16>
    %c5_104 = arith.constant 5 : index
    %c0_105 = arith.constant 0 : index
    %c0_106 = arith.constant 0 : index
    %88 = vector.load %arg4[%c5_104, %c0_105, %c0_106] : memref<9x8x8xbf16, #tpu.memory_space<vmem>>, vector<1x8x8xbf16>
    %89 = vector.shape_cast %88 : vector<1x8x8xbf16> to vector<8x8xbf16>
    %cst_107 = arith.constant dense<0.000000e+00> : vector<16x16x8xf32>
    %90 = tpu.matmul %87, %89, %cst_107 {dimension_numbers = #tpu.dot_dimension_numbers<[2], [0], [0, 1], [1], [0, 0, 0, 1, 1, 1], [], []>} : vector<16x16x8xbf16>, vector<8x8xbf16>, vector<16x16x8xf32> -> vector<16x16x8xf32>
    %91 = arith.addf %86, %90 : vector<16x16x8xf32>
    %c4_108 = arith.constant 4 : index
    %c6_109 = arith.constant 6 : index
    %c0_110 = arith.constant 0 : index
    %92 = vector.load %arg9[%c4_108, %c6_109, %c0_110] : memref<20x26x8xbf16, #tpu.memory_space<vmem>>, vector<16x16x8xbf16>
    %c6_111 = arith.constant 6 : index
    %c0_112 = arith.constant 0 : index
    %c0_113 = arith.constant 0 : index
    %93 = vector.load %arg4[%c6_111, %c0_112, %c0_113] : memref<9x8x8xbf16, #tpu.memory_space<vmem>>, vector<1x8x8xbf16>
    %94 = vector.shape_cast %93 : vector<1x8x8xbf16> to vector<8x8xbf16>
    %cst_114 = arith.constant dense<0.000000e+00> : vector<16x16x8xf32>
    %95 = tpu.matmul %92, %94, %cst_114 {dimension_numbers = #tpu.dot_dimension_numbers<[2], [0], [0, 1], [1], [0, 0, 0, 1, 1, 1], [], []>} : vector<16x16x8xbf16>, vector<8x8xbf16>, vector<16x16x8xf32> -> vector<16x16x8xf32>
    %96 = arith.addf %91, %95 : vector<16x16x8xf32>
    %c4_115 = arith.constant 4 : index
    %c8_116 = arith.constant 8 : index
    %c0_117 = arith.constant 0 : index
    %97 = vector.load %arg9[%c4_115, %c8_116, %c0_117] : memref<20x26x8xbf16, #tpu.memory_space<vmem>>, vector<16x16x8xbf16>
    %c7_118 = arith.constant 7 : index
    %c0_119 = arith.constant 0 : index
    %c0_120 = arith.constant 0 : index
    %98 = vector.load %arg4[%c7_118, %c0_119, %c0_120] : memref<9x8x8xbf16, #tpu.memory_space<vmem>>, vector<1x8x8xbf16>
    %99 = vector.shape_cast %98 : vector<1x8x8xbf16> to vector<8x8xbf16>
    %cst_121 = arith.constant dense<0.000000e+00> : vector<16x16x8xf32>
    %100 = tpu.matmul %97, %99, %cst_121 {dimension_numbers = #tpu.dot_dimension_numbers<[2], [0], [0, 1], [1], [0, 0, 0, 1, 1, 1], [], []>} : vector<16x16x8xbf16>, vector<8x8xbf16>, vector<16x16x8xf32> -> vector<16x16x8xf32>
    %101 = arith.addf %96, %100 : vector<16x16x8xf32>
    %c4_122 = arith.constant 4 : index
    %c10_123 = arith.constant 10 : index
    %c0_124 = arith.constant 0 : index
    %102 = vector.load %arg9[%c4_122, %c10_123, %c0_124] : memref<20x26x8xbf16, #tpu.memory_space<vmem>>, vector<16x16x8xbf16>
    %c8_125 = arith.constant 8 : index
    %c0_126 = arith.constant 0 : index
    %c0_127 = arith.constant 0 : index
    %103 = vector.load %arg4[%c8_125, %c0_126, %c0_127] : memref<9x8x8xbf16, #tpu.memory_space<vmem>>, vector<1x8x8xbf16>
    %104 = vector.shape_cast %103 : vector<1x8x8xbf16> to vector<8x8xbf16>
    %cst_128 = arith.constant dense<0.000000e+00> : vector<16x16x8xf32>
    %105 = tpu.matmul %102, %104, %cst_128 {dimension_numbers = #tpu.dot_dimension_numbers<[2], [0], [0, 1], [1], [0, 0, 0, 1, 1, 1], [], []>} : vector<16x16x8xbf16>, vector<8x8xbf16>, vector<16x16x8xf32> -> vector<16x16x8xf32>
    %106 = arith.addf %101, %105 : vector<16x16x8xf32>
    %c0_129 = arith.constant 0 : index
    %c0_130 = arith.constant 0 : index
    %107 = vector.load %arg5[%c0_129, %c0_130] : memref<1x8xf32, #tpu.memory_space<vmem>>, vector<1x8xf32>
    %108 = vector.shape_cast %107 : vector<1x8xf32> to vector<8xf32>
    %109 = vector.shape_cast %108 : vector<8xf32> to vector<1x1x8xf32>
    %110 = vector.broadcast %109 : vector<1x1x8xf32> to vector<16x16x8xf32>
    %111 = arith.addf %106, %110 : vector<16x16x8xf32>
    %cst_131 = arith.constant 0.000000e+00 : f32
    %112 = vector.broadcast %cst_131 : f32 to vector<16x16x8xf32>
    %113 = arith.cmpf oge, %111, %112 : vector<16x16x8xf32>
    %c0_132 = arith.constant 0 : index
    %c0_133 = arith.constant 0 : index
    %114 = vector.load %arg6[%c0_132, %c0_133] : memref<1x8xf32, #tpu.memory_space<vmem>>, vector<1x8xf32>
    %115 = vector.shape_cast %114 : vector<1x8xf32> to vector<8xf32>
    %116 = vector.shape_cast %115 : vector<8xf32> to vector<1x1x8xf32>
    %117 = vector.broadcast %116 : vector<1x1x8xf32> to vector<16x16x8xf32>
    %118 = arith.mulf %117, %111 : vector<16x16x8xf32>
    %119 = arith.select %113, %111, %118 : vector<16x16x8xi1>, vector<16x16x8xf32>
    %120 = tpu.concatenate %4, %119 in 2 : vector<16x16x4xf32>, vector<16x16x8xf32> -> vector<16x16x12xf32>
    %c0_134 = arith.constant 0 : index
    %c0_135 = arith.constant 0 : index
    %c0_136 = arith.constant 0 : index
    %c0_137 = arith.constant 0 : index
    %121 = vector.load %arg7[%c0_134, %c0_135, %c0_136, %c0_137] : memref<1x16x16x12xf32, #tpu.memory_space<vmem>>, vector<1x16x16x12xf32>
    %122 = vector.shape_cast %121 : vector<1x16x16x12xf32> to vector<16x16x12xf32>
    %123 = vector.shape_cast %120 : vector<16x16x12xf32> to vector<1x16x16x12xf32>
    tpu.vector_store %arg7[%c0_134, %c0_135, %c0_136, %c0_137], %123 {strides = array<i32>} : memref<1x16x16x12xf32, #tpu.memory_space<vmem>>, vector<1x16x16x12xf32>,
    return
  }
  func.func @transform_0(%arg0: i32) -> (i32, i32, i32, i32) {
    %c0_i32 = arith.constant 0 : i32
    %c0_i32_0 = arith.constant 0 : i32
    %c0_i32_1 = arith.constant 0 : i32
    %c0_i32_2 = arith.constant 0 : i32
    return %arg0, %c0_i32, %c0_i32_0, %c0_i32_1 : i32, i32, i32, i32
  }
  func.func @transform_1(%arg0: i32) -> (i32, i32, i32) {
    %c0_i32 = arith.constant 0 : i32
    %c0_i32_0 = arith.constant 0 : i32
    %c0_i32_1 = arith.constant 0 : i32
    %c0_i32_2 = arith.constant 0 : i32
    return %c0_i32, %c0_i32_0, %c0_i32_1 : i32, i32, i32
  }
  func.func @transform_2(%arg0: i32) -> (i32, i32) {
    %c0_i32 = arith.constant 0 : i32
    %c0_i32_0 = arith.constant 0 : i32
    %c0_i32_1 = arith.constant 0 : i32
    return %c0_i32, %c0_i32_0 : i32, i32
  }
  func.func @transform_3(%arg0: i32) -> (i32, i32, i32) {
    %c0_i32 = arith.constant 0 : i32
    %c0_i32_0 = arith.constant 0 : i32
    %c0_i32_1 = arith.constant 0 : i32
    %c0_i32_2 = arith.constant 0 : i32
    return %c0_i32, %c0_i32_0, %c0_i32_1 : i32, i32, i32
  }
  func.func @transform_4(%arg0: i32) -> (i32, i32) {
    %c0_i32 = arith.constant 0 : i32
    %c0_i32_0 = arith.constant 0 : i32
    %c0_i32_1 = arith.constant 0 : i32
    return %c0_i32, %c0_i32_0 : i32, i32
  }
  func.func @transform_5(%arg0: i32) -> (i32, i32) {
    %c0_i32 = arith.constant 0 : i32
    %c0_i32_0 = arith.constant 0 : i32
    %c0_i32_1 = arith.constant 0 : i32
    return %c0_i32, %c0_i32_0 : i32, i32
  }
  func.func @transform_6(%arg0: i32) -> (i32, i32, i32, i32) {
    %c0_i32 = arith.constant 0 : i32
    %c0_i32_0 = arith.constant 0 : i32
    %c0_i32_1 = arith.constant 0 : i32
    %c0_i32_2 = arith.constant 0 : i32
    return %arg0, %c0_i32, %c0_i32_0, %c0_i32_1 : i32, i32, i32, i32
  }
}

</mosaic_0001>

<bundles_post_ra>
// kernel: tpu_custom_call.1
= control target key start
LH: loop header
LB: loop body
LE: loop exit
PB: predicated region body
PF: predicated region fallthrough
CT: control target
= control target key end

     0   :  { %s12945_s21 = smov 0   ;;  %s16089_s0 = inlined_call_operand.vmem [shape: f32[2,16,16,4], index: 0, kind: input, shape index: {}]   ;;  %s16090_s1 = inlined_call_operand.vmem [shape: bf16[9,4,8], index: 1, kind: input, shape index: {}]   ;;  %s16091_s2 = inlined_call_operand.vmem [shape: f32[1,8], index: 2, kind: input, shape index: {}]   ;;  %s16092_s3 = inlined_call_operand.vmem [shape: bf16[9,8,8], index: 3, kind: input, shape index: {}]   ;;  %s16093_s4 = inlined_call_operand.vmem [shape: f32[1,8], index: 4, kind: input, shape index: {}]   ;;  %s16094_s5 = inlined_call_operand.vmem [shape: f32[1,8], index: 5, kind: input, shape index: {}]   ;;  %s16095_s6 = inlined_call_operand.vmem [shape: f32[2,16,16,12], index: 6, kind: output, shape index: {}]  }
   0x1 LB: > { %s10448_s22 = sadd.s32 4294967295, %s12906_s21   ;;  %p10452_p0 = scmp.ge.s32.totalorder %s12906_s21, 1  ;;  %s12906_s21 = sphi %s12945_s21, %s16_s21  }
   0x2   : > { %p212_p1 = scmp.lt.s32.totalorder %s12906_s21, 3 }
   0x4   : > { %p213_p2 = pnand %p10452_p0, %p212_p1 }
   0x6   : > { %216 = sbr.rel (%p213_p2) target bundleno = 1757 (0x6dd), region = 44 }
   0xd   : > { %p242_p3 = scmp.lt.s32.totalorder %s10448_s22, 1  ;;  %p10457_p4 = scmp.ne.s32.totalorder %s10448_s22, 0 }
   0xe   : > { %vm257_vm0 = vcmask (!%p10457_p4), 27648   ;;  %vm261_vm1 = vcmask (!%p10457_p4), 24576   ;;  %vm262_vm2 = vsmask.f32 (!%p10457_p4), 256  ;;  %v12908_v0 = vmov (!%p10457_p4), 0  }
   0xf   : > { %s243_s23 = scalar_select %p242_p3, %s10448_s22, 1 }
  0x10   : > { %256 = sbr.rel (%p10457_p4) target bundleno = 93 (0x5d), region = 48  ;;  %258 = vst.msk [vmem:[#allocation2] sm:$0xf] (!%p10457_p4), %vm257_vm0, %v12908_v0  ;;  %259 = vst.msk [vmem:[#allocation2 + $0x4] sm:$0xf] (!%p10457_p4), %vm257_vm0, %v12908_v0  ;;  %vm369_vm4 = vcmask (!%p10457_p4), 60416  }
  0x11   : > { %s11263_s24 = sshll.u32 %s243_s23, 8  ;;  %260 = vst.msk [vmem:[#allocation2 + $0x8] sm:$0xf] (!%p10457_p4), %vm257_vm0, %v12908_v0  ;;  %267 = vst.msk [vmem:[#allocation2 + $0x10] sm:$0xf] (!%p10457_p4), %vm257_vm0, %v12908_v0  ;;  %vm373_vm5 = vcmask (!%p10457_p4), 57344  }
  0x12   : > { %s12956_s27 = scalar_lea.vmem %s16089_s0, %s11263_s24  ;;  %s12961_s30 = scalar_lea.vmem %s16095_s6, %s11263_s24  ;;  %268 = vst.msk [vmem:[#allocation2 + $0x14] sm:$0xf] (!%p10457_p4), %vm257_vm0, %v12908_v0  ;;  %269 = vst.msk [vmem:[#allocation2 + $0x18] sm:$0xf] (!%p10457_p4), %vm257_vm0, %v12908_v0  ;;  %v13077_v2 = vld [vmem:[#allocation2 + $0xc] sm:$0x1] (!%p10457_p4) }
  0x13   : > { %273 = vst.msk [vmem:[#allocation2 + $0x20] sm:$0xf] (!%p10457_p4), %vm257_vm0, %v12908_v0  ;;  %274 = vst.msk [vmem:[#allocation2 + $0x24] sm:$0xf] (!%p10457_p4), %vm257_vm0, %v12908_v0  ;;  %v13079_v3 = vld [vmem:[#allocation2 + $0x1c] sm:$0x1] (!%p10457_p4) }
  0x14   : > { %275 = vst.msk [vmem:[#allocation2 + $0x28] sm:$0xf] (!%p10457_p4), %vm257_vm0, %v12908_v0  ;;  %279 = vst.msk [vmem:[#allocation2 + $0x30] sm:$0xf] (!%p10457_p4), %vm257_vm0, %v12908_v0  ;;  %v13087_v6 = vld [vmem:[#allocation2 + $0x2c] sm:$0x1] (!%p10457_p4) }
  0x15   : > { %280 = vst.msk [vmem:[#allocation2 + $0x34] sm:$0xf] (!%p10457_p4), %vm257_vm0, %v12908_v0  ;;  %281 = vst.msk [vmem:[#allocation2 + $0x38] sm:$0xf] (!%p10457_p4), %vm257_vm0, %v12908_v0  ;;  %v13089_v7 = vld [vmem:[#allocation2 + $0x3c] sm:$0x1] (!%p10457_p4) }
  0x16   : > { %285 = vst.msk [vmem:[#allocation2 + $0x40] sm:$0xf] (!%p10457_p4), %vm257_vm0, %v12908_v0  ;;  %286 = vst.msk [vmem:[#allocation2 + $0x44] sm:$0xf] (!%p10457_p4), %vm257_vm0, %v12908_v0  ;;  %v288_v10 = vld [vmem:[#allocation2 + $0x4c] sm:$0x1] (!%p10457_p4) }
  0x17   : > { %287 = vst.msk [vmem:[#allocation2 + $0x48] sm:$0xf] %vm257_vm0, %v12908_v0  ;;  %291 = vst.msk [vmem:[#allocation2 + $0x50] sm:$0xf] %vm257_vm0, %v12908_v0  ;;  %v294_v11 = vld [vmem:[#allocation2 + $0x5c] sm:$0x1] }
  0x18   : > { %292 = vst.msk [vmem:[#allocation2 + $0x54] sm:$0xf] %vm257_vm0, %v12908_v0  ;;  %293 = vst.msk [vmem:[#allocation2 + $0x58] sm:$0xf] %vm257_vm0, %v12908_v0  ;;  %v300_v14 = vld [vmem:[#allocation2 + $0x6c] sm:$0x1] }
  0x19   : > { %297 = vst.msk [vmem:[#allocation2 + $0x60] sm:$0xf] %vm257_vm0, %v12908_v0  ;;  %298 = vst.msk [vmem:[#allocation2 + $0x64] sm:$0xf] %vm257_vm0, %v12908_v0  ;;  %v306_v15 = vld [vmem:[#allocation2 + $0x7c] sm:$0x1] }
  0x1a   : > { %299 = vst.msk [vmem:[#allocation2 + $0x68] sm:$0xf] %vm257_vm0, %v12908_v0  ;;  %303 = vst.msk [vmem:[#allocation2 + $0x70] sm:$0xf] %vm257_vm0, %v12908_v0  ;;  %v312_v18 = vld [vmem:[#allocation2 + $0x8c] sm:$0x1] }
  0x1b   : > { %304 = vst.msk [vmem:[#allocation2 + $0x74] sm:$0xf] %vm257_vm0, %v12908_v0  ;;  %305 = vst.msk [vmem:[#allocation2 + $0x78] sm:$0xf] %vm257_vm0, %v12908_v0  ;;  %v318_v19 = vld [vmem:[#allocation2 + $0x9c] sm:$0x1] }
  0x1c   : > { %309 = vst.msk [vmem:[#allocation2 + $0x80] sm:$0xf] %vm257_vm0, %v12908_v0  ;;  %310 = vst.msk [vmem:[#allocation2 + $0x84] sm:$0xf] %vm257_vm0, %v12908_v0  ;;  %v324_v22 = vld [vmem:[#allocation2 + $0xac] sm:$0x1] }
  0x1d   : > { %311 = vst.msk [vmem:[#allocation2 + $0x88] sm:$0xf] %vm257_vm0, %v12908_v0  ;;  %315 = vst.msk [vmem:[#allocation2 + $0x90] sm:$0xf] %vm257_vm0, %v12908_v0  ;;  %v330_v23 = vld [vmem:[#allocation2 + $0xbc] sm:$0x1] }
  0x1e   : > { %316 = vst.msk [vmem:[#allocation2 + $0x94] sm:$0xf] %vm257_vm0, %v12908_v0  ;;  %317 = vst.msk [vmem:[#allocation2 + $0x98] sm:$0xf] %vm257_vm0, %v12908_v0  ;;  %v336_v26 = vld [vmem:[#allocation2 + $0xcc] sm:$0x1] }
  0x1f   : > { %321 = vst.msk [vmem:[#allocation2 + $0xa0] sm:$0xf] %vm257_vm0, %v12908_v0  ;;  %322 = vst.msk [vmem:[#allocation2 + $0xa4] sm:$0xf] %vm257_vm0, %v12908_v0  ;;  %v342_v27 = vld [vmem:[#allocation2 + $0xdc] sm:$0x1] }
  0x20   : > { %323 = vst.msk [vmem:[#allocation2 + $0xa8] sm:$0xf] %vm257_vm0, %v12908_v0  ;;  %327 = vst.msk [vmem:[#allocation2 + $0xb0] sm:$0xf] %vm257_vm0, %v12908_v0  ;;  %v348_v30 = vld [vmem:[#allocation2 + $0xec] sm:$0x1] }
  0x21   : > { %328 = vst.msk [vmem:[#allocation2 + $0xb4] sm:$0xf] %vm257_vm0, %v12908_v0  ;;  %329 = vst.msk [vmem:[#allocation2 + $0xb8] sm:$0xf] %vm257_vm0, %v12908_v0  ;;  %v354_v31 = vld [vmem:[#allocation2 + $0xfc] sm:$0x1] }
  0x22   : > { %333 = vst.msk [vmem:[#allocation2 + $0xc0] sm:$0xf] %vm257_vm0, %v12908_v0  ;;  %334 = vst.msk [vmem:[#allocation2 + $0xc4] sm:$0xf] %vm257_vm0, %v12908_v0  ;;  %v360_v34 = vld [vmem:[#allocation2 + $0x10c] sm:$0x1] }
  0x23   : > { %335 = vst.msk [vmem:[#allocation2 + $0xc8] sm:$0xf] %vm257_vm0, %v12908_v0  ;;  %339 = vst.msk [vmem:[#allocation2 + $0xd0] sm:$0xf] %vm257_vm0, %v12908_v0  ;;  %v366_v35 = vld [vmem:[#allocation2 + $0x11c] sm:$0x1] }
  0x24   : > { %340 = vst.msk [vmem:[#allocation2 + $0xd4] sm:$0xf] %vm257_vm0, %v12908_v0  ;;  %341 = vst.msk [vmem:[#allocation2 + $0xd8] sm:$0xf] %vm257_vm0, %v12908_v0 }
  0x25   : > { %345 = vst.msk [vmem:[#allocation2 + $0xe0] sm:$0xf] %vm257_vm0, %v12908_v0  ;;  %346 = vst.msk [vmem:[#allocation2 + $0xe4] sm:$0xf] %vm257_vm0, %v12908_v0 }
  0x26   : > { %347 = vst.msk [vmem:[#allocation2 + $0xe8] sm:$0xf] %vm257_vm0, %v12908_v0  ;;  %351 = vst.msk [vmem:[#allocation2 + $0xf0] sm:$0xf] %vm257_vm0, %v12908_v0 }
  0x27   : > { %352 = vst.msk [vmem:[#allocation2 + $0xf4] sm:$0xf] %vm257_vm0, %v12908_v0  ;;  %353 = vst.msk [vmem:[#allocation2 + $0xf8] sm:$0xf] %vm257_vm0, %v12908_v0 }
  0x28   : > { %357 = vst.msk [vmem:[#allocation2 + $0x100] sm:$0xf] %vm257_vm0, %v12908_v0  ;;  %358 = vst.msk [vmem:[#allocation2 + $0x104] sm:$0xf] %vm257_vm0, %v12908_v0 }
  0x29   : > { %359 = vst.msk [vmem:[#allocation2 + $0x108] sm:$0xf] %vm257_vm0, %v12908_v0  ;;  %363 = vst.msk [vmem:[#allocation2 + $0x110] sm:$0xf] %vm257_vm0, %v12908_v0 }
  0x2a   : > { %364 = vst.msk [vmem:[#allocation2 + $0x114] sm:$0xf] %vm257_vm0, %v12908_v0  ;;  %365 = vst.msk [vmem:[#allocation2 + $0x118] sm:$0xf] %vm257_vm0, %v12908_v0 }
  0x2b   : > { %vm13073_vm3 = vmand %vm261_vm1, %vm262_vm2  ;;  %370 = vst.msk [vmem:[#allocation3] sm:$0xf] %vm369_vm4, %v12908_v0 }
  0x2c   : > { %v265_v4 = vsel %vm13073_vm3, 0, %v13077_v2  ;;  %v271_v5 = vsel %vm13073_vm3, 0, %v13079_v3  ;;  %371 = vst.msk [vmem:[#allocation3 + $0x4] sm:$0xf] %vm369_vm4, %v12908_v0  ;;  %372 = vst.msk [vmem:[#allocation3 + $0x8] sm:$0xf] %vm369_vm4, %v12908_v0 }
  0x2d   : > { %375 = vst.msk [vmem:[#allocation3 + $0x10] sm:$0xf] %vm369_vm4, %v12908_v0  ;;  %376 = vst.msk [vmem:[#allocation3 + $0x14] sm:$0xf] %vm369_vm4, %v12908_v0  ;;  %v277_v8 = vsel %vm13073_vm3, 0, %v13087_v6  ;;  %v283_v9 = vsel %vm13073_vm3, 0, %v13089_v7 }
  0x2e   : > { %377 = vst.msk [vmem:[#allocation3 + $0x18] sm:$0xf] %vm369_vm4, %v12908_v0  ;;  %379 = vst.msk [vmem:[#allocation3 + $0x20] sm:$0xf] %vm369_vm4, %v12908_v0  ;;  %v289_v12 = vsel %vm13073_vm3, 0, %v288_v10  ;;  %v295_v13 = vsel %vm13073_vm3, 0, %v294_v11 }
  0x2f   : > { %380 = vst.msk [vmem:[#allocation3 + $0x24] sm:$0xf] %vm369_vm4, %v12908_v0  ;;  %381 = vst.msk [vmem:[#allocation3 + $0x28] sm:$0xf] %vm369_vm4, %v12908_v0  ;;  %v301_v16 = vsel %vm13073_vm3, 0, %v300_v14  ;;  %v307_v17 = vsel %vm13073_vm3, 0, %v306_v15 }
  0x30   : > { %383 = vst.msk [vmem:[#allocation3 + $0x30] sm:$0xf] %vm369_vm4, %v12908_v0  ;;  %384 = vst.msk [vmem:[#allocation3 + $0x34] sm:$0xf] %vm369_vm4, %v12908_v0  ;;  %v313_v20 = vsel %vm13073_vm3, 0, %v312_v18  ;;  %v319_v21 = vsel %vm13073_vm3, 0, %v318_v19 }
  0x31   : > { %385 = vst.msk [vmem:[#allocation3 + $0x38] sm:$0xf] %vm369_vm4, %v12908_v0  ;;  %387 = vst.msk [vmem:[#allocation3 + $0x40] sm:$0xf] %vm369_vm4, %v12908_v0  ;;  %v325_v24 = vsel %vm13073_vm3, 0, %v324_v22  ;;  %v331_v25 = vsel %vm13073_vm3, 0, %v330_v23 }
  0x32   : > { %388 = vst.msk [vmem:[#allocation3 + $0x44] sm:$0xf] %vm369_vm4, %v12908_v0  ;;  %389 = vst.msk [vmem:[#allocation3 + $0x48] sm:$0xf] %vm369_vm4, %v12908_v0  ;;  %v337_v28 = vsel %vm13073_vm3, 0, %v336_v26  ;;  %v343_v29 = vsel %vm13073_vm3, 0, %v342_v27 }
  0x33   : > { %391 = vst.msk [vmem:[#allocation3 + $0x50] sm:$0xf] %vm369_vm4, %v12908_v0  ;;  %392 = vst.msk [vmem:[#allocation3 + $0x54] sm:$0xf] %vm369_vm4, %v12908_v0  ;;  %v349_v32 = vsel %vm13073_vm3, 0, %v348_v30  ;;  %v355_v33 = vsel %vm13073_vm3, 0, %v354_v31 }
  0x34   : > { %393 = vst.msk [vmem:[#allocation3 + $0x58] sm:$0xf] %vm369_vm4, %v12908_v0  ;;  %395 = vst.msk [vmem:[#allocation3 + $0x60] sm:$0xf] %vm369_vm4, %v12908_v0  ;;  %v361_v36 = vsel %vm13073_vm3, 0, %v360_v34  ;;  %v367_v37 = vsel %vm13073_vm3, 0, %v366_v35 }
  0x35   : > { %396 = vst.msk [vmem:[#allocation3 + $0x64] sm:$0xf] %vm369_vm4, %v12908_v0  ;;  %397 = vst.msk [vmem:[#allocation3 + $0x68] sm:$0xf] %vm369_vm4, %v12908_v0 }
  0x36   : > { %399 = vst.msk [vmem:[#allocation3 + $0x70] sm:$0xf] %vm369_vm4, %v12908_v0  ;;  %400 = vst.msk [vmem:[#allocation3 + $0x74] sm:$0xf] %vm369_vm4, %v12908_v0 }
  0x37   : > { %401 = vst.msk [vmem:[#allocation3 + $0x78] sm:$0xf] %vm369_vm4, %v12908_v0  ;;  %403 = vst.msk [vmem:[#allocation3 + $0x80] sm:$0xf] %vm369_vm4, %v12908_v0 }
  0x38   : > { %404 = vst.msk [vmem:[#allocation3 + $0x84] sm:$0xf] %vm369_vm4, %v12908_v0  ;;  %405 = vst.msk [vmem:[#allocation3 + $0x88] sm:$0xf] %vm369_vm4, %v12908_v0 }
  0x39   : > { %407 = vst.msk [vmem:[#allocation3 + $0x90] sm:$0xf] %vm369_vm4, %v12908_v0  ;;  %408 = vst.msk [vmem:[#allocation3 + $0x94] sm:$0xf] %vm369_vm4, %v12908_v0 }
  0x3a   : > { %409 = vst.msk [vmem:[#allocation3 + $0x98] sm:$0xf] %vm369_vm4, %v12908_v0  ;;  %411 = vst.msk [vmem:[#allocation3 + $0xa0] sm:$0xf] %vm369_vm4, %v12908_v0 }
  0x3b   : > { %412 = vst.msk [vmem:[#allocation3 + $0xa4] sm:$0xf] %vm369_vm4, %v12908_v0  ;;  %413 = vst.msk [vmem:[#allocation3 + $0xa8] sm:$0xf] %vm369_vm4, %v12908_v0 }
  0x3c   : > { %415 = vst.msk [vmem:[#allocation3 + $0xb0] sm:$0xf] %vm369_vm4, %v12908_v0  ;;  %416 = vst.msk [vmem:[#allocation3 + $0xb4] sm:$0xf] %vm369_vm4, %v12908_v0 }
  0x3d   : > { %417 = vst.msk [vmem:[#allocation3 + $0xb8] sm:$0xf] %vm369_vm4, %v12908_v0  ;;  %419 = vst.msk [vmem:[#allocation3 + $0xc0] sm:$0xf] %vm369_vm4, %v12908_v0 }
  0x3e   : > { %420 = vst.msk [vmem:[#allocation3 + $0xc4] sm:$0xf] %vm369_vm4, %v12908_v0  ;;  %421 = vst.msk [vmem:[#allocation3 + $0xc8] sm:$0xf] %vm369_vm4, %v12908_v0 }
  0x3f   : > { %423 = vst.msk [vmem:[#allocation3 + $0xd0] sm:$0xf] %vm369_vm4, %v12908_v0  ;;  %424 = vst.msk [vmem:[#allocation3 + $0xd4] sm:$0xf] %vm369_vm4, %v12908_v0 }
  0x40   : > { %425 = vst.msk [vmem:[#allocation3 + $0xd8] sm:$0xf] %vm369_vm4, %v12908_v0  ;;  %427 = vst.msk [vmem:[#allocation3 + $0xe0] sm:$0xf] %vm369_vm4, %v12908_v0 }
  0x41   : > { %428 = vst.msk [vmem:[#allocation3 + $0xe4] sm:$0xf] %vm369_vm4, %v12908_v0  ;;  %429 = vst.msk [vmem:[#allocation3 + $0xe8] sm:$0xf] %vm369_vm4, %v12908_v0 }
  0x42   : > { %431 = vst.msk [vmem:[#allocation3 + $0xf0] sm:$0xf] %vm369_vm4, %v12908_v0  ;;  %432 = vst.msk [vmem:[#allocation3 + $0xf4] sm:$0xf] %vm369_vm4, %v12908_v0 }
  0x43   : > { %433 = vst.msk [vmem:[#allocation3 + $0xf8] sm:$0xf] %vm369_vm4, %v12908_v0  ;;  %435 = vst.msk [vmem:[#allocation3 + $0x100] sm:$0xf] %vm369_vm4, %v12908_v0 }
  0x44   : > { %436 = vst.msk [vmem:[#allocation3 + $0x104] sm:$0xf] %vm369_vm4, %v12908_v0  ;;  %437 = vst.msk [vmem:[#allocation3 + $0x108] sm:$0xf] %vm369_vm4, %v12908_v0 }
  0x45   : > { %439 = vst.msk [vmem:[#allocation3 + $0x110] sm:$0xf] %vm369_vm4, %v12908_v0  ;;  %440 = vst.msk [vmem:[#allocation3 + $0x114] sm:$0xf] %vm369_vm4, %v12908_v0 }
  0x46   : > { %441 = vst.msk [vmem:[#allocation3 + $0x118] sm:$0xf] %vm369_vm4, %v12908_v0  ;;  %443 = vst.msk [vmem:[#allocation3 + $0x120] sm:$0xf] %vm369_vm4, %v12908_v0 }
  0x47   : > { %444 = vst.msk [vmem:[#allocation3 + $0x124] sm:$0xf] %vm369_vm4, %v12908_v0  ;;  %445 = vst.msk [vmem:[#allocation3 + $0x128] sm:$0xf] %vm369_vm4, %v12908_v0 }
  0x48   : > { %447 = vst.msk [vmem:[#allocation3 + $0x130] sm:$0xf] %vm369_vm4, %v12908_v0  ;;  %448 = vst.msk [vmem:[#allocation3 + $0x134] sm:$0xf] %vm369_vm4, %v12908_v0 }
  0x49   : > { %449 = vst.msk [vmem:[#allocation3 + $0x138] sm:$0xf] %vm369_vm4, %v12908_v0  ;;  %266 = vst [vmem:[#allocation2 + $0xc] sm:$0x1] %v265_v4 }
  0x4a   : > { %374 = vst.msk [vmem:[#allocation3 + $0xc] sm:$0x1] %vm373_vm5, %v12908_v0  ;;  %378 = vst.msk [vmem:[#allocation3 + $0x1c] sm:$0x1] %vm373_vm5, %v12908_v0 }
  0x4b   : > { %382 = vst.msk [vmem:[#allocation3 + $0x2c] sm:$0x1] %vm373_vm5, %v12908_v0  ;;  %386 = vst.msk [vmem:[#allocation3 + $0x3c] sm:$0x1] %vm373_vm5, %v12908_v0 }
  0x4c   : > { %390 = vst.msk [vmem:[#allocation3 + $0x4c] sm:$0x1] %vm373_vm5, %v12908_v0  ;;  %394 = vst.msk [vmem:[#allocation3 + $0x5c] sm:$0x1] %vm373_vm5, %v12908_v0 }
  0x4d   : > { %398 = vst.msk [vmem:[#allocation3 + $0x6c] sm:$0x1] %vm373_vm5, %v12908_v0  ;;  %402 = vst.msk [vmem:[#allocation3 + $0x7c] sm:$0x1] %vm373_vm5, %v12908_v0 }
  0x4e   : > { %406 = vst.msk [vmem:[#allocation3 + $0x8c] sm:$0x1] %vm373_vm5, %v12908_v0  ;;  %410 = vst.msk [vmem:[#allocation3 + $0x9c] sm:$0x1] %vm373_vm5, %v12908_v0 }
  0x4f   : > { %414 = vst.msk [vmem:[#allocation3 + $0xac] sm:$0x1] %vm373_vm5, %v12908_v0  ;;  %418 = vst.msk [vmem:[#allocation3 + $0xbc] sm:$0x1] %vm373_vm5, %v12908_v0 }
  0x50   : > { %422 = vst.msk [vmem:[#allocation3 + $0xcc] sm:$0x1] %vm373_vm5, %v12908_v0  ;;  %426 = vst.msk [vmem:[#allocation3 + $0xdc] sm:$0x1] %vm373_vm5, %v12908_v0 }
  0x51   : > { %430 = vst.msk [vmem:[#allocation3 + $0xec] sm:$0x1] %vm373_vm5, %v12908_v0  ;;  %434 = vst.msk [vmem:[#allocation3 + $0xfc] sm:$0x1] %vm373_vm5, %v12908_v0 }
  0x52   : > { %438 = vst.msk [vmem:[#allocation3 + $0x10c] sm:$0x1] %vm373_vm5, %v12908_v0  ;;  %442 = vst.msk [vmem:[#allocation3 + $0x11c] sm:$0x1] %vm373_vm5, %v12908_v0 }
  0x53   : > { %446 = vst.msk [vmem:[#allocation3 + $0x12c] sm:$0x1] %vm373_vm5, %v12908_v0  ;;  %450 = vst.msk [vmem:[#allocation3 + $0x13c] sm:$0x1] %vm373_vm5, %v12908_v0 }
  0x54   : > { %272 = vst [vmem:[#allocation2 + $0x1c] sm:$0x1] %v271_v5  ;;  %278 = vst [vmem:[#allocation2 + $0x2c] sm:$0x1] %v277_v8 }
  0x55   : > { %284 = vst [vmem:[#allocation2 + $0x3c] sm:$0x1] %v283_v9  ;;  %290 = vst [vmem:[#allocation2 + $0x4c] sm:$0x1] %v289_v12 }
  0x56   : > { %296 = vst [vmem:[#allocation2 + $0x5c] sm:$0x1] %v295_v13  ;;  %302 = vst [vmem:[#allocation2 + $0x6c] sm:$0x1] %v301_v16 }
  0x57   : > { %308 = vst [vmem:[#allocation2 + $0x7c] sm:$0x1] %v307_v17  ;;  %314 = vst [vmem:[#allocation2 + $0x8c] sm:$0x1] %v313_v20 }
  0x58   : > { %320 = vst [vmem:[#allocation2 + $0x9c] sm:$0x1] %v319_v21  ;;  %326 = vst [vmem:[#allocation2 + $0xac] sm:$0x1] %v325_v24 }
  0x59   : > { %332 = vst [vmem:[#allocation2 + $0xbc] sm:$0x1] %v331_v25  ;;  %338 = vst [vmem:[#allocation2 + $0xcc] sm:$0x1] %v337_v28 }
  0x5a   : > { %344 = vst [vmem:[#allocation2 + $0xdc] sm:$0x1] %v343_v29  ;;  %350 = vst [vmem:[#allocation2 + $0xec] sm:$0x1] %v349_v32 }
  0x5b   : > { %356 = vst [vmem:[#allocation2 + $0xfc] sm:$0x1] %v355_v33  ;;  %362 = vst [vmem:[#allocation2 + $0x10c] sm:$0x1] %v361_v36 }
  0x5c   : > { %368 = vst [vmem:[#allocation2 + $0x11c] sm:$0x1] %v367_v37 }
  0x5d PF: > { %v10490_v38 = vld [vmem:[%s16090_s1 + $0x2] sm:$0x3]  ;;  %vm825_vm6 = vcmask 1041408   ;;  %v13296_v39 = vld [vmem:[#allocation2 + $0x4] sm:$0xf]  ;;  %vm776_vm7 = vcmask 31744  }
  0x5e   : > { %12759 = vmatprep.subr.msk.bf16.mxu0 %vm825_vm6, %v10490_v38  ;;  %v827_v40 = vsel %vm825_vm6, %v10490_v38, 0  ;;  %v13300_v41 = vld [vmem:[#allocation2 + $0x8] sm:$0xf]  ;;  %v451_v42 = vld [vmem:[%s12956_s27] sm:$0xff]  ;;  %v453_v47 = vld [vmem:[%s12956_s27 + $0x10] sm:$0xff]  ;;  %vm612_vm8 = vcmask 27648  }
  0x5f   : > { %11636 = vmatpush3.bf16.msra.mxu0 %v827_v40  ;;  %v10491_v43 = vcombine.low %v13296_v39, %v13300_v41  ;;  %v13308_v44 = vld [vmem:[%s16090_s1] sm:$0x3]  ;;  %v452_v45 = vld [vmem:[%s12956_s27 + $0x8] sm:$0xff]  ;;  %v11265_v46 = vpack.c.bf16 %v451_v42, %v451_v42  ;;  %v454_v49 = vld [vmem:[%s12956_s27 + $0x18] sm:$0xff]  ;;  %v11267_v52 = vpack.c.bf16 %v453_v47, %v453_v47  ;;  %vm990_vm9 = vsmask.f32 256 }
  0x60   : > { %12760 = vmatprep.subr.msk.bf16.mxu0 %vm825_vm6, %v13308_v44  ;;  %v11266_v48 = vpack.c.bf16 %v452_v45, %v452_v45  ;;  %v455_v50 = vld [vmem:[%s12956_s27 + $0x20] sm:$0xff]  ;;  %v456_v51 = vld [vmem:[%s12956_s27 + $0x28] sm:$0xff]  ;;  %v11268_v53 = vpack.c.bf16 %v454_v49, %v454_v49  ;;  %v457_v55 = vld [vmem:[%s12956_s27 + $0x30] sm:$0xff]  ;;  %v1442_v45 = vsel %vm825_vm6, %v13308_v44, 0  ;;  %vm991_vm10 = vsmask.f32 4368 }
  0x61   : > { %11637 = vmatprep.mubr.msk.bf16.mxu0 %vm776_vm7, %v10491_v43  ;;  %613 = vst.msk [vmem:[#allocation2 + $0x14] sm:$0xf] %vm612_vm8, %v11265_v46  ;;  %v11269_v54 = vpack.c.bf16 %v455_v50, %v455_v50  ;;  %v458_v56 = vld [vmem:[%s12956_s27 + $0x38] sm:$0xff]  ;;  %v459_v57 = vld [vmem:[%s12956_s27 + $0x40] sm:$0xff]  ;;  %v11270_v58 = vpack.c.bf16 %v456_v51, %v456_v51  ;;  %v11271_v59 = vpack.c.bf16 %v457_v55, %v457_v55  ;;  %v460_v60 = vld [vmem:[%s12956_s27 + $0x48] sm:$0xff]  ;;  %vm6320_vm15 = vcmask 1043456  }
  0x62   : > { %614 = vst.msk [vmem:[#allocation2 + $0x18] sm:$0xf] %vm612_vm8, %v11266_v48  ;;  %v461_v61 = vld [vmem:[%s12956_s27 + $0x50] sm:$0xff]  ;;  %v462_v62 = vld [vmem:[%s12956_s27 + $0x58] sm:$0xff]  ;;  %615 = vst.msk [vmem:[#allocation2 + $0x24] sm:$0xf] %vm612_vm8, %v11267_v52  ;;  %v11272_v63 = vpack.c.bf16 %v458_v56, %v458_v56  ;;  %v11273_v0 = vpack.c.bf16 %v459_v57, %v459_v57  ;;  %v11274_v1 = vpack.c.bf16 %v460_v60, %v460_v60 }
  0x63   : > { %616 = vst.msk [vmem:[#allocation2 + $0x28] sm:$0xf] %vm612_vm8, %v11268_v53  ;;  %617 = vst.msk [vmem:[#allocation2 + $0x34] sm:$0xf] %vm612_vm8, %v11269_v54  ;;  %v463_v2 = vld [vmem:[%s12956_s27 + $0x60] sm:$0xff]  ;;  %v464_v3 = vld [vmem:[%s12956_s27 + $0x68] sm:$0xff]  ;;  %v11275_v5 = vpack.c.bf16 %v461_v61, %v461_v61  ;;  %v11276_v6 = vpack.c.bf16 %v462_v62, %v462_v62 }
  0x64   : > { %v465_v4 = vld [vmem:[%s12956_s27 + $0x70] sm:$0xff]  ;;  %618 = vst.msk [vmem:[#allocation2 + $0x38] sm:$0xf] %vm612_vm8, %v11270_v58  ;;  %619 = vst.msk [vmem:[#allocation2 + $0x44] sm:$0xf] %vm612_vm8, %v11271_v59  ;;  %v11277_v7 = vpack.c.bf16 %v463_v2, %v463_v2  ;;  %v11278_v8 = vpack.c.bf16 %v464_v3, %v464_v3  ;;  %v466_v9 = vld [vmem:[%s12956_s27 + $0x78] sm:$0xff] }
  0x65   : > { %v467_v10 = vld [vmem:[%s12956_s27 + $0x80] sm:$0xff]  ;;  %v468_v11 = vld [vmem:[%s12956_s27 + $0x88] sm:$0xff]  ;;  %620 = vst.msk [vmem:[#allocation2 + $0x48] sm:$0xf] %vm612_vm8, %v11272_v63  ;;  %621 = vst.msk [vmem:[#allocation2 + $0x54] sm:$0xf] %vm612_vm8, %v11273_v0  ;;  %v11279_v12 = vpack.c.bf16 %v465_v4, %v465_v4  ;;  %v11280_v13 = vpack.c.bf16 %v466_v9, %v466_v9 }
  0x66   : > { %622 = vst.msk [vmem:[#allocation2 + $0x58] sm:$0xf] %vm612_vm8, %v11274_v1  ;;  %v11281_v14 = vpack.c.bf16 %v467_v10, %v467_v10  ;;  %v11282_v15 = vpack.c.bf16 %v468_v11, %v468_v11  ;;  %v469_v16 = vld [vmem:[%s12956_s27 + $0x90] sm:$0xff]  ;;  %v470_v17 = vld [vmem:[%s12956_s27 + $0x98] sm:$0xff]  ;;  %v471_v18 = vld [vmem:[%s12956_s27 + $0xa0] sm:$0xff]  ;;  %v999_v10 = vshrl.u32 %v13296_v39, 16 }
  0x67   : > { %623 = vst.msk [vmem:[#allocation2 + $0x64] sm:$0xf] %vm612_vm8, %v11275_v5  ;;  %624 = vst.msk [vmem:[#allocation2 + $0x68] sm:$0xf] %vm612_vm8, %v11276_v6  ;;  %v11283_v19 = vpack.c.bf16 %v469_v16, %v469_v16  ;;  %v11284_v20 = vpack.c.bf16 %v470_v17, %v470_v17  ;;  %v472_v21 = vld [vmem:[%s12956_s27 + $0xa8] sm:$0xff]  ;;  %v11285_v22 = vpack.c.bf16 %v471_v18, %v471_v18  ;;  %v473_v23 = vld [vmem:[%s12956_s27 + $0xb0] sm:$0xff] }
  0x68   : > { %625 = vst.msk [vmem:[#allocation2 + $0x74] sm:$0xf] %vm612_vm8, %v11277_v7  ;;  %626 = vst.msk [vmem:[#allocation2 + $0x78] sm:$0xf] %vm612_vm8, %v11278_v8  ;;  %v474_v24 = vld [vmem:[%s12956_s27 + $0xb8] sm:$0xff]  ;;  %v11286_v25 = vpack.c.bf16 %v472_v21, %v472_v21  ;;  %v11287_v26 = vpack.c.bf16 %v473_v23, %v473_v23  ;;  %v475_v28 = vld [vmem:[%s12956_s27 + $0xc0] sm:$0xff] }
  0x69   : > { %627 = vst.msk [vmem:[#allocation2 + $0x84] sm:$0xf] %vm612_vm8, %v11279_v12  ;;  %628 = vst.msk [vmem:[#allocation2 + $0x88] sm:$0xf] %vm612_vm8, %v11280_v13  ;;  %v11288_v27 = vpack.c.bf16 %v474_v24, %v474_v24  ;;  %v476_v29 = vld [vmem:[%s12956_s27 + $0xc8] sm:$0xff]  ;;  %v477_v30 = vld [vmem:[%s12956_s27 + $0xd0] sm:$0xff]  ;;  %v11289_v32 = vpack.c.bf16 %v475_v28, %v475_v28 }
  0x6a   : > { %629 = vst.msk [vmem:[#allocation2 + $0x94] sm:$0xf] %vm612_vm8, %v11281_v14  ;;  %630 = vst.msk [vmem:[#allocation2 + $0x98] sm:$0xf] %vm612_vm8, %v11282_v15  ;;  %v13357_v31 = vld [vmem:[#allocation2 + $0x14] sm:$0xf]  ;;  %v11290_v33 = vpack.c.bf16 %v476_v29, %v476_v29  ;;  %v11291_v35 = vpack.c.bf16 %v477_v30, %v477_v30 }
  0x6b   : > { %631 = vst.msk [vmem:[#allocation2 + $0xa4] sm:$0xf] %vm612_vm8, %v11283_v19  ;;  %632 = vst.msk [vmem:[#allocation2 + $0xa8] sm:$0xf] %vm612_vm8, %v11284_v20  ;;  %v478_v34 = vld [vmem:[%s12956_s27 + $0xd8] sm:$0xff]  ;;  %v479_v36 = vld [vmem:[%s12956_s27 + $0xe0] sm:$0xff] }
  0x6c   : > { %633 = vst.msk [vmem:[#allocation2 + $0xb4] sm:$0xf] %vm612_vm8, %v11285_v22  ;;  %v13364_v37 = vld [vmem:[#allocation2 + $0x18] sm:$0xf]  ;;  %634 = vst.msk [vmem:[#allocation2 + $0xb8] sm:$0xf] %vm612_vm8, %v11286_v25  ;;  %v11292_v38 = vpack.c.bf16 %v478_v34, %v478_v34  ;;  %v11293_v42 = vpack.c.bf16 %v479_v36, %v479_v36 }
  0x6d   : > { %635 = vst.msk [vmem:[#allocation2 + $0xc4] sm:$0xf] %vm612_vm8, %v11287_v26  ;;  %636 = vst.msk [vmem:[#allocation2 + $0xc8] sm:$0xf] %vm612_vm8, %v11288_v27  ;;  %v480_v40 = vld [vmem:[%s12956_s27 + $0xe8] sm:$0xff]  ;;  %v10492_v43 = vcombine.low %v13357_v31, %v13364_v37  ;;  %v1008_v13 = vshrl.u32 %v13300_v41, 16 }
  0x6e   : > { %v13374_v46 = vld [vmem:[#allocation2 + $0x24] sm:$0xf]  ;;  %v13376_v47 = vld [vmem:[#allocation2 + $0x28] sm:$0xf]  ;;  %637 = vst.msk [vmem:[#allocation2 + $0xd4] sm:$0xf] %vm612_vm8, %v11289_v32  ;;  %v11294_v48 = vpack.c.bf16 %v480_v40, %v480_v40  ;;  %vm13511_vm11 = vmor %vm990_vm9, %vm991_vm10 }
  0x6f   : > { %638 = vst.msk [vmem:[#allocation2 + $0xd8] sm:$0xf] %vm612_vm8, %v11290_v33  ;;  %639 = vst.msk [vmem:[#allocation2 + $0xe4] sm:$0xf] %vm612_vm8, %v11291_v35  ;;  %v10493_v49 = vcombine.low %v13374_v46, %v13376_v47  ;;  %11638 = vmatmul.mubr.msk.bf16.vlgmr.msra.gmra.mrb[0].mxu0 %vm776_vm7, %v10492_v43  ;;  %v13388_v44 = vld [vmem:[#allocation2 + $0x34] sm:$0xf] }
  0x70   : > { %640 = vst.msk [vmem:[#allocation2 + $0xe8] sm:$0xf] %vm612_vm8, %v11292_v38  ;;  %641 = vst.msk [vmem:[#allocation2 + $0xf4] sm:$0xf] %vm612_vm8, %v11293_v42  ;;  %11670 = vmatpush3.bf16.msra.mxu0 %v1442_v45  ;;  %v13390_v50 = vld [vmem:[#allocation2 + $0x38] sm:$0xf] }
  0x71   : > { %642 = vst.msk [vmem:[#allocation2 + $0xf8] sm:$0xf] %vm612_vm8, %v11294_v48  ;;  %11641 = vmatprep.mubr.msk.bf16.mxu0 %vm776_vm7, %v10493_v49  ;;  %v13392_v51 = vld [vmem:[#allocation2 + $0x44] sm:$0xf]  ;;  %v13394_v52 = vld [vmem:[#allocation2 + $0x48] sm:$0xf]  ;;  %v10494_v53 = vcombine.low %v13388_v44, %v13390_v50 }
  0x72   : > { %v10495_v54 = vcombine.low %v13392_v51, %v13394_v52  ;;  %v13402_v55 = vld [vmem:[#allocation2 + $0x54] sm:$0xf]  ;;  %v13404_v56 = vld [vmem:[#allocation2 + $0x58] sm:$0xf]  ;;  %v13406_v57 = vld [vmem:[#allocation2 + $0x64] sm:$0xf] }
  0x73   : > { %v13408_v58 = vld [vmem:[#allocation2 + $0x68] sm:$0xf]  ;;  %v10496_v59 = vcombine.low %v13402_v55, %v13404_v56  ;;  %v13416_v61 = vld [vmem:[#allocation2 + $0x74] sm:$0xf]  ;;  %v13418_v62 = vld [vmem:[#allocation2 + $0x78] sm:$0xf] }
  0x74   : > { %v10497_v60 = vcombine.low %v13406_v57, %v13408_v58  ;;  %v13420_v63 = vld [vmem:[#allocation2 + $0x84] sm:$0xf]  ;;  %v13422_v0 = vld [vmem:[#allocation2 + $0x88] sm:$0xf]  ;;  %v10498_v1 = vcombine.low %v13416_v61, %v13418_v62  ;;  %v13430_v3 = vld [vmem:[#allocation2 + $0x94] sm:$0xf] }
  0x75   : > { %v10499_v2 = vcombine.low %v13420_v63, %v13422_v0  ;;  %v13432_v4 = vld [vmem:[#allocation2 + $0x98] sm:$0xf]  ;;  %v13437_v5 = vld [vmem:[%s16090_s1 + $0x4] sm:$0x3]  ;;  %v13441_v7 = vld [vmem:[#allocation2 + $0xa8] sm:$0xf] }
  0x76   : > { %v13439_v6 = vld [vmem:[#allocation2 + $0xa4] sm:$0xf]  ;;  %12761 = vmatprep.subr.msk.bf16.mxu0 %vm825_vm6, %v13437_v5  ;;  %v10500_v8 = vcombine.low %v13430_v3, %v13432_v4  ;;  %v13452_v11 = vld [vmem:[#allocation2 + $0xb4] sm:$0xf]  ;;  %v13454_v12 = vld [vmem:[#allocation2 + $0xb8] sm:$0xf] }
  0x77   : > { %11642 = vmatmul.mubr.msk.bf16.gmra.mrb[4].mxu0 %vm776_vm7, %v10494_v53  ;;  %v10501_v9 = vcombine.low %v13439_v6, %v13441_v7  ;;  %v13457_v14 = vld [vmem:[#allocation2 + $0xc4] sm:$0xf]  ;;  %v13459_v15 = vld [vmem:[#allocation2 + $0xc8] sm:$0xf]  ;;  %v13461_v16 = vrot.slane %v999_v10, 7  ;;  %v1021_v17 = vshrl.u32 %v13357_v31, 16  ;;  %v10502_v18 = vcombine.low %v13452_v11, %v13454_v12 }
  0x78   : > { %11645 = vmatprep.mubr.msk.bf16.mxu0 %vm776_vm7, %v10495_v54  ;;  %v10503_v19 = vcombine.low %v13457_v14, %v13459_v15  ;;  %v1002_v20 = vshll.u32 %v13296_v39, 16  ;;  %v1010_v21 = vrot.slane %v1008_v13, 7  ;;  %v1011_v22 = vshll.u32 %v13300_v41, 16  ;;  %v645_v24 = vld [vmem:[#allocation2] sm:$0x8]  ;;  %s12909_s7 = smov 4  }
  0x79   : > { %v1030_v23 = vshrl.u32 %v13364_v37, 16  ;;  %v1006_v25 = vrot.slane %v13461_v16, 4  ;;  %v13472_v26 = vrot.slane %v1021_v17, 7  ;;  %v1043_v27 = vshrl.u32 %v13374_v46, 16  ;;  %v13478_v39 = vld [vmem:[#allocation2 + $0xd4] sm:$0xf] }
  0x7a   : > { %v1052_v28 = vshrl.u32 %v13376_v47, 16  ;;  %v13480_v41 = vld [vmem:[#allocation2 + $0xd8] sm:$0xf]  ;;  %v1004_v29 = vor.u32 %v1002_v20, %v13461_v16  ;;  %v1013_v30 = vor.u32 %v1011_v22, %v1010_v21  ;;  %v1065_v32 = vshrl.u32 %v13388_v44, 16  ;;  %v13484_v33 = vld [vmem:[#allocation2 + $0xe4] sm:$0xf] }
  0x7b   : > { %v13486_v34 = vld [vmem:[#allocation2 + $0xe8] sm:$0xf]  ;;  %v994_v35 = vshrl.u32 %v645_v24, 16  ;;  %v1024_v36 = vshll.u32 %v13357_v31, 16  ;;  %v1032_v38 = vrot.slane %v1030_v23, 7  ;;  %v1033_v40 = vshll.u32 %v13364_v37, 16 }
  0x7c   : > { %v1046_v42 = vshll.u32 %v13374_v46, 16  ;;  %v1055_v43 = vshll.u32 %v13376_v47, 16  ;;  %v1074_v45 = vshrl.u32 %v13390_v50, 16  ;;  %v1087_v48 = vshrl.u32 %v13392_v51, 16  ;;  %v651_v16 = vld [vmem:[#allocation2 + $0x20] sm:$0x8] }
  0x7d   : > { %v10504_v49 = vcombine.low %v13478_v39, %v13480_v41  ;;  %v1028_v53 = vrot.slane %v13472_v26, 4  ;;  %v13497_v54 = vrot.slane %v1043_v27, 7  ;;  %v1096_v31 = vshrl.u32 %v13394_v52, 16  ;;  %v13524_v24 = vld [vmem:[#allocation2 + $0xf4] sm:$0xf] }
  0x7e   : > { %v10505_v37 = vcombine.low %v13484_v33, %v13486_v34  ;;  %v13502_v46 = vrot.slane %v1065_v32, 7  ;;  %v1109_v10 = vshrl.u32 %v13402_v55, 16  ;;  %v13515_v17 = vrot.slane %v1074_v45, 7  ;;  %v13526_v27 = vld [vmem:[#allocation2 + $0xf8] sm:$0xf] }
  0x7f   : > { %11646 = vmatmul.mubr.msk.bf16.gmra.mrb[8].mxu0 %vm776_vm7, %v10496_v59  ;;  %v1054_v59 = vrot.slane %v1052_v28, 7  ;;  %v1118_v20 = vshrl.u32 %v13404_v56, 16  ;;  %v1026_v21 = vor.u32 %v1024_v36, %v13472_v26  ;;  %v1035_v22 = vor.u32 %v1033_v40, %v1032_v38  ;;  %v654_v32 = vld [vmem:[#allocation2 + $0x30] sm:$0x8] }
  0x80   : > { %11649 = vmatprep.mubr.msk.bf16.mxu0 %vm776_vm7, %v10497_v60  ;;  %v10523_v60 = vrot.slane %v994_v35, 11  ;;  %v1098_v23 = vrot.slane %v1096_v31, 7  ;;  %v1014_v45 = vsel %vm13511_vm11, %v1006_v25, %v1013_v30  ;;  %v1131_v26 = vshrl.u32 %v13406_v57, 16  ;;  %v657_v25 = vld [vmem:[#allocation2 + $0x40] sm:$0x8] }
  0x81   : > { %v1140_v38 = vshrl.u32 %v13408_v58, 16  ;;  %v13538_v40 = vrot.slane %v1118_v20, 7  ;;  %v1153_v31 = vshrl.u32 %v13416_v61, 16  ;;  %v1175_v30 = vshrl.u32 %v13420_v63, 16 }
  0x82   : > { %v1005_v35 = vsel %vm13511_vm11, %v10523_v60, %v1004_v29  ;;  %v10506_v29 = vcombine.low %v13524_v24, %v13526_v27  ;;  %v1050_v36 = vrot.slane %v13497_v54, 4  ;;  %v1057_v20 = vor.u32 %v1055_v43, %v1054_v59 }
  0x83   : > { %v10539_v60 = vcombine.low %v1005_v35, %v1014_v45  ;;  %v13554_v47 = vrot.slane %v1153_v31, 7  ;;  %v1187_v43 = vshll.u32 %v13422_v0, 16  ;;  %v1036_v59 = vsel %vm13511_vm11, %v1028_v53, %v1035_v22 }
  0x84   : > { %v1060_v45 = vshrl.u32 %v654_v32, 16  ;;  %v1082_v31 = vshrl.u32 %v657_v25, 16  ;;  %v1219_v53 = vshrl.u32 %v13439_v6, 16  ;;  %v2139_v32 = vsel %vm825_vm6, %v13437_v5, 0 }
  0x85   : > { %v16107_v5 = vshll.u32 %v13394_v52, 16  ;;  %v1222_v52 = vshll.u32 %v13439_v6, 16  ;;  %v1332_v6 = vshll.u32 %v13524_v24, 16  ;;  %vm1655_vm12 = vsmask.f32 3328 }
  0x86   : > { %v10526_v25 = vrot.slane %v1060_v45, 11  ;;  %v1241_v45 = vshrl.u32 %v13452_v11, 16  ;;  %vm1656_vm13 = vsmask.f32 7440  ;;  %vm6271_vm0 = vcmask 64512  }
  0x87   : > { %11650 = vmatmul.mubr.msk.bf16.gmra.mrb[12].mxu0 %vm776_vm7, %v10498_v1  ;;  %v648_v1 = vld [vmem:[#allocation2 + $0x10] sm:$0x8]  ;;  %vm13783_vm14 = vmor %vm1655_vm12, %vm1656_vm13  ;;  %vm6091_vm3 = vcmask 60416  }
  0x88   : > { %11653 = vmatprep.mubr.msk.bf16.mxu0 %vm776_vm7, %v10499_v2  ;;  %v1016_v28 = vshrl.u32 %v648_v1, 16  ;;  %v1184_v2 = vshrl.u32 %v13422_v0, 16 }
  0x8a   : > { %v10524_v1 = vrot.slane %v1016_v28, 11  ;;  %v1165_v28 = vshll.u32 %v13418_v62, 16 }
  0x8f   : > { %11654 = vmatmul.mubr.msk.bf16.gmra.mrb[16].mxu0 %vm776_vm7, %v10500_v8  ;;  %v1156_v8 = vshll.u32 %v13416_v61, 16  ;;  %v16112_v61 = vshll.u32 %v13420_v63, 16  ;;  %v1329_v63 = vshrl.u32 %v13524_v24, 16 }
  0x90   : > { %11657 = vmatprep.mubr.msk.bf16.mxu0 %vm776_vm7, %v10501_v9  ;;  %v13550_v9 = vrot.slane %v1140_v38, 7  ;;  %v1058_v38 = vsel %vm13511_vm11, %v1050_v36, %v1057_v20  ;;  %v10527_v20 = vrot.slane %v1082_v31, 11 }
  0x97   : > { %11658 = vmatmul.mubr.msk.bf16.gmra.mrb[20].mxu0 %vm776_vm7, %v10502_v18  ;;  %v13517_v18 = vrot.slane %v1087_v48, 7  ;;  %v1038_v48 = vshrl.u32 %v651_v16, 16  ;;  %v1048_v16 = vor.u32 %v1046_v42, %v13497_v54  ;;  %v1027_v54 = vsel %vm13511_vm11, %v10524_v1, %v1026_v21 }
  0x98   : > { %11661 = vmatprep.mubr.msk.bf16.mxu0 %vm776_vm7, %v10503_v19  ;;  %v13548_v19 = vrot.slane %v1131_v26, 7  ;;  %v1206_v21 = vshrl.u32 %v13432_v4, 16  ;;  %v10540_v22 = vcombine.low %v1027_v54, %v1036_v59  ;;  %v1101_v42 = vor.u32 %v16107_v5, %v1098_v23 }
  0x99   : > { %v1094_v59 = vrot.slane %v13517_v18, 4  ;;  %v13608_v23 = vrot.slane %v1219_v53, 7  ;;  %v16109_v5 = vshll.u32 %v13404_v56, 16  ;;  %v1285_v56 = vshrl.u32 %v13478_v39, 16 }
  0x9f   : > { %11662 = vmatmul.mubr.msk.bf16.gmra.mrb[24].mxu0 %vm776_vm7, %v10504_v49  ;;  %v13533_v49 = vrot.slane %v1109_v10, 7  ;;  %v10525_v10 = vrot.slane %v1038_v48, 11  ;;  %v13567_v48 = vrot.slane %v1175_v30, 7  ;;  %v16104_v30 = vshll.u32 %v13388_v44, 16  ;;  %v660_v44 = vld [vmem:[#allocation2 + $0x50] sm:$0x8] }
  0xa0   : > { %11665 = vmatprep.mubr.msk.bf16.mxu0 %vm776_vm7, %v10505_v37  ;;  %v1162_v37 = vshrl.u32 %v13418_v62, 16 }
  0xa1   : > { %v1049_v26 = vsel %vm13511_vm11, %v10525_v10, %v1048_v16  ;;  %v1070_v1 = vor.u32 %v16104_v30, %v13502_v46  ;;  %v16105_v10 = vshll.u32 %v13390_v50, 16  ;;  %v13599_v50 = vld [vmem:[%s16090_s1 + $0x6] sm:$0x3]  ;;  %v13624_v30 = vrot.slane %v1241_v45, 7 }
  0xa2   : > { %v13556_v35 = vrot.slane %v1162_v37, 7  ;;  %v13573_v37 = vrot.slane %v1184_v2, 7  ;;  %v10541_v36 = vcombine.low %v1049_v26, %v1058_v38  ;;  %v1072_v2 = vrot.slane %v13502_v46, 4  ;;  %v663_v46 = vld [vmem:[#allocation2 + $0x60] sm:$0x8] }
  0xa3   : > { %v1079_v16 = vor.u32 %v16105_v10, %v13515_v17  ;;  %v1228_v26 = vshrl.u32 %v13441_v7, 16  ;;  %v1071_v38 = vsel %vm13511_vm11, %v10526_v25, %v1070_v1  ;;  %v1126_v53 = vshrl.u32 %v663_v46, 16 }
  0xa4   : > { %v1263_v25 = vshrl.u32 %v13457_v14, 16  ;;  %v16110_v46 = vshll.u32 %v13406_v57, 16  ;;  %v1275_v57 = vshll.u32 %v13459_v15, 16 }
  0xa5   : > { %v1080_v31 = vsel %vm13511_vm11, %v1072_v2, %v1079_v16  ;;  %v1272_v2 = vshrl.u32 %v13459_v15, 16  ;;  %v10529_v45 = vrot.slane %v1126_v53, 11 }
  0xa6   : > { %v10542_v10 = vcombine.low %v1071_v38, %v1080_v31  ;;  %v1136_v1 = vor.u32 %v16110_v46, %v13548_v19  ;;  %v1138_v38 = vrot.slane %v13548_v19, 4 }
  0xa7   : > { %11666 = vmatmul.mubr.msk.bf16.gmra.mrb[28].mxu0 %vm776_vm7, %v10506_v29  ;;  %v1197_v29 = vshrl.u32 %v13430_v3, 16 }
  0xa8   : > { %11671 = vmatprep.mubr.msk.bf16.mxu0 %vm776_vm7, %v10539_v60  ;;  %v16106_v60 = vshll.u32 %v13392_v51, 16  ;;  %v13603_v51 = vrot.slane %v1206_v21, 7  ;;  %v1137_v46 = vsel %vm13511_vm11, %v10529_v45, %v1136_v1  ;;  %v675_v1 = vld [vmem:[#allocation2 + $0xa0] sm:$0x8] }
  0xa9   : > { %v13601_v17 = vrot.slane %v1197_v29, 7  ;;  %v1104_v29 = vshrl.u32 %v660_v44, 16  ;;  %v1123_v44 = vor.u32 %v16109_v5, %v13538_v40  ;;  %v669_v40 = vld [vmem:[#allocation2 + $0x80] sm:$0x8]  ;;  %v1297_v5 = vshll.u32 %v13480_v41, 16 }
  0xaa   : > { %v1092_v54 = vor.u32 %v16106_v60, %v13517_v18  ;;  %v1209_v18 = vshll.u32 %v13432_v4, 16  ;;  %v1231_v60 = vshll.u32 %v13441_v7, 16 }
  0xab   : > { %v1204_v62 = vrot.slane %v13601_v17, 4 }
  0xac   : > { %v1093_v21 = vsel %vm13511_vm11, %v10527_v20, %v1092_v54  ;;  %v10528_v54 = vrot.slane %v1104_v29, 11  ;;  %v1266_v29 = vshll.u32 %v13457_v14, 16 }
  0xaf   : > { %11672 = vmatmul.mubr.msk.bf16.vlgmr.msra.gmra.mrb[0].mxu0 %vm776_vm7, %v10540_v22  ;;  %v1102_v22 = vsel %vm13511_vm11, %v1094_v59, %v1101_v42  ;;  %v16108_v42 = vshll.u32 %v13402_v55, 16  ;;  %v1116_v59 = vrot.slane %v13533_v49, 4  ;;  %v16111_v55 = vshll.u32 %v13408_v58, 16  ;;  %v672_v58 = vld [vmem:[#allocation2 + $0x90] sm:$0x8] }
  0xb0   : > { %11704 = vmatpush3.bf16.msra.mxu0 %v2139_v32  ;;  %11675 = vmatprep.mubr.msk.bf16.mxu0 %vm776_vm7, %v10541_v36  ;;  %v13622_v32 = vrot.slane %v1228_v26, 7  ;;  %v1250_v36 = vshrl.u32 %v13454_v12, 16  ;;  %v10543_v20 = vcombine.low %v1093_v21, %v1102_v22  ;;  %v666_v26 = vld [vmem:[#allocation2 + $0x70] sm:$0x8]  ;;  %v13649_v22 = vrot.slane %v1263_v25, 7 }
  0xb1   : > { %12762 = vmatprep.subr.msk.bf16.mxu0 %vm825_vm6, %v13599_v50  ;;  %v1114_v16 = vor.u32 %v16108_v42, %v13533_v49  ;;  %v1145_v31 = vor.u32 %v16111_v55, %v13550_v9  ;;  %v1253_v49 = vshll.u32 %v13454_v12, 16  ;;  %v1148_v19 = vshrl.u32 %v666_v26, 16 }
  0xb2   : > { %v13644_v21 = vrot.slane %v1250_v36, 7  ;;  %v13654_v9 = vrot.slane %v1272_v2, 7  ;;  %v1294_v36 = vshrl.u32 %v13480_v41, 16  ;;  %v1124_v25 = vsel %vm13511_vm11, %v1116_v59, %v1123_v44 }
  0xb3   : > { %v1115_v42 = vsel %vm13511_vm11, %v10528_v54, %v1114_v16  ;;  %v1170_v2 = vshrl.u32 %v669_v40, 16  ;;  %v13667_v26 = vrot.slane %v1285_v56, 7  ;;  %v1307_v55 = vshrl.u32 %v13484_v33, 16 }
  0xb4   : > { %v1192_v53 = vshrl.u32 %v672_v58, 16  ;;  %v10544_v16 = vcombine.low %v1115_v42, %v1124_v25  ;;  %v10530_v54 = vrot.slane %v1148_v19, 11  ;;  %v1158_v59 = vor.u32 %v1156_v8, %v13554_v47  ;;  %v681_v25 = vld [vmem:[#allocation2 + $0xc0] sm:$0x8] }
  0xb5   : > { %v1160_v44 = vrot.slane %v13554_v47, 4  ;;  %v1189_v56 = vor.u32 %v1187_v43, %v13573_v37  ;;  %v1296_v40 = vrot.slane %v1294_v36, 7  ;;  %v10531_v19 = vrot.slane %v1170_v2, 11 }
  0xb6   : > { %v1180_v8 = vor.u32 %v16112_v61, %v13567_v48  ;;  %v16113_v47 = vshll.u32 %v13430_v3, 16  ;;  %v10532_v42 = vrot.slane %v1192_v53, 11  ;;  %v13692_v0 = vrot.slane %v1307_v55, 7  ;;  %v678_v3 = vld [vmem:[#allocation2 + $0xb0] sm:$0x8] }
  0xb7   : > { %11676 = vmatmul.mubr.msk.bf16.gmra.mrb[4].mxu0 %vm776_vm7, %v10542_v10  ;;  %v1146_v10 = vsel %vm13511_vm11, %v1138_v38, %v1145_v31  ;;  %v1167_v38 = vor.u32 %v1165_v28, %v13556_v35  ;;  %v1182_v31 = vrot.slane %v13567_v48, 4  ;;  %v1211_v35 = vor.u32 %v1209_v18, %v13603_v51 }
  0xb8   : > { %11679 = vmatprep.mubr.msk.bf16.mxu0 %vm776_vm7, %v10543_v20  ;;  %v1310_v20 = vshll.u32 %v13484_v33, 16  ;;  %v10545_v45 = vcombine.low %v1137_v46, %v1146_v10  ;;  %v1202_v58 = vor.u32 %v16113_v47, %v13601_v17  ;;  %v1214_v28 = vshrl.u32 %v675_v1, 16  ;;  %v1605_v47 = vld [vmem:[#allocation2 + $0x4] sm:$0xf] }
  0xb9   : > { %v1316_v43 = vshrl.u32 %v13486_v34, 16  ;;  %v1319_v37 = vshll.u32 %v13486_v34, 16  ;;  %v1338_v48 = vshrl.u32 %v13526_v27, 16  ;;  %v1159_v4 = vsel %vm13511_vm11, %v10530_v54, %v1158_v59 }
  0xba   : > { %v1168_v17 = vsel %vm13511_vm11, %v1160_v44, %v1167_v38  ;;  %v1190_v51 = vsel %vm13511_vm11, %v1182_v31, %v1189_v56  ;;  %v1181_v34 = vsel %vm13511_vm11, %v10531_v19, %v1180_v8  ;;  %v1224_v18 = vor.u32 %v1222_v52, %v13608_v23  ;;  %v690_v19 = vld [vmem:[#allocation2 + $0xf0] sm:$0x8] }
  0xbb   : > { %v1226_v53 = vrot.slane %v13608_v23, 4  ;;  %v1233_v36 = vor.u32 %v1231_v60, %v13622_v32  ;;  %v1203_v46 = vsel %vm13511_vm11, %v10532_v42, %v1202_v58  ;;  %v1212_v10 = vsel %vm13511_vm11, %v1204_v62, %v1211_v35  ;;  %v687_v32 = vld [vmem:[#allocation2 + $0xe0] sm:$0x8]  ;;  %v1606_v35 = vld [vmem:[#allocation2 + $0x8] sm:$0xf] }
  0xbc   : > { %v10533_v2 = vrot.slane %v1214_v28, 11  ;;  %v1236_v55 = vshrl.u32 %v678_v3, 16  ;;  %v1318_v54 = vrot.slane %v1316_v43, 7  ;;  %v1341_v52 = vshll.u32 %v13526_v27, 16 }
  0xbd   : > { %v10546_v23 = vcombine.low %v1159_v4, %v1168_v17  ;;  %v1331_v59 = vrot.slane %v1329_v63, 7  ;;  %v1340_v44 = vrot.slane %v1338_v48, 7  ;;  %v10547_v7 = vcombine.low %v1181_v34, %v1190_v51  ;;  %v1608_v34 = vld [vmem:[#allocation2 + $0x14] sm:$0xf] }
  0xbe   : > { %v1258_v60 = vshrl.u32 %v681_v25, 16  ;;  %v10548_v1 = vcombine.low %v1203_v46, %v1212_v10  ;;  %v16114_v38 = vshll.u32 %v13452_v11, 16  ;;  %v1225_v24 = vsel %vm13511_vm11, %v10533_v2, %v1224_v18  ;;  %v1609_v25 = vld [vmem:[#allocation2 + $0x18] sm:$0xf] }
  0xbf   : > { %11680 = vmatmul.mubr.msk.bf16.gmra.mrb[8].mxu0 %vm776_vm7, %v10544_v16  ;;  %v684_v16 = vld [vmem:[#allocation2 + $0xd0] sm:$0x8]  ;;  %v10534_v27 = vrot.slane %v1236_v55, 11  ;;  %v1248_v61 = vrot.slane %v13624_v30, 4  ;;  %v1255_v8 = vor.u32 %v1253_v49, %v13644_v21  ;;  %v1268_v11 = vor.u32 %v1266_v29, %v13649_v22 }
  0xc0   : > { %11683 = vmatprep.mubr.msk.bf16.mxu0 %vm776_vm7, %v10545_v45  ;;  %v1234_v45 = vsel %vm13511_vm11, %v1226_v53, %v1233_v36  ;;  %v1246_v31 = vor.u32 %v16114_v38, %v13624_v30  ;;  %v1280_v56 = vshrl.u32 %v684_v16, 16  ;;  %v1270_v58 = vrot.slane %v13649_v22, 4 }
  0xc1   : > { %v1277_v42 = vor.u32 %v1275_v57, %v13654_v9  ;;  %v1302_v62 = vshrl.u32 %v687_v32, 16  ;;  %v10535_v30 = vrot.slane %v1258_v60, 11  ;;  %v16115_v12 = vshll.u32 %v13478_v39, 16 }
  0xc2   : > { %v1292_v49 = vrot.slane %v13667_v26, 4  ;;  %v1324_v28 = vshrl.u32 %v690_v19, 16  ;;  %v10536_v14 = vrot.slane %v1280_v56, 11  ;;  %v1299_v29 = vor.u32 %v1297_v5, %v1296_v40  ;;  %v1612_v19 = vld [vmem:[#allocation2 + $0x28] sm:$0xf] }
  0xc3   : > { %v1290_v21 = vor.u32 %v16115_v12, %v13667_v26  ;;  %v1659_v22 = vshrl.u32 %v1605_v47, 16  ;;  %v1662_v43 = vshll.u32 %v1605_v47, 16  ;;  %v1312_v15 = vor.u32 %v1310_v20, %v13692_v0  ;;  %v1607_v20 = vld [vmem:[#allocation2 + $0xc] sm:$0x1] }
  0xc4   : > { %v1314_v57 = vrot.slane %v13692_v0, 4  ;;  %v1668_v9 = vshll.u32 %v1606_v35, 16  ;;  %v1672_v63 = vshrl.u32 %v1606_v35, 16  ;;  %v10537_v3 = vrot.slane %v1302_v62, 11 }
  0xc5   : > { %v1321_v39 = vor.u32 %v1319_v37, %v1318_v54  ;;  %v1336_v48 = vrot.slane %v1331_v59, 4  ;;  %v1343_v4 = vor.u32 %v1341_v52, %v1340_v44  ;;  %v10549_v26 = vcombine.low %v1225_v24, %v1234_v45  ;;  %v1611_v45 = vld [vmem:[#allocation2 + $0x24] sm:$0xf]  ;;  %v1614_v24 = vld [vmem:[#allocation2 + $0x34] sm:$0xf] }
  0xc6   : > { %v1256_v17 = vsel %vm13511_vm11, %v1248_v61, %v1255_v8  ;;  %v10538_v41 = vrot.slane %v1324_v28, 11  ;;  %v1334_v5 = vor.u32 %v1332_v6, %v1331_v59  ;;  %v1247_v40 = vsel %vm13511_vm11, %v10534_v27, %v1246_v31  ;;  %v1610_v59 = vld [vmem:[#allocation2 + $0x1c] sm:$0x1] }
  0xc7   : > { %11684 = vmatmul.mubr.msk.bf16.gmra.mrb[12].mxu0 %vm776_vm7, %v10546_v23  ;;  %v1278_v33 = vsel %vm13511_vm11, %v1270_v58, %v1277_v42  ;;  %v1661_v0 = vrot.slane %v1659_v22, 4  ;;  %v1664_v51 = vrot.slane %v1662_v43, 5  ;;  %v1269_v37 = vsel %vm13511_vm11, %v10535_v30, %v1268_v11  ;;  %v1615_v11 = vld [vmem:[#allocation2 + $0x38] sm:$0xf]  ;;  %v1617_v30 = vld [vmem:[#allocation2 + $0x44] sm:$0xf] }
  0xc8   : > { %11687 = vmatprep.mubr.msk.bf16.mxu0 %vm776_vm7, %v10547_v7  ;;  %v1300_v18 = vsel %vm13511_vm11, %v1292_v49, %v1299_v29  ;;  %v13761_v53 = vrot.slane %v1668_v9, 5  ;;  %v1674_v36 = vrot.slane %v1672_v63, 4  ;;  %v1291_v46 = vsel %vm13511_vm11, %v10536_v14, %v1290_v21  ;;  %v1618_v29 = vld [vmem:[#allocation2 + $0x48] sm:$0xf] }
  0xc9   : > { %v1313_v10 = vsel %vm13511_vm11, %v10537_v3, %v1312_v15  ;;  %v1322_v2 = vsel %vm13511_vm11, %v1314_v57, %v1321_v39  ;;  %v1344_v55 = vsel %vm13511_vm11, %v1336_v48, %v1343_v4  ;;  %v1335_v16 = vsel %vm13511_vm11, %v10538_v41, %v1334_v5  ;;  %v1620_v41 = vld [vmem:[#allocation2 + $0x54] sm:$0xf] }
  0xca   : > { %v1678_v54 = vshll.u32 %v1607_v20, 16  ;;  %v1683_v6 = vshrl.u32 %v1608_v34, 16  ;;  %v1686_v52 = vshll.u32 %v1608_v34, 16  ;;  %v1665_v23 = vor.u32 %v1664_v51, %v1661_v0 }
  0xcb   : > { %v1692_v44 = vshll.u32 %v1609_v25, 16  ;;  %v1696_v7 = vshrl.u32 %v1609_v25, 16  ;;  %v10550_v60 = vcombine.low %v1247_v40, %v1256_v17  ;;  %v10551_v32 = vcombine.low %v1269_v37, %v1278_v33  ;;  %v1613_v40 = vld [vmem:[#allocation2 + $0x2c] sm:$0x1]  ;;  %v1616_v25 = vld [vmem:[#allocation2 + $0x3c] sm:$0x1] }
  0xcc   : > { %v10552_v38 = vcombine.low %v1291_v46, %v1300_v18  ;;  %v13776_v31 = vcombine.low %v1313_v10, %v1322_v2  ;;  %v13778_v56 = vcombine.low %v1335_v16, %v1344_v55  ;;  %v1680_v27 = vrot.slane %v1678_v54, 5 }
  0xcd   : > { %v1685_v61 = vrot.slane %v1683_v6, 4  ;;  %v1688_v8 = vrot.slane %v1686_v52, 5  ;;  %v1702_v47 = vshll.u32 %v1610_v59, 16  ;;  %v1666_v58 = vrot.slane %v1665_v23, 4  ;;  %v1619_v59 = vld [vmem:[#allocation2 + $0x4c] sm:$0x1] }
  0xce   : > { %v13780_v42 = vrot.slane %v1692_v44, 5  ;;  %v1698_v62 = vrot.slane %v1696_v7, 4  ;;  %v1707_v35 = vshrl.u32 %v1611_v45, 16  ;;  %v16116_v12 = vmov 0 }
  0xcf   : > { %11688 = vmatmul.mubr.msk.bf16.gmra.mrb[16].mxu0 %vm776_vm7, %v10548_v1  ;;  %v1675_v1 = vor.u32 %v1674_v36, %v13761_v53  ;;  %v16117_v12 = vsel %vm13783_vm14, 4294967295, %v16116_v12  ;;  %v1710_v49 = vshll.u32 %v1611_v45, 16  ;;  %v1716_v28 = vshll.u32 %v1612_v19, 16  ;;  %v1621_v36 = vld [vmem:[#allocation2 + $0x58] sm:$0xf] }
  0xd0   : > { %11691 = vmatprep.mubr.msk.bf16.mxu0 %vm776_vm7, %v10549_v26  ;;  %16118 = vst [vmem:[#allocation4_spill] sm:$0xff] %v16117_v12  ;;  %v1720_v14 = vshrl.u32 %v1612_v19, 16  ;;  %v1731_v22 = vshrl.u32 %v1614_v24, 16  ;;  %v1734_v43 = vshll.u32 %v1614_v24, 16  ;;  %v1740_v15 = vshll.u32 %v1615_v11, 16 }
  0xd1   : > { %v1676_v21 = vrot.slane %v1675_v1, 4  ;;  %v1744_v57 = vshrl.u32 %v1615_v11, 16  ;;  %v1689_v9 = vor.u32 %v1688_v8, %v1685_v61  ;;  %v13789_v63 = vrot.slane %v1702_v47, 5  ;;  %v1623_v19 = vld [vmem:[#allocation2 + $0x64] sm:$0xf] }
  0xd2   : > { %v1755_v3 = vshrl.u32 %v1617_v30, 16  ;;  %v1758_v39 = vshll.u32 %v1617_v30, 16  ;;  %v1671_v48 = vsel %vm13783_vm14, %v1666_v58, %v13761_v53  ;;  %v1709_v4 = vrot.slane %v1707_v35, 4  ;;  %v2352_v12 = vld [vmem:[#allocation2 + $0x70] sm:$0x8] }
  0xd3   : > { %v1764_v26 = vshll.u32 %v1618_v29, 16  ;;  %v1768_v17 = vshrl.u32 %v1618_v29, 16  ;;  %v1681_v5 = vsel %vm13783_vm14, %v1676_v21, %v1680_v27  ;;  %v1712_v33 = vrot.slane %v1710_v49, 5  ;;  %v1624_v21 = vld [vmem:[#allocation2 + $0x68] sm:$0xf] }
  0xd4   : > { %v13796_v20 = vrot.slane %v1716_v28, 5  ;;  %v1722_v0 = vrot.slane %v1720_v14, 4  ;;  %v1733_v51 = vrot.slane %v1731_v22, 4  ;;  %v1736_v34 = vrot.slane %v1734_v43, 5 }
  0xd5   : > { %v13798_v37 = vrot.slane %v1740_v15, 5  ;;  %v1746_v18 = vrot.slane %v1744_v57, 4  ;;  %v1757_v53 = vrot.slane %v1755_v3, 4  ;;  %v1760_v46 = vrot.slane %v1758_v39, 5 }
  0xd6   : > { %v1779_v10 = vshrl.u32 %v1620_v41, 16  ;;  %v1782_v2 = vshll.u32 %v1620_v41, 16  ;;  %v1699_v55 = vor.u32 %v1698_v62, %v13780_v42  ;;  %v1726_v16 = vshll.u32 %v1613_v40, 16  ;;  %v1625_v41 = vld [vmem:[#allocation2 + $0x6c] sm:$0x1] }
  0xd7   : > { %11692 = vmatmul.mubr.msk.bf16.gmra.mrb[20].mxu0 %vm776_vm7, %v10550_v60  ;;  %v13801_v54 = vrot.slane %v1764_v26, 5  ;;  %v1770_v6 = vrot.slane %v1768_v17, 4  ;;  %v10572_v52 = vcombine.low %v1671_v48, %v1681_v5  ;;  %v13803_v23 = vrot.slane %v1689_v9, 4 }
  0xd8   : > { %11695 = vmatprep.mubr.msk.bf16.mxu0 %vm776_vm7, %v10551_v32  ;;  %v1788_v44 = vshll.u32 %v1621_v36, 16  ;;  %v1792_v7 = vshrl.u32 %v1621_v36, 16  ;;  %v1713_v60 = vor.u32 %v1712_v33, %v1709_v4  ;;  %v1723_v32 = vor.u32 %v1722_v0, %v13796_v20  ;;  %v1627_v36 = vld [vmem:[#allocation2 + $0x78] sm:$0xf] }
  0xd9   : > { %v1737_v1 = vor.u32 %v1736_v34, %v1733_v51  ;;  %v1750_v45 = vshll.u32 %v1616_v25, 16  ;;  %v1747_v24 = vor.u32 %v1746_v18, %v13798_v37  ;;  %v1761_v27 = vor.u32 %v1760_v46, %v1757_v53  ;;  %v1626_v34 = vld [vmem:[#allocation2 + $0x74] sm:$0xf] }
  0xda   : > { %v1781_v61 = vrot.slane %v1779_v10, 4  ;;  %v1784_v8 = vrot.slane %v1782_v2, 5  ;;  %v1700_v47 = vrot.slane %v1699_v55, 4  ;;  %v1728_v11 = vrot.slane %v1726_v16, 5 }
  0xdb   : > { %v1771_v58 = vor.u32 %v1770_v6, %v13801_v54  ;;  %v1774_v62 = vshll.u32 %v1619_v59, 16  ;;  %v13811_v35 = vrot.slane %v1788_v44, 5  ;;  %v1794_v30 = vrot.slane %v1792_v7, 4 }
  0xdc   : > { %v1803_v49 = vshrl.u32 %v1623_v19, 16  ;;  %v1806_v28 = vshll.u32 %v1623_v19, 16  ;;  %v1714_v14 = vrot.slane %v1713_v60, 4  ;;  %v1724_v29 = vrot.slane %v1723_v32, 4  ;;  %v1628_v60 = vld [vmem:[#allocation2 + $0x7c] sm:$0x1] }
  0xdd   : > { %v1752_v22 = vrot.slane %v1750_v45, 5  ;;  %v1748_v43 = vrot.slane %v1747_v24, 4  ;;  %v1762_v15 = vrot.slane %v1761_v27, 4  ;;  %v1785_v57 = vor.u32 %v1784_v8, %v1781_v61  ;;  %v1630_v32 = vld [vmem:[#allocation2 + $0x88] sm:$0xf] }
  0xde   : > { %v1772_v3 = vrot.slane %v1771_v58, 4  ;;  %v1776_v39 = vrot.slane %v1774_v62, 5  ;;  %v1812_v48 = vshll.u32 %v1624_v21, 16  ;;  %v1816_v4 = vshrl.u32 %v1624_v21, 16  ;;  %v1633_v61 = vld [vmem:[#allocation2 + $0x98] sm:$0xf] }
  0xdf   : > { %11696 = vmatmul.mubr.msk.bf16.gmra.mrb[24].mxu0 %vm776_vm7, %v10552_v38  ;;  %v1622_v38 = vld [vmem:[#allocation2 + $0x5c] sm:$0x1]  ;;  %v1695_v26 = vsel %vm13783_vm14, %v13803_v23, %v13780_v42  ;;  %v1795_v17 = vor.u32 %v1794_v30, %v13811_v35  ;;  %v1805_v5 = vrot.slane %v1803_v49, 4  ;;  %v1808_v40 = vrot.slane %v1806_v28, 5  ;;  %v1629_v23 = vld [vmem:[#allocation2 + $0x84] sm:$0xf] }
  0xe0   : > { %11699 = vmatprep.mubr.msk.bf16.mxu0 %vm776_vm7, %v13776_v31  ;;  %v1738_v31 = vrot.slane %v1737_v1, 4  ;;  %v1798_v9 = vshll.u32 %v1622_v38, 16  ;;  %v1705_v33 = vsel %vm13783_vm14, %v1700_v47, %v13789_v63  ;;  %v1719_v0 = vsel %vm13783_vm14, %v1714_v14, %v13796_v20  ;;  %v1632_v1 = vld [vmem:[#allocation2 + $0x94] sm:$0xf]  ;;  %v1635_v8 = vld [vmem:[#allocation2 + $0xa4] sm:$0xf] }
  0xe1   : > { %v1729_v51 = vsel %vm13783_vm14, %v1724_v29, %v1728_v11  ;;  %v1767_v63 = vsel %vm13783_vm14, %v1762_v15, %v13801_v54  ;;  %v13837_v18 = vrot.slane %v1785_v57, 4  ;;  %v1777_v25 = vsel %vm13783_vm14, %v1772_v3, %v1776_v39  ;;  %v13865_v62 = vld [vmem:[%s16090_s1 + $0x8] sm:$0x3] }
  0xe2   : > { %v1743_v42 = vsel %vm13783_vm14, %v1738_v31, %v13798_v37  ;;  %v13839_v20 = vrot.slane %v1798_v9, 5  ;;  %v13843_v53 = vrot.slane %v1812_v48, 5  ;;  %v1818_v37 = vrot.slane %v1816_v4, 4  ;;  %v1636_v28 = vld [vmem:[#allocation2 + $0xa8] sm:$0xf] }
  0xe3   : > { %v1822_v46 = vshll.u32 %v1625_v41, 16  ;;  %v13845_v10 = vrot.slane %v1795_v17, 4  ;;  %v1809_v2 = vor.u32 %v1808_v40, %v1805_v5  ;;  %v1827_v55 = vshrl.u32 %v1626_v34, 16  ;;  %v1631_v41 = vld [vmem:[#allocation2 + $0x8c] sm:$0x1] }
  0xe4   : > { %v1830_v16 = vshll.u32 %v1626_v34, 16  ;;  %v10573_v6 = vcombine.low %v1695_v26, %v1705_v33  ;;  %v1840_v54 = vshrl.u32 %v1627_v36, 16  ;;  %v2833_v59 = vsel %vm825_vm6, %v13599_v50, 0 }
  0xe5   : > { %v10574_v44 = vcombine.low %v1719_v0, %v1729_v51  ;;  %v10576_v45 = vcombine.low %v1767_v63, %v1777_v25  ;;  %v1791_v19 = vsel %vm13783_vm14, %v13837_v18, %v13811_v35  ;;  %v1819_v24 = vor.u32 %v1818_v37, %v13843_v53  ;;  %v1634_v51 = vld [vmem:[#allocation2 + $0x9c] sm:$0x1]  ;;  %v1637_v25 = vld [vmem:[#allocation2 + $0xac] sm:$0x1]  ;;  %v1642_v35 = vld [vmem:[#allocation2 + $0xc8] sm:$0xf] }
  0xe6   : > { %v13854_v27 = vrot.slane %v1822_v46, 5  ;;  %v1801_v50 = vsel %vm13783_vm14, %v13845_v10, %v13839_v20  ;;  %v13860_v47 = vrot.slane %v1809_v2, 4  ;;  %v1829_v11 = vrot.slane %v1827_v55, 4  ;;  %v1638_v55 = vld [vmem:[#allocation2 + $0xb4] sm:$0xf] }
  0xe7   : > { %11700 = vmatmul.mubr.msk.bf16.gmra.mrb[28].mxu0 %vm776_vm7, %v13778_v56  ;;  %v1753_v56 = vsel %vm13783_vm14, %v1748_v43, %v1752_v22  ;;  %v1832_v58 = vrot.slane %v1830_v16, 5  ;;  %v1842_v30 = vrot.slane %v1840_v54, 4  ;;  %v1851_v21 = vshrl.u32 %v1629_v23, 16 }
  0xe8   : > { %11705 = vmatprep.mubr.msk.bf16.mxu0 %vm776_vm7, %v10572_v52  ;;  %v1836_v52 = vshll.u32 %v1627_v36, 16  ;;  %v10575_v7 = vcombine.low %v1743_v42, %v1753_v56  ;;  %v1854_v49 = vshll.u32 %v1629_v23, 16  ;;  %v1860_v14 = vshll.u32 %v1630_v32, 16 }
  0xe9   : > { %v1864_v29 = vshrl.u32 %v1630_v32, 16  ;;  %v1875_v31 = vshrl.u32 %v1632_v1, 16  ;;  %v1878_v22 = vshll.u32 %v1632_v1, 16  ;;  %v1820_v43 = vrot.slane %v1819_v24, 4 }
  0xea   : > { %v13868_v38 = vrot.slane %v1836_v52, 5  ;;  %v1846_v15 = vshll.u32 %v1628_v60, 16  ;;  %v1884_v57 = vshll.u32 %v1633_v61, 16  ;;  %v1888_v9 = vshrl.u32 %v1633_v61, 16 }
  0xeb   : > { %v1899_v3 = vshrl.u32 %v1635_v8, 16  ;;  %v1902_v39 = vshll.u32 %v1635_v8, 16  ;;  %v1908_v48 = vshll.u32 %v1636_v28, 16  ;;  %v1912_v4 = vshrl.u32 %v1636_v28, 16 }
  0xec   : > { %v1833_v26 = vor.u32 %v1832_v58, %v1829_v11  ;;  %v1843_v17 = vor.u32 %v1842_v30, %v13868_v38  ;;  %v1853_v5 = vrot.slane %v1851_v21, 4  ;;  %v1856_v40 = vrot.slane %v1854_v49, 5  ;;  %v1639_v58 = vld [vmem:[#allocation2 + $0xb8] sm:$0xf]  ;;  %v1641_v30 = vld [vmem:[#allocation2 + $0xc4] sm:$0xf] }
  0xed   : > { %v13874_v33 = vrot.slane %v1860_v14, 5  ;;  %v1866_v0 = vrot.slane %v1864_v29, 4  ;;  %v1877_v42 = vrot.slane %v1875_v31, 4  ;;  %v1880_v34 = vrot.slane %v1878_v22, 5 }
  0xee   : > { %v1815_v56 = vsel %vm13783_vm14, %v13860_v47, %v13843_v53  ;;  %v1848_v63 = vrot.slane %v1846_v15, 5  ;;  %v13880_v20 = vrot.slane %v1884_v57, 5  ;;  %v1890_v36 = vrot.slane %v1888_v9, 4 }
  0xef   : > { %11706 = vmatmul.mubr.msk.bf16.vlgmr.msra.gmra.mrb[0].mxu0 %vm776_vm7, %v10573_v6  ;;  %v1901_v37 = vrot.slane %v1899_v3, 4  ;;  %v1904_v46 = vrot.slane %v1902_v39, 5  ;;  %v13882_v10 = vrot.slane %v1908_v48, 5  ;;  %v1914_v2 = vrot.slane %v1912_v4, 4 }
  0xf0   : > { %11738 = vmatpush3.bf16.msra.mxu0 %v2833_v59  ;;  %11709 = vmatprep.mubr.msk.bf16.mxu0 %vm776_vm7, %v10574_v44  ;;  %v1825_v16 = vsel %vm13783_vm14, %v1820_v43, %v13854_v27  ;;  %v1834_v6 = vrot.slane %v1833_v26, 4  ;;  %v1844_v52 = vrot.slane %v1843_v17, 4  ;;  %v1857_v53 = vor.u32 %v1856_v40, %v1853_v5  ;;  %v1640_v43 = vld [vmem:[#allocation2 + $0xbc] sm:$0x1] }
  0xf1   : > { %12763 = vmatprep.subr.msk.bf16.mxu0 %vm825_vm6, %v13865_v62  ;;  %v1867_v54 = vor.u32 %v1866_v0, %v13874_v33  ;;  %v1870_v23 = vshll.u32 %v1631_v41, 16  ;;  %v1881_v59 = vor.u32 %v1880_v34, %v1877_v42  ;;  %v1894_v44 = vshll.u32 %v1634_v51, 16  ;;  %v1643_v34 = vld [vmem:[#allocation2 + $0xcc] sm:$0x1] }
  0xf2   : > { %v1891_v60 = vor.u32 %v1890_v36, %v13880_v20  ;;  %v1918_v32 = vshll.u32 %v1637_v25, 16  ;;  %v1923_v1 = vshrl.u32 %v1638_v55, 16  ;;  %v1926_v24 = vshll.u32 %v1638_v55, 16  ;;  %v1644_v25 = vld [vmem:[#allocation2 + $0xd4] sm:$0xf] }
  0xf3   : > { %v1905_v27 = vor.u32 %v1904_v46, %v1901_v37  ;;  %v1915_v61 = vor.u32 %v1914_v2, %v13882_v10  ;;  %v1839_v8 = vsel %vm13783_vm14, %v1834_v6, %v13868_v38  ;;  %v1849_v47 = vsel %vm13783_vm14, %v1844_v52, %v1848_v63  ;;  %v1645_v46 = vld [vmem:[#allocation2 + $0xd8] sm:$0xf]  ;;  %v1647_v2 = vld [vmem:[#allocation2 + $0xe4] sm:$0xf]  ;;  %v1648_v52 = vld [vmem:[#allocation2 + $0xe8] sm:$0xf] }
  0xf4   : > { %v1858_v11 = vrot.slane %v1857_v53, 4  ;;  %v1868_v21 = vrot.slane %v1867_v54, 4  ;;  %v1872_v49 = vrot.slane %v1870_v23, 5  ;;  %v1882_v28 = vrot.slane %v1881_v59, 4  ;;  %v1650_v53 = vld [vmem:[#allocation2 + $0xf4] sm:$0xf] }
  0xf5   : > { %v1896_v14 = vrot.slane %v1894_v44, 5  ;;  %v1892_v18 = vrot.slane %v1891_v60, 4  ;;  %v1928_v29 = vrot.slane %v1926_v24, 5  ;;  %v1906_v31 = vrot.slane %v1905_v27, 4  ;;  %v1651_v60 = vld [vmem:[#allocation2 + $0xf8] sm:$0xf] }
  0xf6   : > { %v1916_v22 = vrot.slane %v1915_v61, 4  ;;  %v1932_v15 = vshll.u32 %v1639_v58, 16  ;;  %v1936_v38 = vshrl.u32 %v1639_v58, 16  ;;  %v1947_v57 = vshrl.u32 %v1641_v30, 16 }
  0xf7   : > { %11710 = vmatmul.mubr.msk.bf16.gmra.mrb[4].mxu0 %vm776_vm7, %v10575_v7  ;;  %v10577_v7 = vcombine.low %v1791_v19, %v1801_v50  ;;  %v1920_v19 = vrot.slane %v1918_v32, 5  ;;  %v1925_v50 = vrot.slane %v1923_v1, 4  ;;  %v1950_v9 = vshll.u32 %v1641_v30, 16 }
  0xf8   : > { %11713 = vmatprep.mubr.msk.bf16.mxu0 %vm776_vm7, %v10576_v45  ;;  %v10578_v45 = vcombine.low %v1815_v56, %v1825_v16  ;;  %v1956_v3 = vshll.u32 %v1642_v35, 16  ;;  %v1960_v39 = vshrl.u32 %v1642_v35, 16  ;;  %v10579_v48 = vcombine.low %v1839_v8, %v1849_v47  ;;  %v13931_v35 = vld [vmem:[#allocation2 + $0x14] sm:$0xf] }
  0xf9   : > { %v1863_v4 = vsel %vm13783_vm14, %v1858_v11, %v13874_v33  ;;  %v1873_v26 = vsel %vm13783_vm14, %v1868_v21, %v1872_v49  ;;  %v1887_v17 = vsel %vm13783_vm14, %v1882_v28, %v13880_v20  ;;  %v1897_v41 = vsel %vm13783_vm14, %v1892_v18, %v1896_v14 }
  0xfa   : > { %v1929_v5 = vor.u32 %v1928_v29, %v1925_v50  ;;  %v1942_v40 = vshll.u32 %v1640_v43, 16  ;;  %v1911_v0 = vsel %vm13783_vm14, %v1906_v31, %v13882_v10  ;;  %v1921_v51 = vsel %vm13783_vm14, %v1916_v22, %v1920_v19  ;;  %v13935_v31 = vld [vmem:[#allocation2 + $0x18] sm:$0xf]  ;;  %v1646_v22 = vld [vmem:[#allocation2 + $0xdc] sm:$0x1] }
  0xfb   : > { %v13919_v33 = vrot.slane %v1932_v15, 5  ;;  %v1938_v42 = vrot.slane %v1936_v38, 4  ;;  %v1949_v56 = vrot.slane %v1947_v57, 4  ;;  %v1952_v63 = vrot.slane %v1950_v9, 5  ;;  %v1649_v9 = vld [vmem:[#allocation2 + $0xec] sm:$0x1] }
  0xfc   : > { %v13921_v36 = vrot.slane %v1956_v3, 5  ;;  %v1962_v20 = vrot.slane %v1960_v39, 4  ;;  %v10580_v37 = vcombine.low %v1863_v4, %v1873_v26  ;;  %v10581_v55 = vcombine.low %v1887_v17, %v1897_v41  ;;  %v1652_v41 = vld [vmem:[#allocation2 + $0xfc] sm:$0x1] }
  0xfd   : > { %v10582_v16 = vcombine.low %v1911_v0, %v1921_v51  ;;  %v13923_v6 = vrot.slane %v1929_v5, 4  ;;  %v13925_v10 = vrot.slane %v1942_v40, 5  ;;  %v1939_v54 = vor.u32 %v1938_v42, %v13919_v33  ;;  %v2334_v5 = vld [vmem:[#allocation2 + $0x10] sm:$0x8] }
  0xfe   : > { %v1966_v23 = vshll.u32 %v1643_v34, 16  ;;  %v1971_v59 = vshrl.u32 %v1644_v25, 16  ;;  %v1974_v44 = vshll.u32 %v1644_v25, 16  ;;  %v1953_v32 = vor.u32 %v1952_v63, %v1949_v56 }
  0xff   : > { %11714 = vmatmul.mubr.msk.bf16.gmra.mrb[8].mxu0 %vm776_vm7, %v10577_v7  ;;  %v1963_v1 = vor.u32 %v1962_v20, %v13921_v36  ;;  %v1980_v24 = vshll.u32 %v1645_v46, 16  ;;  %v1984_v7 = vshrl.u32 %v1645_v46, 16  ;;  %v1995_v27 = vshrl.u32 %v1647_v2, 16 }
 0x100   : > { %11717 = vmatprep.mubr.msk.bf16.mxu0 %vm776_vm7, %v10578_v45  ;;  %v1998_v61 = vshll.u32 %v1647_v2, 16  ;;  %v2004_v45 = vshll.u32 %v1648_v52, 16  ;;  %v2008_v8 = vshrl.u32 %v1648_v52, 16  ;;  %v2019_v47 = vshrl.u32 %v1650_v53, 16 }
 0x101   : > { %v2022_v11 = vshll.u32 %v1650_v53, 16  ;;  %v2028_v58 = vshll.u32 %v1651_v60, 16  ;;  %v2032_v30 = vshrl.u32 %v1651_v60, 16  ;;  %v1940_v21 = vrot.slane %v1939_v54, 4  ;;  %v13962_v53 = vld [vmem:[#allocation2 + $0x24] sm:$0xf] }
 0x102   : > { %v1968_v49 = vrot.slane %v1966_v23, 5  ;;  %v1973_v28 = vrot.slane %v1971_v59, 4  ;;  %v1976_v14 = vrot.slane %v1974_v44, 5  ;;  %v1954_v18 = vrot.slane %v1953_v32, 4  ;;  %v2337_v44 = vld [vmem:[#allocation2 + $0x20] sm:$0x8] }
 0x103   : > { %v1964_v19 = vrot.slane %v1963_v1, 4  ;;  %v13933_v50 = vrot.slane %v1980_v24, 5  ;;  %v1986_v29 = vrot.slane %v1984_v7, 4  ;;  %v1997_v43 = vrot.slane %v1995_v27, 4  ;;  %v13964_v7 = vld [vmem:[#allocation2 + $0x28] sm:$0xf] }
 0x104   : > { %v2000_v15 = vrot.slane %v1998_v61, 5  ;;  %v13937_v38 = vrot.slane %v2004_v45, 5  ;;  %v2010_v57 = vrot.slane %v2008_v8, 4  ;;  %v2021_v3 = vrot.slane %v2019_v47, 4  ;;  %v13967_v47 = vld [vmem:[#allocation2 + $0x34] sm:$0xf] }
 0x105   : > { %v2024_v39 = vrot.slane %v2022_v11, 5  ;;  %v2034_v4 = vrot.slane %v2032_v30, 4  ;;  %v1935_v26 = vsel %vm13783_vm14, %v13923_v6, %v13919_v33  ;;  %v1945_v17 = vsel %vm13783_vm14, %v1940_v21, %v13925_v10 }
 0x106   : > { %v2390_v40 = vshrl.u32 %v13931_v35, 16  ;;  %v2399_v0 = vshrl.u32 %v13935_v31, 16  ;;  %v1959_v51 = vsel %vm13783_vm14, %v1954_v18, %v13921_v36  ;;  %v1977_v42 = vor.u32 %v1976_v14, %v1973_v28  ;;  %v2340_v18 = vld [vmem:[#allocation2 + $0x30] sm:$0x8] }
 0x107   : > { %11718 = vmatmul.mubr.msk.bf16.gmra.mrb[12].mxu0 %vm776_vm7, %v10579_v48  ;;  %v13939_v48 = vrot.slane %v2028_v58, 5  ;;  %v1987_v34 = vor.u32 %v1986_v29, %v13933_v50  ;;  %v1990_v33 = vshll.u32 %v1646_v22, 16  ;;  %v1969_v56 = vsel %vm13783_vm14, %v1964_v19, %v1968_v49  ;;  %v13976_v19 = vld [vmem:[#allocation2 + $0x38] sm:$0xf] }
 0x108   : > { %11721 = vmatprep.mubr.msk.bf16.mxu0 %vm776_vm7, %v10580_v37  ;;  %v2001_v63 = vor.u32 %v2000_v15, %v1997_v43  ;;  %v2011_v20 = vor.u32 %v2010_v57, %v13937_v38  ;;  %v2014_v25 = vshll.u32 %v1649_v9, 16  ;;  %v2025_v37 = vor.u32 %v2024_v39, %v2021_v3 }
 0x109   : > { %v2035_v46 = vor.u32 %v2034_v4, %v13939_v48  ;;  %v2038_v2 = vshll.u32 %v1652_v41, 16  ;;  %v2392_v6 = vrot.slane %v2390_v40, 7  ;;  %v2393_v36 = vshll.u32 %v13931_v35, 16 }
 0x10a   : > { %v2401_v10 = vrot.slane %v2399_v0, 7  ;;  %v2402_v52 = vshll.u32 %v13935_v31, 16  ;;  %v1978_v54 = vrot.slane %v1977_v42, 4  ;;  %v1988_v23 = vrot.slane %v1987_v34, 4  ;;  %v482_v34 = vld [vmem:[%s12956_s27 + $0xf8] sm:$0xff] }
 0x10b   : > { %v1992_v59 = vrot.slane %v1990_v33, 5  ;;  %v10584_v60 = vcombine.low %v1959_v51, %v1969_v56  ;;  %v2002_v32 = vrot.slane %v2001_v63, 4  ;;  %v2012_v1 = vrot.slane %v2011_v20, 4  ;;  %v14013_v20 = vld [vmem:[#allocation2 + $0x44] sm:$0xf] }
 0x10c   : > { %v2016_v24 = vrot.slane %v2014_v25, 5  ;;  %v2026_v27 = vrot.slane %v2025_v37, 4  ;;  %v2036_v61 = vrot.slane %v2035_v46, 4  ;;  %v2040_v45 = vrot.slane %v2038_v2, 5  ;;  %v14015_v25 = vld [vmem:[#allocation2 + $0x48] sm:$0xf] }
 0x10d   : > { %v2412_v8 = vshrl.u32 %v13962_v53, 16  ;;  %v2395_v58 = vor.u32 %v2393_v36, %v2392_v6  ;;  %v2397_v30 = vrot.slane %v2392_v6, 4  ;;  %v2404_v21 = vor.u32 %v2402_v52, %v2401_v10  ;;  %v14021_v36 = vld [vmem:[#allocation2 + $0x54] sm:$0xf]  ;;  %v14023_v10 = vld [vmem:[#allocation2 + $0x58] sm:$0xf] }
 0x10e   : > { %v1983_v49 = vsel %vm13783_vm14, %v1978_v54, %v13933_v50  ;;  %v1993_v28 = vsel %vm13783_vm14, %v1988_v23, %v1992_v59  ;;  %v2421_v14 = vshrl.u32 %v13964_v7, 16  ;;  %v2007_v29 = vsel %vm13783_vm14, %v2002_v32, %v13937_v38  ;;  %v14025_v52 = vld [vmem:[#allocation2 + $0x64] sm:$0xf]  ;;  %v14030_v23 = vld [vmem:[#allocation2 + $0x74] sm:$0xf] }
 0x10f   : > { %11722 = vmatmul.mubr.msk.bf16.gmra.mrb[16].mxu0 %vm776_vm7, %v10581_v55  ;;  %v2385_v55 = vshrl.u32 %v2334_v5, 16  ;;  %v2017_v22 = vsel %vm13783_vm14, %v2012_v1, %v2016_v24  ;;  %v2407_v43 = vshrl.u32 %v2337_v44, 16  ;;  %v2434_v50 = vshrl.u32 %v13967_v47, 16  ;;  %16119 = vst [vmem:[#allocation5_spill] sm:$0xff] %v14030_v23  ;;  %v14032_v59 = vld [vmem:[#allocation2 + $0x78] sm:$0xf] }
 0x110   : > { %11725 = vmatprep.mubr.msk.bf16.mxu0 %vm776_vm7, %v10582_v16  ;;  %v10583_v16 = vcombine.low %v1935_v26, %v1945_v17  ;;  %v2031_v15 = vsel %vm13783_vm14, %v2026_v27, %v13939_v48  ;;  %v2041_v57 = vsel %vm13783_vm14, %v2036_v61, %v2040_v45  ;;  %v13990_v9 = vrot.slane %v2412_v8, 7  ;;  %v481_v17 = vld [vmem:[%s12956_s27 + $0xf0] sm:$0xff]  ;;  %16120 = vst [vmem:[#allocation6_spill] sm:$0xff] %v14032_v59  ;;  %v14034_v44 = vld [vmem:[#allocation2 + $0x84] sm:$0xf] }
 0x111   : > { %v10605_v11 = vrot.slane %v2385_v55, 11  ;;  %v2415_v3 = vshll.u32 %v13962_v53, 16  ;;  %v2405_v39 = vsel %vm13511_vm11, %v2397_v30, %v2404_v21  ;;  %v2429_v4 = vshrl.u32 %v2340_v18, 16  ;;  %v14038_v32 = vld [vmem:[#allocation2 + $0x94] sm:$0xf] }
 0x112   : > { %v2443_v26 = vshrl.u32 %v13976_v19, 16  ;;  %v10585_v41 = vcombine.low %v1983_v49, %v1993_v28  ;;  %v2423_v48 = vrot.slane %v2421_v14, 7  ;;  %v2424_v5 = vshll.u32 %v13964_v7, 16  ;;  %v14040_v1 = vld [vmem:[#allocation2 + $0x98] sm:$0xf] }
 0x113   : > { %v2396_v38 = vsel %vm13511_vm11, %v10605_v11, %v2395_v58  ;;  %v10586_v40 = vcombine.low %v2007_v29, %v2017_v22  ;;  %v14000_v0 = vcombine.low %v2031_v15, %v2041_v57  ;;  %v14002_v51 = vrot.slane %v2434_v50, 7  ;;  %v2343_v11 = vld [vmem:[#allocation2 + $0x40] sm:$0x8]  ;;  %v14051_v30 = vld [vmem:[#allocation2 + $0xa4] sm:$0xf] }
 0x114   : > { %v2437_v42 = vshll.u32 %v13967_v47, 16  ;;  %v14006_v33 = vcombine.low %v2396_v38, %v2405_v39  ;;  %v14008_v56 = vrot.slane %v2407_v43, 11  ;;  %v14011_v63 = vor.u32 %v2415_v3, %v13990_v9  ;;  %v14053_v21 = vld [vmem:[#allocation2 + $0xa8] sm:$0xf]  ;;  %v14055_v49 = vld [vmem:[#allocation2 + $0xb4] sm:$0xf] }
 0x115   : > { %v11295_v37 = vpack.c.bf16 %v481_v17, %v481_v17  ;;  %v2419_v46 = vrot.slane %v13990_v9, 4  ;;  %v14018_v2 = vrot.slane %v2429_v4, 11  ;;  %v2445_v55 = vrot.slane %v2443_v26, 7  ;;  %v14057_v28 = vld [vmem:[#allocation2 + $0xb8] sm:$0xf] }
 0x116   : > { %v2446_v6 = vshll.u32 %v13976_v19, 16  ;;  %v2426_v54 = vor.u32 %v2424_v5, %v2423_v48  ;;  %v11296_v24 = vpack.c.bf16 %v482_v34, %v482_v34  ;;  %v2439_v45 = vor.u32 %v2437_v42, %v14002_v51  ;;  %v14059_v14 = vld [vmem:[#allocation2 + $0xc4] sm:$0xf]  ;;  %v14064_v22 = vld [vmem:[#allocation2 + $0xc8] sm:$0xf] }
 0x117   : > { %11726 = vmatmul.mubr.msk.bf16.gmra.mrb[20].mxu0 %vm776_vm7, %v10583_v16  ;;  %v14027_v16 = vld [vmem:[#allocation2 + $0x68] sm:$0xf]  ;;  %643 = vst.msk [vmem:[#allocation2 + $0x104] sm:$0xf] %vm612_vm8, %v11295_v37  ;;  %v2441_v8 = vrot.slane %v14002_v51, 4  ;;  %v2456_v58 = vshrl.u32 %v14013_v20, 16  ;;  %v2418_v42 = vsel %vm13511_vm11, %v14008_v56, %v14011_v63 }
 0x118   : > { %11729 = vmatprep.mubr.msk.bf16.mxu0 %vm776_vm7, %v10584_v60  ;;  %v14036_v60 = vld [vmem:[#allocation2 + $0x88] sm:$0xf]  ;;  %v2465_v29 = vshrl.u32 %v14015_v25, 16  ;;  %v14066_v43 = vld [vmem:[#allocation2 + $0xd4] sm:$0xf]  ;;  %v2448_v3 = vor.u32 %v2446_v6, %v2445_v55  ;;  %v2478_v48 = vshrl.u32 %v14021_v36, 16  ;;  %v2440_v56 = vsel %vm13511_vm11, %v14018_v2, %v2439_v45 }
 0x119   : > { %644 = vst.msk [vmem:[#allocation2 + $0x108] sm:$0xf] %vm612_vm8, %v11296_v24  ;;  %v14075_v38 = vld [vmem:[#allocation2 + $0xd8] sm:$0xf]  ;;  %v14077_v39 = vld [vmem:[#allocation2 + $0xe4] sm:$0xf] }
 0x11a   : > { %v14079_v4 = vld [vmem:[#allocation2 + $0xe8] sm:$0xf]  ;;  %v14088_v5 = vld [vmem:[#allocation2 + $0xf4] sm:$0xf]  ;;  %v2346_v37 = vld [vmem:[#allocation2 + $0x50] sm:$0x8]  ;;  %v2449_v63 = vsel %vm13511_vm11, %v2441_v8, %v2448_v3 }
 0x11b   : > { %v2487_v55 = vshrl.u32 %v14023_v10, 16  ;;  %v2451_v51 = vshrl.u32 %v2343_v11, 16  ;;  %v2458_v17 = vrot.slane %v2456_v58, 7  ;;  %v2459_v34 = vshll.u32 %v14013_v20, 16  ;;  %v2349_v2 = vld [vmem:[#allocation2 + $0x60] sm:$0x8] }
 0x11c   : > { %v2467_v26 = vrot.slane %v2465_v29, 7  ;;  %v2468_v57 = vshll.u32 %v14015_v25, 16  ;;  %v2473_v24 = vshrl.u32 %v2346_v37, 16  ;;  %v2480_v6 = vrot.slane %v2478_v48, 7 }
 0x11d   : > { %v2481_v15 = vshll.u32 %v14021_v36, 16  ;;  %v2490_v9 = vshll.u32 %v14023_v10, 16  ;;  %v10608_v58 = vrot.slane %v2451_v51, 11  ;;  %v2461_v29 = vor.u32 %v2459_v34, %v2458_v17 }
 0x11e   : > { %v14126_v11 = vld [vmem:[#allocation2 + $0x104] sm:$0xf]  ;;  %v2470_v48 = vor.u32 %v2468_v57, %v2467_v26  ;;  %v10623_v50 = vcombine.low %v2440_v56, %v2449_v63  ;;  %v2500_v45 = vshrl.u32 %v14025_v52, 16  ;;  %v2509_v8 = vshrl.u32 %v14027_v16, 16 }
 0x11f   : > { %11730 = vmatmul.mubr.msk.bf16.gmra.mrb[24].mxu0 %vm776_vm7, %v10585_v41  ;;  %v2427_v41 = vsel %vm13511_vm11, %v2419_v46, %v2426_v54  ;;  %v10609_v3 = vrot.slane %v2473_v24, 11  ;;  %v2485_v18 = vrot.slane %v2480_v6, 4  ;;  %v3159_v27 = vsel %vm825_vm6, %v13865_v62, 0 }
 0x120   : > { %11733 = vmatprep.mubr.msk.bf16.mxu0 %vm776_vm7, %v10586_v40  ;;  %v14090_v40 = vld [vmem:[#allocation2 + $0xf8] sm:$0xf]  ;;  %v14128_v46 = vld [vmem:[#allocation2 + $0x108] sm:$0xf]  ;;  %v10622_v37 = vcombine.low %v2418_v42, %v2427_v41  ;;  %v2522_v51 = vshrl.u32 %v14030_v23, 16  ;;  %v2462_v57 = vsel %vm13511_vm11, %v10608_v58, %v2461_v29  ;;  %v2495_v41 = vshrl.u32 %v2349_v2, 16 }
 0x121   : > { %v2502_v62 = vrot.slane %v2500_v45, 7  ;;  %v2503_v42 = vshll.u32 %v14025_v52, 16  ;;  %v2511_v34 = vrot.slane %v2509_v8, 7  ;;  %v2517_v63 = vshrl.u32 %v2352_v12, 16  ;;  %v2358_v8 = vld [vmem:[#allocation2 + $0x90] sm:$0x8] }
 0x122   : > { %v2534_v29 = vshll.u32 %v14032_v59, 16 }
 0x123   : > { %v2505_v2 = vor.u32 %v2503_v42, %v2502_v62  ;;  %v2507_v45 = vrot.slane %v2502_v62, 4 }
 0x127   : > { %11734 = vmatmul.mubr.msk.bf16.gmra.mrb[28].mxu0 %vm776_vm7, %v14000_v0  ;;  %v2489_v0 = vrot.slane %v2487_v55, 7  ;;  %v2483_v55 = vor.u32 %v2481_v15, %v2480_v6  ;;  %v14145_v15 = vld [vmem:[%s16090_s1 + $0xa] sm:$0x3]  ;;  %v2512_v6 = vshll.u32 %v14027_v16, 16 }
 0x128   : > { %11739 = vmatprep.mubr.msk.bf16.mxu0 %vm776_vm7, %v14006_v33  ;;  %v2463_v33 = vrot.slane %v2458_v17, 4  ;;  %v2531_v17 = vshrl.u32 %v14032_v59, 16  ;;  %v2547_v59 = vshll.u32 %v14034_v44, 16 }
 0x129   : > { %v2492_v61 = vor.u32 %v2490_v9, %v2489_v0  ;;  %v2484_v24 = vsel %vm13511_vm11, %v10609_v3, %v2483_v55  ;;  %v2524_v0 = vrot.slane %v2522_v51, 7  ;;  %v2525_v9 = vshll.u32 %v14030_v23, 16 }
 0x12a   : > { %v2471_v26 = vsel %vm13511_vm11, %v2463_v33, %v2470_v48  ;;  %v2533_v58 = vrot.slane %v2531_v17, 7  ;;  %v2553_v48 = vshrl.u32 %v14036_v60, 16  ;;  %v2566_v3 = vshrl.u32 %v14038_v32, 16 }
 0x12b   : > { %v2493_v56 = vsel %vm13511_vm11, %v2485_v18, %v2492_v61  ;;  %v10624_v33 = vcombine.low %v2462_v57, %v2471_v26  ;;  %v2514_v61 = vor.u32 %v2512_v6, %v2511_v34  ;;  %v10611_v18 = vrot.slane %v2517_v63, 11 }
 0x12c   : > { %v10625_v12 = vcombine.low %v2484_v24, %v2493_v56  ;;  %v2575_v55 = vshrl.u32 %v14040_v1, 16  ;;  %v2527_v51 = vor.u32 %v2525_v9, %v2524_v0  ;;  %v2529_v17 = vrot.slane %v2524_v0, 4 }
 0x12d   : > { %v2536_v54 = vor.u32 %v2534_v29, %v2533_v58  ;;  %v2555_v23 = vrot.slane %v2553_v48, 7  ;;  %v2515_v42 = vsel %vm13511_vm11, %v2507_v45, %v2514_v61  ;;  %v2561_v34 = vshrl.u32 %v2358_v8, 16 }
 0x12e   : > { %v2568_v6 = vrot.slane %v2566_v3, 7  ;;  %v2569_v24 = vshll.u32 %v14038_v32, 16  ;;  %v2577_v56 = vrot.slane %v2575_v55, 7  ;;  %v2578_v63 = vshll.u32 %v14040_v1, 16  ;;  %v2364_v55 = vld [vmem:[#allocation2 + $0xb0] sm:$0x8] }
 0x12f   : > { %11740 = vmatmul.mubr.msk.bf16.vlgmr.msra.gmra.mrb[0].mxu0 %vm776_vm7, %v10622_v37  ;;  %v10610_v37 = vrot.slane %v2495_v41, 11  ;;  %v2556_v41 = vshll.u32 %v14036_v60, 16  ;;  %v2528_v0 = vsel %vm13511_vm11, %v10611_v18, %v2527_v51  ;;  %v2537_v9 = vsel %vm13511_vm11, %v2529_v17, %v2536_v54 }
 0x130   : > { %11772 = vmatpush3.bf16.msra.mxu0 %v3159_v27  ;;  %11743 = vmatprep.mubr.msk.bf16.mxu0 %vm776_vm7, %v10623_v50  ;;  %v2355_v27 = vld [vmem:[#allocation2 + $0x80] sm:$0x8]  ;;  %v2544_v50 = vshrl.u32 %v14034_v44, 16  ;;  %v10613_v48 = vrot.slane %v2561_v34, 11  ;;  %v2597_v45 = vshrl.u32 %v14053_v21, 16  ;;  %v10627_v61 = vcombine.low %v2528_v0, %v2537_v9 }
 0x131   : > { %12764 = vmatprep.subr.msk.bf16.mxu0 %vm825_vm6, %v14145_v15  ;;  %v2539_v57 = vshrl.u32 %v2355_v27, 16  ;;  %v2506_v62 = vsel %vm13511_vm11, %v10610_v37, %v2505_v2  ;;  %v2558_v27 = vor.u32 %v2556_v41, %v2555_v23  ;;  %v2361_v37 = vld [vmem:[#allocation2 + $0xa0] sm:$0x8]  ;;  %v2588_v2 = vshrl.u32 %v14051_v30, 16 }
 0x132   : > { %v2546_v26 = vrot.slane %v2544_v50, 7  ;;  %v10626_v50 = vcombine.low %v2506_v62, %v2515_v42  ;;  %v2573_v8 = vrot.slane %v2568_v6, 4  ;;  %v2580_v3 = vor.u32 %v2578_v63, %v2577_v56  ;;  %v2367_v9 = vld [vmem:[#allocation2 + $0xc0] sm:$0x8] }
 0x133   : > { %v10612_v58 = vrot.slane %v2539_v57, 11  ;;  %v2610_v18 = vshrl.u32 %v14055_v49, 16  ;;  %v2619_v54 = vshrl.u32 %v14057_v28, 16  ;;  %v2583_v51 = vshrl.u32 %v2361_v37, 16 }
 0x134   : > { %v2549_v29 = vor.u32 %v2547_v59, %v2546_v26  ;;  %v2590_v17 = vrot.slane %v2588_v2, 7  ;;  %v2591_v57 = vshll.u32 %v14051_v30, 16  ;;  %v2600_v41 = vshll.u32 %v14053_v21, 16 }
 0x135   : > { %v2581_v42 = vsel %vm13511_vm11, %v2573_v8, %v2580_v3  ;;  %v2605_v34 = vshrl.u32 %v2364_v55, 16  ;;  %v2621_v56 = vrot.slane %v2619_v54, 7  ;;  %v2622_v63 = vshll.u32 %v14057_v28, 16 }
 0x136   : > { %v2550_v59 = vsel %vm13511_vm11, %v10612_v58, %v2549_v29  ;;  %v2632_v58 = vshrl.u32 %v14059_v14, 16  ;;  %v2641_v29 = vshrl.u32 %v14064_v22, 16 }
 0x137   : > { %11744 = vmatmul.mubr.msk.bf16.gmra.mrb[4].mxu0 %vm776_vm7, %v10624_v33  ;;  %v2551_v33 = vrot.slane %v2546_v26, 4  ;;  %v2599_v26 = vrot.slane %v2597_v45, 7  ;;  %v10615_v2 = vrot.slane %v2605_v34, 11  ;;  %v2370_v45 = vld [vmem:[#allocation2 + $0xd0] sm:$0x8]  ;;  %v2624_v55 = vor.u32 %v2622_v63, %v2621_v56 }
 0x138   : > { %11747 = vmatprep.mubr.msk.bf16.mxu0 %vm776_vm7, %v10625_v12  ;;  %v2571_v12 = vor.u32 %v2569_v24, %v2568_v6  ;;  %v2612_v6 = vrot.slane %v2610_v18, 7  ;;  %v2613_v24 = vshll.u32 %v14055_v49, 16  ;;  %v2627_v18 = vshrl.u32 %v2367_v9, 16 }
 0x139   : > { %v2559_v23 = vsel %vm13511_vm11, %v2551_v33, %v2558_v27  ;;  %v10614_v33 = vrot.slane %v2583_v51, 11  ;;  %v2593_v27 = vor.u32 %v2591_v57, %v2590_v17  ;;  %v2634_v54 = vrot.slane %v2632_v58, 7 }
 0x13a   : > { %v2572_v62 = vsel %vm13511_vm11, %v10613_v48, %v2571_v12  ;;  %v10628_v0 = vcombine.low %v2550_v59, %v2559_v23  ;;  %v2602_v48 = vor.u32 %v2600_v41, %v2599_v26  ;;  %v2663_v12 = vshrl.u32 %v14075_v38, 16 }
 0x13b   : > { %v10629_v37 = vcombine.low %v2572_v62, %v2581_v42  ;;  %v2615_v8 = vor.u32 %v2613_v24, %v2612_v6  ;;  %v2617_v3 = vrot.slane %v2612_v6, 4  ;;  %v2635_v59 = vshll.u32 %v14059_v14, 16 }
 0x13c   : > { %v2643_v23 = vrot.slane %v2641_v29, 7  ;;  %v2644_v51 = vshll.u32 %v14064_v22, 16  ;;  %v2649_v26 = vshrl.u32 %v2370_v45, 16  ;;  %v2657_v62 = vshll.u32 %v14066_v43, 16 }
 0x13d   : > { %v2665_v42 = vrot.slane %v2663_v12, 7  ;;  %v2666_v34 = vshll.u32 %v14075_v38, 16  ;;  %v2616_v6 = vsel %vm13511_vm11, %v10615_v2, %v2615_v8  ;;  %v2625_v24 = vsel %vm13511_vm11, %v2617_v3, %v2624_v55  ;;  %v2376_v12 = vld [vmem:[#allocation2 + $0xf0] sm:$0x8] }
 0x13e   : > { %v10616_v56 = vrot.slane %v2627_v18, 11  ;;  %v2637_v63 = vor.u32 %v2635_v59, %v2634_v54  ;;  %v2646_v9 = vor.u32 %v2644_v51, %v2643_v23  ;;  %v10617_v29 = vrot.slane %v2649_v26, 11 }
 0x13f   : > { %11748 = vmatmul.mubr.msk.bf16.gmra.mrb[8].mxu0 %vm776_vm7, %v10626_v50  ;;  %v2595_v50 = vrot.slane %v2590_v17, 4  ;;  %v2594_v17 = vsel %vm13511_vm11, %v10614_v33, %v2593_v27  ;;  %v2373_v33 = vld [vmem:[#allocation2 + $0xe0] sm:$0x8]  ;;  %v2676_v27 = vshrl.u32 %v14077_v39, 16  ;;  %v2698_v2 = vshrl.u32 %v14088_v5, 16 }
 0x140   : > { %11751 = vmatprep.mubr.msk.bf16.mxu0 %vm776_vm7, %v10627_v61  ;;  %v2654_v61 = vshrl.u32 %v14066_v43, 16  ;;  %v2707_v8 = vshrl.u32 %v14090_v40, 16  ;;  %v2638_v3 = vsel %vm13511_vm11, %v10616_v56, %v2637_v63  ;;  %v2671_v18 = vshrl.u32 %v2373_v33, 16 }
 0x141   : > { %v2603_v57 = vsel %vm13511_vm11, %v2595_v50, %v2602_v48  ;;  %v2685_v50 = vshrl.u32 %v14079_v4, 16  ;;  %v10631_v48 = vcombine.low %v2616_v6, %v2625_v24  ;;  %v2679_v59 = vshll.u32 %v14077_v39, 16 }
 0x142   : > { %v2656_v41 = vrot.slane %v2654_v61, 7  ;;  %v10630_v58 = vcombine.low %v2594_v17, %v2603_v57  ;;  %v2668_v61 = vor.u32 %v2666_v34, %v2665_v42  ;;  %v2688_v51 = vshll.u32 %v14079_v4, 16 }
 0x143   : > { %v2687_v23 = vrot.slane %v2685_v50, 7  ;;  %v2693_v26 = vshrl.u32 %v2376_v12, 16  ;;  %v2709_v42 = vrot.slane %v2707_v8, 7  ;;  %v2710_v34 = vshll.u32 %v14090_v40, 16 }
 0x144   : > { %v2661_v45 = vrot.slane %v2656_v41, 4  ;;  %v10618_v24 = vrot.slane %v2671_v18, 11  ;;  %v2720_v33 = vshrl.u32 %v14126_v11, 16  ;;  %v2723_v8 = vshll.u32 %v14126_v11, 16 }
 0x146   : > { %v2669_v57 = vsel %vm13511_vm11, %v2661_v45, %v2668_v61 }
 0x147   : > { %11752 = vmatmul.mubr.msk.bf16.gmra.mrb[12].mxu0 %vm776_vm7, %v10628_v0  ;;  %v2639_v0 = vrot.slane %v2634_v54, 4  ;;  %v2678_v54 = vrot.slane %v2676_v27, 7  ;;  %v10619_v27 = vrot.slane %v2693_v26, 11 }
 0x148   : > { %11755 = vmatprep.mubr.msk.bf16.mxu0 %vm776_vm7, %v10629_v37  ;;  %v2659_v37 = vor.u32 %v2657_v62, %v2656_v41  ;;  %v2700_v41 = vrot.slane %v2698_v2, 7  ;;  %v2701_v62 = vshll.u32 %v14088_v5, 16  ;;  %v2722_v2 = vrot.slane %v2720_v33, 7  ;;  %v3357_v33 = vld [vmem:[#allocation2 + $0x24] sm:$0xf] }
 0x149   : > { %v2647_v55 = vsel %vm13511_vm11, %v2639_v0, %v2646_v9  ;;  %v2681_v56 = vor.u32 %v2679_v59, %v2678_v54  ;;  %v2683_v63 = vrot.slane %v2678_v54, 4  ;;  %v2690_v0 = vor.u32 %v2688_v51, %v2687_v23 }
 0x14a   : > { %v2660_v17 = vsel %vm13511_vm11, %v10617_v29, %v2659_v37  ;;  %v10632_v6 = vcombine.low %v2638_v3, %v2647_v55  ;;  %v2729_v29 = vshrl.u32 %v14128_v46, 16  ;;  %v2703_v50 = vor.u32 %v2701_v62, %v2700_v41 }
 0x14b   : > { %v10633_v9 = vcombine.low %v2660_v17, %v2669_v57  ;;  %v2712_v37 = vor.u32 %v2710_v34, %v2709_v42  ;;  %v2682_v45 = vsel %vm13511_vm11, %v10618_v24, %v2681_v56  ;;  %v2691_v61 = vsel %vm13511_vm11, %v2683_v63, %v2690_v0  ;;  %v14261_v24 = vld [vmem:[%s16090_s1 + $0xc] sm:$0x3]  ;;  %v3355_v0 = vld [vmem:[#allocation2 + $0x18] sm:$0xf] }
 0x14c   : > { %v2731_v3 = vrot.slane %v2729_v29, 7  ;;  %v2732_v55 = vshll.u32 %v14128_v46, 16  ;;  %v2704_v18 = vsel %vm13511_vm11, %v10619_v27, %v2703_v50  ;;  %v10634_v59 = vcombine.low %v2682_v45, %v2691_v61  ;;  %v3356_v27 = vld [vmem:[#allocation2 + $0x1c] sm:$0x1] }
 0x14d   : > { %v2725_v17 = vor.u32 %v2723_v8, %v2722_v2  ;;  %v2727_v57 = vrot.slane %v2722_v2, 4  ;;  %v16121_v34 = vcombine.low %v13931_v35, %v13935_v31  ;;  %v16122_v56 = vcombine.low %v13962_v53, %v13964_v7  ;;  %v16127_v7 = vld [vmem:[#allocation5_spill] sm:$0xff] }
 0x14e   : > { %v2734_v26 = vor.u32 %v2732_v55, %v2731_v3  ;;  %v16123_v63 = vcombine.low %v13967_v47, %v13976_v19  ;;  %v16124_v35 = vcombine.low %v14013_v20, %v14015_v25  ;;  %v16125_v31 = vcombine.low %v14021_v36, %v14023_v10  ;;  %v16128_v47 = vld [vmem:[#allocation6_spill] sm:$0xff] }
 0x14f   : > { %11756 = vmatmul.mubr.msk.bf16.gmra.mrb[16].mxu0 %vm776_vm7, %v10630_v58  ;;  %v2379_v58 = vld [vmem:[#allocation2 + $0x100] sm:$0x8]  ;;  %v16126_v53 = vcombine.low %v14025_v52, %v14027_v16  ;;  %v16129_v19 = vcombine.low %v16127_v7, %v16128_v47  ;;  %v16130_v36 = vcombine.low %v14034_v44, %v14036_v60  ;;  %v16131_v10 = vcombine.low %v14038_v32, %v14040_v1  ;;  %v3358_v52 = vld [vmem:[#allocation2 + $0x28] sm:$0xf]  ;;  %v3359_v1 = vld [vmem:[#allocation2 + $0x2c] sm:$0x1] }
 0x150   : > { %11759 = vmatprep.mubr.msk.bf16.mxu0 %vm776_vm7, %v10631_v48  ;;  %v2705_v48 = vrot.slane %v2700_v41, 4  ;;  %v2715_v12 = vshrl.u32 %v2379_v58, 16  ;;  %v2735_v62 = vsel %vm13511_vm11, %v2727_v57, %v2734_v26  ;;  %v3418_v58 = vshrl.u32 %v3355_v0, 16  ;;  %v3366_v7 = vld [vmem:[#allocation2 + $0x54] sm:$0xf] }
 0x151   : > { %v3429_v29 = vshrl.u32 %v3357_v33, 16  ;;  %v3432_v45 = vshll.u32 %v3357_v33, 16  ;;  %v3438_v61 = vshll.u32 %v3358_v52, 16  ;;  %v3424_v2 = vshll.u32 %v3356_v27, 16 }
 0x152   : > { %v2713_v54 = vsel %vm13511_vm11, %v2705_v48, %v2712_v37  ;;  %v10620_v23 = vrot.slane %v2715_v12, 11  ;;  %v3420_v37 = vrot.slane %v3418_v58, 4  ;;  %v3442_v12 = vshrl.u32 %v3358_v52, 16 }
 0x153   : > { %v10635_v51 = vcombine.low %v2704_v18, %v2713_v54  ;;  %v3431_v60 = vrot.slane %v3429_v29, 4  ;;  %v3434_v3 = vrot.slane %v3432_v45, 5  ;;  %v16132_v32 = vcombine.low %v14051_v30, %v14053_v21  ;;  %v3365_v45 = vld [vmem:[#allocation2 + $0x4c] sm:$0x1] }
 0x154   : > { %v2726_v41 = vsel %vm13511_vm11, %v10620_v23, %v2725_v17  ;;  %v14301_v55 = vrot.slane %v3438_v61, 5  ;;  %v3444_v18 = vrot.slane %v3442_v12, 4  ;;  %v16133_v54 = vcombine.low %v14055_v49, %v14057_v28  ;;  %v3369_v61 = vld [vmem:[#allocation2 + $0x64] sm:$0xf] }
 0x155   : > { %v10636_v42 = vcombine.low %v2726_v41, %v2735_v62  ;;  %v3426_v23 = vrot.slane %v3424_v2, 5  ;;  %v3435_v26 = vor.u32 %v3434_v3, %v3431_v60  ;;  %v3448_v41 = vshll.u32 %v3359_v1, 16  ;;  %v3363_v62 = vld [vmem:[#allocation2 + $0x44] sm:$0xf]  ;;  %v3370_v60 = vld [vmem:[#allocation2 + $0x68] sm:$0xf] }
 0x156   : > { %v3445_v30 = vor.u32 %v3444_v18, %v14301_v55  ;;  %v16135_v47 = vcombine.low %v14059_v14, %v14064_v22  ;;  %v3501_v22 = vshrl.u32 %v3366_v7, 16  ;;  %v3372_v3 = vld [vmem:[#allocation2 + $0x74] sm:$0xf] }
 0x157   : > { %11760 = vmatmul.mubr.msk.bf16.gmra.mrb[20].mxu0 %vm776_vm7, %v10632_v6  ;;  %v3885_v6 = vsel %vm825_vm6, %v14145_v15, 0  ;;  %v3354_v15 = vld [vmem:[#allocation2 + $0x14] sm:$0xf] }
 0x158   : > { %11763 = vmatprep.mubr.msk.bf16.mxu0 %vm776_vm7, %v10633_v9  ;;  %v3405_v20 = vshrl.u32 %v3354_v15, 16  ;;  %v3408_v25 = vshll.u32 %v3354_v15, 16  ;;  %v3414_v9 = vshll.u32 %v3355_v0, 16  ;;  %v3503_v18 = vrot.slane %v3501_v22, 4 }
 0x15a   : > { %v3407_v16 = vrot.slane %v3405_v20, 4  ;;  %v3410_v50 = vrot.slane %v3408_v25, 5  ;;  %v3416_v48 = vrot.slane %v3414_v9, 5  ;;  %v3477_v20 = vshrl.u32 %v3363_v62, 16  ;;  %v3367_v25 = vld [vmem:[#allocation2 + $0x58] sm:$0xf] }
 0x15b   : > { %v16136_v9 = vcombine.low %v14066_v43, %v14075_v38  ;;  %v3510_v27 = vshll.u32 %v3367_v25, 16 }
 0x15c   : > { %v3411_v8 = vor.u32 %v3410_v50, %v3407_v16  ;;  %v3421_v44 = vor.u32 %v3420_v37, %v3416_v48  ;;  %v3504_v16 = vshll.u32 %v3366_v7, 16  ;;  %v3514_v50 = vshrl.u32 %v3367_v25, 16 }
 0x15e   : > { %v3412_v17 = vrot.slane %v3411_v8, 4  ;;  %v3422_v57 = vrot.slane %v3421_v44, 4  ;;  %v3479_v8 = vrot.slane %v3477_v20, 4  ;;  %v3371_v20 = vld [vmem:[#allocation2 + $0x6c] sm:$0x1] }
 0x15f   : > { %11764 = vmatmul.mubr.msk.bf16.gmra.mrb[24].mxu0 %vm776_vm7, %v10634_v59  ;;  %v3360_v59 = vld [vmem:[#allocation2 + $0x34] sm:$0xf] }
 0x160   : > { %11767 = vmatprep.mubr.msk.bf16.mxu0 %vm776_vm7, %v10635_v51  ;;  %v3361_v51 = vld [vmem:[#allocation2 + $0x38] sm:$0xf]  ;;  %v3453_v21 = vshrl.u32 %v3360_v59, 16  ;;  %v3417_v49 = vsel %vm13783_vm14, %v3412_v17, %v3416_v48  ;;  %v3427_v28 = vsel %vm13783_vm14, %v3422_v57, %v3426_v23  ;;  %v14340_v48 = vsel %vm825_vm6, %v14261_v24, 0  ;;  %v3368_v23 = vld [vmem:[#allocation2 + $0x5c] sm:$0x1] }
 0x161   : > { %v14328_v29 = vcombine.low %v3417_v49, %v3427_v28  ;;  %v3525_v17 = vshrl.u32 %v3369_v61, 16  ;;  %v3528_v57 = vshll.u32 %v3369_v61, 16 }
 0x162   : > { %v3455_v15 = vrot.slane %v3453_v21, 4  ;;  %v3549_v21 = vshrl.u32 %v3372_v3, 16 }
 0x167   : > { %11768 = vmatmul.mubr.msk.bf16.gmra.mrb[28].mxu0 %vm776_vm7, %v10636_v42  ;;  %v3362_v42 = vld [vmem:[#allocation2 + $0x3c] sm:$0x1] }
 0x168   : > { %11773 = vmatprep.mubr.msk.bf16.mxu0 %vm776_vm7, %v16121_v34  ;;  %v3456_v34 = vshll.u32 %v3360_v59, 16  ;;  %v3472_v0 = vshll.u32 %v3362_v42, 16  ;;  %v3373_v59 = vld [vmem:[#allocation2 + $0x78] sm:$0xf]  ;;  %v16138_v42 = vcombine.low %v14088_v5, %v14090_v40  ;;  %v3551_v40 = vrot.slane %v3549_v21, 4 }
 0x169   : > { %v3562_v49 = vshrl.u32 %v3373_v59, 16 }
 0x16a   : > { %v3458_v58 = vrot.slane %v3456_v34, 5  ;;  %v14342_v37 = vrot.slane %v3472_v0, 5  ;;  %v3530_v0 = vrot.slane %v3528_v57, 5 }
 0x16c   : > { %v3459_v12 = vor.u32 %v3458_v58, %v3455_v15  ;;  %v3527_v15 = vrot.slane %v3525_v17, 4 }
 0x16e   : > { %v3460_v34 = vrot.slane %v3459_v12, 4 }
 0x16f   : > { %11774 = vmatmul.mubr.msk.bf16.vlgmr.msra.gmra.mrb[0].mxu0 %vm776_vm7, %v16122_v56  ;;  %v3466_v56 = vshrl.u32 %v3361_v51, 16 }
 0x170   : > { %11806 = vmatpush3.bf16.msra.mxu0 %v3885_v6  ;;  %11777 = vmatprep.mubr.msk.bf16.mxu0 %vm776_vm7, %v16123_v63  ;;  %v3462_v6 = vshll.u32 %v3361_v51, 16  ;;  %v3516_v51 = vrot.slane %v3514_v50, 4  ;;  %v14987_v63 = vld [vmem:[#allocation3 + $0x14] sm:$0xf] }
 0x171   : > { %12765 = vmatprep.subr.msk.bf16.mxu0 %vm825_vm6, %v14261_v24  ;;  %v14347_v24 = vrot.slane %v3510_v27, 5 }
 0x172   : > { %v14326_v33 = vrot.slane %v3462_v6, 5  ;;  %v3496_v6 = vshll.u32 %v3365_v45, 16  ;;  %v3375_v45 = vld [vmem:[#allocation2 + $0x84] sm:$0xf] }
 0x174   : > { %v3465_v58 = vsel %vm13783_vm14, %v3460_v34, %v14326_v33 }
 0x177   : > { %11778 = vmatmul.mubr.msk.bf16.gmra.mrb[4].mxu0 %vm776_vm7, %v16124_v35  ;;  %v14312_v35 = vrot.slane %v3435_v26, 4  ;;  %v16137_v26 = vcombine.low %v14077_v39, %v14079_v4  ;;  %v3520_v39 = vshll.u32 %v3368_v23, 16 }
 0x178   : > { %11781 = vmatprep.mubr.msk.bf16.mxu0 %vm776_vm7, %v16125_v31  ;;  %v14314_v31 = vrot.slane %v3448_v41, 5  ;;  %v3534_v41 = vshll.u32 %v3370_v60, 16 }
 0x179   : > { %v3441_v43 = vsel %vm13783_vm14, %v14312_v35, %v14301_v55  ;;  %v3522_v50 = vrot.slane %v3520_v39, 5  ;;  %v3378_v55 = vld [vmem:[#allocation2 + $0x94] sm:$0xf]  ;;  %v3379_v35 = vld [vmem:[#allocation2 + $0x98] sm:$0xf] }
 0x17a   : > { %v14359_v25 = vrot.slane %v3534_v41, 5  ;;  %v3606_v39 = vshll.u32 %v3379_v35, 16 }
 0x17f   : > { %11782 = vmatmul.mubr.msk.bf16.gmra.mrb[8].mxu0 %vm776_vm7, %v16126_v53  ;;  %v3364_v53 = vld [vmem:[#allocation2 + $0x48] sm:$0xf] }
 0x180   : > { %11785 = vmatprep.mubr.msk.bf16.mxu0 %vm776_vm7, %v16129_v19  ;;  %v14320_v19 = vrot.slane %v3445_v30, 4  ;;  %v3486_v52 = vshll.u32 %v3364_v53, 16  ;;  %v3490_v14 = vshrl.u32 %v3364_v53, 16  ;;  %v3538_v30 = vshrl.u32 %v3370_v60, 16 }
 0x181   : > { %v16139_v60 = vcombine.low %v14126_v11, %v14128_v46  ;;  %v3573_v11 = vshrl.u32 %v3375_v45, 16  ;;  %v3576_v46 = vshll.u32 %v3375_v45, 16 }
 0x182   : > { %v3451_v38 = vsel %vm13783_vm14, %v14320_v19, %v14314_v31  ;;  %v3492_v1 = vrot.slane %v3490_v14, 4  ;;  %v3540_v5 = vrot.slane %v3538_v30, 4  ;;  %v3564_v14 = vrot.slane %v3562_v49, 4  ;;  %v3382_v49 = vld [vmem:[#allocation2 + $0xa8] sm:$0xf] }
 0x183   : > { %v10688_v57 = vcombine.low %v3441_v43, %v3451_v38 }
 0x187   : > { %11786 = vmatmul.mubr.msk.bf16.gmra.mrb[12].mxu0 %vm776_vm7, %v16130_v36  ;;  %v3468_v36 = vrot.slane %v3466_v56, 4  ;;  %v3558_v56 = vshll.u32 %v3373_v59, 16  ;;  %v14380_v59 = vld [vmem:[#allocation2 + $0x38] sm:$0xf] }
 0x188   : > { %11789 = vmatprep.mubr.msk.bf16.mxu0 %vm776_vm7, %v16131_v10  ;;  %v3480_v10 = vshll.u32 %v3363_v62, 16  ;;  %v3552_v62 = vshll.u32 %v3372_v3, 16  ;;  %v3541_v3 = vor.u32 %v3540_v5, %v14359_v25  ;;  %v14428_v5 = vld [vmem:[#allocation2 + $0x44] sm:$0xf] }
 0x189   : > { %v3469_v2 = vor.u32 %v3468_v36, %v14326_v33  ;;  %v3498_v36 = vrot.slane %v3496_v6, 5  ;;  %v14371_v33 = vld [vmem:[#allocation2 + $0x28] sm:$0xf]  ;;  %v3578_v6 = vrot.slane %v3576_v46, 5 }
 0x18a   : > { %v3482_v44 = vrot.slane %v3480_v10, 5  ;;  %v3374_v10 = vld [vmem:[#allocation2 + $0x7c] sm:$0x1]  ;;  %v14413_v43 = vrot.slane %v3541_v3, 4 }
 0x18b   : > { %v3470_v4 = vrot.slane %v3469_v2, 4  ;;  %v3531_v2 = vor.u32 %v3530_v0, %v3527_v15  ;;  %v3380_v3 = vld [vmem:[#allocation2 + $0x9c] sm:$0x1] }
 0x18c   : > { %v3483_v28 = vor.u32 %v3482_v44, %v3479_v8  ;;  %v3544_v8 = vshll.u32 %v3371_v20, 16  ;;  %v14369_v44 = vld [vmem:[#allocation2 + $0x24] sm:$0xf]  ;;  %v14426_v20 = vld [vmem:[%s16090_s1 + $0xe] sm:$0x3] }
 0x18d   : > { %v3475_v61 = vsel %vm13783_vm14, %v3470_v4, %v14342_v37  ;;  %v10769_v37 = vcombine.low %v14369_v44, %v14371_v33  ;;  %v14409_v19 = vrot.slane %v3531_v2, 4  ;;  %v3610_v4 = vshrl.u32 %v3379_v35, 16 }
 0x18e   : > { %v3484_v22 = vrot.slane %v3483_v28, 4  ;;  %v14411_v21 = vrot.slane %v3544_v8, 5  ;;  %v14421_v28 = vld [vmem:[#allocation2 + $0x8c] sm:$0x1] }
 0x18f   : > { %11790 = vmatmul.mubr.msk.bf16.gmra.mrb[16].mxu0 %vm776_vm7, %v16132_v32  ;;  %v14345_v32 = vrot.slane %v3486_v52, 5  ;;  %v14364_v52 = vrot.slane %v3558_v56, 5 }
 0x190   : > { %11793 = vmatprep.mubr.msk.bf16.mxu0 %vm776_vm7, %v16133_v54  ;;  %v3506_v54 = vrot.slane %v3504_v16, 5 }
 0x191   : > { %v3493_v53 = vor.u32 %v3492_v1, %v14345_v32  ;;  %v3565_v23 = vor.u32 %v3564_v14, %v14364_v52  ;;  %v14441_v14 = vld [vmem:[#allocation2 + $0x54] sm:$0xf] }
 0x192   : > { %v3507_v7 = vor.u32 %v3506_v54, %v3503_v18  ;;  %v3568_v18 = vshll.u32 %v3374_v10, 16  ;;  %v14378_v54 = vld [vmem:[#allocation2 + $0x34] sm:$0xf]  ;;  %v14439_v10 = vld [vmem:[#allocation2 + $0x48] sm:$0xf] }
 0x193   : > { %v3494_v16 = vrot.slane %v3493_v53, 4  ;;  %v14419_v34 = vrot.slane %v3565_v23, 4  ;;  %v3597_v53 = vshrl.u32 %v3378_v55, 16  ;;  %v14456_v23 = vrot.slane %v3606_v39, 5 }
 0x194   : > { %v3508_v27 = vrot.slane %v3507_v7, 4  ;;  %v3600_v7 = vshll.u32 %v3378_v55, 16  ;;  %v16141_v13 = vcombine.low %v14428_v5, %v14439_v10 }
 0x195   : > { %v3499_v41 = vsel %vm13783_vm14, %v3494_v16, %v3498_v36  ;;  %v3547_v36 = vsel %vm13783_vm14, %v14413_v43, %v14411_v21  ;;  %v3630_v16 = vshll.u32 %v3382_v49, 16 }
 0x196   : > { %v3513_v30 = vsel %vm13783_vm14, %v3508_v27, %v14347_v24  ;;  %v3634_v27 = vshrl.u32 %v3382_v49, 16 }
 0x197   : > { %11794 = vmatmul.mubr.msk.bf16.gmra.mrb[20].mxu0 %vm776_vm7, %v16135_v47  ;;  %v3517_v47 = vor.u32 %v3516_v51, %v14347_v24  ;;  %v3376_v51 = vld [vmem:[#allocation2 + $0x88] sm:$0xf]  ;;  %v3575_v24 = vrot.slane %v3573_v11, 4 }
 0x198   : > { %11797 = vmatprep.mubr.msk.bf16.mxu0 %vm776_vm7, %v16136_v9  ;;  %v3554_v9 = vrot.slane %v3552_v62, 5  ;;  %v3582_v62 = vshll.u32 %v3376_v51, 16  ;;  %v3586_v56 = vshrl.u32 %v3376_v51, 16  ;;  %v3612_v51 = vrot.slane %v3610_v4, 4 }
 0x199   : > { %v3518_v12 = vrot.slane %v3517_v47, 4  ;;  %v3384_v47 = vld [vmem:[#allocation2 + $0xb4] sm:$0xf]  ;;  %v3579_v45 = vor.u32 %v3578_v6, %v3575_v24  ;;  %v3386_v24 = vld [vmem:[#allocation2 + $0xbc] sm:$0x1] }
 0x19a   : > { %v3555_v1 = vor.u32 %v3554_v9, %v3551_v40  ;;  %v3645_v2 = vshrl.u32 %v3384_v47, 16  ;;  %v3648_v8 = vshll.u32 %v3384_v47, 16  ;;  %v14471_v6 = vld [vmem:[#allocation2 + $0x64] sm:$0xf]  ;;  %v3613_v49 = vor.u32 %v3612_v51, %v14456_v23 }
 0x19b   : > { %v3523_v31 = vsel %vm13783_vm14, %v3518_v12, %v3522_v50  ;;  %v3385_v12 = vld [vmem:[#allocation2 + $0xb8] sm:$0xf] }
 0x19c   : > { %v14415_v38 = vrot.slane %v3555_v1, 4  ;;  %v10691_v9 = vcombine.low %v3513_v30, %v3523_v31  ;;  %v3599_v1 = vrot.slane %v3597_v53, 4  ;;  %v3658_v30 = vshrl.u32 %v3385_v12, 16 }
 0x19d   : > { %v14460_v31 = vrot.slane %v3579_v45, 4  ;;  %v3647_v21 = vrot.slane %v3645_v2, 4  ;;  %v3650_v55 = vrot.slane %v3648_v8, 5  ;;  %v3388_v2 = vld [vmem:[#allocation2 + $0xc8] sm:$0xf]  ;;  %v3614_v8 = vrot.slane %v3613_v49, 4 }
 0x19e   : > { %v3561_v35 = vsel %vm13783_vm14, %v14415_v38, %v14364_v52  ;;  %v14477_v52 = vld [vmem:[#allocation2 + $0x74] sm:$0xf]  ;;  %v14479_v38 = vld [vmem:[#allocation2 + $0x78] sm:$0xf]  ;;  %v3660_v39 = vrot.slane %v3658_v30, 4  ;;  %v3682_v30 = vshrl.u32 %v3388_v2, 16 }
 0x19f   : > { %11798 = vmatmul.mubr.msk.bf16.gmra.mrb[24].mxu0 %vm776_vm7, %v16137_v26  ;;  %v3489_v26 = vsel %vm13783_vm14, %v3484_v22, %v14345_v32  ;;  %v14417_v32 = vrot.slane %v3568_v18, 5  ;;  %v14443_v22 = vld [vmem:[#allocation2 + $0x58] sm:$0xf]  ;;  %v3602_v18 = vrot.slane %v3600_v7, 5 }
 0x1a0   : > { %11801 = vmatprep.mubr.msk.bf16.mxu0 %vm776_vm7, %v16138_v42  ;;  %v3381_v42 = vld [vmem:[#allocation2 + $0xa4] sm:$0xf]  ;;  %v10690_v40 = vcombine.low %v3489_v26, %v3499_v41  ;;  %v3636_v26 = vrot.slane %v3634_v27, 4  ;;  %v3654_v41 = vshll.u32 %v3385_v12, 16 }
 0x1a1   : > { %v3621_v15 = vshrl.u32 %v3381_v42, 16  ;;  %v3624_v0 = vshll.u32 %v3381_v42, 16  ;;  %v3571_v43 = vsel %vm13783_vm14, %v14419_v34, %v14417_v32  ;;  %v3603_v42 = vor.u32 %v3602_v18, %v3599_v1  ;;  %v3390_v18 = vld [vmem:[#allocation2 + $0xd4] sm:$0xf] }
 0x1a2   : > { %v14485_v7 = vrot.slane %v3654_v41, 5  ;;  %v3678_v41 = vshll.u32 %v3388_v2, 16  ;;  %v3393_v2 = vld [vmem:[#allocation2 + $0xe4] sm:$0xf] }
 0x1a3   : > { %v3623_v11 = vrot.slane %v3621_v15, 4  ;;  %v3626_v46 = vrot.slane %v3624_v0, 5  ;;  %v10693_v15 = vcombine.low %v3561_v35, %v3571_v43  ;;  %v3651_v0 = vor.u32 %v3650_v55, %v3647_v21  ;;  %v14499_v21 = vld [vmem:[#allocation2 + $0x84] sm:$0xf]  ;;  %v14501_v55 = vld [vmem:[#allocation2 + $0x88] sm:$0xf] }
 0x1a4   : > { %v3604_v12 = vrot.slane %v3603_v42, 4  ;;  %v14506_v42 = vld [vmem:[#allocation2 + $0x94] sm:$0xf] }
 0x1a7   : > { %11802 = vmatmul.mubr.msk.bf16.gmra.mrb[28].mxu0 %vm776_vm7, %v16139_v60  ;;  %v3592_v60 = vshll.u32 %v14421_v28, 16  ;;  %v3627_v28 = vor.u32 %v3626_v46, %v3623_v11  ;;  %v3391_v46 = vld [vmem:[#allocation2 + $0xd8] sm:$0xf] }
 0x1a8   : > { %11807 = vmatprep.mubr.msk.bf16.mxu0 %vm776_vm7, %v14328_v29  ;;  %v10689_v29 = vcombine.low %v3465_v58, %v3475_v61  ;;  %v3537_v58 = vsel %vm13783_vm14, %v14409_v19, %v14359_v25  ;;  %v14451_v61 = vrot.slane %v3582_v62, 5  ;;  %v3616_v19 = vshll.u32 %v3380_v3, 16 }
 0x1a9   : > { %v10692_v47 = vcombine.low %v3537_v58, %v3547_v36  ;;  %v3628_v3 = vrot.slane %v3627_v28, 4  ;;  %v3661_v58 = vor.u32 %v3660_v39, %v14485_v7  ;;  %v3702_v43 = vshll.u32 %v3391_v46, 16  ;;  %v3389_v39 = vld [vmem:[#allocation2 + $0xcc] sm:$0x1] }
 0x1aa   : > { %v3585_v27 = vsel %vm13783_vm14, %v14460_v31, %v14451_v61  ;;  %v3693_v31 = vshrl.u32 %v3390_v18, 16 }
 0x1ab   : > { %v3662_v49 = vrot.slane %v3661_v58, 4  ;;  %v3394_v58 = vld [vmem:[#allocation2 + $0xe8] sm:$0xf] }
 0x1af   : > { %11808 = vmatmul.mubr.msk.bf16.vlgmr.msra.gmra.mrb[0].mxu0 %vm776_vm7, %v10688_v57  ;;  %v3383_v57 = vld [vmem:[#allocation2 + $0xac] sm:$0x1] }
 0x1b0   : > { %11840 = vmatpush3.bf16.msra.mxu0 %v14340_v48  ;;  %11811 = vmatprep.mubr.msk.bf16.mxu0 %vm776_vm7, %v10689_v29  ;;  %v3588_v48 = vrot.slane %v3586_v56, 4  ;;  %v14458_v29 = vrot.slane %v3630_v16, 5  ;;  %v14473_v56 = vld [vmem:[#allocation2 + $0x68] sm:$0xf]  ;;  %v3640_v53 = vshll.u32 %v3383_v57, 16  ;;  %v3652_v57 = vrot.slane %v3651_v0, 4 }
 0x1b1   : > { %12766 = vmatprep.subr.msk.bf16.mxu0 %vm825_vm6, %v14426_v20  ;;  %v3387_v16 = vld [vmem:[#allocation2 + $0xc4] sm:$0xf]  ;;  %v3684_v0 = vrot.slane %v3682_v30, 4 }
 0x1b2   : > { %v3589_v62 = vor.u32 %v3588_v48, %v14451_v61  ;;  %v3637_v34 = vor.u32 %v3636_v26, %v14458_v29  ;;  %v3618_v48 = vrot.slane %v3616_v19, 5  ;;  %v3642_v1 = vrot.slane %v3640_v53, 5 }
 0x1b3   : > { %v3669_v36 = vshrl.u32 %v3387_v16, 16  ;;  %v3672_v11 = vshll.u32 %v3387_v16, 16  ;;  %v3696_v19 = vshll.u32 %v3390_v18, 16 }
 0x1b4   : > { %v3590_v45 = vrot.slane %v3589_v62, 4  ;;  %v3638_v51 = vrot.slane %v3637_v34, 4  ;;  %v3619_v35 = vsel %vm13783_vm14, %v3614_v8, %v3618_v48  ;;  %v3706_v62 = vshrl.u32 %v3391_v46, 16  ;;  %v3400_v34 = vld [vmem:[#allocation2 + $0x108] sm:$0xf] }
 0x1b5   : > { %v3671_v28 = vrot.slane %v3669_v36, 4  ;;  %v3674_v53 = vrot.slane %v3672_v11, 5  ;;  %v14522_v48 = vrot.slane %v3702_v43, 5  ;;  %v3688_v46 = vshll.u32 %v3389_v39, 16  ;;  %v14532_v43 = vld [vmem:[#allocation2 + $0xa8] sm:$0xf] }
 0x1b6   : > { %v3643_v8 = vsel %vm13783_vm14, %v3638_v51, %v3642_v1  ;;  %v3708_v18 = vrot.slane %v3706_v62, 4  ;;  %v3397_v1 = vld [vmem:[#allocation2 + $0xf8] sm:$0xf]  ;;  %v14536_v62 = vld [vmem:[#allocation2 + $0xb4] sm:$0xf] }
 0x1b7   : > { %11812 = vmatmul.mubr.msk.bf16.gmra.mrb[4].mxu0 %vm776_vm7, %v10690_v40  ;;  %v3664_v40 = vshll.u32 %v3386_v24, 16  ;;  %v14508_v24 = vld [vmem:[#allocation2 + $0x98] sm:$0xf]  ;;  %v3675_v11 = vor.u32 %v3674_v53, %v3671_v28  ;;  %v3750_v39 = vshll.u32 %v3397_v1, 16 }
 0x1b8   : > { %11815 = vmatprep.mubr.msk.bf16.mxu0 %vm776_vm7, %v10691_v9  ;;  %v3594_v9 = vrot.slane %v3592_v60, 5  ;;  %v3609_v60 = vsel %vm13783_vm14, %v3604_v12, %v14456_v23  ;;  %v3698_v12 = vrot.slane %v3696_v19, 5  ;;  %v3730_v19 = vshrl.u32 %v3394_v58, 16  ;;  %v3395_v23 = vld [vmem:[#allocation2 + $0xec] sm:$0x1] }
 0x1b9   : > { %v3666_v26 = vrot.slane %v3664_v40, 5  ;;  %v10695_v16 = vcombine.low %v3609_v60, %v3619_v35  ;;  %v14530_v35 = vld [vmem:[#allocation2 + $0xa4] sm:$0xf]  ;;  %v14547_v4 = vrot.slane %v3750_v39, 5  ;;  %v14561_v39 = vld [vmem:[#allocation2 + $0xd4] sm:$0xf] }
 0x1ba   : > { %v3595_v61 = vsel %vm13783_vm14, %v3590_v45, %v3594_v9  ;;  %v3392_v45 = vld [vmem:[#allocation2 + $0xdc] sm:$0x1]  ;;  %v3695_v9 = vrot.slane %v3693_v31, 4  ;;  %v3726_v31 = vshll.u32 %v3394_v58, 16 }
 0x1bb   : > { %v10694_v40 = vcombine.low %v3585_v27, %v3595_v61  ;;  %v3657_v27 = vsel %vm13783_vm14, %v3652_v57, %v14485_v7  ;;  %v3667_v36 = vsel %vm13783_vm14, %v3662_v49, %v3666_v26  ;;  %v3720_v61 = vshll.u32 %v3393_v2, 16  ;;  %v14538_v49 = vld [vmem:[#allocation2 + $0xb8] sm:$0xf] }
 0x1bc   : > { %v3699_v60 = vor.u32 %v3698_v12, %v3695_v9  ;;  %v3709_v7 = vor.u32 %v3708_v18, %v14522_v48  ;;  %v10697_v53 = vcombine.low %v3657_v27, %v3667_v36  ;;  %v3690_v12 = vrot.slane %v3688_v46, 5 }
 0x1bd   : > { %v3722_v58 = vrot.slane %v3720_v61, 5 }
 0x1be   : > { %v3710_v28 = vrot.slane %v3709_v7, 4 }
 0x1bf   : > { %11816 = vmatmul.mubr.msk.bf16.gmra.mrb[8].mxu0 %vm776_vm7, %v10692_v47  ;;  %v14515_v47 = vrot.slane %v3678_v41, 5  ;;  %v3396_v41 = vld [vmem:[#allocation2 + $0xf4] sm:$0xf] }
 0x1c0   : > { %11819 = vmatprep.mubr.msk.bf16.mxu0 %vm776_vm7, %v10693_v15  ;;  %v3633_v15 = vsel %vm13783_vm14, %v3628_v3, %v14458_v29  ;;  %v3712_v29 = vshll.u32 %v3392_v45, 16  ;;  %v3717_v3 = vshrl.u32 %v3393_v2, 16  ;;  %v3741_v57 = vshrl.u32 %v3396_v41, 16 }
 0x1c1   : > { %v3685_v30 = vor.u32 %v3684_v0, %v14515_v47  ;;  %v10696_v51 = vcombine.low %v3633_v15, %v3643_v8  ;;  %v3744_v26 = vshll.u32 %v3396_v41, 16  ;;  %v3754_v0 = vshrl.u32 %v3397_v1, 16  ;;  %v3399_v15 = vld [vmem:[#allocation2 + $0x104] sm:$0xf]  ;;  %v3398_v1 = vld [vmem:[#allocation2 + $0xfc] sm:$0x1] }
 0x1c2   : > { %v3714_v2 = vrot.slane %v3712_v29, 5  ;;  %v3700_v8 = vrot.slane %v3699_v60, 4  ;;  %v3719_v18 = vrot.slane %v3717_v3, 4  ;;  %v14545_v41 = vrot.slane %v3726_v31, 5 }
 0x1c3   : > { %v3686_v9 = vrot.slane %v3685_v30, 4  ;;  %v3743_v27 = vrot.slane %v3741_v57, 4  ;;  %v3746_v36 = vrot.slane %v3744_v26, 5  ;;  %v3756_v45 = vrot.slane %v3754_v0, 4 }
 0x1c4   : > { %v3768_v30 = vshll.u32 %v3399_v15, 16  ;;  %v3774_v29 = vshll.u32 %v3400_v34, 16  ;;  %v3778_v3 = vshrl.u32 %v3400_v34, 16  ;;  %v3705_v60 = vsel %vm13783_vm14, %v3700_v8, %v14522_v48  ;;  %v14563_v34 = vld [vmem:[#allocation2 + $0xd8] sm:$0xf] }
 0x1c5   : > { %v3691_v61 = vsel %vm13783_vm14, %v3686_v9, %v3690_v12  ;;  %v3723_v31 = vor.u32 %v3722_v58, %v3719_v18  ;;  %v3715_v7 = vsel %vm13783_vm14, %v3710_v28, %v3714_v2  ;;  %v3747_v26 = vor.u32 %v3746_v36, %v3743_v27  ;;  %v4081_v8 = vld [vmem:[#allocation2 + $0x20] sm:$0x8] }
 0x1c6   : > { %v3757_v0 = vor.u32 %v3756_v45, %v14547_v4  ;;  %v14569_v9 = vrot.slane %v3774_v29, 5  ;;  %v3780_v28 = vrot.slane %v3778_v3, 4  ;;  %v4137_v12 = vshrl.u32 %v14369_v44, 16 }
 0x1c7   : > { %11820 = vmatmul.mubr.msk.bf16.gmra.mrb[12].mxu0 %vm776_vm7, %v10694_v40  ;;  %v3676_v40 = vrot.slane %v3675_v11, 4  ;;  %v3765_v11 = vshrl.u32 %v3399_v15, 16  ;;  %v3724_v15 = vrot.slane %v3723_v31, 4  ;;  %v4146_v18 = vshrl.u32 %v14371_v33, 16 }
 0x1c8   : > { %11823 = vmatprep.mubr.msk.bf16.mxu0 %vm776_vm7, %v10695_v16  ;;  %v3732_v16 = vrot.slane %v3730_v19, 4  ;;  %v3736_v19 = vshll.u32 %v3395_v23, 16  ;;  %v10699_v58 = vcombine.low %v3705_v60, %v3715_v7  ;;  %v3748_v45 = vrot.slane %v3747_v26, 4  ;;  %v14587_v7 = vld [vmem:[#allocation2 + $0xf8] sm:$0xf] }
 0x1c9   : > { %v3681_v46 = vsel %vm13783_vm14, %v3676_v40, %v14515_v47  ;;  %v3760_v47 = vshll.u32 %v3398_v1, 16  ;;  %v3767_v48 = vrot.slane %v3765_v11, 4  ;;  %v3770_v40 = vrot.slane %v3768_v30, 5 }
 0x1ca   : > { %v3733_v57 = vor.u32 %v3732_v16, %v14545_v41  ;;  %v10698_v2 = vcombine.low %v3681_v46, %v3691_v61  ;;  %v3738_v16 = vrot.slane %v3736_v19, 5  ;;  %v3758_v27 = vrot.slane %v3757_v0, 4  ;;  %v14585_v19 = vld [vmem:[#allocation2 + $0xf4] sm:$0xf] }
 0x1cb   : > { %v3762_v36 = vrot.slane %v3760_v47, 5  ;;  %v3771_v1 = vor.u32 %v3770_v40, %v3767_v48  ;;  %v3781_v30 = vor.u32 %v3780_v28, %v14569_v9  ;;  %v4132_v29 = vshrl.u32 %v4081_v8, 16  ;;  %v4087_v8 = vld [vmem:[#allocation2 + $0x40] sm:$0x8] }
 0x1cc   : > { %v4139_v23 = vrot.slane %v4137_v12, 7  ;;  %v4140_v3 = vshll.u32 %v14369_v44, 16  ;;  %v4148_v32 = vrot.slane %v4146_v18, 7  ;;  %v4149_v46 = vshll.u32 %v14371_v33, 16 }
 0x1cd   : > { %v3729_v61 = vsel %vm13783_vm14, %v3724_v15, %v14545_v41  ;;  %v3753_v31 = vsel %vm13783_vm14, %v3748_v45, %v14547_v4  ;;  %v3772_v26 = vrot.slane %v3771_v1, 4  ;;  %v3782_v0 = vrot.slane %v3781_v30, 4 }
 0x1ce   : > { %v10720_v48 = vrot.slane %v4132_v29, 11  ;;  %v4142_v40 = vor.u32 %v4140_v3, %v4139_v23  ;;  %v4159_v4 = vshrl.u32 %v14378_v54, 16  ;;  %v4144_v28 = vrot.slane %v4139_v23, 4 }
 0x1cf   : > { %11824 = vmatmul.mubr.msk.bf16.gmra.mrb[16].mxu0 %vm776_vm7, %v10696_v51  ;;  %v3401_v51 = vld [vmem:[#allocation2 + $0x10c] sm:$0x1]  ;;  %v4151_v12 = vor.u32 %v4149_v46, %v4148_v32  ;;  %v4181_v18 = vshrl.u32 %v14428_v5, 16  ;;  %v4190_v45 = vshrl.u32 %v14439_v10, 16  ;;  %v4171_v30 = vshll.u32 %v14380_v59, 16 }
 0x1d0   : > { %11827 = vmatprep.mubr.msk.bf16.mxu0 %vm776_vm7, %v10697_v53  ;;  %v3734_v53 = vrot.slane %v3733_v57, 4  ;;  %v3784_v11 = vshll.u32 %v3401_v51, 16  ;;  %v3763_v57 = vsel %vm13783_vm14, %v3758_v27, %v3762_v36  ;;  %v4084_v51 = vld [vmem:[#allocation2 + $0x30] sm:$0x8]  ;;  %v4143_v32 = vsel %vm13511_vm11, %v10720_v48, %v4142_v40 }
 0x1d1   : > { %v4161_v23 = vrot.slane %v4159_v4, 7  ;;  %v4162_v36 = vshll.u32 %v14378_v54, 16  ;;  %v4152_v1 = vsel %vm13511_vm11, %v4144_v28, %v4151_v12  ;;  %v4176_v29 = vshrl.u32 %v4087_v8, 16  ;;  %v4093_v12 = vld [vmem:[#allocation2 + $0x60] sm:$0x8] }
 0x1d2   : > { %v3739_v60 = vsel %vm13783_vm14, %v3734_v53, %v3738_v16  ;;  %v3786_v47 = vrot.slane %v3784_v11, 5  ;;  %v3777_v53 = vsel %vm13783_vm14, %v3772_v26, %v14569_v9  ;;  %v4154_v16 = vshrl.u32 %v4084_v51, 16 }
 0x1d3   : > { %v10700_v15 = vcombine.low %v3729_v61, %v3739_v60  ;;  %v4183_v9 = vrot.slane %v4181_v18, 7  ;;  %v4184_v3 = vshll.u32 %v14428_v5, 16  ;;  %v4192_v46 = vrot.slane %v4190_v45, 7  ;;  %v4090_v60 = vld [vmem:[#allocation2 + $0x50] sm:$0x8] }
 0x1d4   : > { %v3787_v27 = vsel %vm13783_vm14, %v3782_v0, %v3786_v47  ;;  %v4193_v61 = vshll.u32 %v14439_v10, 16  ;;  %v10736_v47 = vcombine.low %v4143_v32, %v4152_v1  ;;  %v10721_v0 = vrot.slane %v4154_v16, 11  ;;  %v5101_v5 = vld [vmem:[#allocation2 + $0x24] sm:$0xf]  ;;  %v5102_v10 = vld [vmem:[#allocation2 + $0x28] sm:$0xf] }
 0x1d5   : > { %v10702_v26 = vcombine.low %v3777_v53, %v3787_v27  ;;  %v4225_v48 = vshrl.u32 %v14471_v6, 16  ;;  %v4164_v40 = vor.u32 %v4162_v36, %v4161_v23  ;;  %v4166_v51 = vrot.slane %v4161_v23, 4 }
 0x1d6   : > { %v10722_v28 = vrot.slane %v4176_v29, 11  ;;  %v4198_v8 = vshrl.u32 %v4090_v60, 16  ;;  %v4234_v18 = vshrl.u32 %v14473_v56, 16  ;;  %v4206_v41 = vshll.u32 %v14441_v14, 16 }
 0x1d7   : > { %11828 = vmatmul.mubr.msk.bf16.gmra.mrb[20].mxu0 %vm776_vm7, %v10698_v2  ;;  %v4168_v2 = vshrl.u32 %v14380_v59, 16  ;;  %v4215_v53 = vshll.u32 %v14443_v22, 16  ;;  %v4220_v16 = vshrl.u32 %v4093_v12, 16  ;;  %v4227_v27 = vrot.slane %v4225_v48, 7 }
 0x1d8   : > { %11831 = vmatprep.mubr.msk.bf16.mxu0 %vm776_vm7, %v10699_v58  ;;  %v10701_v58 = vcombine.low %v3753_v31, %v3763_v57  ;;  %v4203_v31 = vshrl.u32 %v14441_v14, 16  ;;  %v4212_v57 = vshrl.u32 %v14443_v22, 16  ;;  %v4228_v32 = vshll.u32 %v14471_v6, 16 }
 0x1d9   : > { %v4170_v11 = vrot.slane %v4168_v2, 7  ;;  %v4186_v2 = vor.u32 %v4184_v3, %v4183_v9  ;;  %v4165_v23 = vsel %vm13511_vm11, %v10721_v0, %v4164_v40  ;;  %v10723_v1 = vrot.slane %v4198_v8, 11 }
 0x1da   : > { %v4205_v45 = vrot.slane %v4203_v31, 7  ;;  %v4214_v50 = vrot.slane %v4212_v57, 7  ;;  %v10724_v60 = vrot.slane %v4220_v16, 11  ;;  %v4230_v31 = vor.u32 %v4228_v32, %v4227_v27  ;;  %v4096_v57 = vld [vmem:[#allocation2 + $0x70] sm:$0x8] }
 0x1db   : > { %v4173_v4 = vor.u32 %v4171_v30, %v4170_v11  ;;  %v4236_v11 = vrot.slane %v4234_v18, 7  ;;  %v4237_v30 = vshll.u32 %v14473_v56, 16  ;;  %v4187_v29 = vsel %vm13511_vm11, %v10722_v28, %v4186_v2 }
 0x1dc   : > { %v4208_v3 = vor.u32 %v4206_v41, %v4205_v45  ;;  %v4256_v48 = vshrl.u32 %v14479_v38, 16  ;;  %v4232_v40 = vrot.slane %v4227_v27, 4  ;;  %v4278_v28 = vshrl.u32 %v14501_v55, 16  ;;  %v14649_v27 = vld [vmem:[%s16090_s1 + $0x10] sm:$0x3] }
 0x1dd   : > { %v4174_v36 = vsel %vm13511_vm11, %v4166_v51, %v4173_v4  ;;  %v4239_v51 = vor.u32 %v4237_v30, %v4236_v11  ;;  %v4269_v4 = vshrl.u32 %v14499_v21, 16  ;;  %v4906_v41 = vsel %vm825_vm6, %v14426_v20, 0  ;;  %v4102_v11 = vld [vmem:[#allocation2 + $0x90] sm:$0x8] }
 0x1de   : > { %v10737_v0 = vcombine.low %v4165_v23, %v4174_v36  ;;  %v4242_v2 = vshrl.u32 %v4096_v57, 16  ;;  %v4231_v8 = vsel %vm13511_vm11, %v10724_v60, %v4230_v31  ;;  %v4272_v20 = vshll.u32 %v14499_v21, 16 }
 0x1df   : > { %11832 = vmatmul.mubr.msk.bf16.gmra.mrb[24].mxu0 %vm776_vm7, %v10700_v15  ;;  %v4188_v15 = vrot.slane %v4183_v9, 4  ;;  %v4240_v32 = vsel %vm13511_vm11, %v4232_v40, %v4239_v51  ;;  %v4271_v23 = vrot.slane %v4269_v4, 7  ;;  %v4280_v36 = vrot.slane %v4278_v28, 7 }
 0x1e0   : > { %11835 = vmatprep.mubr.msk.bf16.mxu0 %vm776_vm7, %v10701_v58  ;;  %v4195_v58 = vor.u32 %v4193_v61, %v4192_v46  ;;  %v4210_v46 = vrot.slane %v4205_v45, 4  ;;  %v4217_v61 = vor.u32 %v4215_v53, %v4214_v50  ;;  %v4209_v50 = vsel %vm13511_vm11, %v10723_v1, %v4208_v3 }
 0x1e1   : > { %v4258_v45 = vrot.slane %v4256_v48, 7  ;;  %v4259_v53 = vshll.u32 %v14479_v38, 16  ;;  %v4281_v1 = vshll.u32 %v14501_v55, 16  ;;  %v4291_v30 = vshrl.u32 %v14506_v42, 16 }
 0x1e2   : > { %v4196_v9 = vsel %vm13511_vm11, %v4188_v15, %v4195_v58  ;;  %v4218_v15 = vsel %vm13511_vm11, %v4210_v46, %v4217_v61  ;;  %v4250_v58 = vshll.u32 %v14477_v52, 16  ;;  %v10725_v3 = vrot.slane %v4242_v2, 11 }
 0x1e3   : > { %v10738_v12 = vcombine.low %v4187_v29, %v4196_v9  ;;  %v4300_v29 = vshrl.u32 %v14508_v24, 16  ;;  %v10739_v9 = vcombine.low %v4209_v50, %v4218_v15  ;;  %v10740_v61 = vcombine.low %v4231_v8, %v4240_v32 }
 0x1e4   : > { %v4261_v31 = vor.u32 %v4259_v53, %v4258_v45  ;;  %v4283_v48 = vor.u32 %v4281_v1, %v4280_v36  ;;  %v4286_v40 = vshrl.u32 %v4102_v11, 16  ;;  %v4293_v51 = vrot.slane %v4291_v30, 7  ;;  %v14677_v36 = vld [vmem:[#allocation2 + $0xc8] sm:$0xf] }
 0x1e5   : > { %v4302_v4 = vrot.slane %v4300_v29, 7  ;;  %v4303_v28 = vshll.u32 %v14508_v24, 16  ;;  %v4322_v50 = vshrl.u32 %v14532_v43, 16  ;;  %v4316_v32 = vshll.u32 %v14530_v35, 16  ;;  %v4108_v29 = vld [vmem:[#allocation2 + $0xb0] sm:$0x8] }
 0x1e6   : > { %v4325_v30 = vshll.u32 %v14532_v43, 16  ;;  %v16143_v44 = vcombine.low %v14471_v6, %v14473_v56  ;;  %v16144_v33 = vcombine.low %v14477_v52, %v14479_v38  ;;  %v5155_v6 = vshll.u32 %v5101_v5, 16  ;;  %v5104_v56 = vld [vmem:[#allocation2 + $0x34] sm:$0xf] }
 0x1e7   : > { %11836 = vmatmul.mubr.msk.bf16.gmra.mrb[28].mxu0 %vm776_vm7, %v10702_v26  ;;  %v4247_v26 = vshrl.u32 %v14477_v52, 16  ;;  %v4324_v11 = vrot.slane %v4322_v50, 7  ;;  %v4347_v50 = vshll.u32 %v14538_v49, 16  ;;  %v5161_v52 = vshll.u32 %v5102_v10, 16 }
 0x1e8   : > { %11841 = vmatprep.mubr.msk.bf16.mxu0 %vm776_vm7, %v10736_v47  ;;  %v4099_v47 = vld [vmem:[#allocation2 + $0x80] sm:$0x8]  ;;  %v5165_v38 = vshrl.u32 %v5102_v10, 16 }
 0x1e9   : > { %v4249_v18 = vrot.slane %v4247_v26, 7  ;;  %v4264_v16 = vshrl.u32 %v4099_v47, 16  ;;  %v4274_v26 = vor.u32 %v4272_v20, %v4271_v23  ;;  %v4294_v47 = vshll.u32 %v14506_v42, 16 }
 0x1ea   : > { %v4305_v20 = vor.u32 %v4303_v28, %v4302_v4  ;;  %v4327_v28 = vor.u32 %v4325_v30, %v4324_v11  ;;  %v14700_v11 = vld [vmem:[#allocation2 + $0xe8] sm:$0xf] }
 0x1eb   : > { %v4252_v46 = vor.u32 %v4250_v58, %v4249_v18  ;;  %v4254_v60 = vrot.slane %v4249_v18, 4  ;;  %v10726_v57 = vrot.slane %v4264_v16, 11  ;;  %v10727_v58 = vrot.slane %v4286_v40, 11 }
 0x1ec   : > { %v4296_v53 = vor.u32 %v4294_v47, %v4293_v51  ;;  %v4298_v16 = vrot.slane %v4293_v51, 4  ;;  %v4330_v40 = vshrl.u32 %v4108_v29, 16  ;;  %v4338_v51 = vshll.u32 %v14536_v62, 16 }
 0x1ed   : > { %v4253_v2 = vsel %vm13511_vm11, %v10725_v3, %v4252_v46  ;;  %v4262_v15 = vsel %vm13511_vm11, %v4254_v60, %v4261_v31  ;;  %v4275_v8 = vsel %vm13511_vm11, %v10726_v57, %v4274_v26  ;;  %v4344_v46 = vshrl.u32 %v14538_v49, 16  ;;  %v4111_v31 = vld [vmem:[#allocation2 + $0xc0] sm:$0x8] }
 0x1ee   : > { %v10741_v3 = vcombine.low %v4253_v2, %v4262_v15  ;;  %v4366_v26 = vshrl.u32 %v14677_v36, 16  ;;  %v4352_v2 = vshrl.u32 %v4111_v31, 16 }
 0x1ef   : > { %11842 = vmatmul.mubr.msk.bf16.vlgmr.msra.gmra.mrb[0].mxu0 %vm776_vm7, %v10737_v0  ;;  %v4276_v0 = vrot.slane %v4271_v23, 4  ;;  %v14675_v23 = vld [vmem:[#allocation2 + $0xc4] sm:$0xf] }
 0x1f0   : > { %11874 = vmatpush3.bf16.msra.mxu0 %v4906_v41  ;;  %11845 = vmatprep.mubr.msk.bf16.mxu0 %vm776_vm7, %v10738_v12  ;;  %v4105_v41 = vld [vmem:[#allocation2 + $0xa0] sm:$0x8]  ;;  %v4313_v12 = vshrl.u32 %v14530_v35, 16  ;;  %v4357_v57 = vshrl.u32 %v14675_v23, 16 }
 0x1f1   : > { %12767 = vmatprep.subr.msk.bf16.mxu0 %vm825_vm6, %v14649_v27  ;;  %v4284_v18 = vsel %vm13511_vm11, %v4276_v0, %v4283_v48  ;;  %v4308_v45 = vshrl.u32 %v4105_v41, 16  ;;  %v4297_v0 = vsel %vm13511_vm11, %v10727_v58, %v4296_v53  ;;  %v4306_v48 = vsel %vm13511_vm11, %v4298_v16, %v4305_v20 }
 0x1f2   : > { %v4315_v1 = vrot.slane %v4313_v12, 7  ;;  %v4346_v12 = vrot.slane %v4344_v46, 7  ;;  %v4359_v15 = vrot.slane %v4357_v57, 7  ;;  %v4369_v58 = vshll.u32 %v14677_v36, 16 }
 0x1f3   : > { %v10728_v60 = vrot.slane %v4308_v45, 11  ;;  %v10743_v45 = vcombine.low %v4297_v0, %v4306_v48  ;;  %v10729_v20 = vrot.slane %v4330_v40, 11  ;;  %v4388_v46 = vshrl.u32 %v14563_v34, 16  ;;  %v4117_v0 = vld [vmem:[#allocation2 + $0xe0] sm:$0x8] }
 0x1f4   : > { %v4318_v47 = vor.u32 %v4316_v32, %v4315_v1  ;;  %v4320_v4 = vrot.slane %v4315_v1, 4  ;;  %v14698_v1 = vld [vmem:[#allocation2 + $0xe4] sm:$0xf]  ;;  %v4349_v29 = vor.u32 %v4347_v50, %v4346_v12  ;;  %v4364_v57 = vrot.slane %v4359_v15, 4 }
 0x1f5   : > { %v4401_v48 = vshrl.u32 %v14698_v1, 16  ;;  %v4410_v40 = vshrl.u32 %v14700_v11, 16  ;;  %v4391_v12 = vshll.u32 %v14563_v34, 16 }
 0x1f6   : > { %v4319_v53 = vsel %vm13511_vm11, %v10728_v60, %v4318_v47  ;;  %v4328_v16 = vsel %vm13511_vm11, %v4320_v4, %v4327_v28  ;;  %v4382_v28 = vshll.u32 %v14561_v39, 16 }
 0x1f7   : > { %11846 = vmatmul.mubr.msk.bf16.gmra.mrb[4].mxu0 %vm776_vm7, %v10739_v9  ;;  %v4335_v9 = vshrl.u32 %v14536_v62, 16 }
 0x1f8   : > { %11849 = vmatprep.mubr.msk.bf16.mxu0 %vm776_vm7, %v10740_v61  ;;  %v10742_v61 = vcombine.low %v4275_v8, %v4284_v18  ;;  %v4360_v8 = vshll.u32 %v14675_v23, 16  ;;  %v4368_v18 = vrot.slane %v4366_v26, 7  ;;  %v10744_v26 = vcombine.low %v4319_v53, %v4328_v16 }
 0x1f9   : > { %v4337_v41 = vrot.slane %v4335_v9, 7  ;;  %v4114_v9 = vld [vmem:[#allocation2 + $0xd0] sm:$0x8]  ;;  %v4412_v53 = vrot.slane %v4410_v40, 7  ;;  %v4413_v16 = vshll.u32 %v14700_v11, 16 }
 0x1fa   : > { %v4362_v31 = vor.u32 %v4360_v8, %v4359_v15  ;;  %v4371_v60 = vor.u32 %v4369_v58, %v4368_v18  ;;  %v4374_v47 = vshrl.u32 %v4114_v9, 16  ;;  %v4396_v8 = vshrl.u32 %v4117_v0, 16  ;;  %v4123_v40 = vld [vmem:[#allocation2 + $0x100] sm:$0x8] }
 0x1fb   : > { %v4340_v32 = vor.u32 %v4338_v51, %v4337_v41  ;;  %v4342_v30 = vrot.slane %v4337_v41, 4  ;;  %v4390_v41 = vrot.slane %v4388_v46, 7  ;;  %v4403_v18 = vrot.slane %v4401_v48, 7 }
 0x1fc   : > { %v4372_v15 = vsel %vm13511_vm11, %v4364_v57, %v4371_v60  ;;  %v4404_v58 = vshll.u32 %v14698_v1, 16  ;;  %v4432_v57 = vshrl.u32 %v14587_v7, 16  ;;  %v10732_v60 = vrot.slane %v4396_v8, 11 }
 0x1fd   : > { %v4341_v51 = vsel %vm13511_vm11, %v10729_v20, %v4340_v32  ;;  %v4350_v50 = vsel %vm13511_vm11, %v4342_v30, %v4349_v29  ;;  %v10731_v20 = vrot.slane %v4374_v47, 11  ;;  %v4393_v9 = vor.u32 %v4391_v12, %v4390_v41  ;;  %v14720_v30 = vld [vmem:[#allocation2 + $0x104] sm:$0xf]  ;;  %v14722_v29 = vld [vmem:[#allocation2 + $0x108] sm:$0xf] }
 0x1fe   : > { %v4408_v0 = vrot.slane %v4403_v18, 4  ;;  %v4415_v48 = vor.u32 %v4413_v16, %v4412_v53  ;;  %v4445_v47 = vshrl.u32 %v14720_v30, 16  ;;  %v14740_v53 = vld [vmem:[#allocation2 + $0x114] sm:$0xf] }
 0x1ff   : > { %11850 = vmatmul.mubr.msk.bf16.gmra.mrb[8].mxu0 %vm776_vm7, %v10741_v3  ;;  %v4379_v3 = vshrl.u32 %v14561_v39, 16 }
 0x200   : > { %11853 = vmatprep.mubr.msk.bf16.mxu0 %vm776_vm7, %v10742_v61  ;;  %v10730_v61 = vrot.slane %v4352_v2, 11  ;;  %v4447_v16 = vrot.slane %v4445_v47, 7 }
 0x201   : > { %v4381_v4 = vrot.slane %v4379_v3, 7  ;;  %v10745_v3 = vcombine.low %v4341_v51, %v4350_v50  ;;  %v4426_v50 = vshll.u32 %v14585_v19, 16 }
 0x202   : > { %v4363_v2 = vsel %vm13511_vm11, %v10730_v61, %v4362_v31  ;;  %v4120_v61 = vld [vmem:[#allocation2 + $0xf0] sm:$0x8]  ;;  %v4423_v31 = vshrl.u32 %v14585_v19, 16  ;;  %v4452_v25 = vrot.slane %v4447_v16, 4 }
 0x203   : > { %v4386_v32 = vrot.slane %v4381_v4, 4  ;;  %v10746_v46 = vcombine.low %v4363_v2, %v4372_v15  ;;  %v4418_v41 = vshrl.u32 %v4120_v61, 16  ;;  %v4434_v2 = vrot.slane %v4432_v57, 7 }
 0x204   : > { %v4425_v12 = vrot.slane %v4423_v31, 7  ;;  %v4435_v15 = vshll.u32 %v14587_v7, 16 }
 0x205   : > { %v4394_v51 = vsel %vm13511_vm11, %v4386_v32, %v4393_v9  ;;  %v4457_v32 = vshll.u32 %v14722_v29, 16  ;;  %v14744_v9 = vld [vmem:[#allocation2 + $0x118] sm:$0xf]  ;;  %v10733_v61 = vrot.slane %v4418_v41, 11 }
 0x206   : > { %v4430_v31 = vrot.slane %v4425_v12, 4  ;;  %v4437_v57 = vor.u32 %v4435_v15, %v4434_v2  ;;  %v4479_v2 = vshll.u32 %v14744_v9, 16 }
 0x207   : > { %11854 = vmatmul.mubr.msk.bf16.gmra.mrb[12].mxu0 %vm776_vm7, %v10743_v45  ;;  %v4384_v45 = vor.u32 %v4382_v28, %v4381_v4  ;;  %v4454_v4 = vshrl.u32 %v14722_v29, 16 }
 0x208   : > { %11857 = vmatprep.mubr.msk.bf16.mxu0 %vm776_vm7, %v10744_v26  ;;  %v4406_v26 = vor.u32 %v4404_v58, %v4403_v18  ;;  %v4416_v18 = vsel %vm13511_vm11, %v4408_v0, %v4415_v48  ;;  %v4440_v58 = vshrl.u32 %v4123_v40, 16  ;;  %v4467_v0 = vshrl.u32 %v14740_v53, 16 }
 0x209   : > { %v4385_v28 = vsel %vm13511_vm11, %v10731_v20, %v4384_v45  ;;  %v4448_v20 = vshll.u32 %v14720_v30, 16  ;;  %v4456_v45 = vrot.slane %v4454_v4, 7  ;;  %v4476_v48 = vshrl.u32 %v14744_v9, 16 }
 0x20a   : > { %v4407_v8 = vsel %vm13511_vm11, %v10732_v60, %v4406_v26  ;;  %v4126_v26 = vld [vmem:[#allocation2 + $0x110] sm:$0x8]  ;;  %v10734_v40 = vrot.slane %v4440_v58, 11  ;;  %v4469_v41 = vrot.slane %v4467_v0, 7 }
 0x20b   : > { %v10748_v60 = vcombine.low %v4407_v8, %v4416_v18  ;;  %v4450_v47 = vor.u32 %v4448_v20, %v4447_v16  ;;  %v4459_v17 = vor.u32 %v4457_v32, %v4456_v45 }
 0x20c   : > { %v4474_v45 = vrot.slane %v4469_v41, 4 }
 0x20d   : > { %v4451_v15 = vsel %vm13511_vm11, %v10734_v40, %v4450_v47  ;;  %v4460_v8 = vsel %vm13511_vm11, %v4452_v25, %v4459_v17  ;;  %v5632_v17 = vsel %vm825_vm6, %v14649_v27, 0  ;;  %v16140_v25 = vcombine.low %v14378_v54, %v14380_v59  ;;  %v5108_v40 = vld [vmem:[#allocation2 + $0x48] sm:$0xf] }
 0x20e   : > { %v10750_v16 = vcombine.low %v4451_v15, %v4460_v8  ;;  %v16145_v54 = vcombine.low %v14499_v21, %v14501_v55  ;;  %v16146_v59 = vcombine.low %v14506_v42, %v14508_v24  ;;  %v5105_v21 = vld [vmem:[#allocation2 + $0x38] sm:$0xf]  ;;  %v16148_v55 = vcombine.low %v14536_v62, %v14538_v49  ;;  %v5110_v8 = vld [vmem:[#allocation2 + $0x54] sm:$0xf] }
 0x20f   : > { %11858 = vmatmul.mubr.msk.bf16.gmra.mrb[16].mxu0 %vm776_vm7, %v10745_v3  ;;  %v10747_v3 = vcombine.low %v4385_v28, %v4394_v51  ;;  %v4438_v28 = vsel %vm13511_vm11, %v4430_v31, %v4437_v57  ;;  %v4462_v51 = vshrl.u32 %v4126_v26, 16  ;;  %v16142_v31 = vcombine.low %v14441_v14, %v14443_v22  ;;  %v5103_v26 = vld [vmem:[#allocation2 + $0x2c] sm:$0x1] }
 0x210   : > { %11861 = vmatprep.mubr.msk.bf16.mxu0 %vm776_vm7, %v10746_v46  ;;  %v4428_v46 = vor.u32 %v4426_v50, %v4425_v12  ;;  %v4470_v12 = vshll.u32 %v14740_v53, 16  ;;  %v4478_v50 = vrot.slane %v4476_v48, 7  ;;  %v10779_v14 = vcombine.low %v14675_v23, %v14677_v36 }
 0x211   : > { %v10735_v58 = vrot.slane %v4462_v51, 11  ;;  %v5152_v22 = vshrl.u32 %v5101_v5, 16  ;;  %v5176_v42 = vshrl.u32 %v5104_v56, 16  ;;  %v5179_v24 = vshll.u32 %v5104_v56, 16 }
 0x212   : > { %v4429_v4 = vsel %vm13511_vm11, %v10733_v61, %v4428_v46  ;;  %v4472_v20 = vor.u32 %v4470_v12, %v4469_v41  ;;  %v4481_v32 = vor.u32 %v4479_v2, %v4478_v50  ;;  %v14812_v27 = vrot.slane %v5161_v52, 5  ;;  %v5106_v41 = vld [vmem:[#allocation2 + $0x3c] sm:$0x1] }
 0x213   : > { %v10749_v18 = vcombine.low %v4429_v4, %v4438_v28  ;;  %v5167_v23 = vrot.slane %v5165_v38, 4  ;;  %v5185_v36 = vshll.u32 %v5105_v21, 16  ;;  %v5189_v57 = vshrl.u32 %v5105_v21, 16 }
 0x214   : > { %v4482_v61 = vsel %vm13511_vm11, %v4474_v45, %v4481_v32  ;;  %v5178_v0 = vrot.slane %v5176_v42, 4  ;;  %v5181_v48 = vrot.slane %v5179_v24, 5  ;;  %v10781_v62 = vcombine.low %v14698_v1, %v14700_v11 }
 0x215   : > { %v5168_v28 = vor.u32 %v5167_v23, %v14812_v27  ;;  %v5171_v51 = vshll.u32 %v5103_v26, 16  ;;  %v14817_v12 = vrot.slane %v5185_v36, 5  ;;  %v5191_v50 = vrot.slane %v5189_v57, 4  ;;  %v5112_v36 = vld [vmem:[#allocation2 + $0x5c] sm:$0x1] }
 0x216   : > { %v5209_v2 = vshll.u32 %v5108_v40, 16  ;;  %v5213_v15 = vshrl.u32 %v5108_v40, 16  ;;  %v10783_v1 = vcombine.low %v14720_v30, %v14722_v29  ;;  %v10784_v11 = vcombine.low %v14740_v53, %v14744_v9 }
 0x217   : > { %11862 = vmatmul.mubr.msk.bf16.gmra.mrb[20].mxu0 %vm776_vm7, %v10747_v3  ;;  %v4473_v3 = vsel %vm13511_vm11, %v10735_v58, %v4472_v20  ;;  %v5182_v58 = vor.u32 %v5181_v48, %v5178_v0  ;;  %v5195_v45 = vshll.u32 %v5106_v41, 16  ;;  %v16150_v23 = vcombine.low %v14585_v19, %v14587_v7  ;;  %v5115_v48 = vld [vmem:[#allocation2 + $0x6c] sm:$0x1] }
 0x218   : > { %11865 = vmatprep.mubr.msk.bf16.mxu0 %vm776_vm7, %v10748_v60  ;;  %v10751_v46 = vcombine.low %v4473_v3, %v4482_v61  ;;  %v5107_v60 = vld [vmem:[#allocation2 + $0x44] sm:$0xf]  ;;  %v14829_v30 = vrot.slane %v5209_v2, 5  ;;  %v5215_v29 = vrot.slane %v5213_v15, 4  ;;  %v5243_v15 = vshll.u32 %v5112_v36, 16 }
 0x219   : > { %v5200_v47 = vshrl.u32 %v5107_v60, 16  ;;  %v5203_v4 = vshll.u32 %v5107_v60, 16  ;;  %v5113_v61 = vld [vmem:[#allocation2 + $0x64] sm:$0xf]  ;;  %v14833_v5 = vrot.slane %v5195_v45, 5 }
 0x21b   : > { %v5202_v32 = vrot.slane %v5200_v47, 4  ;;  %v5205_v3 = vrot.slane %v5203_v4, 5 }
 0x21d   : > { %v5206_v10 = vor.u32 %v5205_v3, %v5202_v32 }
 0x21f   : > { %11866 = vmatmul.mubr.msk.bf16.gmra.mrb[24].mxu0 %vm776_vm7, %v10749_v18  ;;  %v16149_v18 = vcombine.low %v14561_v39, %v14563_v34  ;;  %v5192_v39 = vor.u32 %v5191_v50, %v14817_v12  ;;  %v5224_v34 = vshrl.u32 %v5110_v8, 16  ;;  %v5207_v0 = vrot.slane %v5206_v10, 4  ;;  %v5123_v10 = vld [vmem:[#allocation2 + $0x98] sm:$0xf] }
 0x220   : > { %11869 = vmatprep.mubr.msk.bf16.mxu0 %vm776_vm7, %v10750_v16  ;;  %v5111_v16 = vld [vmem:[#allocation2 + $0x58] sm:$0xf] }
 0x221   : > { %v14840_v38 = vrot.slane %v5192_v39, 4  ;;  %v5226_v42 = vrot.slane %v5224_v34, 4  ;;  %v5212_v34 = vsel %vm13783_vm14, %v5207_v0, %v14829_v30 }
 0x223   : > { %v5198_v39 = vsel %vm13783_vm14, %v14840_v38, %v14833_v5 }
 0x227   : > { %11870 = vmatmul.mubr.msk.bf16.gmra.mrb[28].mxu0 %vm776_vm7, %v10751_v46  ;;  %v5169_v46 = vrot.slane %v5168_v28, 4  ;;  %v5119_v28 = vld [vmem:[#allocation2 + $0x84] sm:$0xf] }
 0x228   : > { %11875 = vmatprep.mubr.msk.bf16.mxu0 %vm776_vm7, %v10769_v37  ;;  %v16147_v37 = vcombine.low %v14530_v35, %v14532_v43  ;;  %v5154_v35 = vrot.slane %v5152_v22, 4  ;;  %v5157_v43 = vrot.slane %v5155_v6, 5  ;;  %v5116_v6 = vld [vmem:[#allocation2 + $0x74] sm:$0xf]  ;;  %v5299_v45 = vshll.u32 %v5119_v28, 16 }
 0x229   : > { %v5272_v26 = vshrl.u32 %v5116_v6, 16 }
 0x22a   : > { %v5158_v49 = vor.u32 %v5157_v43, %v5154_v35  ;;  %v5117_v43 = vld [vmem:[#allocation2 + $0x78] sm:$0xf] }
 0x22b   : > { %v5281_v7 = vshll.u32 %v5117_v43, 16  ;;  %v5285_v4 = vshrl.u32 %v5117_v43, 16  ;;  %v5125_v43 = vld [vmem:[#allocation2 + $0xa4] sm:$0xf] }
 0x22c   : > { %v5159_v20 = vrot.slane %v5158_v49, 4  ;;  %v5275_v49 = vshll.u32 %v5116_v6, 16 }
 0x22e   : > { %v5164_v56 = vsel %vm13783_vm14, %v5159_v20, %v14812_v27  ;;  %v5296_v20 = vshrl.u32 %v5119_v28, 16  ;;  %v5129_v28 = vld [vmem:[#allocation2 + $0xb8] sm:$0xf] }
 0x22f   : > { %11876 = vmatmul.mubr.msk.bf16.vlgmr.msra.gmra.mrb[0].mxu0 %vm776_vm7, %v16140_v25  ;;  %v5114_v25 = vld [vmem:[#allocation2 + $0x68] sm:$0xf] }
 0x230   : > { %11908 = vmatpush3.bf16.msra.mxu0 %v5632_v17  ;;  %11879 = vmatprep.mubr.msk.bf16.mxu0 %vm776_vm7, %v16141_v13  ;;  %v5173_v17 = vrot.slane %v5171_v51, 5  ;;  %v5109_v13 = vld [vmem:[#allocation2 + $0x4c] sm:$0x1]  ;;  %v5261_v22 = vshrl.u32 %v5114_v25, 16  ;;  %v5120_v51 = vld [vmem:[#allocation2 + $0x88] sm:$0xf] }
 0x231   : > { %v5219_v21 = vshll.u32 %v5109_v13, 16  ;;  %v5305_v32 = vshll.u32 %v5120_v51, 16  ;;  %v5309_v3 = vshrl.u32 %v5120_v51, 16  ;;  %v5245_v13 = vrot.slane %v5243_v15, 5 }
 0x232   : > { %v5174_v52 = vsel %vm13783_vm14, %v5169_v46, %v5173_v17  ;;  %v14858_v46 = vrot.slane %v5281_v7, 5  ;;  %v5287_v17 = vrot.slane %v5285_v4, 4 }
 0x233   : > { %v10802_v47 = vcombine.low %v5164_v56, %v5174_v52  ;;  %v5221_v50 = vrot.slane %v5219_v21, 5  ;;  %v5311_v5 = vrot.slane %v5309_v3, 4 }
 0x234   : > { %v5288_v9 = vor.u32 %v5287_v17, %v14858_v46 }
 0x237   : > { %11880 = vmatmul.mubr.msk.bf16.gmra.mrb[4].mxu0 %vm776_vm7, %v16142_v31  ;;  %v5227_v31 = vshll.u32 %v5110_v8, 16 }
 0x238   : > { %11883 = vmatprep.mubr.msk.bf16.mxu0 %vm776_vm7, %v16143_v44  ;;  %v5233_v44 = vshll.u32 %v5111_v16, 16 }
 0x239   : > { %v5229_v24 = vrot.slane %v5227_v31, 5 }
 0x23a   : > { %v14843_v35 = vrot.slane %v5233_v44, 5 }
 0x23b   : > { %v5230_v2 = vor.u32 %v5229_v24, %v5226_v42  ;;  %v5329_v42 = vshll.u32 %v5123_v10, 16  ;;  %v5333_v24 = vshrl.u32 %v5123_v10, 16  ;;  %v5132_v10 = vld [vmem:[#allocation2 + $0xc8] sm:$0xf] }
 0x23f   : > { %11884 = vmatmul.mubr.msk.bf16.gmra.mrb[8].mxu0 %vm776_vm7, %v16144_v33  ;;  %v14831_v33 = vrot.slane %v5182_v58, 4  ;;  %v5274_v58 = vrot.slane %v5272_v26, 4 }
 0x240   : > { %11887 = vmatprep.mubr.msk.bf16.mxu0 %vm776_vm7, %v16145_v54  ;;  %v5237_v54 = vshrl.u32 %v5111_v16, 16  ;;  %v5118_v16 = vld [vmem:[#allocation2 + $0x7c] sm:$0x1] }
 0x241   : > { %v5188_v19 = vsel %vm13783_vm14, %v14831_v33, %v14817_v12  ;;  %v5291_v33 = vshll.u32 %v5118_v16, 16  ;;  %v5377_v16 = vshll.u32 %v5129_v28, 16 }
 0x242   : > { %v5239_v27 = vrot.slane %v5237_v54, 4  ;;  %v5122_v54 = vld [vmem:[#allocation2 + $0x94] sm:$0xf]  ;;  %v10803_v6 = vcombine.low %v5188_v19, %v5198_v39  ;;  %v5347_v19 = vshll.u32 %v5125_v43, 16 }
 0x243   : > { %v5320_v52 = vshrl.u32 %v5122_v54, 16  ;;  %v5323_v38 = vshll.u32 %v5122_v54, 16  ;;  %v5293_v36 = vrot.slane %v5291_v33, 5  ;;  %v5131_v33 = vld [vmem:[#allocation2 + $0xc4] sm:$0xf] }
 0x244   : > { %v5240_v8 = vor.u32 %v5239_v27, %v14843_v35 }
 0x245   : > { %v5322_v51 = vrot.slane %v5320_v52, 4  ;;  %v5401_v52 = vshll.u32 %v5132_v10, 16 }
 0x246   : > { %v5241_v31 = vrot.slane %v5240_v8, 4 }
 0x247   : > { %11888 = vmatmul.mubr.msk.bf16.gmra.mrb[12].mxu0 %vm776_vm7, %v16146_v59  ;;  %v5248_v59 = vshrl.u32 %v5113_v61, 16 }
 0x248   : > { %11891 = vmatprep.mubr.msk.bf16.mxu0 %vm776_vm7, %v16147_v37  ;;  %v5251_v37 = vshll.u32 %v5113_v61, 16  ;;  %v5277_v61 = vrot.slane %v5275_v49, 5  ;;  %v5128_v49 = vld [vmem:[#allocation2 + $0xb4] sm:$0xf] }
 0x249   : > { %v5250_v57 = vrot.slane %v5248_v59, 4  ;;  %v5298_v59 = vrot.slane %v5296_v20, 4  ;;  %v5381_v20 = vshrl.u32 %v5129_v28, 16  ;;  %v5138_v28 = vld [vmem:[#allocation2 + $0xe8] sm:$0xf] }
 0x24a   : > { %v5253_v60 = vrot.slane %v5251_v37, 5  ;;  %v5301_v37 = vrot.slane %v5299_v45, 5  ;;  %v5278_v53 = vor.u32 %v5277_v61, %v5274_v58  ;;  %v5371_v58 = vshll.u32 %v5128_v49, 16 }
 0x24c   : > { %v5302_v27 = vor.u32 %v5301_v37, %v5298_v59  ;;  %v5373_v59 = vrot.slane %v5371_v58, 5  ;;  %v14908_v37 = vrot.slane %v5377_v16, 5  ;;  %v5449_v16 = vshll.u32 %v5138_v28, 16 }
 0x24f   : > { %11892 = vmatmul.mubr.msk.bf16.gmra.mrb[16].mxu0 %vm776_vm7, %v16148_v55  ;;  %v5216_v55 = vor.u32 %v5215_v29, %v14829_v30  ;;  %v14876_v30 = vrot.slane %v5305_v32, 5  ;;  %v5349_v32 = vrot.slane %v5347_v19, 5 }
 0x250   : > { %11895 = vmatprep.mubr.msk.bf16.mxu0 %vm776_vm7, %v10779_v14  ;;  %v5257_v14 = vshll.u32 %v5114_v25, 16  ;;  %v14867_v25 = vrot.slane %v5230_v2, 4  ;;  %v5335_v2 = vrot.slane %v5333_v24, 4 }
 0x251   : > { %v5217_v41 = vrot.slane %v5216_v55, 4  ;;  %v5246_v55 = vsel %vm13783_vm14, %v5241_v31, %v5245_v13 }
 0x252   : > { %v14850_v40 = vrot.slane %v5257_v14, 5  ;;  %v5236_v21 = vsel %vm13783_vm14, %v14867_v25, %v14843_v35  ;;  %v5279_v35 = vrot.slane %v5278_v53, 4  ;;  %v5127_v25 = vld [vmem:[#allocation2 + $0xac] sm:$0x1] }
 0x253   : > { %v5222_v29 = vsel %vm13783_vm14, %v5217_v41, %v5221_v50  ;;  %v5325_v41 = vrot.slane %v5323_v38, 5  ;;  %v14892_v50 = vrot.slane %v5329_v42, 5  ;;  %v10805_v61 = vcombine.low %v5236_v21, %v5246_v55 }
 0x254   : > { %v10804_v56 = vcombine.low %v5212_v34, %v5222_v29  ;;  %v5284_v13 = vsel %vm13783_vm14, %v5279_v35, %v14858_v46  ;;  %v5363_v53 = vshll.u32 %v5127_v25, 16  ;;  %v5405_v38 = vshrl.u32 %v5132_v10, 16  ;;  %v5140_v10 = vld [vmem:[#allocation2 + $0xf4] sm:$0xf] }
 0x255   : > { %v5326_v39 = vor.u32 %v5325_v41, %v5322_v51  ;;  %v5336_v34 = vor.u32 %v5335_v2, %v14892_v50 }
 0x256   : > { %v5407_v19 = vrot.slane %v5405_v38, 4  ;;  %v5144_v38 = vld [vmem:[#allocation2 + $0x108] sm:$0xf] }
 0x257   : > { %11896 = vmatmul.mubr.msk.bf16.gmra.mrb[20].mxu0 %vm776_vm7, %v16149_v18  ;;  %v5254_v18 = vor.u32 %v5253_v60, %v5250_v57  ;;  %v5312_v57 = vor.u32 %v5311_v5, %v14876_v30  ;;  %v5383_v5 = vrot.slane %v5381_v20, 4  ;;  %v5453_v20 = vshrl.u32 %v5138_v28, 16 }
 0x258   : > { %11899 = vmatprep.mubr.msk.bf16.mxu0 %vm776_vm7, %v10781_v62  ;;  %v5263_v62 = vrot.slane %v5261_v22, 4 }
 0x259   : > { %v5255_v14 = vrot.slane %v5254_v18, 4  ;;  %v5313_v15 = vrot.slane %v5312_v57, 4  ;;  %v5384_v42 = vor.u32 %v5383_v5, %v14908_v37  ;;  %v5365_v57 = vrot.slane %v5363_v53, 5  ;;  %v5141_v53 = vld [vmem:[#allocation2 + $0xf8] sm:$0xf] }
 0x25a   : > { %v5264_v12 = vor.u32 %v5263_v62, %v14850_v40  ;;  %v5124_v62 = vld [vmem:[#allocation2 + $0x9c] sm:$0x1]  ;;  %v5455_v5 = vrot.slane %v5453_v20, 4 }
 0x25b   : > { %v5260_v26 = vsel %vm13783_vm14, %v5255_v14, %v14850_v40  ;;  %v5303_v40 = vrot.slane %v5302_v27, 4  ;;  %v5339_v18 = vshll.u32 %v5124_v62, 16  ;;  %v5135_v62 = vld [vmem:[#allocation2 + $0xd8] sm:$0xf]  ;;  %v5385_v41 = vrot.slane %v5384_v42, 4 }
 0x25c   : > { %v5265_v22 = vrot.slane %v5264_v12, 4  ;;  %v5473_v42 = vshll.u32 %v5141_v53, 16 }
 0x25d   : > { %v5308_v31 = vsel %vm13783_vm14, %v5303_v40, %v14876_v30  ;;  %v5327_v30 = vrot.slane %v5326_v39, 4 }
 0x25e   : > { %v5475_v28 = vrot.slane %v5473_v42, 5 }
 0x25f   : > { %11900 = vmatmul.mubr.msk.bf16.gmra.mrb[24].mxu0 %vm776_vm7, %v16150_v23  ;;  %v5126_v23 = vld [vmem:[#allocation2 + $0xa8] sm:$0xf] }
 0x260   : > { %11903 = vmatprep.mubr.msk.bf16.mxu0 %vm776_vm7, %v10783_v1  ;;  %v5267_v1 = vshll.u32 %v5115_v48, 16  ;;  %v5289_v48 = vrot.slane %v5288_v9, 4  ;;  %v5353_v7 = vshll.u32 %v5126_v23, 16  ;;  %v5357_v4 = vshrl.u32 %v5126_v23, 16  ;;  %v5130_v9 = vld [vmem:[#allocation2 + $0xbc] sm:$0x1] }
 0x261   : > { %v5387_v24 = vshll.u32 %v5130_v9, 16 }
 0x262   : > { %v5269_v44 = vrot.slane %v5267_v1, 5  ;;  %v5368_v1 = vshrl.u32 %v5128_v49, 16  ;;  %v14895_v3 = vrot.slane %v5353_v7, 5  ;;  %v5359_v12 = vrot.slane %v5357_v4, 4  ;;  %v5137_v49 = vld [vmem:[#allocation2 + $0xe4] sm:$0xf] }
 0x263   : > { %v5294_v29 = vsel %vm13783_vm14, %v5289_v48, %v5293_v36  ;;  %v5389_v2 = vrot.slane %v5387_v24, 5  ;;  %v5477_v24 = vshrl.u32 %v5141_v53, 16  ;;  %v5148_v53 = vld [vmem:[#allocation2 + $0x11c] sm:$0x1] }
 0x264   : > { %v5270_v0 = vsel %vm13783_vm14, %v5265_v22, %v5269_v44  ;;  %v14906_v44 = vrot.slane %v5339_v18, 5  ;;  %v5370_v54 = vrot.slane %v5368_v1, 4  ;;  %v5360_v22 = vor.u32 %v5359_v12, %v14895_v3 }
 0x265   : > { %v10806_v17 = vcombine.low %v5260_v26, %v5270_v0  ;;  %v10807_v21 = vcombine.low %v5284_v13, %v5294_v29  ;;  %v5332_v26 = vsel %vm13783_vm14, %v5327_v30, %v14892_v50  ;;  %v5429_v50 = vshrl.u32 %v5135_v62, 16 }
 0x266   : > { %v5374_v55 = vor.u32 %v5373_v59, %v5370_v54  ;;  %v5361_v27 = vrot.slane %v5360_v22, 4  ;;  %v5443_v18 = vshll.u32 %v5137_v49, 16  ;;  %v5390_v39 = vsel %vm13783_vm14, %v5385_v41, %v5389_v2  ;;  %v5139_v54 = vld [vmem:[#allocation2 + $0xec] sm:$0x1] }
 0x267   : > { %11904 = vmatmul.mubr.msk.bf16.gmra.mrb[28].mxu0 %vm776_vm7, %v10784_v11  ;;  %v5121_v11 = vld [vmem:[#allocation2 + $0x8c] sm:$0x1]  ;;  %v5431_v13 = vrot.slane %v5429_v50, 4  ;;  %v14939_v59 = vrot.slane %v5449_v16, 5 }
 0x268   : > { %11909 = vmatprep.mubr.msk.bf16.mxu0 %vm776_vm7, %v10802_v47  ;;  %v5315_v60 = vshll.u32 %v5121_v11, 16  ;;  %v5344_v47 = vshrl.u32 %v5125_v43, 16  ;;  %v5337_v11 = vrot.slane %v5336_v34, 4  ;;  %v5134_v43 = vld [vmem:[#allocation2 + $0xd4] sm:$0xf]  ;;  %v5375_v51 = vrot.slane %v5374_v55, 4 }
 0x269   : > { %v5416_v7 = vshrl.u32 %v5134_v43, 16  ;;  %v5419_v4 = vshll.u32 %v5134_v43, 16  ;;  %v5366_v58 = vsel %vm13783_vm14, %v5361_v27, %v5365_v57  ;;  %v5136_v34 = vld [vmem:[#allocation2 + $0xdc] sm:$0x1]  ;;  %v5467_v55 = vshll.u32 %v5140_v10, 16 }
 0x26a   : > { %v5317_v8 = vrot.slane %v5315_v60, 5  ;;  %v5346_v45 = vrot.slane %v5344_v47, 4  ;;  %v5133_v60 = vld [vmem:[#allocation2 + $0xcc] sm:$0x1]  ;;  %v5342_v0 = vsel %vm13783_vm14, %v5337_v11, %v14906_v44  ;;  %v14922_v47 = vrot.slane %v5401_v52, 5 }
 0x26b   : > { %v5411_v40 = vshll.u32 %v5133_v60, 16  ;;  %v5418_v12 = vrot.slane %v5416_v7, 4  ;;  %v10809_v44 = vcombine.low %v5332_v26, %v5342_v0  ;;  %v5435_v22 = vshll.u32 %v5136_v34, 16  ;;  %v5143_v52 = vld [vmem:[#allocation2 + $0x104] sm:$0xf] }
 0x26c   : > { %v5318_v14 = vsel %vm13783_vm14, %v5313_v15, %v5317_v8  ;;  %v5350_v46 = vor.u32 %v5349_v32, %v5346_v45  ;;  %v5425_v15 = vshll.u32 %v5135_v62, 16  ;;  %v5440_v8 = vshrl.u32 %v5137_v49, 16  ;;  %v5142_v7 = vld [vmem:[#allocation2 + $0xfc] sm:$0x1]  ;;  %v5145_v16 = vld [vmem:[#allocation2 + $0x10c] sm:$0x1] }
 0x26d   : > { %v10808_v23 = vcombine.low %v5308_v31, %v5318_v14  ;;  %v5408_v32 = vor.u32 %v5407_v19, %v14922_v47  ;;  %v5445_v31 = vrot.slane %v5443_v18, 5  ;;  %v5437_v27 = vrot.slane %v5435_v22, 5 }
 0x26e   : > { %v5351_v36 = vrot.slane %v5350_v46, 4  ;;  %v14937_v25 = vrot.slane %v5425_v15, 5  ;;  %v5442_v29 = vrot.slane %v5440_v8, 4  ;;  %v5488_v57 = vshrl.u32 %v5143_v52, 16  ;;  %v5147_v8 = vld [vmem:[#allocation2 + $0x118] sm:$0xf] }
 0x26f   : > { %11910 = vmatmul.mubr.msk.bf16.vlgmr.msra.gmra.mrb[0].mxu0 %vm776_vm7, %v10803_v6  ;;  %v5392_v6 = vshrl.u32 %v5131_v33, 16  ;;  %v5409_v46 = vrot.slane %v5408_v32, 4  ;;  %v5491_v60 = vshll.u32 %v5143_v52, 16  ;;  %v5497_v26 = vshll.u32 %v5144_v38, 16 }
 0x270   : > { %11913 = vmatprep.mubr.msk.bf16.mxu0 %vm776_vm7, %v10804_v56  ;;  %v5395_v56 = vshll.u32 %v5131_v33, 16  ;;  %v5356_v1 = vsel %vm13783_vm14, %v5351_v36, %v14895_v3  ;;  %v5413_v3 = vrot.slane %v5411_v40, 5  ;;  %v5432_v30 = vor.u32 %v5431_v13, %v14937_v25 }
 0x271   : > { %v5394_v35 = vrot.slane %v5392_v6, 4  ;;  %v10810_v33 = vcombine.low %v5356_v1, %v5366_v58  ;;  %v5446_v11 = vor.u32 %v5445_v31, %v5442_v29  ;;  %v5459_v6 = vshll.u32 %v5139_v54, 16 }
 0x272   : > { %v5397_v48 = vrot.slane %v5395_v56, 5  ;;  %v5464_v56 = vshrl.u32 %v5140_v10, 16  ;;  %v5501_v0 = vshrl.u32 %v5144_v38, 16  ;;  %v5490_v2 = vrot.slane %v5488_v57, 4  ;;  %v10867_v57 = vld [vmem:[%s16092_s3 + $0x4] sm:$0xf] }
 0x273   : > { %v5461_v62 = vrot.slane %v5459_v6, 5  ;;  %v5493_v40 = vrot.slane %v5491_v60, 5  ;;  %v5499_v15 = vrot.slane %v5497_v26, 5  ;;  %v5483_v58 = vshll.u32 %v5142_v7, 16  ;;  %12768 = vmatprep.subr.msk.bf16.mxu1 %vm6320_vm15, %v10867_v57  ;;  %v14984_v26 = vld [vmem:[#allocation3 + $0x4] sm:$0xf] }
 0x274   : > { %v5398_v45 = vor.u32 %v5397_v48, %v5394_v35  ;;  %v5433_v35 = vrot.slane %v5432_v30, 4  ;;  %v5447_v48 = vrot.slane %v5446_v11, 4  ;;  %v5466_v49 = vrot.slane %v5464_v56, 4  ;;  %v15000_v7 = vld [vmem:[%s16092_s3 + $0x8] sm:$0xf] }
 0x275   : > { %v5503_v50 = vrot.slane %v5501_v0, 4  ;;  %v5494_v34 = vor.u32 %v5493_v40, %v5490_v2  ;;  %v5507_v13 = vshll.u32 %v5145_v16, 16  ;;  %v5485_v54 = vrot.slane %v5483_v58, 5  ;;  %v6173_v0 = vld [vmem:[#allocation3 + $0x8] sm:$0xf] }
 0x276   : > { %v5399_v14 = vrot.slane %v5398_v45, 4  ;;  %v5438_v1 = vsel %vm13783_vm14, %v5433_v35, %v5437_v27  ;;  %v5452_v20 = vsel %vm13783_vm14, %v5447_v48, %v14939_v59  ;;  %v5531_v56 = vshll.u32 %v5148_v53, 16  ;;  %v6174_v48 = vld [vmem:[#allocation3 + $0x18] sm:$0xf] }
 0x277   : > { %11914 = vmatmul.mubr.msk.bf16.gmra.mrb[4].mxu0 %vm776_vm7, %v10805_v61  ;;  %v5421_v61 = vrot.slane %v5419_v4, 5  ;;  %v5469_v4 = vrot.slane %v5467_v55, 5  ;;  %v5509_v22 = vrot.slane %v5507_v13, 5  ;;  %v6322_v60 = vsel %vm6320_vm15, %v10867_v57, 0 }
 0x278   : > { %11917 = vmatprep.mubr.msk.bf16.mxu0 %vm776_vm7, %v10806_v17  ;;  %v5380_v17 = vsel %vm13783_vm14, %v5375_v51, %v14908_v37  ;;  %v5404_v43 = vsel %vm13783_vm14, %v5399_v14, %v14922_v47  ;;  %v5479_v51 = vrot.slane %v5477_v24, 4  ;;  %v5146_v47 = vld [vmem:[#allocation2 + $0x114] sm:$0xf]  ;;  %11942 = vmatpush3.bf16.msra.mxu1 %v6322_v60  ;;  %v10868_v35 = vcombine.low %v14984_v26, %v6173_v0 }
 0x279   : > { %v5422_v37 = vor.u32 %v5421_v61, %v5418_v12  ;;  %v10811_v9 = vcombine.low %v5380_v17, %v5390_v39  ;;  %v5470_v32 = vor.u32 %v5469_v4, %v5466_v49  ;;  %v5512_v61 = vshrl.u32 %v5146_v47, 16  ;;  %v6172_v49 = vld [vmem:[%s16092_s3] sm:$0xf] }
 0x27a   : > { %v5480_v12 = vor.u32 %v5479_v51, %v5475_v28  ;;  %v5515_v17 = vshll.u32 %v5146_v47, 16  ;;  %v5521_v39 = vshll.u32 %v5147_v8, 16  ;;  %11943 = vmatprep.mubr.msk.bf16.mxu1 %vm6271_vm0, %v10868_v35  ;;  %12769 = vmatprep.subr.msk.bf16.mxu1 %vm6320_vm15, %v6172_v49  ;;  %v15007_v4 = vld [vmem:[%s16091_s2] ss:$0 sm:$0xff] }
 0x27b   : > { %v5423_v36 = vrot.slane %v5422_v37, 4 }
 0x27c   : > { %v5523_v10 = vrot.slane %v5521_v39, 5 }
 0x27d   : > { %v5428_v18 = vsel %vm13783_vm14, %v5423_v36, %v14937_v25  ;;  %v5504_v25 = vor.u32 %v5503_v50, %v5499_v15 }
 0x27e   : > { %v10813_v29 = vcombine.low %v5428_v18, %v5438_v1 }
 0x27f   : > { %11918 = vmatmul.mubr.msk.bf16.gmra.mrb[8].mxu0 %vm776_vm7, %v10807_v21  ;;  %v5456_v21 = vor.u32 %v5455_v5, %v14939_v59  ;;  %v5514_v59 = vrot.slane %v5512_v61, 4  ;;  %v5517_v5 = vrot.slane %v5515_v17, 5  ;;  %v5505_v37 = vrot.slane %v5504_v25, 4 }
 0x280   : > { %11921 = vmatprep.mubr.msk.bf16.mxu0 %vm776_vm7, %v10808_v23  ;;  %v5414_v23 = vsel %vm13783_vm14, %v5409_v46, %v5413_v3  ;;  %v5525_v3 = vshrl.u32 %v5147_v8, 16  ;;  %v5495_v46 = vrot.slane %v5494_v34, 4 }
 0x281   : > { %v5457_v19 = vrot.slane %v5456_v21, 4  ;;  %v10812_v41 = vcombine.low %v5404_v43, %v5414_v23  ;;  %v5518_v11 = vor.u32 %v5517_v5, %v5514_v59  ;;  %v5510_v38 = vsel %vm13783_vm14, %v5505_v37, %v5509_v22 }
 0x282   : > { %v5527_v14 = vrot.slane %v5525_v3, 4  ;;  %v5500_v52 = vsel %vm13783_vm14, %v5495_v46, %v5499_v15  ;;  %v5533_v43 = vrot.slane %v5531_v56, 5 }
 0x283   : > { %v5462_v45 = vsel %vm13783_vm14, %v5457_v19, %v5461_v62  ;;  %v10816_v55 = vcombine.low %v5500_v52, %v5510_v38  ;;  %v5519_v42 = vrot.slane %v5518_v11, 4  ;;  %v10869_v62 = vcombine.low %v14987_v63, %v6174_v48 }
 0x284   : > { %v10814_v31 = vcombine.low %v5452_v20, %v5462_v45  ;;  %v5528_v6 = vor.u32 %v5527_v14, %v5523_v10  ;;  %v6729_v19 = vsel %vm6320_vm15, %v6172_v49, 0 }
 0x285   : > { %v5524_v23 = vsel %vm13783_vm14, %v5519_v42, %v5523_v10  ;;  %11944 = vmatmul.mubr.msk.bf16.vlgmr.msra.gmra.mrb[0].mxu1 %vm6271_vm0, %v10869_v62 }
 0x286   : > { %v5529_v24 = vrot.slane %v5528_v6, 4  ;;  %11976 = vmatpush3.bf16.msra.mxu1 %v6729_v19 }
 0x287   : > { %11922 = vmatmul.mubr.msk.bf16.gmra.mrb[12].mxu0 %vm776_vm7, %v10809_v44  ;;  %v5471_v44 = vrot.slane %v5470_v32, 4  ;;  %12770 = vmatprep.subr.msk.bf16.mxu1 %vm6320_vm15, %v15000_v7 }
 0x288   : > { %11925 = vmatprep.mubr.msk.bf16.mxu0 %vm776_vm7, %v10810_v33  ;;  %v5481_v33 = vrot.slane %v5480_v12, 4  ;;  %v5534_v36 = vsel %vm13783_vm14, %v5529_v24, %v5533_v43 }
 0x289   : > { %v10817_v27 = vcombine.low %v5524_v23, %v5534_v36 }
 0x28a   : > { %v5486_v30 = vsel %vm13783_vm14, %v5481_v33, %v5485_v54 }
 0x28f   : > { %11926 = vmatmul.mubr.msk.bf16.gmra.mrb[16].mxu0 %vm776_vm7, %v10811_v9  ;;  %v5476_v9 = vsel %vm13783_vm14, %v5471_v44, %v5475_v28 }
 0x290   : > { %11929 = vmatprep.mubr.msk.bf16.mxu0 %vm776_vm7, %v10812_v41  ;;  %v10815_v21 = vcombine.low %v5476_v9, %v5486_v30 }
 0x297   : > { %11930 = vmatmul.mubr.msk.bf16.gmra.mrb[20].mxu0 %vm776_vm7, %v10813_v29 }
 0x298   : > { %11933 = vmatprep.mubr.msk.bf16.mxu0 %vm776_vm7, %v10814_v31 }
 0x29f   : > { %11934 = vmatmul.mubr.msk.bf16.gmra.mrb[24].mxu0 %vm776_vm7, %v10815_v21 }
 0x2a0   : > { %11937 = vmatprep.mubr.msk.bf16.mxu0 %vm776_vm7, %v10816_v55 }
 0x2a7   : > { %11938 = vmatmul.mubr.msk.bf16.gmra.mrb[28].mxu0 %vm776_vm7, %v10817_v27 }
 0x342   : > { %v11911_v28 = vpop.f32.mrb[0].mxu0 }
 0x343   : > { %v5836_v51 = vadd.f32 %v11911_v28, %v15007_v4  ;;  %v5668_v41 = vpop.f32.mrb[1].mxu0 }
 0x344   : > { %v5834_v47 = vadd.f32 %v15007_v4, %v5668_v41  ;;  %v11912_v2 = vpop.f32.mrb[2].mxu0 }
 0x345   : > { %vm5868_vm1 = vcmp.ge.f32.partialorder %v5836_v51, 0.0  ;;  %v5900_v40 = vmul.f32 0.2, %v5836_v51  ;;  %v5837_v15 = vadd.f32 %v11912_v2, %v15007_v4  ;;  %v5671_v50 = vpop.f32.mrb[3].mxu0 }
 0x346   : > { %vm5866_vm2 = vcmp.ge.f32.partialorder %v5834_v47, 0.0  ;;  %v5898_v8 = vmul.f32 0.2, %v5834_v47  ;;  %v5835_v18 = vadd.f32 %v15007_v4, %v5671_v50 }
 0x347   : > { %v5932_v1 = vsel %vm5868_vm1, %v5836_v51, %v5900_v40  ;;  %vm5869_vm4 = vcmp.ge.f32.partialorder %v5837_v15, 0.0  ;;  %v5901_v58 = vmul.f32 0.2, %v5837_v15 }
 0x348   : > { %v11299_v16 = vpack.c.bf16 %v5932_v1, %v5932_v1  ;;  %v5930_v20 = vsel %vm5866_vm2, %v5834_v47, %v5898_v8  ;;  %vm5867_vm5 = vcmp.ge.f32.partialorder %v5835_v18, 0.0  ;;  %v5899_v45 = vmul.f32 0.2, %v5835_v18 }
 0x349   : > { %v11297_v32 = vpack.c.bf16 %v5930_v20, %v5930_v20  ;;  %v5933_v12 = vsel %vm5869_vm4, %v5837_v15, %v5901_v58 }
 0x34a   : > { %6094 = vst.msk [vmem:[#allocation3 + $0x34] sm:$0xf] %vm6091_vm3, %v11299_v16  ;;  %v11300_v61 = vpack.c.bf16 %v5933_v12, %v5933_v12  ;;  %v5931_v17 = vsel %vm5867_vm5, %v5835_v18, %v5899_v45  ;;  %v11915_v39 = vpop.f32.mrb[4].mxu0 }
 0x34b   : > { %6092 = vst.msk [vmem:[#allocation3 + $0x24] sm:$0xf] %vm6091_vm3, %v11297_v32  ;;  %v11298_v3 = vpack.c.bf16 %v5931_v17, %v5931_v17  ;;  %v5840_v34 = vadd.f32 %v11915_v39, %v15007_v4  ;;  %v5684_v25 = vpop.f32.mrb[5].mxu0 }
 0x34c   : > { %6095 = vst.msk [vmem:[#allocation3 + $0x38] sm:$0xf] %vm6091_vm3, %v11300_v61  ;;  %v5838_v13 = vadd.f32 %v15007_v4, %v5684_v25  ;;  %v11916_v29 = vpop.f32.mrb[6].mxu0 }
 0x34d   : > { %6093 = vst.msk [vmem:[#allocation3 + $0x28] sm:$0xf] %vm6091_vm3, %v11298_v3  ;;  %vm5872_vm6 = vcmp.ge.f32.partialorder %v5840_v34, 0.0  ;;  %v5904_v31 = vmul.f32 0.2, %v5840_v34  ;;  %v5841_v44 = vadd.f32 %v11916_v29, %v15007_v4  ;;  %v5687_v33 = vpop.f32.mrb[7].mxu0 }
 0x34e   : > { %vm5870_vm8 = vcmp.ge.f32.partialorder %v5838_v13, 0.0  ;;  %v5902_v54 = vmul.f32 0.2, %v5838_v13  ;;  %v5839_v59 = vadd.f32 %v15007_v4, %v5687_v33 }
 0x34f   : > { %v5936_v5 = vsel %vm5872_vm6, %v5840_v34, %v5904_v31  ;;  %vm5873_vm9 = vcmp.ge.f32.partialorder %v5841_v44, 0.0  ;;  %v5905_v10 = vmul.f32 0.2, %v5841_v44 }
 0x350   : > { %v11303_v14 = vpack.c.bf16 %v5936_v5, %v5936_v5  ;;  %v5934_v46 = vsel %vm5870_vm8, %v5838_v13, %v5902_v54  ;;  %vm5871_vm10 = vcmp.ge.f32.partialorder %v5839_v59, 0.0  ;;  %v5903_v37 = vmul.f32 0.2, %v5839_v59 }
 0x351   : > { %v11301_v22 = vpack.c.bf16 %v5934_v46, %v5934_v46  ;;  %v5937_v53 = vsel %vm5873_vm9, %v5841_v44, %v5905_v10  ;;  %v15031_v57 = vld [vmem:[#allocation3 + $0x34] sm:$0xf] }
 0x352   : > { %6098 = vst.msk [vmem:[#allocation3 + $0x54] sm:$0xf] %vm6091_vm3, %v11303_v14  ;;  %v11304_v9 = vpack.c.bf16 %v5937_v53, %v5937_v53  ;;  %v5935_v30 = vsel %vm5871_vm10, %v5839_v59, %v5903_v37  ;;  %v11919_v11 = vpop.f32.mrb[8].mxu0  ;;  %v15026_v42 = vld [vmem:[#allocation3 + $0x24] sm:$0xf] }
 0x353   : > { %6096 = vst.msk [vmem:[#allocation3 + $0x44] sm:$0xf] %vm6091_vm3, %v11301_v22  ;;  %v11302_v6 = vpack.c.bf16 %v5935_v30, %v5935_v30  ;;  %v5844_v56 = vadd.f32 %v11919_v11, %v15007_v4  ;;  %v5700_v52 = vpop.f32.mrb[9].mxu0  ;;  %v6176_v38 = vld [vmem:[#allocation3 + $0x38] sm:$0xf] }
 0x354   : > { %6099 = vst.msk [vmem:[#allocation3 + $0x58] sm:$0xf] %vm6091_vm3, %v11304_v9  ;;  %v5842_v21 = vadd.f32 %v15007_v4, %v5700_v52  ;;  %v11920_v55 = vpop.f32.mrb[10].mxu0  ;;  %v6175_v24 = vld [vmem:[#allocation3 + $0x28] sm:$0xf]  ;;  %v10871_v35 = vcombine.low %v15031_v57, %v6176_v38 }
 0x355   : > { %6097 = vst.msk [vmem:[#allocation3 + $0x48] sm:$0xf] %vm6091_vm3, %v11302_v6  ;;  %vm5876_vm11 = vcmp.ge.f32.partialorder %v5844_v56, 0.0  ;;  %v5908_v43 = vmul.f32 0.2, %v5844_v56  ;;  %v5845_v23 = vadd.f32 %v11920_v55, %v15007_v4  ;;  %v5703_v36 = vpop.f32.mrb[11].mxu0  ;;  %v10870_v27 = vcombine.low %v15026_v42, %v6175_v24 }
 0x356   : > { %vm5874_vm12 = vcmp.ge.f32.partialorder %v5842_v21, 0.0  ;;  %v5906_v60 = vmul.f32 0.2, %v5842_v21  ;;  %v5843_v0 = vadd.f32 %v15007_v4, %v5703_v36 }
 0x357   : > { %v5940_v48 = vsel %vm5876_vm11, %v5844_v56, %v5908_v43  ;;  %vm5877_vm13 = vcmp.ge.f32.partialorder %v5845_v23, 0.0  ;;  %v5909_v62 = vmul.f32 0.2, %v5845_v23  ;;  %11947 = vmatprep.mubr.msk.bf16.mxu1 %vm6271_vm0, %v10870_v27 }
 0x358   : > { %v11307_v49 = vpack.c.bf16 %v5940_v48, %v5940_v48  ;;  %v5938_v19 = vsel %vm5874_vm12, %v5842_v21, %v5906_v60  ;;  %vm5875_vm14 = vcmp.ge.f32.partialorder %v5843_v0, 0.0  ;;  %v5907_v28 = vmul.f32 0.2, %v5843_v0  ;;  %11948 = vmatmul.mubr.msk.bf16.gmra.mrb[4].mxu1 %vm6271_vm0, %v10871_v35 }
 0x359   : > { %v11305_v51 = vpack.c.bf16 %v5938_v19, %v5938_v19  ;;  %v5941_v41 = vsel %vm5877_vm13, %v5845_v23, %v5909_v62  ;;  %v15047_v17 = vld [vmem:[#allocation3 + $0x54] sm:$0xf] }
 0x35a   : > { %6102 = vst.msk [vmem:[#allocation3 + $0x74] sm:$0xf] %vm6091_vm3, %v11307_v49  ;;  %v11308_v47 = vpack.c.bf16 %v5941_v41, %v5941_v41  ;;  %v5939_v2 = vsel %vm5875_vm14, %v5843_v0, %v5907_v28  ;;  %v11923_v40 = vpop.f32.mrb[12].mxu0  ;;  %v15042_v16 = vld [vmem:[#allocation3 + $0x44] sm:$0xf] }
 0x35b   : > { %6100 = vst.msk [vmem:[#allocation3 + $0x64] sm:$0xf] %vm6091_vm3, %v11305_v51  ;;  %v11306_v15 = vpack.c.bf16 %v5939_v2, %v5939_v2  ;;  %v5848_v50 = vadd.f32 %v11923_v40, %v15007_v4  ;;  %v5716_v8 = vpop.f32.mrb[13].mxu0  ;;  %v6178_v18 = vld [vmem:[#allocation3 + $0x58] sm:$0xf] }
 0x35c   : > { %6103 = vst.msk [vmem:[#allocation3 + $0x78] sm:$0xf] %vm6091_vm3, %v11308_v47  ;;  %v5846_v1 = vadd.f32 %v15007_v4, %v5716_v8  ;;  %v11924_v58 = vpop.f32.mrb[14].mxu0  ;;  %v6177_v20 = vld [vmem:[#allocation3 + $0x48] sm:$0xf]  ;;  %v10873_v34 = vcombine.low %v15047_v17, %v6178_v18 }
 0x35d   : > { %6101 = vst.msk [vmem:[#allocation3 + $0x68] sm:$0xf] %vm6091_vm3, %v11306_v15  ;;  %vm5880_vm1 = vcmp.ge.f32.partialorder %v5848_v50, 0.0  ;;  %v5912_v45 = vmul.f32 0.2, %v5848_v50  ;;  %v5849_v32 = vadd.f32 %v11924_v58, %v15007_v4  ;;  %v5719_v12 = vpop.f32.mrb[15].mxu0  ;;  %v10872_v61 = vcombine.low %v15042_v16, %v6177_v20 }
 0x35e   : > { %vm5878_vm2 = vcmp.ge.f32.partialorder %v5846_v1, 0.0  ;;  %v5910_v39 = vmul.f32 0.2, %v5846_v1  ;;  %v5847_v3 = vadd.f32 %v15007_v4, %v5719_v12 }
 0x35f   : > { %v5944_v25 = vsel %vm5880_vm1, %v5848_v50, %v5912_v45  ;;  %vm5881_vm4 = vcmp.ge.f32.partialorder %v5849_v32, 0.0  ;;  %v5913_v13 = vmul.f32 0.2, %v5849_v32  ;;  %11951 = vmatprep.mubr.msk.bf16.mxu1 %vm6271_vm0, %v10872_v61 }
 0x360   : > { %v11311_v29 = vpack.c.bf16 %v5944_v25, %v5944_v25  ;;  %v5942_v31 = vsel %vm5878_vm2, %v5846_v1, %v5910_v39  ;;  %vm5879_vm5 = vcmp.ge.f32.partialorder %v5847_v3, 0.0  ;;  %v5911_v44 = vmul.f32 0.2, %v5847_v3  ;;  %11952 = vmatmul.mubr.msk.bf16.gmra.mrb[8].mxu1 %vm6271_vm0, %v10873_v34 }
 0x361   : > { %v11309_v33 = vpack.c.bf16 %v5942_v31, %v5942_v31  ;;  %v5945_v54 = vsel %vm5881_vm4, %v5849_v32, %v5913_v13  ;;  %v15063_v21 = vld [vmem:[#allocation3 + $0x74] sm:$0xf] }
 0x362   : > { %6106 = vst.msk [vmem:[#allocation3 + $0x94] sm:$0xf] %vm6091_vm3, %v11311_v29  ;;  %v11312_v59 = vpack.c.bf16 %v5945_v54, %v5945_v54  ;;  %v5943_v5 = vsel %vm5879_vm5, %v5847_v3, %v5911_v44  ;;  %v11927_v10 = vpop.f32.mrb[16].mxu0  ;;  %v15058_v30 = vld [vmem:[#allocation3 + $0x64] sm:$0xf] }
 0x363   : > { %6104 = vst.msk [vmem:[#allocation3 + $0x84] sm:$0xf] %vm6091_vm3, %v11309_v33  ;;  %v11310_v14 = vpack.c.bf16 %v5943_v5, %v5943_v5  ;;  %v5852_v46 = vadd.f32 %v11927_v10, %v15007_v4  ;;  %v5732_v37 = vpop.f32.mrb[17].mxu0  ;;  %v6180_v22 = vld [vmem:[#allocation3 + $0x78] sm:$0xf] }
 0x364   : > { %6107 = vst.msk [vmem:[#allocation3 + $0x98] sm:$0xf] %vm6091_vm3, %v11312_v59  ;;  %v5850_v53 = vadd.f32 %v15007_v4, %v5732_v37  ;;  %v11928_v9 = vpop.f32.mrb[18].mxu0  ;;  %v6179_v11 = vld [vmem:[#allocation3 + $0x68] sm:$0xf]  ;;  %v10875_v43 = vcombine.low %v15063_v21, %v6180_v22 }
 0x365   : > { %6105 = vst.msk [vmem:[#allocation3 + $0x88] sm:$0xf] %vm6091_vm3, %v11310_v14  ;;  %vm5884_vm6 = vcmp.ge.f32.partialorder %v5852_v46, 0.0  ;;  %v5916_v6 = vmul.f32 0.2, %v5852_v46  ;;  %v5853_v56 = vadd.f32 %v11928_v9, %v15007_v4  ;;  %v5735_v52 = vpop.f32.mrb[19].mxu0  ;;  %v10874_v38 = vcombine.low %v15058_v30, %v6179_v11 }
 0x366   : > { %vm5882_vm8 = vcmp.ge.f32.partialorder %v5850_v53, 0.0  ;;  %v5914_v55 = vmul.f32 0.2, %v5850_v53  ;;  %v5851_v24 = vadd.f32 %v15007_v4, %v5735_v52 }
 0x367   : > { %v5948_v23 = vsel %vm5884_vm6, %v5852_v46, %v5916_v6  ;;  %vm5885_vm9 = vcmp.ge.f32.partialorder %v5853_v56, 0.0  ;;  %v5917_v36 = vmul.f32 0.2, %v5853_v56  ;;  %11955 = vmatprep.mubr.msk.bf16.mxu1 %vm6271_vm0, %v10874_v38  ;;  %vm6517_vm6 = vcmask 1040384  }
 0x368   : > { %v11315_v27 = vpack.c.bf16 %v5948_v23, %v5948_v23  ;;  %v5946_v60 = vsel %vm5882_vm8, %v5850_v53, %v5914_v55  ;;  %vm5883_vm10 = vcmp.ge.f32.partialorder %v5851_v24, 0.0  ;;  %v5915_v0 = vmul.f32 0.2, %v5851_v24  ;;  %11956 = vmatmul.mubr.msk.bf16.gmra.mrb[12].mxu1 %vm6271_vm0, %v10875_v43 }
 0x369   : > { %v11313_v35 = vpack.c.bf16 %v5946_v60, %v5946_v60  ;;  %v5949_v48 = vsel %vm5885_vm9, %v5853_v56, %v5917_v36  ;;  %v15079_v20 = vld [vmem:[#allocation3 + $0x94] sm:$0xf]  ;;  %v6124_v36 = vld [vmem:[#allocation3] sm:$0x8]  ;;  %vm6518_vm8 = vcmask 1044484  }
 0x36a   : > { %6110 = vst.msk [vmem:[#allocation3 + $0xb4] sm:$0xf] %vm6091_vm3, %v11315_v27  ;;  %v11316_v62 = vpack.c.bf16 %v5949_v48, %v5949_v48  ;;  %v5947_v49 = vsel %vm5883_vm10, %v5851_v24, %v5915_v0  ;;  %v11931_v19 = vpop.f32.mrb[20].mxu0  ;;  %v15074_v15 = vld [vmem:[#allocation3 + $0x84] sm:$0xf]  ;;  %v6522_v24 = vrot.slane %v14984_v26, 7 }
 0x36b   : > { %6108 = vst.msk [vmem:[#allocation3 + $0xa4] sm:$0xf] %vm6091_vm3, %v11313_v35  ;;  %v11314_v28 = vpack.c.bf16 %v5947_v49, %v5947_v49  ;;  %v5856_v51 = vadd.f32 %v11931_v19, %v15007_v4  ;;  %v5748_v41 = vpop.f32.mrb[21].mxu0  ;;  %v6182_v47 = vld [vmem:[#allocation3 + $0x98] sm:$0xf] }
 0x36c   : > { %6111 = vst.msk [vmem:[#allocation3 + $0xb8] sm:$0xf] %vm6091_vm3, %v11316_v62  ;;  %v5854_v2 = vadd.f32 %v15007_v4, %v5748_v41  ;;  %v11932_v40 = vpop.f32.mrb[22].mxu0  ;;  %v6181_v50 = vld [vmem:[#allocation3 + $0x88] sm:$0xf]  ;;  %v10877_v12 = vcombine.low %v15079_v20, %v6182_v47 }
 0x36d   : > { %6109 = vst.msk [vmem:[#allocation3 + $0xa8] sm:$0xf] %vm6091_vm3, %v11314_v28  ;;  %vm5888_vm11 = vcmp.ge.f32.partialorder %v5856_v51, 0.0  ;;  %v5920_v8 = vmul.f32 0.2, %v5856_v51  ;;  %v5857_v18 = vadd.f32 %v11932_v40, %v15007_v4  ;;  %v5751_v1 = vpop.f32.mrb[23].mxu0  ;;  %v10876_v58 = vcombine.low %v15074_v15, %v6181_v50 }
 0x36e   : > { %vm5886_vm12 = vcmp.ge.f32.partialorder %v5854_v2, 0.0  ;;  %v5918_v45 = vmul.f32 0.2, %v5854_v2  ;;  %v5855_v32 = vadd.f32 %v15007_v4, %v5751_v1  ;;  %v6126_v62 = vld [vmem:[#allocation3 + $0x8] sm:$0x7]  ;;  %v10900_v28 = vrot.slane %v6124_v36, 11 }
 0x36f   : > { %v5952_v61 = vsel %vm5888_vm11, %v5856_v51, %v5920_v8  ;;  %vm5889_vm13 = vcmp.ge.f32.partialorder %v5857_v18, 0.0  ;;  %v5921_v39 = vmul.f32 0.2, %v5857_v18  ;;  %11959 = vmatprep.mubr.msk.bf16.mxu1 %vm6271_vm0, %v10876_v58  ;;  %v6524_v51 = vrot.slane %v6522_v24, 4 }
 0x370   : > { %v11319_v3 = vpack.c.bf16 %v5952_v61, %v5952_v61  ;;  %v5950_v34 = vsel %vm5886_vm12, %v5854_v2, %v5918_v45  ;;  %vm5887_vm14 = vcmp.ge.f32.partialorder %v5855_v32, 0.0  ;;  %v5919_v25 = vmul.f32 0.2, %v5855_v32  ;;  %11960 = vmatmul.mubr.msk.bf16.gmra.mrb[16].mxu1 %vm6271_vm0, %v10877_v12 }
 0x371   : > { %v11317_v13 = vpack.c.bf16 %v5950_v34, %v5950_v34  ;;  %v5953_v29 = vsel %vm5889_vm13, %v5857_v18, %v5921_v39  ;;  %v15095_v56 = vld [vmem:[#allocation3 + $0xb4] sm:$0xf]  ;;  %v6525_v58 = vrot.slane %v6126_v62, 7  ;;  %vm15120_vm13 = vmor %vm6517_vm6, %vm6518_vm8 }
 0x372   : > { %6114 = vst.msk [vmem:[#allocation3 + $0xd4] sm:$0xf] %vm6091_vm3, %v11319_v3  ;;  %v11320_v31 = vpack.c.bf16 %v5953_v29, %v5953_v29  ;;  %v5951_v44 = vsel %vm5887_vm14, %v5855_v32, %v5919_v25  ;;  %v11935_v33 = vpop.f32.mrb[24].mxu0  ;;  %v15090_v37 = vld [vmem:[#allocation3 + $0xa4] sm:$0xf]  ;;  %vm6991_vm14 = vcmask 1046532  }
 0x373   : > { %6112 = vst.msk [vmem:[#allocation3 + $0xc4] sm:$0xf] %vm6091_vm3, %v11317_v13  ;;  %v11318_v54 = vpack.c.bf16 %v5951_v44, %v5951_v44  ;;  %v5860_v59 = vadd.f32 %v11935_v33, %v15007_v4  ;;  %v5764_v5 = vpop.f32.mrb[25].mxu0  ;;  %v6184_v10 = vld [vmem:[#allocation3 + $0xb8] sm:$0xf] }
 0x374   : > { %6115 = vst.msk [vmem:[#allocation3 + $0xd8] sm:$0xf] %vm6091_vm3, %v11320_v31  ;;  %v5858_v14 = vadd.f32 %v15007_v4, %v5764_v5  ;;  %v11936_v46 = vpop.f32.mrb[26].mxu0  ;;  %v6183_v22 = vld [vmem:[#allocation3 + $0xa8] sm:$0xf]  ;;  %v10879_v55 = vcombine.low %v15095_v56, %v6184_v10 }
 0x375   : > { %6113 = vst.msk [vmem:[#allocation3 + $0xc8] sm:$0xf] %vm6091_vm3, %v11318_v54  ;;  %vm5892_vm1 = vcmp.ge.f32.partialorder %v5860_v59, 0.0  ;;  %v5924_v53 = vmul.f32 0.2, %v5860_v59  ;;  %v5861_v9 = vadd.f32 %v11936_v46, %v15007_v4  ;;  %v5767_v11 = vpop.f32.mrb[27].mxu0  ;;  %v10878_v6 = vcombine.low %v15090_v37, %v6183_v22 }
 0x376   : > { %vm5890_vm2 = vcmp.ge.f32.partialorder %v5858_v14, 0.0  ;;  %v5922_v52 = vmul.f32 0.2, %v5858_v14  ;;  %v5859_v38 = vadd.f32 %v15007_v4, %v5767_v11  ;;  %v6129_v46 = vld [vmem:[#allocation3 + $0x18] sm:$0x7] }
 0x377   : > { %v5956_v43 = vsel %vm5892_vm1, %v5860_v59, %v5924_v53  ;;  %vm5893_vm4 = vcmp.ge.f32.partialorder %v5861_v9, 0.0  ;;  %v5925_v23 = vmul.f32 0.2, %v5861_v9  ;;  %11963 = vmatprep.mubr.msk.bf16.mxu1 %vm6271_vm0, %v10878_v6  ;;  %v6529_v59 = vrot.slane %v14987_v63, 7  ;;  %v9233_v54 = vld [vmem:[#allocation3 + $0x78] sm:$0xf] }
 0x378   : > { %v11323_v27 = vpack.c.bf16 %v5956_v43, %v5956_v43  ;;  %v5954_v60 = vsel %vm5890_vm2, %v5858_v14, %v5922_v52  ;;  %vm5891_vm5 = vcmp.ge.f32.partialorder %v5859_v38, 0.0  ;;  %v5923_v0 = vmul.f32 0.2, %v5859_v38  ;;  %11964 = vmatmul.mubr.msk.bf16.gmra.mrb[20].mxu1 %vm6271_vm0, %v10879_v55 }
 0x379   : > { %v11321_v35 = vpack.c.bf16 %v5954_v60, %v5954_v60  ;;  %v5957_v48 = vsel %vm5893_vm4, %v5861_v9, %v5925_v23  ;;  %v15112_v39 = vld [vmem:[#allocation3 + $0xd4] sm:$0xf]  ;;  %v6523_v14 = vsel %vm15120_vm13, %v10900_v28, %v6522_v24  ;;  %v6526_v9 = vsel %vm15120_vm13, %v6524_v51, %v6525_v58  ;;  %v6132_v60 = vld [vmem:[#allocation3 + $0x28] sm:$0x7] }
 0x37a   : > { %6118 = vst.msk [vmem:[#allocation3 + $0xf4] sm:$0xf] %vm6091_vm3, %v11323_v27  ;;  %v11324_v26 = vpack.c.bf16 %v5957_v48, %v5957_v48  ;;  %v5955_v49 = vsel %vm5891_vm5, %v5859_v38, %v5923_v0  ;;  %v11939_v19 = vpop.f32.mrb[28].mxu0  ;;  %v15107_v18 = vld [vmem:[#allocation3 + $0xc4] sm:$0xf]  ;;  %v6536_v63 = vrot.slane %v15026_v42, 7  ;;  %v10916_v27 = vcombine.low %v6523_v14, %v6526_v9 }
 0x37b   : > { %6116 = vst.msk [vmem:[#allocation3 + $0xe4] sm:$0xf] %vm6091_vm3, %v11321_v35  ;;  %v11322_v41 = vpack.c.bf16 %v5955_v49, %v5955_v49  ;;  %v5864_v47 = vadd.f32 %v11939_v19, %v15007_v4  ;;  %v5780_v2 = vpop.f32.mrb[29].mxu0  ;;  %v6186_v40 = vld [vmem:[#allocation3 + $0xd8] sm:$0xf]  ;;  %v6531_v24 = vrot.slane %v6529_v59, 4 }
 0x37c   : > { %6119 = vst.msk [vmem:[#allocation3 + $0xf8] sm:$0xf] %vm6091_vm3, %v11324_v26  ;;  %v5862_v50 = vadd.f32 %v15007_v4, %v5780_v2  ;;  %v11940_v8 = vpop.f32.mrb[30].mxu0  ;;  %v6185_v1 = vld [vmem:[#allocation3 + $0xc8] sm:$0xf]  ;;  %v10881_v25 = vcombine.low %v15112_v39, %v6186_v40  ;;  %v6532_v43 = vrot.slane %v6129_v46, 7 }
 0x37d   : > { %6117 = vst.msk [vmem:[#allocation3 + $0xe8] sm:$0xf] %vm6091_vm3, %v11322_v41  ;;  %vm5896_vm9 = vcmp.ge.f32.partialorder %v5864_v47, 0.0  ;;  %v5928_v45 = vmul.f32 0.2, %v5864_v47  ;;  %v5865_v32 = vadd.f32 %v11940_v8, %v15007_v4  ;;  %v5783_v12 = vpop.f32.mrb[31].mxu0  ;;  %v10880_v61 = vcombine.low %v15107_v18, %v6185_v1 }
 0x37e   : > { %vm5894_vm10 = vcmp.ge.f32.partialorder %v5862_v50, 0.0  ;;  %v5926_v3 = vmul.f32 0.2, %v5862_v50  ;;  %v5863_v34 = vadd.f32 %v15007_v4, %v5783_v12  ;;  %v6127_v4 = vld [vmem:[#allocation3 + $0x10] sm:$0x8]  ;;  %v6538_v35 = vrot.slane %v6536_v63, 4 }
 0x37f   : > { %v5960_v13 = vsel %vm5896_vm9, %v5864_v47, %v5928_v45  ;;  %vm5897_vm11 = vcmp.ge.f32.partialorder %v5865_v32, 0.0  ;;  %v5929_v29 = vmul.f32 0.2, %v5865_v32  ;;  %11967 = vmatprep.mubr.msk.bf16.mxu1 %vm6271_vm0, %v10880_v61  ;;  %v10901_v52 = vrot.slane %v6127_v4, 11  ;;  %v6130_v42 = vld [vmem:[#allocation3 + $0x20] sm:$0x8] }
 0x380   : > { %v11327_v31 = vpack.c.bf16 %v5960_v13, %v5960_v13  ;;  %v5958_v44 = vsel %vm5894_vm10, %v5862_v50, %v5926_v3  ;;  %vm5895_vm12 = vcmp.ge.f32.partialorder %v5863_v34, 0.0  ;;  %v5927_v33 = vmul.f32 0.2, %v5863_v34  ;;  %11968 = vmatmul.mubr.msk.bf16.gmra.mrb[24].mxu1 %vm6271_vm0, %v10881_v25  ;;  %v6135_v47 = vld [vmem:[#allocation3 + $0x38] sm:$0x7] }
 0x381   : > { %v11325_v5 = vpack.c.bf16 %v5958_v44, %v5958_v44  ;;  %v5961_v10 = vsel %vm5897_vm11, %v5865_v32, %v5929_v29  ;;  %v15137_v36 = vld [vmem:[#allocation3 + $0xf4] sm:$0xf]  ;;  %v6539_v48 = vrot.slane %v6132_v60, 7  ;;  %v6530_v62 = vsel %vm15120_vm13, %v10901_v52, %v6529_v59  ;;  %v6138_v2 = vld [vmem:[#allocation3 + $0x48] sm:$0x7] }
 0x382   : > { %6122 = vst.msk [vmem:[#allocation3 + $0x114] sm:$0xf] %vm6091_vm3, %v11327_v31  ;;  %v11328_v22 = vpack.c.bf16 %v5961_v10, %v5961_v10  ;;  %v5959_v53 = vsel %vm5895_vm12, %v5863_v34, %v5927_v33  ;;  %v15133_v38 = vld [vmem:[#allocation3 + $0xe4] sm:$0xf]  ;;  %v6533_v26 = vsel %vm15120_vm13, %v6531_v24, %v6532_v43  ;;  %v10902_v49 = vrot.slane %v6130_v42, 11 }
 0x383   : > { %6120 = vst.msk [vmem:[#allocation3 + $0x104] sm:$0xf] %vm6091_vm3, %v11325_v5  ;;  %v11326_v11 = vpack.c.bf16 %v5959_v53, %v5959_v53  ;;  %v6188_v6 = vld [vmem:[#allocation3 + $0xf8] sm:$0xf]  ;;  %v6543_v19 = vrot.slane %v15031_v57, 7  ;;  %v10917_v28 = vcombine.low %v6530_v62, %v6533_v26  ;;  %v6550_v51 = vrot.slane %v15042_v16, 7 }
 0x384   : > { %6123 = vst.msk [vmem:[#allocation3 + $0x118] sm:$0xf] %vm6091_vm3, %v11328_v22  ;;  %v6187_v55 = vld [vmem:[#allocation3 + $0xe8] sm:$0xf]  ;;  %v10883_v0 = vcombine.low %v15137_v36, %v6188_v6  ;;  %v6540_v41 = vsel %vm15120_vm13, %v6538_v35, %v6539_v48  ;;  %v7202_v40 = vsel %vm6320_vm15, %v15000_v7, 0  ;;  %v6537_v50 = vsel %vm15120_vm13, %v10902_v49, %v6536_v63 }
 0x385   : > { %6121 = vst.msk [vmem:[#allocation3 + $0x108] sm:$0xf] %vm6091_vm3, %v11326_v11  ;;  %v10882_v23 = vcombine.low %v15133_v38, %v6187_v55  ;;  %v6133_v8 = vld [vmem:[#allocation3 + $0x30] sm:$0x8]  ;;  %v6545_v1 = vrot.slane %v6543_v19, 4  ;;  %v10918_v58 = vcombine.low %v6537_v50, %v6540_v41  ;;  %v6546_v45 = vrot.slane %v6135_v47, 7 }
 0x386   : > { %v6136_v32 = vld [vmem:[#allocation3 + $0x40] sm:$0x8]  ;;  %v15158_v57 = vld [vmem:[%s16092_s3 + $0xc] sm:$0xf]  ;;  %v6552_v16 = vrot.slane %v6550_v51, 4  ;;  %v6553_v12 = vrot.slane %v6138_v2, 7 }
 0x387   : > { %11971 = vmatprep.mubr.msk.bf16.mxu1 %vm6271_vm0, %v10882_v23  ;;  %v10903_v7 = vrot.slane %v6133_v8, 11  ;;  %v10904_v61 = vrot.slane %v6136_v32, 11  ;;  %v6557_v3 = vrot.slane %v15047_v17, 7  ;;  %v6547_v34 = vsel %vm15120_vm13, %v6545_v1, %v6546_v45  ;;  %v6141_v29 = vld [vmem:[#allocation3 + $0x58] sm:$0x7] }
 0x388   : > { %11972 = vmatmul.mubr.msk.bf16.gmra.mrb[28].mxu1 %vm6271_vm0, %v10883_v0  ;;  %v6564_v25 = vrot.slane %v15058_v30, 7  ;;  %v6554_v13 = vsel %vm15120_vm13, %v6552_v16, %v6553_v12  ;;  %v6144_v44 = vld [vmem:[#allocation3 + $0x68] sm:$0x7]  ;;  %v6139_v59 = vld [vmem:[#allocation3 + $0x50] sm:$0x8]  ;;  %v6560_v10 = vrot.slane %v6141_v29, 7 }
 0x389   : > { %11977 = vmatprep.mubr.msk.bf16.mxu1 %vm6271_vm0, %v10916_v27  ;;  %v6544_v31 = vsel %vm15120_vm13, %v10903_v7, %v6543_v19  ;;  %v6551_v4 = vsel %vm15120_vm13, %v10904_v61, %v6550_v51  ;;  %v6559_v5 = vrot.slane %v6557_v3, 4  ;;  %v6142_v14 = vld [vmem:[#allocation3 + $0x60] sm:$0x8]  ;;  %v6567_v30 = vrot.slane %v6144_v44, 7  ;;  %v6147_v63 = vld [vmem:[#allocation3 + $0x78] sm:$0x7] }
 0x38a   : > { %v10919_v33 = vcombine.low %v6544_v31, %v6547_v34  ;;  %v10920_v17 = vcombine.low %v6551_v4, %v6554_v13  ;;  %v6566_v46 = vrot.slane %v6564_v25, 4  ;;  %v10905_v22 = vrot.slane %v6139_v59, 11  ;;  %v6150_v24 = vld [vmem:[#allocation3 + $0x88] sm:$0x7]  ;;  %v6145_v27 = vld [vmem:[#allocation3 + $0x70] sm:$0x8] }
 0x38b   : > { %v10906_v53 = vrot.slane %v6142_v14, 11  ;;  %v6571_v9 = vrot.slane %v15063_v21, 7  ;;  %v6561_v11 = vsel %vm15120_vm13, %v6559_v5, %v6560_v10  ;;  %v6578_v6 = vrot.slane %v15074_v15, 7  ;;  %v6148_v42 = vld [vmem:[#allocation3 + $0x80] sm:$0x8] }
 0x38c   : > { %v6568_v52 = vsel %vm15120_vm13, %v6566_v46, %v6567_v30  ;;  %v6558_v55 = vsel %vm15120_vm13, %v10905_v22, %v6557_v3  ;;  %v6574_v0 = vrot.slane %v6147_v63, 7  ;;  %v6581_v15 = vrot.slane %v6150_v24, 7  ;;  %v6153_v51 = vld [vmem:[#allocation3 + $0x98] sm:$0x7]  ;;  %v6156_v47 = vld [vmem:[#allocation3 + $0xa8] sm:$0x7] }
 0x38d   : > { %v10921_v43 = vcombine.low %v6558_v55, %v6561_v11  ;;  %v6565_v23 = vsel %vm15120_vm13, %v10906_v53, %v6564_v25  ;;  %v6573_v60 = vrot.slane %v6571_v9, 4  ;;  %v6580_v35 = vrot.slane %v6578_v6, 4  ;;  %v6151_v50 = vld [vmem:[#allocation3 + $0x90] sm:$0x8]  ;;  %v6159_v34 = vld [vmem:[#allocation3 + $0xb8] sm:$0x7] }
 0x38e   : > { %v10922_v21 = vcombine.low %v6565_v23, %v6568_v52  ;;  %v10907_v48 = vrot.slane %v6145_v27, 11  ;;  %v10908_v62 = vrot.slane %v6148_v42, 11  ;;  %v6585_v26 = vrot.slane %v15079_v20, 7  ;;  %v6162_v13 = vld [vmem:[#allocation3 + $0xc8] sm:$0x7] }
 0x38f   : > { %v6575_v49 = vsel %vm15120_vm13, %v6573_v60, %v6574_v0  ;;  %v6592_v19 = vrot.slane %v15090_v37, 7  ;;  %v6588_v1 = vrot.slane %v6153_v51, 7  ;;  %v6595_v37 = vrot.slane %v6156_v47, 7  ;;  %v6157_v44 = vld [vmem:[#allocation3 + $0xb0] sm:$0x8] }
 0x390   : > { %11978 = vmatmul.mubr.msk.bf16.vlgmr.msra.gmra.mrb[0].mxu1 %vm6271_vm0, %v10917_v28  ;;  %v6582_v28 = vsel %vm15120_vm13, %v6580_v35, %v6581_v15  ;;  %v6572_v41 = vsel %vm15120_vm13, %v10907_v48, %v6571_v9  ;;  %v6587_v8 = vrot.slane %v6585_v26, 4  ;;  %v10909_v32 = vrot.slane %v6151_v50, 11  ;;  %v6160_v59 = vld [vmem:[#allocation3 + $0xc0] sm:$0x8]  ;;  %v6165_v53 = vld [vmem:[#allocation3 + $0xd8] sm:$0x7] }
 0x391   : > { %12010 = vmatpush3.bf16.msra.mxu1 %v7202_v40  ;;  %11981 = vmatprep.mubr.msk.bf16.mxu1 %vm6271_vm0, %v10918_v58  ;;  %v10923_v2 = vcombine.low %v6572_v41, %v6575_v49  ;;  %v6579_v40 = vsel %vm15120_vm13, %v10908_v62, %v6578_v6  ;;  %v6154_v58 = vld [vmem:[#allocation3 + $0xa0] sm:$0x8]  ;;  %v6594_v45 = vrot.slane %v6592_v19, 4  ;;  %v6599_v12 = vrot.slane %v15095_v56, 7  ;;  %v6168_v11 = vld [vmem:[#allocation3 + $0xe8] sm:$0x7] }
 0x392   : > { %12771 = vmatprep.subr.msk.bf16.mxu1 %vm6320_vm15, %v15158_v57  ;;  %v10924_v20 = vcombine.low %v6579_v40, %v6582_v28  ;;  %v10910_v16 = vrot.slane %v6154_v58, 11  ;;  %v6589_v7 = vsel %vm15120_vm13, %v6587_v8, %v6588_v1  ;;  %v6606_v61 = vrot.slane %v15107_v18, 7  ;;  %v6163_v63 = vld [vmem:[#allocation3 + $0xd0] sm:$0x8]  ;;  %v6893_v23 = vld [vmem:[#allocation3 + $0x8] sm:$0xf] }
 0x393   : > { %v6596_v3 = vsel %vm15120_vm13, %v6594_v45, %v6595_v37  ;;  %v6586_v25 = vsel %vm15120_vm13, %v10909_v32, %v6585_v26  ;;  %v6602_v4 = vrot.slane %v6159_v34, 7  ;;  %v6609_v18 = vrot.slane %v6162_v13, 7  ;;  %v6892_v0 = vld [vmem:[#allocation3 + $0x4] sm:$0xe]  ;;  %v6894_v48 = vld [vmem:[#allocation3 + $0xc] sm:$0x1] }
 0x394   : > { %v10925_v29 = vcombine.low %v6586_v25, %v6589_v7  ;;  %v6593_v31 = vsel %vm15120_vm13, %v10910_v16, %v6592_v19  ;;  %v6608_v5 = vrot.slane %v6606_v61, 4  ;;  %v10912_v10 = vrot.slane %v6160_v59, 11  ;;  %v6171_v26 = vld [vmem:[#allocation3 + $0xf8] sm:$0x7]  ;;  %v6169_v41 = vld [vmem:[#allocation3 + $0xf0] sm:$0x8] }
 0x395   : > { %v10926_v56 = vcombine.low %v6593_v31, %v6596_v3  ;;  %v6613_v14 = vrot.slane %v15112_v39, 7  ;;  %v6620_v30 = vrot.slane %v15133_v38, 7  ;;  %v6616_v24 = vrot.slane %v6165_v53, 7  ;;  %v6895_v58 = vld [vmem:[#allocation3 + $0x14] sm:$0xe] }
 0x396   : > { %v6610_v22 = vsel %vm15120_vm13, %v6608_v5, %v6609_v18  ;;  %v6607_v52 = vsel %vm15120_vm13, %v10912_v10, %v6606_v61  ;;  %v6623_v38 = vrot.slane %v6168_v11, 7  ;;  %v10913_v60 = vrot.slane %v6163_v63, 11  ;;  %v6899_v37 = vld [vmem:[#allocation3 + $0x28] sm:$0xf]  ;;  %v6900_v31 = vld [vmem:[#allocation3 + $0x2c] sm:$0x1] }
 0x397   : > { %v6615_v55 = vrot.slane %v6613_v14, 4  ;;  %v10928_v39 = vcombine.low %v6607_v52, %v6610_v22  ;;  %v6622_v27 = vrot.slane %v6620_v30, 4  ;;  %v6995_v42 = vrot.slane %v6893_v23, 5  ;;  %v6898_v18 = vld [vmem:[#allocation3 + $0x24] sm:$0xe] }
 0x398   : > { %11982 = vmatmul.mubr.msk.bf16.gmra.mrb[4].mxu1 %vm6271_vm0, %v10919_v33  ;;  %v6601_v33 = vrot.slane %v6599_v12, 4  ;;  %v6627_v35 = vrot.slane %v15137_v36, 7  ;;  %v6614_v49 = vsel %vm15120_vm13, %v10913_v60, %v6613_v14  ;;  %vm6990_vm3 = vcmask 1042432   ;;  %v6903_v22 = vld [vmem:[#allocation3 + $0x3c] sm:$0x1] }
 0x399   : > { %11985 = vmatprep.mubr.msk.bf16.mxu1 %vm6271_vm0, %v10920_v17  ;;  %v10911_v17 = vrot.slane %v6157_v44, 11  ;;  %v6617_v15 = vsel %vm15120_vm13, %v6615_v55, %v6616_v24  ;;  %v6624_v62 = vsel %vm15120_vm13, %v6622_v27, %v6623_v38  ;;  %v10949_v19 = vrot.slane %v6892_v0, 9  ;;  %vm15236_vm1 = vmor %vm6990_vm3, %vm6991_vm14  ;;  %v6901_v24 = vld [vmem:[#allocation3 + $0x34] sm:$0xe]  ;;  %v6908_v27 = vld [vmem:[#allocation3 + $0x58] sm:$0xf] }
 0x39a   : > { %v6603_v46 = vsel %vm15120_vm13, %v6601_v33, %v6602_v4  ;;  %v10929_v28 = vcombine.low %v6614_v49, %v6617_v15  ;;  %v6997_v36 = vrot.slane %v6995_v42, 4  ;;  %v6998_v47 = vrot.slane %v6894_v48, 5  ;;  %v6902_v4 = vld [vmem:[#allocation3 + $0x38] sm:$0xf]  ;;  %v6911_v38 = vld [vmem:[#allocation3 + $0x68] sm:$0xf] }
 0x39b   : > { %v6600_v9 = vsel %vm15120_vm13, %v10911_v17, %v6599_v12  ;;  %v6629_v40 = vrot.slane %v6627_v35, 4  ;;  %v6630_v8 = vrot.slane %v6171_v26, 7  ;;  %v6996_v32 = vsel %vm15236_vm1, %v10949_v19, %v6995_v42  ;;  %v6897_v12 = vld [vmem:[#allocation3 + $0x1c] sm:$0x1]  ;;  %v6905_v17 = vld [vmem:[#allocation3 + $0x48] sm:$0xf] }
 0x39c   : > { %v10927_v6 = vcombine.low %v6600_v9, %v6603_v46  ;;  %v6999_v16 = vsel %vm15236_vm1, %v6997_v36, %v6998_v47  ;;  %v10950_v61 = vrot.slane %v6895_v58, 9  ;;  %v7009_v3 = vrot.slane %v6899_v37, 5  ;;  %v6906_v9 = vld [vmem:[#allocation3 + $0x4c] sm:$0x1]  ;;  %v6909_v15 = vld [vmem:[#allocation3 + $0x5c] sm:$0x1] }
 0x39d   : > { %v6631_v7 = vsel %vm15120_vm13, %v6629_v40, %v6630_v8  ;;  %v10965_v25 = vcombine.low %v6996_v32, %v6999_v16  ;;  %v7016_v10 = vrot.slane %v6902_v4, 5  ;;  %v10951_v46 = vrot.slane %v6898_v18, 9  ;;  %v6912_v26 = vld [vmem:[#allocation3 + $0x6c] sm:$0x1]  ;;  %v6907_v36 = vld [vmem:[#allocation3 + $0x54] sm:$0xe] }
 0x39e   : > { %v7011_v33 = vrot.slane %v7009_v3, 4  ;;  %v7023_v53 = vrot.slane %v6905_v17, 5  ;;  %v7704_v11 = vsel %vm6320_vm15, %v15158_v57, 0  ;;  %v7019_v55 = vrot.slane %v6903_v22, 5  ;;  %v6904_v57 = vld [vmem:[#allocation3 + $0x44] sm:$0xe] }
 0x39f   : > { %v7018_v63 = vrot.slane %v7016_v10, 4  ;;  %v7026_v23 = vrot.slane %v6906_v9, 5  ;;  %v10952_v60 = vrot.slane %v6901_v24, 9  ;;  %v7030_v0 = vrot.slane %v6908_v27, 5  ;;  %v6914_v40 = vld [vmem:[#allocation3 + $0x78] sm:$0xf] }
 0x3a0   : > { %11986 = vmatmul.mubr.msk.bf16.gmra.mrb[8].mxu1 %vm6271_vm0, %v10921_v43  ;;  %v6166_v43 = vld [vmem:[#allocation3 + $0xe0] sm:$0x8]  ;;  %v10953_v42 = vrot.slane %v6904_v57, 9  ;;  %v7037_v48 = vrot.slane %v6911_v38, 5  ;;  %v6917_v8 = vld [vmem:[#allocation3 + $0x88] sm:$0xf] }
 0x3a1   : > { %11989 = vmatprep.mubr.msk.bf16.mxu1 %vm6271_vm0, %v10922_v21  ;;  %v10914_v21 = vrot.slane %v6166_v43, 11  ;;  %v7025_v43 = vrot.slane %v7023_v53, 4  ;;  %v6915_v16 = vld [vmem:[#allocation3 + $0x7c] sm:$0x1]  ;;  %v6916_v4 = vld [vmem:[#allocation3 + $0x84] sm:$0xe] }
 0x3a2   : > { %v7024_v19 = vsel %vm15236_vm1, %v10953_v42, %v7023_v53  ;;  %v7039_v47 = vrot.slane %v7037_v48, 4  ;;  %v6924_v53 = vld [vmem:[#allocation3 + $0xac] sm:$0x1]  ;;  %v6922_v27 = vld [vmem:[#allocation3 + $0xa4] sm:$0xe] }
 0x3a3   : > { %v6621_v51 = vsel %vm15120_vm13, %v10914_v21, %v6620_v30  ;;  %v7020_v21 = vsel %vm15236_vm1, %v7018_v63, %v7019_v55  ;;  %v6919_v55 = vld [vmem:[#allocation3 + $0x94] sm:$0xe]  ;;  %v6929_v57 = vld [vmem:[#allocation3 + $0xc8] sm:$0xf] }
 0x3a4   : > { %v10930_v50 = vcombine.low %v6621_v51, %v6624_v62  ;;  %v7017_v62 = vsel %vm15236_vm1, %v10952_v60, %v7016_v10  ;;  %v7032_v51 = vrot.slane %v7030_v0, 4  ;;  %v10957_v10 = vrot.slane %v6916_v4, 9  ;;  %v15319_v4 = vld [vmem:[#allocation3 + $0x24] sm:$0xf] }
 0x3a5   : > { %v10968_v49 = vcombine.low %v7017_v62, %v7020_v21  ;;  %v10958_v38 = vrot.slane %v6919_v55, 9  ;;  %v6930_v62 = vld [vmem:[#allocation3 + $0xcc] sm:$0x1]  ;;  %v6937_v55 = vld [vmem:[#allocation3 + $0xf4] sm:$0xe] }
 0x3a8   : > { %11990 = vmatmul.mubr.msk.bf16.gmra.mrb[12].mxu1 %vm6271_vm0, %v10923_v2  ;;  %v6896_v2 = vld [vmem:[#allocation3 + $0x18] sm:$0xf] }
 0x3a9   : > { %11993 = vmatprep.mubr.msk.bf16.mxu1 %vm6271_vm0, %v10924_v20  ;;  %v10915_v20 = vrot.slane %v6169_v41, 11  ;;  %v7002_v45 = vrot.slane %v6896_v2, 5  ;;  %v7033_v41 = vrot.slane %v6909_v15, 5  ;;  %v7040_v2 = vrot.slane %v6912_v26, 5 }
 0x3aa   : > { %v7079_v15 = vrot.slane %v6929_v57, 5 }
 0x3ab   : > { %v6628_v34 = vsel %vm15120_vm13, %v10915_v20, %v6627_v35  ;;  %v7004_v13 = vrot.slane %v7002_v45, 4  ;;  %v7003_v59 = vsel %vm15236_vm1, %v10950_v61, %v7002_v45  ;;  %v7027_v35 = vsel %vm15236_vm1, %v7025_v43, %v7026_v23  ;;  %v6918_v61 = vld [vmem:[#allocation3 + $0x8c] sm:$0x1]  ;;  %v6926_v23 = vld [vmem:[#allocation3 + $0xb8] sm:$0xf] }
 0x3ac   : > { %v10931_v44 = vcombine.low %v6628_v34, %v6631_v7  ;;  %v10954_v20 = vrot.slane %v6907_v36, 9  ;;  %v7034_v58 = vsel %vm15236_vm1, %v7032_v51, %v7033_v41  ;;  %v7044_v45 = vrot.slane %v6914_v40, 5  ;;  %v6925_v41 = vld [vmem:[#allocation3 + $0xb4] sm:$0xe]  ;;  %v6928_v40 = vld [vmem:[#allocation3 + $0xc4] sm:$0xe] }
 0x3ad   : > { %v7041_v32 = vsel %vm15236_vm1, %v7039_v47, %v7040_v2  ;;  %v7068_v43 = vrot.slane %v6924_v53, 5  ;;  %v7072_v21 = vrot.slane %v6926_v23, 5  ;;  %v7081_v36 = vrot.slane %v7079_v15, 4  ;;  %v6932_v2 = vld [vmem:[#allocation3 + $0xd8] sm:$0xf] }
 0x3ae   : > { %v7031_v7 = vsel %vm15236_vm1, %v10954_v20, %v7030_v0  ;;  %v10959_v0 = vrot.slane %v6922_v27, 9  ;;  %v7082_v47 = vrot.slane %v6930_v62, 5  ;;  %v15331_v23 = vld [vmem:[#allocation3 + $0x34] sm:$0xf]  ;;  %v15334_v27 = vld [vmem:[#allocation3 + $0x44] sm:$0xf] }
 0x3b0   : > { %11994 = vmatmul.mubr.msk.bf16.gmra.mrb[16].mxu1 %vm6271_vm0, %v10925_v29  ;;  %v7005_v29 = vrot.slane %v6897_v12, 5  ;;  %v7051_v12 = vrot.slane %v6917_v8, 5  ;;  %v10960_v8 = vrot.slane %v6925_v41, 9  ;;  %v7403_v41 = vld [vmem:[#allocation3 + $0x40] sm:$0x8] }
 0x3b1   : > { %11997 = vmatprep.mubr.msk.bf16.mxu1 %vm6271_vm0, %v10926_v56  ;;  %v7012_v56 = vrot.slane %v6900_v31, 5  ;;  %v6913_v31 = vld [vmem:[#allocation3 + $0x74] sm:$0xe] }
 0x3b2   : > { %v7006_v5 = vsel %vm15236_vm1, %v7004_v13, %v7005_v29  ;;  %v7046_v13 = vrot.slane %v7044_v45, 4  ;;  %v7047_v29 = vrot.slane %v6915_v16, 5 }
 0x3b3   : > { %v10966_v14 = vcombine.low %v7003_v59, %v7006_v5  ;;  %v7013_v30 = vsel %vm15236_vm1, %v7011_v33, %v7012_v56  ;;  %v7054_v33 = vrot.slane %v6918_v61, 5  ;;  %v6920_v56 = vld [vmem:[#allocation3 + $0x98] sm:$0xf]  ;;  %v6923_v59 = vld [vmem:[#allocation3 + $0xa8] sm:$0xf]  ;;  %v10956_v5 = vrot.slane %v6913_v31, 9 }
 0x3b4   : > { %v7048_v18 = vsel %vm15236_vm1, %v7046_v13, %v7047_v29  ;;  %v7058_v17 = vrot.slane %v6920_v56, 5  ;;  %v6931_v29 = vld [vmem:[#allocation3 + $0xd4] sm:$0xe]  ;;  %v6934_v56 = vld [vmem:[#allocation3 + $0xe4] sm:$0xe] }
 0x3b5   : > { %v7045_v22 = vsel %vm15236_vm1, %v10956_v5, %v7044_v45  ;;  %v10961_v45 = vrot.slane %v6928_v40, 9 }
 0x3b6   : > { %v10972_v9 = vcombine.low %v7045_v22, %v7048_v18  ;;  %v7399_v22 = vld [vmem:[#allocation3 + $0x28] sm:$0x7] }
 0x3b8   : > { %11998 = vmatmul.mubr.msk.bf16.gmra.mrb[20].mxu1 %vm6271_vm0, %v10927_v6  ;;  %v7010_v6 = vsel %vm15236_vm1, %v10951_v46, %v7009_v3  ;;  %v10970_v3 = vcombine.low %v7031_v7, %v7034_v58  ;;  %v6921_v46 = vld [vmem:[#allocation3 + $0x9c] sm:$0x1]  ;;  %v7086_v58 = vrot.slane %v6932_v2, 5  ;;  %v6936_v7 = vld [vmem:[#allocation3 + $0xec] sm:$0x1] }
 0x3b9   : > { %12001 = vmatprep.mubr.msk.bf16.mxu1 %vm6271_vm0, %v10928_v39  ;;  %v10967_v52 = vcombine.low %v7010_v6, %v7013_v30  ;;  %v15263_v39 = vld [vmem:[%s16092_s3 + $0x10] sm:$0xf]  ;;  %v7065_v30 = vrot.slane %v6923_v59, 5  ;;  %v7061_v63 = vrot.slane %v6921_v46, 5  ;;  %v10962_v59 = vrot.slane %v6931_v29, 9 }
 0x3ba   : > { %v7497_v46 = vrot.slane %v15319_v4, 7  ;;  %v15347_v2 = vld [vmem:[#allocation3 + $0x54] sm:$0xf] }
 0x3bb   : > { %v7067_v24 = vrot.slane %v7065_v30, 4 }
 0x3bd   : > { %v7069_v42 = vsel %vm15236_vm1, %v7067_v24, %v7068_v43  ;;  %v7499_v24 = vrot.slane %v7497_v46, 4  ;;  %v7500_v43 = vrot.slane %v7399_v22, 7 }
 0x3c0   : > { %12002 = vmatmul.mubr.msk.bf16.gmra.mrb[24].mxu1 %vm6271_vm0, %v10929_v28  ;;  %v10969_v28 = vcombine.low %v7024_v19, %v7027_v35  ;;  %v6927_v35 = vld [vmem:[#allocation3 + $0xbc] sm:$0x1] }
 0x3c1   : > { %12005 = vmatprep.mubr.msk.bf16.mxu1 %vm6271_vm0, %v10930_v50  ;;  %v6910_v50 = vld [vmem:[#allocation3 + $0x64] sm:$0xe]  ;;  %v7075_v51 = vrot.slane %v6927_v35, 5  ;;  %v7511_v35 = vrot.slane %v15334_v27, 7 }
 0x3c2   : > { %v10955_v37 = vrot.slane %v6910_v50, 9  ;;  %v6935_v50 = vld [vmem:[#allocation3 + $0xe8] sm:$0xf] }
 0x3c3   : > { %v7093_v16 = vrot.slane %v6935_v50, 5  ;;  %v15350_v50 = vld [vmem:[#allocation3 + $0x64] sm:$0xf] }
 0x3c4   : > { %v7038_v34 = vsel %vm15236_vm1, %v10955_v37, %v7037_v48  ;;  %v7059_v48 = vsel %vm15236_vm1, %v10958_v38, %v7058_v17  ;;  %v7083_v37 = vsel %vm15236_vm1, %v7081_v36, %v7082_v47  ;;  %v10964_v38 = vrot.slane %v6937_v55, 9 }
 0x3c5   : > { %v7095_v31 = vrot.slane %v7093_v16, 4  ;;  %v7513_v36 = vrot.slane %v7511_v35, 4 }
 0x3c8   : > { %12006 = vmatmul.mubr.msk.bf16.gmra.mrb[28].mxu1 %vm6271_vm0, %v10931_v44  ;;  %v7053_v44 = vrot.slane %v7051_v12, 4 }
 0x3c9   : > { %12011 = vmatprep.mubr.msk.bf16.mxu1 %vm6271_vm0, %v10965_v25  ;;  %v10971_v25 = vcombine.low %v7038_v34, %v7041_v32  ;;  %v6933_v32 = vld [vmem:[#allocation3 + $0xdc] sm:$0x1] }
 0x3ca   : > { %v7089_v13 = vrot.slane %v6933_v32, 5  ;;  %v7525_v32 = vrot.slane %v15350_v50, 7 }
 0x3d0   : > { %12012 = vmatmul.mubr.msk.bf16.vlgmr.msra.gmra.mrb[0].mxu1 %vm6271_vm0, %v10966_v14  ;;  %v7055_v14 = vsel %vm15236_vm1, %v7053_v44, %v7054_v33  ;;  %v7096_v44 = vrot.slane %v6936_v7, 5  ;;  %v6938_v33 = vld [vmem:[#allocation3 + $0xf8] sm:$0xf] }
 0x3d1   : > { %12044 = vmatpush3.bf16.msra.mxu1 %v7704_v11  ;;  %12015 = vmatprep.mubr.msk.bf16.mxu1 %vm6271_vm0, %v10967_v52  ;;  %v7052_v11 = vsel %vm15236_vm1, %v10957_v10, %v7051_v12  ;;  %v7060_v52 = vrot.slane %v7058_v17, 4  ;;  %v7073_v12 = vsel %vm15236_vm1, %v10960_v8, %v7072_v21  ;;  %v7100_v18 = vrot.slane %v6938_v33, 5 }
 0x3d2   : > { %12772 = vmatprep.subr.msk.bf16.mxu1 %vm6320_vm15, %v15263_v39  ;;  %v10973_v6 = vcombine.low %v7052_v11, %v7055_v14  ;;  %v10963_v17 = vrot.slane %v6934_v56, 9  ;;  %v7097_v10 = vsel %vm15236_vm1, %v7095_v31, %v7096_v44  ;;  %v6939_v14 = vld [vmem:[#allocation3 + $0xfc] sm:$0x1]  ;;  %v11000_v8 = vrot.slane %v7403_v41, 11  ;;  %v7409_v31 = vld [vmem:[#allocation3 + $0x60] sm:$0x8] }
 0x3d3   : > { %v7062_v60 = vsel %vm15236_vm1, %v7060_v52, %v7061_v63  ;;  %v7103_v52 = vrot.slane %v6939_v14, 5  ;;  %v7397_v63 = vld [vmem:[#allocation3 + $0x20] sm:$0x8]  ;;  %v15367_v44 = vld [vmem:[%s16092_s3 + $0x14] sm:$0xf]  ;;  %v7527_v33 = vrot.slane %v7525_v32, 4 }
 0x3d4   : > { %v10974_v26 = vcombine.low %v7059_v48, %v7062_v60  ;;  %v10998_v57 = vrot.slane %v7397_v63, 11  ;;  %v7405_v48 = vld [vmem:[#allocation3 + $0x48] sm:$0x7] }
 0x3d5   : > { %v7514_v47 = vrot.slane %v7405_v48, 7  ;;  %v7420_v48 = vld [vmem:[#allocation3 + $0x98] sm:$0x7] }
 0x3d8   : > { %12016 = vmatmul.mubr.msk.bf16.gmra.mrb[4].mxu1 %vm6271_vm0, %v10968_v49  ;;  %v7066_v49 = vsel %vm15236_vm1, %v10959_v0, %v7065_v30  ;;  %v7087_v30 = vsel %vm15236_vm1, %v10962_v59, %v7086_v58  ;;  %v7501_v0 = vsel %vm15120_vm13, %v7499_v24, %v7500_v43  ;;  %v15370_v59 = vld [vmem:[#allocation3 + $0x74] sm:$0xf]  ;;  %v7415_v24 = vld [vmem:[#allocation3 + $0x80] sm:$0x8] }
 0x3d9   : > { %12019 = vmatprep.mubr.msk.bf16.mxu1 %vm6271_vm0, %v10969_v28  ;;  %v10975_v19 = vcombine.low %v7066_v49, %v7069_v42  ;;  %v7074_v28 = vrot.slane %v7072_v21, 4  ;;  %v7504_v21 = vrot.slane %v15331_v23, 7  ;;  %v7402_v42 = vld [vmem:[#allocation3 + $0x38] sm:$0x7]  ;;  %v7400_v49 = vld [vmem:[#allocation3 + $0x30] sm:$0x8] }
 0x3da   : > { %v10999_v40 = vrot.slane %v7400_v49, 11  ;;  %v7423_v49 = vld [vmem:[#allocation3 + $0xa8] sm:$0x7] }
 0x3db   : > { %v7076_v20 = vsel %vm15236_vm1, %v7074_v28, %v7075_v51  ;;  %v7506_v28 = vrot.slane %v7504_v21, 4  ;;  %v7507_v51 = vrot.slane %v7402_v42, 7 }
 0x3dc   : > { %v10976_v61 = vcombine.low %v7073_v12, %v7076_v20  ;;  %v7411_v12 = vld [vmem:[#allocation3 + $0x68] sm:$0x7] }
 0x3dd   : > { %v7508_v20 = vsel %vm15120_vm13, %v7506_v28, %v7507_v51  ;;  %v7528_v56 = vrot.slane %v7411_v12, 7  ;;  %v7418_v51 = vld [vmem:[#allocation3 + $0x90] sm:$0x8] }
 0x3df   : > { %v7529_v14 = vsel %vm15120_vm13, %v7527_v33, %v7528_v56 }
 0x3e0   : > { %12020 = vmatmul.mubr.msk.bf16.gmra.mrb[8].mxu1 %vm6271_vm0, %v10970_v3  ;;  %v7080_v3 = vsel %vm15236_vm1, %v10961_v45, %v7079_v15  ;;  %v7101_v15 = vsel %vm15236_vm1, %v10964_v38, %v7100_v18  ;;  %v7515_v45 = vsel %vm15120_vm13, %v7513_v36, %v7514_v47  ;;  %v15388_v38 = vld [vmem:[#allocation3 + $0x94] sm:$0xf]  ;;  %v7549_v47 = vrot.slane %v7420_v48, 7 }
 0x3e1   : > { %12023 = vmatprep.mubr.msk.bf16.mxu1 %vm6271_vm0, %v10971_v25  ;;  %v10977_v34 = vcombine.low %v7080_v3, %v7083_v37  ;;  %v7088_v25 = vrot.slane %v7086_v58, 4  ;;  %v7518_v58 = vrot.slane %v15347_v2, 7  ;;  %v7408_v37 = vld [vmem:[#allocation3 + $0x58] sm:$0x7]  ;;  %v7512_v3 = vsel %vm15120_vm13, %v11000_v8, %v7511_v35 }
 0x3e2   : > { %v7521_v29 = vrot.slane %v7408_v37, 7  ;;  %v7546_v35 = vrot.slane %v15388_v38, 7  ;;  %v15407_v37 = vld [vmem:[#allocation3 + $0xc4] sm:$0xf] }
 0x3e3   : > { %v7090_v5 = vsel %vm15236_vm1, %v7088_v25, %v7089_v13  ;;  %v11016_v25 = vcombine.low %v7512_v3, %v7515_v45  ;;  %v7520_v13 = vrot.slane %v7518_v58, 4  ;;  %v11005_v45 = vrot.slane %v7418_v51, 11 }
 0x3e4   : > { %v10978_v53 = vcombine.low %v7087_v30, %v7090_v5  ;;  %v15373_v5 = vld [vmem:[#allocation3 + $0x84] sm:$0xf]  ;;  %v7548_v36 = vrot.slane %v7546_v35, 4  ;;  %v7567_v3 = vrot.slane %v15407_v37, 7 }
 0x3e5   : > { %v7539_v30 = vrot.slane %v15373_v5, 7 }
 0x3e7   : > { %v7541_v43 = vrot.slane %v7539_v30, 4 }
 0x3e8   : > { %12024 = vmatmul.mubr.msk.bf16.gmra.mrb[12].mxu1 %vm6271_vm0, %v10972_v9  ;;  %v7094_v9 = vsel %vm15236_vm1, %v10963_v17, %v7093_v16  ;;  %v7505_v16 = vsel %vm15120_vm13, %v10999_v40, %v7504_v21  ;;  %v7522_v17 = vsel %vm15120_vm13, %v7520_v13, %v7521_v29  ;;  %v15391_v21 = vld [vmem:[#allocation3 + $0xa4] sm:$0xf]  ;;  %v7421_v40 = vld [vmem:[#allocation3 + $0xa0] sm:$0x8] }
 0x3e9   : > { %12027 = vmatprep.mubr.msk.bf16.mxu1 %vm6271_vm0, %v10973_v6  ;;  %v10979_v11 = vcombine.low %v7094_v9, %v7097_v10  ;;  %v7102_v6 = vrot.slane %v7100_v18, 4  ;;  %v11015_v7 = vcombine.low %v7505_v16, %v7508_v20  ;;  %v11002_v18 = vrot.slane %v7409_v31, 11  ;;  %v7424_v31 = vld [vmem:[#allocation3 + $0xb0] sm:$0x8] }
 0x3ea   : > { %v7532_v10 = vrot.slane %v15370_v59, 7  ;;  %v7556_v20 = vrot.slane %v7423_v49, 7  ;;  %v7550_v16 = vsel %vm15120_vm13, %v7548_v36, %v7549_v47  ;;  %v15439_v49 = vld [vmem:[#allocation3 + $0x104] sm:$0xf]  ;;  %v7438_v36 = vld [vmem:[#allocation3 + $0xf8] sm:$0x7] }
 0x3eb   : > { %v7104_v60 = vsel %vm15236_vm1, %v7102_v6, %v7103_v52  ;;  %v7412_v6 = vld [vmem:[#allocation3 + $0x70] sm:$0x8]  ;;  %v7595_v47 = vrot.slane %v15439_v49, 7 }
 0x3ec   : > { %v10980_v62 = vcombine.low %v7101_v15, %v7104_v60  ;;  %v7534_v63 = vrot.slane %v7532_v10, 4  ;;  %v11003_v60 = vrot.slane %v7412_v6, 11  ;;  %v7432_v6 = vld [vmem:[#allocation3 + $0xd8] sm:$0x7] }
 0x3f0   : > { %12028 = vmatmul.mubr.msk.bf16.gmra.mrb[16].mxu1 %vm6271_vm0, %v10974_v26  ;;  %v7498_v26 = vsel %vm15120_vm13, %v10998_v57, %v7497_v46  ;;  %v7414_v46 = vld [vmem:[#allocation3 + $0x78] sm:$0x7] }
 0x3f1   : > { %12031 = vmatprep.mubr.msk.bf16.mxu1 %vm6271_vm0, %v10975_v19  ;;  %v11014_v19 = vcombine.low %v7498_v26, %v7501_v0  ;;  %v7535_v55 = vrot.slane %v7414_v46, 7  ;;  %v11004_v0 = vrot.slane %v7415_v24, 11  ;;  %v7533_v26 = vsel %vm15120_vm13, %v11003_v60, %v7532_v10 }
 0x3f2   : > { %v11007_v46 = vrot.slane %v7424_v31, 11 }
 0x3f3   : > { %v7536_v42 = vsel %vm15120_vm13, %v7534_v63, %v7535_v55  ;;  %v7540_v28 = vsel %vm15120_vm13, %v11004_v0, %v7539_v30  ;;  %v15423_v30 = vld [vmem:[#allocation3 + $0xe4] sm:$0xf]  ;;  %v7435_v55 = vld [vmem:[#allocation3 + $0xe8] sm:$0x7] }
 0x3f4   : > { %v7584_v48 = vrot.slane %v7435_v55, 7 }
 0x3f8   : > { %12032 = vmatmul.mubr.msk.bf16.gmra.mrb[20].mxu1 %vm6271_vm0, %v10976_v61  ;;  %v8030_v61 = vsel %vm6320_vm15, %v15263_v39, 0 }
 0x3f9   : > { %12035 = vmatprep.mubr.msk.bf16.mxu1 %vm6271_vm0, %v10977_v34  ;;  %v7406_v34 = vld [vmem:[#allocation3 + $0x50] sm:$0x8] }
 0x3fa   : > { %v11001_v39 = vrot.slane %v7406_v34, 11  ;;  %v7547_v34 = vsel %vm15120_vm13, %v11005_v45, %v7546_v35  ;;  %v7433_v35 = vld [vmem:[#allocation3 + $0xe0] sm:$0x8] }
 0x3fb   : > { %v11021_v13 = vcombine.low %v7547_v34, %v7550_v16 }
 0x3fc   : > { %v7519_v22 = vsel %vm15120_vm13, %v11001_v39, %v7518_v58  ;;  %v15404_v58 = vld [vmem:[#allocation3 + $0xb4] sm:$0xf] }
 0x3fd   : > { %v11017_v9 = vcombine.low %v7519_v22, %v7522_v17  ;;  %v7560_v12 = vrot.slane %v15404_v58, 7  ;;  %v7569_v17 = vrot.slane %v7567_v3, 4 }
 0x3ff   : > { %v7562_v56 = vrot.slane %v7560_v12, 4  ;;  %v7561_v63 = vsel %vm15120_vm13, %v11007_v46, %v7560_v12  ;;  %v7442_v46 = vld [vmem:[#allocation3 + $0x110] sm:$0x8] }
 0x400   : > { %12036 = vmatmul.mubr.msk.bf16.gmra.mrb[24].mxu1 %vm6271_vm0, %v10978_v53  ;;  %v7417_v53 = vld [vmem:[#allocation3 + $0x88] sm:$0x7] }
 0x401   : > { %12039 = vmatprep.mubr.msk.bf16.mxu1 %vm6271_vm0, %v10979_v11  ;;  %v7526_v11 = vsel %vm15120_vm13, %v11002_v18, %v7525_v32  ;;  %v7542_v57 = vrot.slane %v7417_v53, 7  ;;  %v11006_v32 = vrot.slane %v7421_v40, 11  ;;  %v7427_v18 = vld [vmem:[#allocation3 + $0xc0] sm:$0x8] }
 0x402   : > { %v11018_v52 = vcombine.low %v7526_v11, %v7529_v14  ;;  %v15420_v14 = vld [vmem:[#allocation3 + $0xd4] sm:$0xf]  ;;  %v11008_v22 = vrot.slane %v7427_v18, 11 }
 0x403   : > { %v7543_v15 = vsel %vm15120_vm13, %v7541_v43, %v7542_v57  ;;  %v7430_v57 = vld [vmem:[#allocation3 + $0xd0] sm:$0x8] }
 0x404   : > { %v11020_v41 = vcombine.low %v7540_v28, %v7543_v15  ;;  %v7568_v43 = vsel %vm15120_vm13, %v11008_v22, %v7567_v3  ;;  %v7597_v3 = vrot.slane %v7595_v47, 4 }
 0x408   : > { %12040 = vmatmul.mubr.msk.bf16.gmra.mrb[28].mxu1 %vm6271_vm0, %v10980_v62  ;;  %v7553_v62 = vrot.slane %v15391_v21, 7 }
 0x409   : > { %12045 = vmatprep.mubr.msk.bf16.mxu1 %vm6271_vm0, %v11014_v19  ;;  %v11019_v19 = vcombine.low %v7533_v26, %v7536_v42  ;;  %v7577_v42 = vrot.slane %v7432_v6, 7  ;;  %v11009_v26 = vrot.slane %v7430_v57, 11  ;;  %v7901_v57 = vld [vmem:[#allocation3 + $0x48] sm:$0xf] }
 0x40a   : > { %v7555_v8 = vrot.slane %v7553_v62, 4  ;;  %v7554_v29 = vsel %vm15120_vm13, %v11006_v32, %v7553_v62  ;;  %v15436_v62 = vld [vmem:[#allocation3 + $0xf4] sm:$0xf]  ;;  %v7436_v32 = vld [vmem:[#allocation3 + $0xf0] sm:$0x8] }
 0x40b   : > { %v7588_v51 = vrot.slane %v15436_v62, 7 }
 0x40d   : > { %v7590_v12 = vrot.slane %v7588_v51, 4 }
 0x410   : > { %12046 = vmatmul.mubr.msk.bf16.vlgmr.msra.gmra.mrb[0].mxu1 %vm6271_vm0, %v11015_v7  ;;  %v7557_v7 = vsel %vm15120_vm13, %v7555_v8, %v7556_v20  ;;  %v7441_v8 = vld [vmem:[#allocation3 + $0x108] sm:$0x7] }
 0x411   : > { %12078 = vmatpush3.bf16.msra.mxu1 %v8030_v61  ;;  %12049 = vmatprep.mubr.msk.bf16.mxu1 %vm6271_vm0, %v11016_v25  ;;  %v7426_v61 = vld [vmem:[#allocation3 + $0xb8] sm:$0x7]  ;;  %v7429_v25 = vld [vmem:[#allocation3 + $0xc8] sm:$0x7]  ;;  %v11022_v33 = vcombine.low %v7554_v29, %v7557_v7  ;;  %v7591_v7 = vrot.slane %v7438_v36, 7  ;;  %v7598_v34 = vrot.slane %v7441_v8, 7 }
 0x412   : > { %12773 = vmatprep.subr.msk.bf16.mxu1 %vm6320_vm15, %v15367_v44  ;;  %v7563_v39 = vrot.slane %v7426_v61, 7  ;;  %v7570_v10 = vrot.slane %v7429_v25, 7  ;;  %v7439_v61 = vld [vmem:[#allocation3 + $0x100] sm:$0x8]  ;;  %v15452_v25 = vld [vmem:[#allocation3 + $0x114] sm:$0xf] }
 0x413   : > { %v11012_v29 = vrot.slane %v7439_v61, 11  ;;  %v7592_v31 = vsel %vm15120_vm13, %v7590_v12, %v7591_v7  ;;  %v7909_v36 = vld [vmem:[#allocation3 + $0xc8] sm:$0xf] }
 0x414   : > { %v7564_v53 = vsel %vm15120_vm13, %v7562_v56, %v7563_v39  ;;  %v7571_v11 = vsel %vm15120_vm13, %v7569_v17, %v7570_v10  ;;  %v7599_v56 = vsel %vm15120_vm13, %v7597_v3, %v7598_v34  ;;  %v7444_v39 = vld [vmem:[#allocation3 + $0x118] sm:$0x7]  ;;  %v8226_v8 = vld [vmem:[#allocation3 + $0x28] sm:$0xf] }
 0x415   : > { %v11023_v24 = vcombine.low %v7561_v63, %v7564_v53  ;;  %v11024_v60 = vcombine.low %v7568_v43, %v7571_v11  ;;  %v7596_v10 = vsel %vm15120_vm13, %v11012_v29, %v7595_v47  ;;  %v11013_v11 = vrot.slane %v7442_v46, 11  ;;  %v7900_v43 = vld [vmem:[#allocation3 + $0x38] sm:$0xf]  ;;  %v8232_v61 = vld [vmem:[#allocation3 + $0x48] sm:$0xf] }
 0x416   : > { %v11028_v22 = vcombine.low %v7596_v10, %v7599_v56  ;;  %v7910_v47 = vld [vmem:[#allocation3 + $0xd8] sm:$0xf]  ;;  %v8228_v10 = vld [vmem:[#allocation3 + $0x34] sm:$0xe] }
 0x417   : > { %v7914_v3 = vld [vmem:[#allocation3 + $0x118] sm:$0xf] }
 0x418   : > { %12050 = vmatmul.mubr.msk.bf16.gmra.mrb[4].mxu1 %vm6271_vm0, %v11017_v9  ;;  %v7574_v9 = vrot.slane %v15420_v14, 7 }
 0x419   : > { %12053 = vmatprep.mubr.msk.bf16.mxu1 %vm6271_vm0, %v11018_v52  ;;  %v7581_v52 = vrot.slane %v15423_v30, 7 }
 0x41a   : > { %v7576_v0 = vrot.slane %v7574_v9, 4  ;;  %v7575_v40 = vsel %vm15120_vm13, %v11009_v26, %v7574_v9  ;;  %v7605_v9 = vrot.slane %v7444_v39, 7 }
 0x41b   : > { %v7583_v15 = vrot.slane %v7581_v52, 4 }
 0x41c   : > { %v7578_v28 = vsel %vm15120_vm13, %v7576_v0, %v7577_v42  ;;  %v8532_v0 = vsel %vm6320_vm15, %v15367_v44, 0  ;;  %v11049_v42 = vcombine.low %v15334_v27, %v7901_v57  ;;  %v7904_v27 = vld [vmem:[#allocation3 + $0x78] sm:$0xf] }
 0x41d   : > { %v11025_v20 = vcombine.low %v7575_v40, %v7578_v28  ;;  %v11052_v26 = vcombine.low %v15370_v59, %v7904_v27  ;;  %v7906_v28 = vld [vmem:[#allocation3 + $0x98] sm:$0xf]  ;;  %v7911_v40 = vld [vmem:[#allocation3 + $0xe8] sm:$0xf]  ;;  %v15530_v27 = vld [vmem:[%s16092_s3 + $0x1c] sm:$0xf] }
 0x420   : > { %12054 = vmatmul.mubr.msk.bf16.gmra.mrb[8].mxu1 %vm6271_vm0, %v11019_v19  ;;  %v11010_v19 = vrot.slane %v7433_v35, 11  ;;  %v15480_v35 = vld [vmem:[%s16092_s3 + $0x18] sm:$0xf] }
 0x421   : > { %12057 = vmatprep.mubr.msk.bf16.mxu1 %vm6271_vm0, %v11020_v41  ;;  %v7585_v41 = vsel %vm15120_vm13, %v7583_v15, %v7584_v48  ;;  %v7905_v48 = vld [vmem:[#allocation3 + $0x88] sm:$0xf] }
 0x422   : > { %v7582_v45 = vsel %vm15120_vm13, %v11010_v19, %v7581_v52  ;;  %v7899_v52 = vld [vmem:[#allocation3 + $0x28] sm:$0xf]  ;;  %v11053_v19 = vcombine.low %v15373_v5, %v7905_v48  ;;  %v11057_v5 = vcombine.low %v15407_v37, %v7909_v36  ;;  %v8234_v48 = vld [vmem:[#allocation3 + $0x54] sm:$0xe] }
 0x423   : > { %v11026_v16 = vcombine.low %v7582_v45, %v7585_v41  ;;  %v7908_v41 = vld [vmem:[#allocation3 + $0xb8] sm:$0xf]  ;;  %v7913_v45 = vld [vmem:[#allocation3 + $0x108] sm:$0xf] }
 0x424   : > { %v11056_v59 = vcombine.low %v15404_v58, %v7908_v41  ;;  %v8325_v58 = vrot.slane %v8226_v8, 5 }
 0x426   : > { %v8327_v12 = vrot.slane %v8325_v58, 4 }
 0x428   : > { %12058 = vmatmul.mubr.msk.bf16.gmra.mrb[12].mxu1 %vm6271_vm0, %v11021_v13  ;;  %v11011_v13 = vrot.slane %v7436_v32, 11  ;;  %v8227_v32 = vld [vmem:[#allocation3 + $0x2c] sm:$0x1] }
 0x429   : > { %12061 = vmatprep.mubr.msk.bf16.mxu1 %vm6271_vm0, %v11022_v33  ;;  %v7602_v33 = vrot.slane %v15452_v25, 7  ;;  %v8328_v7 = vrot.slane %v8227_v32, 5  ;;  %v8240_v32 = vld [vmem:[#allocation3 + $0x74] sm:$0xe] }
 0x42a   : > { %v7589_v18 = vsel %vm15120_vm13, %v11011_v13, %v7588_v51  ;;  %v7907_v51 = vld [vmem:[#allocation3 + $0xa8] sm:$0xf] }
 0x42b   : > { %v11027_v17 = vcombine.low %v7589_v18, %v7592_v31  ;;  %v7604_v53 = vrot.slane %v7602_v33, 4  ;;  %v7603_v63 = vsel %vm15120_vm13, %v11013_v11, %v7602_v33  ;;  %v8329_v29 = vsel %vm15236_vm1, %v8327_v12, %v8328_v7  ;;  %v8230_v31 = vld [vmem:[#allocation3 + $0x3c] sm:$0x1]  ;;  %v8238_v11 = vld [vmem:[#allocation3 + $0x68] sm:$0xf] }
 0x42c   : > { %v8339_v33 = vrot.slane %v8232_v61, 5  ;;  %v8247_v12 = vld [vmem:[#allocation3 + $0x98] sm:$0xf]  ;;  %v8243_v7 = vld [vmem:[#allocation3 + $0x84] sm:$0xe] }
 0x42d   : > { %v7606_v6 = vsel %vm15120_vm13, %v7604_v53, %v7605_v9  ;;  %v8235_v53 = vld [vmem:[#allocation3 + $0x58] sm:$0xf]  ;;  %v8231_v9 = vld [vmem:[#allocation3 + $0x44] sm:$0xe] }
 0x42e   : > { %v11029_v55 = vcombine.low %v7603_v63, %v7606_v6  ;;  %v8341_v46 = vrot.slane %v8339_v33, 4  ;;  %v11081_v6 = vrot.slane %v8228_v10, 9  ;;  %v11082_v63 = vrot.slane %v8231_v9, 9  ;;  %v8246_v10 = vld [vmem:[#allocation3 + $0x94] sm:$0xe] }
 0x42f   : > { %v8249_v9 = vld [vmem:[#allocation3 + $0xa4] sm:$0xe] }
 0x430   : > { %12062 = vmatmul.mubr.msk.bf16.gmra.mrb[16].mxu1 %vm6271_vm0, %v11023_v24  ;;  %v11047_v24 = vcombine.low %v15319_v4, %v7899_v52  ;;  %v7902_v4 = vld [vmem:[#allocation3 + $0x58] sm:$0xf]  ;;  %v8346_v52 = vrot.slane %v8235_v53, 5 }
 0x431   : > { %12065 = vmatprep.mubr.msk.bf16.mxu1 %vm6271_vm0, %v11024_v60  ;;  %v11048_v60 = vcombine.low %v15331_v23, %v7900_v43  ;;  %v7903_v23 = vld [vmem:[#allocation3 + $0x68] sm:$0xf]  ;;  %v11050_v15 = vcombine.low %v15347_v2, %v7902_v4  ;;  %v11054_v2 = vcombine.low %v15388_v38, %v7906_v28  ;;  %v11058_v38 = vcombine.low %v15420_v14, %v7910_v47  ;;  %v8229_v14 = vld [vmem:[#allocation3 + $0x38] sm:$0xf] }
 0x432   : > { %v11051_v44 = vcombine.low %v15350_v50, %v7903_v23  ;;  %v11055_v50 = vcombine.low %v15391_v21, %v7907_v51  ;;  %v11059_v21 = vcombine.low %v15423_v30, %v7911_v40  ;;  %v8225_v30 = vld [vmem:[#allocation3 + $0x24] sm:$0xe]  ;;  %v8332_v34 = vrot.slane %v8229_v14, 5  ;;  %v8241_v28 = vld [vmem:[#allocation3 + $0x78] sm:$0xf] }
 0x433   : > { %v11080_v13 = vrot.slane %v8225_v30, 9  ;;  %v8353_v43 = vrot.slane %v8238_v11, 5  ;;  %v8340_v4 = vsel %vm15236_vm1, %v11082_v63, %v8339_v33  ;;  %v8244_v51 = vld [vmem:[#allocation3 + $0x88] sm:$0xf]  ;;  %v8360_v41 = vrot.slane %v8241_v28, 5 }
 0x434   : > { %v8334_v18 = vrot.slane %v8332_v34, 4  ;;  %v8333_v57 = vsel %vm15236_vm1, %v11081_v6, %v8332_v34  ;;  %v8367_v47 = vrot.slane %v8244_v51, 5  ;;  %v8250_v14 = vld [vmem:[#allocation3 + $0xa8] sm:$0xf]  ;;  %v11085_v30 = vrot.slane %v8240_v32, 9 }
 0x435   : > { %v8326_v56 = vsel %vm15236_vm1, %v11080_v13, %v8325_v58  ;;  %v11086_v34 = vrot.slane %v8243_v7, 9  ;;  %v8253_v53 = vld [vmem:[#allocation3 + $0xb8] sm:$0xf]  ;;  %v8256_v11 = vld [vmem:[#allocation3 + $0xc8] sm:$0xf]  ;;  %v11087_v6 = vrot.slane %v8246_v10, 9 }
 0x436   : > { %v11096_v39 = vcombine.low %v8326_v56, %v8329_v29  ;;  %v8248_v29 = vld [vmem:[#allocation3 + $0x9c] sm:$0x1]  ;;  %v8361_v33 = vsel %vm15236_vm1, %v11085_v30, %v8360_v41  ;;  %v11088_v63 = vrot.slane %v8249_v9, 9  ;;  %v8255_v28 = vld [vmem:[#allocation3 + $0xc4] sm:$0xe] }
 0x437   : > { %v8368_v56 = vsel %vm15236_vm1, %v11086_v34, %v8367_v47  ;;  %v8268_v7 = vld [vmem:[#allocation3 + $0x108] sm:$0xf]  ;;  %v15586_v9 = vld [vmem:[#allocation3 + $0x44] sm:$0xf] }
 0x438   : > { %12066 = vmatmul.mubr.msk.bf16.gmra.mrb[20].mxu1 %vm6271_vm0, %v11025_v20  ;;  %v7912_v20 = vld [vmem:[#allocation3 + $0xf8] sm:$0xf] }
 0x439   : > { %12069 = vmatprep.mubr.msk.bf16.mxu1 %vm6271_vm0, %v11026_v16  ;;  %v11060_v37 = vcombine.low %v15436_v62, %v7912_v20  ;;  %v11061_v16 = vcombine.low %v15439_v49, %v7913_v45  ;;  %v8233_v62 = vld [vmem:[#allocation3 + $0x4c] sm:$0x1]  ;;  %v11062_v49 = vcombine.low %v15452_v25, %v7914_v3  ;;  %v8362_v45 = vrot.slane %v8360_v41, 4 }
 0x43a   : > { %v8374_v3 = vrot.slane %v8247_v12, 5  ;;  %v11090_v41 = vrot.slane %v8255_v28, 9  ;;  %v8261_v12 = vld [vmem:[#allocation3 + $0xe4] sm:$0xe] }
 0x43b   : > { %v15601_v28 = vld [vmem:[#allocation3 + $0x64] sm:$0xf] }
 0x440   : > { %12070 = vmatmul.mubr.msk.bf16.gmra.mrb[24].mxu1 %vm6271_vm0, %v11027_v17  ;;  %v8335_v17 = vrot.slane %v8230_v31, 5  ;;  %v8381_v31 = vrot.slane %v8250_v14, 5 }
 0x441   : > { %12073 = vmatprep.mubr.msk.bf16.mxu1 %vm6271_vm0, %v11028_v22  ;;  %v8342_v22 = vrot.slane %v8233_v62, 5  ;;  %v8251_v62 = vld [vmem:[#allocation3 + $0xac] sm:$0x1] }
 0x442   : > { %v8336_v25 = vsel %vm15236_vm1, %v8334_v18, %v8335_v17  ;;  %v8376_v18 = vrot.slane %v8374_v3, 4  ;;  %v8377_v17 = vrot.slane %v8248_v29, 5  ;;  %v8423_v29 = vrot.slane %v8268_v7, 5  ;;  %v15617_v7 = vld [vmem:[#allocation3 + $0x84] sm:$0xf] }
 0x444   : > { %v8425_v10 = vrot.slane %v8423_v29, 4 }
 0x448   : > { %12074 = vmatmul.mubr.msk.bf16.gmra.mrb[28].mxu1 %vm6271_vm0, %v11029_v55  ;;  %v8343_v55 = vsel %vm15236_vm1, %v8341_v46, %v8342_v22  ;;  %v8383_v46 = vrot.slane %v8381_v31, 4  ;;  %v8384_v22 = vrot.slane %v8251_v62, 5 }
 0x449   : > { %12079 = vmatprep.mubr.msk.bf16.mxu1 %vm6271_vm0, %v11047_v24  ;;  %v8236_v24 = vld [vmem:[#allocation3 + $0x5c] sm:$0x1]  ;;  %v11098_v23 = vcombine.low %v8340_v4, %v8343_v55 }
 0x44a   : > { %v8385_v55 = vsel %vm15236_vm1, %v8383_v46, %v8384_v22  ;;  %v8271_v22 = vld [vmem:[#allocation3 + $0x118] sm:$0xf] }
 0x450   : > { %12080 = vmatmul.mubr.msk.bf16.vlgmr.msra.gmra.mrb[0].mxu1 %vm6271_vm0, %v11048_v60  ;;  %v8239_v60 = vld [vmem:[#allocation3 + $0x6c] sm:$0x1] }
 0x451   : > { %12112 = vmatpush3.bf16.msra.mxu1 %v8532_v0  ;;  %12083 = vmatprep.mubr.msk.bf16.mxu1 %vm6271_vm0, %v11049_v42  ;;  %v11097_v0 = vcombine.low %v8333_v57, %v8336_v25  ;;  %v9035_v42 = vsel %vm6320_vm15, %v15480_v35, 0  ;;  %v8378_v25 = vsel %vm15236_vm1, %v8376_v18, %v8377_v17  ;;  %v8375_v57 = vsel %vm15236_vm1, %v11087_v6, %v8374_v3  ;;  %v8264_v17 = vld [vmem:[#allocation3 + $0xf4] sm:$0xe] }
 0x452   : > { %12774 = vmatprep.subr.msk.bf16.mxu1 %vm6320_vm15, %v15480_v35  ;;  %v8237_v35 = vld [vmem:[#allocation3 + $0x64] sm:$0xe]  ;;  %v11092_v3 = vrot.slane %v8261_v12, 9 }
 0x453   : > { %v11084_v36 = vrot.slane %v8237_v35, 9  ;;  %v8262_v35 = vld [vmem:[#allocation3 + $0xe8] sm:$0xf] }
 0x455   : > { %v8354_v8 = vsel %vm15236_vm1, %v11084_v36, %v8353_v43 }
 0x458   : > { %12084 = vmatmul.mubr.msk.bf16.gmra.mrb[4].mxu1 %vm6271_vm0, %v11050_v15  ;;  %v8348_v15 = vrot.slane %v8346_v52, 4 }
 0x459   : > { %12087 = vmatprep.mubr.msk.bf16.mxu1 %vm6271_vm0, %v11051_v44  ;;  %v8349_v44 = vrot.slane %v8236_v24, 5  ;;  %v8254_v24 = vld [vmem:[#allocation3 + $0xbc] sm:$0x1] }
 0x460   : > { %12088 = vmatmul.mubr.msk.bf16.gmra.mrb[8].mxu1 %vm6271_vm0, %v11052_v26  ;;  %v8355_v26 = vrot.slane %v8353_v43, 4  ;;  %v8395_v43 = vrot.slane %v8256_v11, 5  ;;  %v11093_v11 = vrot.slane %v8264_v17, 9 }
 0x461   : > { %12091 = vmatprep.mubr.msk.bf16.mxu1 %vm6271_vm0, %v11053_v19  ;;  %v8356_v19 = vrot.slane %v8239_v60, 5  ;;  %v8257_v60 = vld [vmem:[#allocation3 + $0xcc] sm:$0x1] }
 0x468   : > { %12092 = vmatmul.mubr.msk.bf16.gmra.mrb[12].mxu1 %vm6271_vm0, %v11054_v2  ;;  %v11083_v2 = vrot.slane %v8234_v48, 9  ;;  %v8397_v48 = vrot.slane %v8395_v43, 4 }
 0x469   : > { %12095 = vmatprep.mubr.msk.bf16.mxu1 %vm6271_vm0, %v11055_v50  ;;  %v8350_v50 = vsel %vm15236_vm1, %v8348_v15, %v8349_v44  ;;  %v8391_v15 = vrot.slane %v8254_v24, 5  ;;  %v8252_v44 = vld [vmem:[#allocation3 + $0xb4] sm:$0xe]  ;;  %v8828_v24 = vrot.slane %v15586_v9, 7 }
 0x46a   : > { %v8347_v40 = vsel %vm15236_vm1, %v11083_v2, %v8346_v52  ;;  %v8388_v52 = vrot.slane %v8253_v53, 5  ;;  %v11089_v51 = vrot.slane %v8252_v44, 9  ;;  %v8267_v53 = vld [vmem:[#allocation3 + $0x104] sm:$0xe]  ;;  %v8270_v44 = vld [vmem:[#allocation3 + $0x114] sm:$0xe] }
 0x470   : > { %12096 = vmatmul.mubr.msk.bf16.gmra.mrb[16].mxu1 %vm6271_vm0, %v11056_v59  ;;  %v8357_v59 = vsel %vm15236_vm1, %v8355_v26, %v8356_v19  ;;  %v8398_v26 = vrot.slane %v8257_v60, 5  ;;  %v8259_v19 = vld [vmem:[#allocation3 + $0xd8] sm:$0xf] }
 0x471   : > { %12099 = vmatprep.mubr.msk.bf16.mxu1 %vm6271_vm0, %v11057_v5  ;;  %v8242_v5 = vld [vmem:[#allocation3 + $0x7c] sm:$0x1]  ;;  %v11100_v20 = vcombine.low %v8354_v8, %v8357_v59 }
 0x472   : > { %v8363_v58 = vrot.slane %v8242_v5, 5  ;;  %v8399_v36 = vsel %vm15236_vm1, %v8397_v48, %v8398_v26  ;;  %v8260_v59 = vld [vmem:[#allocation3 + $0xdc] sm:$0x1]  ;;  %v8409_v5 = vrot.slane %v8262_v35, 5  ;;  %v8830_v48 = vrot.slane %v8828_v24, 4 }
 0x474   : > { %v8364_v61 = vsel %vm15236_vm1, %v8362_v45, %v8363_v58  ;;  %v8405_v45 = vrot.slane %v8260_v59, 5  ;;  %v8258_v58 = vld [vmem:[#allocation3 + $0xd4] sm:$0xe]  ;;  %v8411_v32 = vrot.slane %v8409_v5, 4  ;;  %v8842_v59 = vrot.slane %v15601_v28, 7 }
 0x475   : > { %v11091_v14 = vrot.slane %v8258_v58, 9  ;;  %v8734_v58 = vld [vmem:[#allocation3 + $0x60] sm:$0x8] }
 0x478   : > { %12100 = vmatmul.mubr.msk.bf16.gmra.mrb[20].mxu1 %vm6271_vm0, %v11058_v38  ;;  %v8245_v38 = vld [vmem:[#allocation3 + $0x8c] sm:$0x1] }
 0x479   : > { %12103 = vmatprep.mubr.msk.bf16.mxu1 %vm6271_vm0, %v11059_v21  ;;  %v11099_v21 = vcombine.low %v8347_v40, %v8350_v50  ;;  %v8402_v50 = vrot.slane %v8259_v19, 5  ;;  %v8263_v40 = vld [vmem:[#allocation3 + $0xec] sm:$0x1]  ;;  %v15598_v19 = vld [vmem:[#allocation3 + $0x54] sm:$0xf] }
 0x480   : > { %12104 = vmatmul.mubr.msk.bf16.gmra.mrb[24].mxu1 %vm6271_vm0, %v11060_v37  ;;  %v8369_v37 = vrot.slane %v8367_v47, 4  ;;  %v8389_v47 = vsel %vm15236_vm1, %v11089_v51, %v8388_v52  ;;  %v11095_v51 = vrot.slane %v8270_v44, 9 }
 0x481   : > { %12107 = vmatprep.mubr.msk.bf16.mxu1 %vm6271_vm0, %v11061_v16  ;;  %v8370_v16 = vrot.slane %v8245_v38, 5 }
 0x483   : > { %v8371_v13 = vsel %vm15236_vm1, %v8369_v37, %v8370_v16  ;;  %v8412_v37 = vrot.slane %v8263_v40, 5  ;;  %v8265_v16 = vld [vmem:[#allocation3 + $0xf8] sm:$0xf] }
 0x485   : > { %v8413_v34 = vsel %vm15236_vm1, %v8411_v32, %v8412_v37  ;;  %v8844_v32 = vrot.slane %v8842_v59, 4 }
 0x488   : > { %12108 = vmatmul.mubr.msk.bf16.gmra.mrb[28].mxu1 %vm6271_vm0, %v11062_v49  ;;  %v11101_v49 = vcombine.low %v8361_v33, %v8364_v61  ;;  %v8416_v61 = vrot.slane %v8265_v16, 5  ;;  %v8269_v33 = vld [vmem:[#allocation3 + $0x10c] sm:$0x1]  ;;  %v15614_v16 = vld [vmem:[#allocation3 + $0x74] sm:$0xf] }
 0x489   : > { %12113 = vmatprep.mubr.msk.bf16.mxu1 %vm6271_vm0, %v11096_v39  ;;  %v11102_v39 = vcombine.low %v8368_v56, %v8371_v13  ;;  %v8266_v13 = vld [vmem:[#allocation3 + $0xfc] sm:$0x1]  ;;  %v8426_v46 = vrot.slane %v8269_v33, 5 }
 0x48a   : > { %v8419_v18 = vrot.slane %v8266_v13, 5  ;;  %v8856_v13 = vrot.slane %v15617_v7, 7 }
 0x490   : > { %12114 = vmatmul.mubr.msk.bf16.vlgmr.msra.gmra.mrb[0].mxu1 %vm6271_vm0, %v11097_v0  ;;  %v11103_v0 = vcombine.low %v8375_v57, %v8378_v25  ;;  %v8430_v25 = vrot.slane %v8271_v22, 5  ;;  %v8730_v57 = vld [vmem:[#allocation3 + $0x48] sm:$0x7]  ;;  %v8858_v22 = vrot.slane %v8856_v13, 4 }
 0x491   : > { %12146 = vmatpush3.bf16.msra.mxu1 %v9035_v42  ;;  %12117 = vmatprep.mubr.msk.bf16.mxu1 %vm6271_vm0, %v11098_v23  ;;  %v8382_v42 = vsel %vm15236_vm1, %v11088_v63, %v8381_v31  ;;  %v8390_v23 = vrot.slane %v8388_v52, 4  ;;  %v8403_v31 = vsel %vm15236_vm1, %v11091_v14, %v8402_v50  ;;  %v11094_v52 = vrot.slane %v8267_v53, 9 }
 0x492   : > { %12775 = vmatprep.subr.msk.bf16.mxu1 %vm6320_vm15, %v15530_v27  ;;  %v11104_v4 = vcombine.low %v8382_v42, %v8385_v55  ;;  %v8427_v63 = vsel %vm15236_vm1, %v8425_v10, %v8426_v46  ;;  %v8272_v55 = vld [vmem:[#allocation3 + $0x11c] sm:$0x1]  ;;  %v8831_v26 = vrot.slane %v8730_v57, 7  ;;  %v11131_v14 = vrot.slane %v8734_v58, 11  ;;  %v8740_v10 = vld [vmem:[#allocation3 + $0x80] sm:$0x8] }
 0x493   : > { %v8392_v2 = vsel %vm15236_vm1, %v8390_v23, %v8391_v15  ;;  %v8433_v23 = vrot.slane %v8272_v55, 5  ;;  %v8728_v15 = vld [vmem:[#allocation3 + $0x40] sm:$0x8] }
 0x494   : > { %v11105_v38 = vcombine.low %v8389_v47, %v8392_v2  ;;  %v11129_v35 = vrot.slane %v8728_v15, 11  ;;  %v8736_v47 = vld [vmem:[#allocation3 + $0x68] sm:$0x7]  ;;  %v15634_v46 = vld [vmem:[%s16092_s3 + $0x20] sm:$0xf] }
 0x495   : > { %v8845_v37 = vrot.slane %v8736_v47, 7  ;;  %v8751_v47 = vld [vmem:[#allocation3 + $0xb8] sm:$0x7] }
 0x498   : > { %12118 = vmatmul.mubr.msk.bf16.gmra.mrb[4].mxu1 %vm6271_vm0, %v11099_v21  ;;  %v8396_v21 = vsel %vm15236_vm1, %v11090_v41, %v8395_v43  ;;  %v8417_v43 = vsel %vm15236_vm1, %v11093_v11, %v8416_v61  ;;  %v8832_v41 = vsel %vm15120_vm13, %v8830_v48, %v8831_v26  ;;  %v15637_v11 = vld [vmem:[#allocation3 + $0x94] sm:$0xf]  ;;  %v8746_v48 = vld [vmem:[#allocation3 + $0xa0] sm:$0x8] }
 0x499   : > { %12121 = vmatprep.mubr.msk.bf16.mxu1 %vm6271_vm0, %v11100_v20  ;;  %v11106_v8 = vcombine.low %v8396_v21, %v8399_v36  ;;  %v8404_v20 = vrot.slane %v8402_v50, 4  ;;  %v8835_v50 = vrot.slane %v15598_v19, 7  ;;  %v8733_v36 = vld [vmem:[#allocation3 + $0x58] sm:$0x7]  ;;  %v8731_v21 = vld [vmem:[#allocation3 + $0x50] sm:$0x8] }
 0x49a   : > { %v11130_v12 = vrot.slane %v8731_v21, 11  ;;  %v8754_v21 = vld [vmem:[#allocation3 + $0xc8] sm:$0x7] }
 0x49b   : > { %v8406_v30 = vsel %vm15236_vm1, %v8404_v20, %v8405_v45  ;;  %v8837_v20 = vrot.slane %v8835_v50, 4  ;;  %v8838_v45 = vrot.slane %v8733_v36, 7 }
 0x49c   : > { %v11107_v62 = vcombine.low %v8403_v31, %v8406_v30  ;;  %v8742_v31 = vld [vmem:[#allocation3 + $0x88] sm:$0x7] }
 0x49d   : > { %v8839_v30 = vsel %vm15120_vm13, %v8837_v20, %v8838_v45  ;;  %v8859_v53 = vrot.slane %v8742_v31, 7  ;;  %v8749_v45 = vld [vmem:[#allocation3 + $0xb0] sm:$0x8] }
 0x49f   : > { %v8860_v55 = vsel %vm15120_vm13, %v8858_v22, %v8859_v53 }
 0x4a0   : > { %12122 = vmatmul.mubr.msk.bf16.gmra.mrb[8].mxu1 %vm6271_vm0, %v11101_v49  ;;  %v8410_v49 = vsel %vm15236_vm1, %v11092_v3, %v8409_v5  ;;  %v8431_v5 = vsel %vm15236_vm1, %v11095_v51, %v8430_v25  ;;  %v8846_v3 = vsel %vm15120_vm13, %v8844_v32, %v8845_v37  ;;  %v15655_v51 = vld [vmem:[#allocation3 + $0xb4] sm:$0xf]  ;;  %v8880_v37 = vrot.slane %v8751_v47, 7 }
 0x4a1   : > { %12125 = vmatprep.mubr.msk.bf16.mxu1 %vm6271_vm0, %v11102_v39  ;;  %v11108_v56 = vcombine.low %v8410_v49, %v8413_v34  ;;  %v8418_v39 = vrot.slane %v8416_v61, 4  ;;  %v8849_v61 = vrot.slane %v15614_v16, 7  ;;  %v8739_v34 = vld [vmem:[#allocation3 + $0x78] sm:$0x7]  ;;  %v8843_v49 = vsel %vm15120_vm13, %v11131_v14, %v8842_v59 }
 0x4a2   : > { %v8852_v17 = vrot.slane %v8739_v34, 7  ;;  %v8877_v59 = vrot.slane %v15655_v51, 7  ;;  %v15674_v34 = vld [vmem:[#allocation3 + $0xe4] sm:$0xf] }
 0x4a3   : > { %v8420_v6 = vsel %vm15236_vm1, %v8418_v39, %v8419_v18  ;;  %v11147_v39 = vcombine.low %v8843_v49, %v8846_v3  ;;  %v8851_v18 = vrot.slane %v8849_v61, 4  ;;  %v11136_v3 = vrot.slane %v8749_v45, 11 }
 0x4a4   : > { %v11109_v60 = vcombine.low %v8417_v43, %v8420_v6  ;;  %v15640_v6 = vld [vmem:[#allocation3 + $0xa4] sm:$0xf]  ;;  %v8879_v32 = vrot.slane %v8877_v59, 4  ;;  %v8898_v49 = vrot.slane %v15674_v34, 7 }
 0x4a5   : > { %v8870_v43 = vrot.slane %v15640_v6, 7 }
 0x4a7   : > { %v8872_v26 = vrot.slane %v8870_v43, 4 }
 0x4a8   : > { %12126 = vmatmul.mubr.msk.bf16.gmra.mrb[12].mxu1 %vm6271_vm0, %v11103_v0  ;;  %v8424_v0 = vsel %vm15236_vm1, %v11094_v52, %v8423_v29  ;;  %v8836_v29 = vsel %vm15120_vm13, %v11130_v12, %v8835_v50  ;;  %v8853_v52 = vsel %vm15120_vm13, %v8851_v18, %v8852_v17  ;;  %v15658_v50 = vld [vmem:[#allocation3 + $0xc4] sm:$0xf]  ;;  %v8752_v12 = vld [vmem:[#allocation3 + $0xc0] sm:$0x8] }
 0x4a9   : > { %12129 = vmatprep.mubr.msk.bf16.mxu1 %vm6271_vm0, %v11104_v4  ;;  %v11110_v42 = vcombine.low %v8424_v0, %v8427_v63  ;;  %v8432_v4 = vrot.slane %v8430_v25, 4  ;;  %v11146_v33 = vcombine.low %v8836_v29, %v8839_v30  ;;  %v11133_v25 = vrot.slane %v8740_v10, 11  ;;  %v8755_v10 = vld [vmem:[#allocation3 + $0xd0] sm:$0x8] }
 0x4aa   : > { %v8863_v63 = vrot.slane %v15637_v11, 7  ;;  %v8887_v30 = vrot.slane %v8754_v21, 7  ;;  %v8881_v29 = vsel %vm15120_vm13, %v8879_v32, %v8880_v37  ;;  %v8770_v32 = vld [vmem:[#allocation3 + $0x120] sm:$0x8]  ;;  %v8772_v37 = vld [vmem:[#allocation3 + $0x128] sm:$0x7] }
 0x4ab   : > { %v8434_v2 = vsel %vm15236_vm1, %v8432_v4, %v8433_v23  ;;  %v8743_v4 = vld [vmem:[#allocation3 + $0x90] sm:$0x8] }
 0x4ac   : > { %v11111_v40 = vcombine.low %v8431_v5, %v8434_v2  ;;  %v8865_v15 = vrot.slane %v8863_v63, 4  ;;  %v11134_v2 = vrot.slane %v8743_v4, 11  ;;  %v8763_v4 = vld [vmem:[#allocation3 + $0xf8] sm:$0x7] }
 0x4b0   : > { %12130 = vmatmul.mubr.msk.bf16.gmra.mrb[16].mxu1 %vm6271_vm0, %v11105_v38  ;;  %v8829_v38 = vsel %vm15120_vm13, %v11129_v35, %v8828_v24  ;;  %v8745_v24 = vld [vmem:[#allocation3 + $0x98] sm:$0x7] }
 0x4b1   : > { %12133 = vmatprep.mubr.msk.bf16.mxu1 %vm6271_vm0, %v11106_v8  ;;  %v11145_v8 = vcombine.low %v8829_v38, %v8832_v41  ;;  %v8866_v44 = vrot.slane %v8745_v24, 7  ;;  %v11135_v41 = vrot.slane %v8746_v48, 11  ;;  %v8864_v38 = vsel %vm15120_vm13, %v11134_v2, %v8863_v63  ;;  %v8764_v2 = vld [vmem:[#allocation3 + $0x100] sm:$0x8] }
 0x4b2   : > { %v11138_v24 = vrot.slane %v8755_v10, 11 }
 0x4b3   : > { %v8867_v36 = vsel %vm15120_vm13, %v8865_v15, %v8866_v44  ;;  %v8871_v20 = vsel %vm15120_vm13, %v11135_v41, %v8870_v43  ;;  %v15690_v43 = vld [vmem:[#allocation3 + $0x104] sm:$0xf]  ;;  %v8766_v44 = vld [vmem:[#allocation3 + $0x108] sm:$0x7] }
 0x4b8   : > { %12134 = vmatmul.mubr.msk.bf16.gmra.mrb[20].mxu1 %vm6271_vm0, %v11107_v62  ;;  %v9361_v62 = vsel %vm6320_vm15, %v15530_v27, 0 }
 0x4b9   : > { %12137 = vmatprep.mubr.msk.bf16.mxu1 %vm6271_vm0, %v11108_v56  ;;  %v8737_v56 = vld [vmem:[#allocation3 + $0x70] sm:$0x8] }
 0x4ba   : > { %v11132_v27 = vrot.slane %v8737_v56, 11  ;;  %v8878_v56 = vsel %vm15120_vm13, %v11136_v3, %v8877_v59  ;;  %v8908_v59 = vrot.slane %v8763_v4, 7 }
 0x4bb   : > { %v11152_v18 = vcombine.low %v8878_v56, %v8881_v29 }
 0x4bc   : > { %v8850_v57 = vsel %vm15120_vm13, %v11132_v27, %v8849_v61  ;;  %v15671_v61 = vld [vmem:[#allocation3 + $0xd4] sm:$0xf] }
 0x4bd   : > { %v11148_v0 = vcombine.low %v8850_v57, %v8853_v52  ;;  %v8891_v31 = vrot.slane %v15671_v61, 7  ;;  %v8900_v52 = vrot.slane %v8898_v49, 4 }
 0x4bf   : > { %v8893_v53 = vrot.slane %v8891_v31, 4  ;;  %v8892_v15 = vsel %vm15120_vm13, %v11138_v24, %v8891_v31  ;;  %v11143_v31 = vrot.slane %v8770_v32, 11  ;;  %v9242_v32 = vld [vmem:[#allocation3 + $0x108] sm:$0xf] }
 0x4c0   : > { %12138 = vmatmul.mubr.msk.bf16.gmra.mrb[24].mxu1 %vm6271_vm0, %v11109_v60  ;;  %v8748_v60 = vld [vmem:[#allocation3 + $0xa8] sm:$0x7] }
 0x4c1   : > { %12141 = vmatprep.mubr.msk.bf16.mxu1 %vm6271_vm0, %v11110_v42  ;;  %v8857_v42 = vsel %vm15120_vm13, %v11133_v25, %v8856_v13  ;;  %v8873_v35 = vrot.slane %v8748_v60, 7  ;;  %v11137_v13 = vrot.slane %v8752_v12, 11  ;;  %v8758_v25 = vld [vmem:[#allocation3 + $0xe0] sm:$0x8] }
 0x4c2   : > { %v11149_v23 = vcombine.low %v8857_v42, %v8860_v55  ;;  %v15687_v55 = vld [vmem:[#allocation3 + $0xf4] sm:$0xf]  ;;  %v11139_v57 = vrot.slane %v8758_v25, 11  ;;  %v8775_v25 = vld [vmem:[#allocation3 + $0x138] sm:$0x7] }
 0x4c3   : > { %v8874_v5 = vsel %vm15120_vm13, %v8872_v26, %v8873_v35  ;;  %v8761_v35 = vld [vmem:[#allocation3 + $0xf0] sm:$0x8] }
 0x4c4   : > { %v11151_v58 = vcombine.low %v8871_v20, %v8874_v5  ;;  %v8899_v26 = vsel %vm15120_vm13, %v11139_v57, %v8898_v49  ;;  %v15702_v5 = vld [vmem:[#allocation3 + $0x124] sm:$0xf]  ;;  %v11140_v21 = vrot.slane %v8761_v35, 11  ;;  %v15718_v49 = vld [vmem:[#allocation3 + $0x134] sm:$0xf] }
 0x4c5   : > { %v8926_v20 = vrot.slane %v15702_v5, 7  ;;  %v8933_v10 = vrot.slane %v15718_v49, 7  ;;  %v9232_v35 = vld [vmem:[#allocation3 + $0x68] sm:$0xf] }
 0x4c8   : > { %12142 = vmatmul.mubr.msk.bf16.gmra.mrb[28].mxu1 %vm6271_vm0, %v11111_v40  ;;  %v8884_v40 = vrot.slane %v15658_v50, 7 }
 0x4c9   : > { %12147 = vmatprep.mubr.msk.bf16.mxu1 %vm6271_vm0, %v11145_v8  ;;  %v11150_v8 = vcombine.low %v8864_v38, %v8867_v36  ;;  %v15705_v38 = vld [vmem:[#allocation3 + $0x114] sm:$0xf] }
 0x4ca   : > { %v8886_v14 = vrot.slane %v8884_v40, 4  ;;  %v8885_v17 = vsel %vm15120_vm13, %v11137_v13, %v8884_v40  ;;  %v8915_v40 = vrot.slane %v8766_v44, 7  ;;  %v8767_v13 = vld [vmem:[#allocation3 + $0x110] sm:$0x8]  ;;  %v9230_v44 = vld [vmem:[#allocation3 + $0x48] sm:$0xf] }
 0x4d0   : > { %12148 = vmatmul.mubr.msk.bf16.vlgmr.msra.gmra.mrb[0].mxu1 %vm6271_vm0, %v11146_v33  ;;  %v8888_v33 = vsel %vm15120_vm13, %v8886_v14, %v8887_v30  ;;  %v8769_v14 = vld [vmem:[#allocation3 + $0x118] sm:$0x7] }
 0x4d1   : > { %12180 = vmatpush3.bf16.msra.mxu1 %v9361_v62  ;;  %12151 = vmatprep.mubr.msk.bf16.mxu1 %vm6271_vm0, %v11147_v39  ;;  %v8757_v62 = vld [vmem:[#allocation3 + $0xd8] sm:$0x7]  ;;  %v8760_v39 = vld [vmem:[#allocation3 + $0xe8] sm:$0x7]  ;;  %v11153_v22 = vcombine.low %v8885_v17, %v8888_v33  ;;  %v8928_v33 = vrot.slane %v8926_v20, 4  ;;  %v11142_v17 = vrot.slane %v8767_v13, 11 }
 0x4d2   : > { %12776 = vmatprep.subr.msk.bf16.mxu1 %vm6320_vm15, %v15634_v46  ;;  %v8894_v27 = vrot.slane %v8757_v62, 7  ;;  %v8901_v63 = vrot.slane %v8760_v39, 7  ;;  %v8929_v62 = vrot.slane %v8772_v37, 7  ;;  %v9557_v37 = vld [vmem:[#allocation3 + $0x48] sm:$0xf] }
 0x4d4   : > { %v8895_v60 = vsel %vm15120_vm13, %v8893_v53, %v8894_v27  ;;  %v8902_v42 = vsel %vm15120_vm13, %v8900_v52, %v8901_v63  ;;  %v8930_v53 = vsel %vm15120_vm13, %v8928_v33, %v8929_v62  ;;  %v8773_v27 = vld [vmem:[#allocation3 + $0x130] sm:$0x8]  ;;  %v9563_v33 = vld [vmem:[#allocation3 + $0x68] sm:$0xf] }
 0x4d5   : > { %v11154_v48 = vcombine.low %v8892_v15, %v8895_v60  ;;  %v11155_v41 = vcombine.low %v8899_v26, %v8902_v42  ;;  %v11144_v57 = vrot.slane %v8773_v27, 11  ;;  %v8935_v60 = vrot.slane %v8933_v10, 4  ;;  %v9231_v26 = vld [vmem:[#allocation3 + $0x58] sm:$0xf] }
 0x4d7   : > { %v8934_v4 = vsel %vm15120_vm13, %v11144_v57, %v8933_v10  ;;  %v9569_v57 = vld [vmem:[#allocation3 + $0x88] sm:$0xf] }
 0x4d8   : > { %12152 = vmatmul.mubr.msk.bf16.gmra.mrb[4].mxu1 %vm6271_vm0, %v11148_v0  ;;  %v8905_v0 = vrot.slane %v15687_v55, 7 }
 0x4d9   : > { %12155 = vmatprep.mubr.msk.bf16.mxu1 %vm6271_vm0, %v11149_v23  ;;  %v8912_v23 = vrot.slane %v15690_v43, 7 }
 0x4da   : > { %v8907_v36 = vrot.slane %v8905_v0, 4  ;;  %v8906_v30 = vsel %vm15120_vm13, %v11140_v21, %v8905_v0  ;;  %v8936_v0 = vrot.slane %v8775_v25, 7  ;;  %v9237_v21 = vld [vmem:[#allocation3 + $0xb8] sm:$0xf]  ;;  %v9559_v25 = vld [vmem:[#allocation3 + $0x54] sm:$0xe] }
 0x4db   : > { %v8914_v47 = vrot.slane %v8912_v23, 4 }
 0x4dc   : > { %v8909_v45 = vsel %vm15120_vm13, %v8907_v36, %v8908_v59  ;;  %v11180_v36 = vcombine.low %v15601_v28, %v9232_v35  ;;  %v11181_v59 = vcombine.low %v15614_v16, %v9233_v54  ;;  %v11185_v16 = vcombine.low %v15655_v51, %v9237_v21 }
 0x4dd   : > { %v8916_v12 = vsel %vm15120_vm13, %v8914_v47, %v8915_v40  ;;  %v11156_v29 = vcombine.low %v8906_v30, %v8909_v45  ;;  %v9236_v40 = vld [vmem:[#allocation3 + $0xa8] sm:$0xf]  ;;  %v9558_v30 = vld [vmem:[#allocation3 + $0x4c] sm:$0x1] }
 0x4de   : > { %v11184_v28 = vcombine.low %v15640_v6, %v9236_v40  ;;  %v9240_v45 = vld [vmem:[#allocation3 + $0xe8] sm:$0xf]  ;;  %v9568_v40 = vld [vmem:[#allocation3 + $0x84] sm:$0xe] }
 0x4df   : > { %v11188_v6 = vcombine.low %v15674_v34, %v9240_v45 }
 0x4e0   : > { %12156 = vmatmul.mubr.msk.bf16.gmra.mrb[8].mxu1 %vm6271_vm0, %v11150_v8  ;;  %v11141_v8 = vrot.slane %v8764_v2, 11  ;;  %v11179_v2 = vcombine.low %v15598_v19, %v9231_v26  ;;  %v9235_v19 = vld [vmem:[#allocation3 + $0x98] sm:$0xf]  ;;  %v9570_v26 = vld [vmem:[#allocation3 + $0x8c] sm:$0x1] }
 0x4e1   : > { %12159 = vmatprep.mubr.msk.bf16.mxu1 %vm6271_vm0, %v11151_v58  ;;  %v8919_v58 = vrot.slane %v15705_v38, 7 }
 0x4e2   : > { %v8913_v3 = vsel %vm15120_vm13, %v11141_v8, %v8912_v23  ;;  %v8937_v23 = vsel %vm15120_vm13, %v8935_v60, %v8936_v0  ;;  %v9238_v8 = vld [vmem:[#allocation3 + $0xc8] sm:$0xf]  ;;  %v11212_v60 = vrot.slane %v9559_v25, 9  ;;  %v9584_v25 = vld [vmem:[#allocation3 + $0xd8] sm:$0xf] }
 0x4e3   : > { %v11157_v56 = vcombine.low %v8913_v3, %v8916_v12  ;;  %v8921_v39 = vrot.slane %v8919_v58, 4  ;;  %v8920_v63 = vsel %vm15120_vm13, %v11142_v17, %v8919_v58  ;;  %v11160_v15 = vcombine.low %v8934_v4, %v8937_v23  ;;  %v9241_v58 = vld [vmem:[#allocation3 + $0xf8] sm:$0xf]  ;;  %v9244_v12 = vld [vmem:[#allocation3 + $0x128] sm:$0xf] }
 0x4e4   : > { %v11189_v51 = vcombine.low %v15687_v55, %v9241_v58  ;;  %v11192_v34 = vcombine.low %v15702_v5, %v9244_v12  ;;  %v9560_v55 = vld [vmem:[#allocation3 + $0x58] sm:$0xf]  ;;  %v9670_v17 = vrot.slane %v9563_v33, 5  ;;  %v9571_v12 = vld [vmem:[#allocation3 + $0x94] sm:$0xe] }
 0x4e5   : > { %v9663_v62 = vrot.slane %v9560_v55, 5  ;;  %v9579_v33 = vld [vmem:[#allocation3 + $0xbc] sm:$0x1] }
 0x4e8   : > { %12160 = vmatmul.mubr.msk.bf16.gmra.mrb[12].mxu1 %vm6271_vm0, %v11152_v18  ;;  %v8922_v18 = vrot.slane %v8769_v14, 7  ;;  %v9243_v14 = vld [vmem:[#allocation3 + $0x118] sm:$0xf] }
 0x4e9   : > { %12163 = vmatprep.mubr.msk.bf16.mxu1 %vm6271_vm0, %v11153_v22  ;;  %v8927_v22 = vsel %vm15120_vm13, %v11143_v31, %v8926_v20  ;;  %v9239_v20 = vld [vmem:[#allocation3 + $0xd8] sm:$0xf]  ;;  %v11191_v3 = vcombine.low %v15705_v38, %v9243_v14  ;;  %v9556_v31 = vld [vmem:[#allocation3 + $0x44] sm:$0xe]  ;;  %v9564_v38 = vld [vmem:[#allocation3 + $0x6c] sm:$0x1] }
 0x4ea   : > { %v8923_v52 = vsel %vm15120_vm13, %v8921_v39, %v8922_v18  ;;  %v11159_v24 = vcombine.low %v8927_v22, %v8930_v53  ;;  %v11211_v39 = vrot.slane %v9556_v31, 9  ;;  %v9561_v18 = vld [vmem:[#allocation3 + $0x5c] sm:$0x1]  ;;  %v9665_v53 = vrot.slane %v9663_v62, 4 }
 0x4eb   : > { %v11158_v42 = vcombine.low %v8920_v63, %v8923_v52  ;;  %v9666_v27 = vrot.slane %v9561_v18, 5  ;;  %v9672_v52 = vrot.slane %v9670_v17, 4  ;;  %v9673_v63 = vrot.slane %v9564_v38, 5 }
 0x4ed   : > { %v9667_v0 = vsel %vm15236_vm1, %v9665_v53, %v9666_v27  ;;  %v9674_v23 = vsel %vm15236_vm1, %v9672_v52, %v9673_v63  ;;  %v9580_v52 = vld [vmem:[#allocation3 + $0xc4] sm:$0xe]  ;;  %v9587_v63 = vld [vmem:[#allocation3 + $0xe8] sm:$0xf] }
 0x4f0   : > { %12164 = vmatmul.mubr.msk.bf16.gmra.mrb[16].mxu1 %vm6271_vm0, %v11154_v48  ;;  %v11178_v48 = vcombine.low %v15586_v9, %v9230_v44  ;;  %v9234_v9 = vld [vmem:[#allocation3 + $0x88] sm:$0xf]  ;;  %v9684_v44 = vrot.slane %v9569_v57, 5  ;;  %v9719_v57 = vrot.slane %v9584_v25, 5 }
 0x4f1   : > { %12167 = vmatprep.mubr.msk.bf16.mxu1 %vm6271_vm0, %v11155_v41  ;;  %v9863_v41 = vsel %vm6320_vm15, %v15634_v46, 0  ;;  %v11182_v47 = vcombine.low %v15617_v7, %v9234_v9  ;;  %v11183_v46 = vcombine.low %v15637_v11, %v9235_v19  ;;  %v11186_v7 = vcombine.low %v15658_v50, %v9238_v8  ;;  %v9565_v9 = vld [vmem:[#allocation3 + $0x74] sm:$0xe]  ;;  %v9572_v19 = vld [vmem:[#allocation3 + $0x98] sm:$0xf] }
 0x4f2   : > { %v11187_v11 = vcombine.low %v15671_v61, %v9239_v20  ;;  %v11190_v50 = vcombine.low %v15690_v43, %v9242_v32  ;;  %v9656_v61 = vrot.slane %v9557_v37, 5  ;;  %v9245_v43 = vld [vmem:[#allocation3 + $0x138] sm:$0xf]  ;;  %v9691_v8 = vrot.slane %v9572_v19, 5  ;;  %v9573_v20 = vld [vmem:[#allocation3 + $0x9c] sm:$0x1] }
 0x4f3   : > { %v9694_v37 = vrot.slane %v9573_v20, 5  ;;  %v9594_v20 = vld [vmem:[#allocation3 + $0x10c] sm:$0x1] }
 0x4f4   : > { %v9658_v13 = vrot.slane %v9656_v61, 4  ;;  %v9657_v10 = vsel %vm15236_vm1, %v11211_v39, %v9656_v61  ;;  %v9582_v39 = vld [vmem:[#allocation3 + $0xcc] sm:$0x1] }
 0x4f5   : > { %v9715_v27 = vrot.slane %v9582_v39, 5 }
 0x4f8   : > { %12168 = vmatmul.mubr.msk.bf16.gmra.mrb[20].mxu1 %vm6271_vm0, %v11156_v29  ;;  %v9659_v29 = vrot.slane %v9558_v30, 5  ;;  %v9574_v30 = vld [vmem:[#allocation3 + $0xa4] sm:$0xe] }
 0x4f9   : > { %12171 = vmatprep.mubr.msk.bf16.mxu1 %vm6271_vm0, %v11157_v56  ;;  %v11193_v56 = vcombine.low %v15718_v49, %v9245_v43  ;;  %v9562_v49 = vld [vmem:[#allocation3 + $0x64] sm:$0xe]  ;;  %v11217_v43 = vrot.slane %v9574_v30, 9 }
 0x4fa   : > { %v9660_v5 = vsel %vm15236_vm1, %v9658_v13, %v9659_v29  ;;  %v11213_v4 = vrot.slane %v9562_v49, 9  ;;  %v11216_v13 = vrot.slane %v9571_v12, 9 }
 0x4fb   : > { %v11227_v22 = vcombine.low %v9657_v10, %v9660_v5  ;;  %v9708_v10 = vrot.slane %v9579_v33, 5  ;;  %v9597_v33 = vld [vmem:[#allocation3 + $0x11c] sm:$0x1] }
 0x500   : > { %12172 = vmatmul.mubr.msk.bf16.gmra.mrb[24].mxu1 %vm6271_vm0, %v11158_v42 }
 0x501   : > { %12175 = vmatprep.mubr.msk.bf16.mxu1 %vm6271_vm0, %v11159_v24  ;;  %v9566_v24 = vld [vmem:[#allocation3 + $0x78] sm:$0xf] }
 0x502   : > { %v9677_v42 = vrot.slane %v9566_v24, 5 }
 0x508   : > { %12176 = vmatmul.mubr.msk.bf16.gmra.mrb[28].mxu1 %vm6271_vm0, %v11160_v15  ;;  %v9567_v15 = vld [vmem:[#allocation3 + $0x7c] sm:$0x1] }
 0x509   : > { %12181 = vmatprep.mubr.msk.bf16.mxu1 %vm6271_vm0, %v11178_v48  ;;  %v9664_v48 = vsel %vm15236_vm1, %v11212_v60, %v9663_v62  ;;  %v9680_v54 = vrot.slane %v9567_v15, 5  ;;  %v11219_v60 = vrot.slane %v9580_v52, 9  ;;  %v9588_v15 = vld [vmem:[#allocation3 + $0xec] sm:$0x1] }
 0x50a   : > { %v11228_v35 = vcombine.low %v9664_v48, %v9667_v0 }
 0x510   : > { %12182 = vmatmul.mubr.msk.bf16.vlgmr.msra.gmra.mrb[0].mxu1 %vm6271_vm0, %v11179_v2  ;;  %v9671_v2 = vsel %vm15236_vm1, %v11213_v4, %v9670_v17  ;;  %v9726_v4 = vrot.slane %v9587_v63, 5 }
 0x511   : > { %12214 = vmatpush3.bf16.msra.mxu1 %v9863_v41  ;;  %12185 = vmatprep.mubr.msk.bf16.mxu1 %vm6271_vm0, %v11180_v36  ;;  %v11229_v41 = vcombine.low %v9671_v2, %v9674_v23  ;;  %v9679_v36 = vrot.slane %v9677_v42, 4 }
 0x513   : > { %v9681_v21 = vsel %vm15236_vm1, %v9679_v36, %v9680_v54  ;;  %v9728_v36 = vrot.slane %v9726_v4, 4  ;;  %v9729_v54 = vrot.slane %v9588_v15, 5 }
 0x518   : > { %12186 = vmatmul.mubr.msk.bf16.gmra.mrb[4].mxu1 %vm6271_vm0, %v11181_v59  ;;  %v9686_v59 = vrot.slane %v9684_v44, 4 }
 0x519   : > { %12189 = vmatprep.mubr.msk.bf16.mxu1 %vm6271_vm0, %v11182_v47  ;;  %v9687_v47 = vrot.slane %v9570_v26, 5 }
 0x520   : > { %12190 = vmatmul.mubr.msk.bf16.gmra.mrb[8].mxu1 %vm6271_vm0, %v11183_v46  ;;  %v9575_v46 = vld [vmem:[#allocation3 + $0xa8] sm:$0xf] }
 0x521   : > { %12193 = vmatprep.mubr.msk.bf16.mxu1 %vm6271_vm0, %v11184_v28  ;;  %v11214_v28 = vrot.slane %v9565_v9, 9  ;;  %v9698_v45 = vrot.slane %v9575_v46, 5  ;;  %v9590_v9 = vld [vmem:[#allocation3 + $0xf8] sm:$0xf] }
 0x522   : > { %v9733_v46 = vrot.slane %v9590_v9, 5 }
 0x523   : > { %v9700_v14 = vrot.slane %v9698_v45, 4  ;;  %v9699_v18 = vsel %vm15236_vm1, %v11217_v43, %v9698_v45  ;;  %v9600_v43 = vld [vmem:[#allocation3 + $0x12c] sm:$0x1] }
 0x528   : > { %12194 = vmatmul.mubr.msk.bf16.gmra.mrb[12].mxu1 %vm6271_vm0, %v11185_v16  ;;  %v11215_v16 = vrot.slane %v9568_v40, 9 }
 0x529   : > { %12197 = vmatprep.mubr.msk.bf16.mxu1 %vm6271_vm0, %v11186_v7  ;;  %v9688_v7 = vsel %vm15236_vm1, %v9686_v59, %v9687_v47  ;;  %v9586_v59 = vld [vmem:[#allocation3 + $0xe4] sm:$0xe]  ;;  %v9593_v47 = vld [vmem:[#allocation3 + $0x108] sm:$0xf] }
 0x52a   : > { %v9685_v32 = vsel %vm15236_vm1, %v11215_v16, %v9684_v44  ;;  %v9740_v16 = vrot.slane %v9593_v47, 5 }
 0x52c   : > { %v9742_v12 = vrot.slane %v9740_v16, 4 }
 0x530   : > { %12198 = vmatmul.mubr.msk.bf16.gmra.mrb[16].mxu1 %vm6271_vm0, %v11187_v11  ;;  %v9678_v11 = vsel %vm15236_vm1, %v11214_v28, %v9677_v42  ;;  %v9585_v42 = vld [vmem:[#allocation3 + $0xdc] sm:$0x1]  ;;  %v11221_v28 = vrot.slane %v9586_v59, 9 }
 0x531   : > { %12201 = vmatprep.mubr.msk.bf16.mxu1 %vm6271_vm0, %v11188_v6  ;;  %v9576_v6 = vld [vmem:[#allocation3 + $0xac] sm:$0x1]  ;;  %v11230_v58 = vcombine.low %v9678_v11, %v9681_v21  ;;  %v9722_v2 = vrot.slane %v9585_v42, 5  ;;  %v9730_v21 = vsel %vm15236_vm1, %v9728_v36, %v9729_v54  ;;  %v15860_v36 = vld [vmem:[%s16094_s5] ss:$0 sm:$0xff] }
 0x532   : > { %v9701_v61 = vrot.slane %v9576_v6, 5  ;;  %v9727_v11 = vsel %vm15236_vm1, %v11221_v28, %v9726_v4 }
 0x533   : > { %v11237_v6 = vcombine.low %v9727_v11, %v9730_v21 }
 0x534   : > { %v9702_v31 = vsel %vm15236_vm1, %v9700_v14, %v9701_v61  ;;  %v9743_v14 = vrot.slane %v9594_v20, 5  ;;  %v9596_v61 = vld [vmem:[#allocation3 + $0x118] sm:$0xf] }
 0x535   : > { %v11233_v17 = vcombine.low %v9699_v18, %v9702_v31 }
 0x536   : > { %v9744_v31 = vsel %vm15236_vm1, %v9742_v12, %v9743_v14 }
 0x538   : > { %12202 = vmatmul.mubr.msk.bf16.gmra.mrb[20].mxu1 %vm6271_vm0, %v11189_v51  ;;  %v11231_v51 = vcombine.low %v9685_v32, %v9688_v7  ;;  %v9735_v32 = vrot.slane %v9733_v46, 4 }
 0x539   : > { %12205 = vmatprep.mubr.msk.bf16.mxu1 %vm6271_vm0, %v11190_v50  ;;  %v9693_v50 = vrot.slane %v9691_v8, 4 }
 0x53b   : > { %v9695_v29 = vsel %vm15236_vm1, %v9693_v50, %v9694_v37  ;;  %v9599_v50 = vld [vmem:[#allocation3 + $0x128] sm:$0xf]  ;;  %v9592_v37 = vld [vmem:[#allocation3 + $0x104] sm:$0xe] }
 0x53c   : > { %v9754_v30 = vrot.slane %v9599_v50, 5 }
 0x53e   : > { %v9756_v18 = vrot.slane %v9754_v30, 4 }
 0x540   : > { %12206 = vmatmul.mubr.msk.bf16.gmra.mrb[24].mxu1 %vm6271_vm0, %v11191_v3  ;;  %v9581_v3 = vld [vmem:[#allocation3 + $0xc8] sm:$0xf] }
 0x541   : > { %12209 = vmatprep.mubr.msk.bf16.mxu1 %vm6271_vm0, %v11192_v34  ;;  %v9578_v34 = vld [vmem:[#allocation3 + $0xb8] sm:$0xf]  ;;  %v9712_v62 = vrot.slane %v9581_v3, 5 }
 0x542   : > { %v9705_v55 = vrot.slane %v9578_v34, 5 }
 0x543   : > { %v9714_v53 = vrot.slane %v9712_v62, 4  ;;  %v9713_v48 = vsel %vm15236_vm1, %v11219_v60, %v9712_v62 }
 0x544   : > { %v9707_v38 = vrot.slane %v9705_v55, 4 }
 0x545   : > { %v9716_v0 = vsel %vm15236_vm1, %v9714_v53, %v9715_v27  ;;  %v9750_v27 = vrot.slane %v9597_v33, 5 }
 0x546   : > { %v9709_v49 = vsel %vm15236_vm1, %v9707_v38, %v9708_v10  ;;  %v11235_v26 = vcombine.low %v9713_v48, %v9716_v0  ;;  %v9602_v38 = vld [vmem:[#allocation3 + $0x138] sm:$0xf] }
 0x547   : > { %v9761_v25 = vrot.slane %v9602_v38, 5 }
 0x548   : > { %12210 = vmatmul.mubr.msk.bf16.gmra.mrb[28].mxu1 %vm6271_vm0, %v11193_v56  ;;  %v9692_v56 = vsel %vm15236_vm1, %v11216_v13, %v9691_v8  ;;  %v9591_v8 = vld [vmem:[#allocation3 + $0xfc] sm:$0x1]  ;;  %v11223_v13 = vrot.slane %v9592_v37, 9 }
 0x549   : > { %12215 = vmatprep.mubr.msk.bf16.mxu1 %vm6271_vm0, %v11227_v22  ;;  %v11232_v5 = vcombine.low %v9692_v56, %v9695_v29  ;;  %v9577_v22 = vld [vmem:[#allocation3 + $0xb4] sm:$0xe]  ;;  %v9747_v29 = vrot.slane %v9596_v61, 5 }
 0x54a   : > { %v11218_v24 = vrot.slane %v9577_v22, 9  ;;  %v9741_v56 = vsel %vm15236_vm1, %v11223_v13, %v9740_v16  ;;  %v9595_v22 = vld [vmem:[#allocation3 + $0x114] sm:$0xe] }
 0x54b   : > { %v11239_v10 = vcombine.low %v9741_v56, %v9744_v31  ;;  %v9749_v53 = vrot.slane %v9747_v29, 4  ;;  %v11224_v52 = vrot.slane %v9595_v22, 9 }
 0x54c   : > { %v9706_v23 = vsel %vm15236_vm1, %v11218_v24, %v9705_v55  ;;  %v9598_v55 = vld [vmem:[#allocation3 + $0x124] sm:$0xe] }
 0x54d   : > { %v11234_v44 = vcombine.low %v9706_v23, %v9709_v49  ;;  %v9601_v49 = vld [vmem:[#allocation3 + $0x134] sm:$0xe]  ;;  %v9751_v60 = vsel %vm15236_vm1, %v9749_v53, %v9750_v27  ;;  %v9748_v0 = vsel %vm15236_vm1, %v11224_v52, %v9747_v29  ;;  %v9763_v23 = vrot.slane %v9761_v25, 4 }
 0x54e   : > { %v11226_v4 = vrot.slane %v9601_v49, 9 }
 0x550   : > { %12216 = vmatmul.mubr.msk.bf16.vlgmr.msra.gmra.mrb[0].mxu1 %vm6271_vm0, %v11228_v35  ;;  %v9721_v35 = vrot.slane %v9719_v57, 4  ;;  %v9762_v48 = vsel %vm15236_vm1, %v11226_v4, %v9761_v25 }
 0x551   : > { %12219 = vmatprep.mubr.msk.bf16.mxu1 %vm6271_vm0, %v11229_v41  ;;  %v9583_v41 = vld [vmem:[#allocation3 + $0xd4] sm:$0xe] }
 0x552   : > { %v11220_v19 = vrot.slane %v9583_v41, 9  ;;  %v9723_v40 = vsel %vm15236_vm1, %v9721_v35, %v9722_v2  ;;  %v15855_v2 = vld [vmem:[%s16093_s4] ss:$0 sm:$0xff] }
 0x554   : > { %v9720_v7 = vsel %vm15236_vm1, %v11220_v19, %v9719_v57  ;;  %v9603_v57 = vld [vmem:[#allocation3 + $0x13c] sm:$0x1] }
 0x555   : > { %v11236_v45 = vcombine.low %v9720_v7, %v9723_v40  ;;  %v9764_v15 = vrot.slane %v9603_v57, 5 }
 0x558   : > { %12220 = vmatmul.mubr.msk.bf16.gmra.mrb[4].mxu1 %vm6271_vm0, %v11230_v58  ;;  %v9589_v58 = vld [vmem:[#allocation3 + $0xf4] sm:$0xe] }
 0x559   : > { %12223 = vmatprep.mubr.msk.bf16.mxu1 %vm6271_vm0, %v11231_v51  ;;  %v9736_v51 = vrot.slane %v9591_v8, 5  ;;  %v11222_v34 = vrot.slane %v9589_v58, 9 }
 0x55b   : > { %v9737_v3 = vsel %vm15236_vm1, %v9735_v32, %v9736_v51  ;;  %v9734_v62 = vsel %vm15236_vm1, %v11222_v34, %v9733_v46 }
 0x55c   : > { %v11238_v39 = vcombine.low %v9734_v62, %v9737_v3 }
 0x560   : > { %12224 = vmatmul.mubr.msk.bf16.gmra.mrb[8].mxu1 %vm6271_vm0, %v11232_v5  ;;  %v11225_v5 = vrot.slane %v9598_v55, 9 }
 0x561   : > { %12227 = vmatprep.mubr.msk.bf16.mxu1 %vm6271_vm0, %v11233_v17  ;;  %v9757_v17 = vrot.slane %v9600_v43, 5 }
 0x562   : > { %v9755_v63 = vsel %vm15236_vm1, %v11225_v5, %v9754_v30 }
 0x563   : > { %v9758_v24 = vsel %vm15236_vm1, %v9756_v18, %v9757_v17 }
 0x564   : > { %v11241_v42 = vcombine.low %v9755_v63, %v9758_v24 }
 0x568   : > { %12228 = vmatmul.mubr.msk.bf16.gmra.mrb[12].mxu1 %vm6271_vm0, %v11234_v44  ;;  %v11240_v44 = vcombine.low %v9748_v0, %v9751_v60 }
 0x569   : > { %12231 = vmatprep.mubr.msk.bf16.mxu1 %vm6271_vm0, %v11235_v26  ;;  %v9765_v26 = vsel %vm15236_vm1, %v9763_v23, %v9764_v15 }
 0x56a   : > { %v11242_v35 = vcombine.low %v9762_v48, %v9765_v26 }
 0x570   : > { %12232 = vmatmul.mubr.msk.bf16.gmra.mrb[16].mxu1 %vm6271_vm0, %v11236_v45 }
 0x571   : > { %12235 = vmatprep.mubr.msk.bf16.mxu1 %vm6271_vm0, %v11237_v6 }
 0x578   : > { %12236 = vmatmul.mubr.msk.bf16.gmra.mrb[20].mxu1 %vm6271_vm0, %v11238_v39 }
 0x579   : > { %12239 = vmatprep.mubr.msk.bf16.mxu1 %vm6271_vm0, %v11239_v10 }
 0x580   : > { %12240 = vmatmul.mubr.msk.bf16.gmra.mrb[24].mxu1 %vm6271_vm0, %v11240_v44 }
 0x581   : > { %12243 = vmatprep.mubr.msk.bf16.mxu1 %vm6271_vm0, %v11241_v42 }
 0x588   : > { %12244 = vmatmul.mubr.msk.bf16.gmra.mrb[28].mxu1 %vm6271_vm0, %v11242_v35 }
 0x623   : > { %v12217_v41 = vpop.f32.mrb[0].mxu1 }
 0x624   : > { %v10067_v54 = vadd.f32 %v12217_v41, %v15855_v2  ;;  %v9899_v9 = vpop.f32.mrb[1].mxu1 }
 0x625   : > { %v10065_v1 = vadd.f32 %v15855_v2, %v9899_v9  ;;  %v12218_v59 = vpop.f32.mrb[2].mxu1 }
 0x626   : > { %v10068_v47 = vadd.f32 %v12218_v59, %v15855_v2  ;;  %v9902_v19 = vpop.f32.mrb[3].mxu1  ;;  %vm10099_vm15 = vcmp.ge.f32.partialorder %v10067_v54, 0.0  ;;  %v10138_v40 = vmul.f32 %v15860_v36, %v10067_v54 }
 0x627   : > { %v10066_v46 = vadd.f32 %v15855_v2, %v9902_v19  ;;  %vm10097_vm0 = vcmp.ge.f32.partialorder %v10065_v1, 0.0  ;;  %v10136_v28 = vmul.f32 %v15860_v36, %v10065_v1 }
 0x628   : > { %v10139_v21 = vmul.f32 %v15860_v36, %v10068_v47  ;;  %v10170_v8 = vsel %vm10099_vm15, %v10067_v54, %v10138_v40  ;;  %vm10100_vm2 = vcmp.ge.f32.partialorder %v10068_v47, 0.0 }
 0x629   : > { %v10137_v16 = vmul.f32 %v15860_v36, %v10066_v46  ;;  %10236 = vrot.lane.b32.xlu1 %v10170_v8, %s12909_s7  ;;  %v10168_v7 = vsel %vm10097_vm0, %v10065_v1, %v10136_v28  ;;  %vm10098_vm4 = vcmp.ge.f32.partialorder %v10066_v46, 0.0 }
 0x62a   : > { %10232 = vrot.lane.b32.xlu0 %v10168_v7, %s12909_s7  ;;  %v10171_v6 = vsel %vm10100_vm2, %v10068_v47, %v10139_v21 }
 0x62b   : > { %v12221_v20 = vpop.f32.mrb[4].mxu1  ;;  %v10169_v51 = vsel %vm10098_vm4, %v10066_v46, %v10137_v16 }
 0x62c   : > { %v10071_v45 = vadd.f32 %v12221_v20, %v15855_v2  ;;  %v9915_v11 = vpop.f32.mrb[5].mxu1 }
 0x62d   : > { %v10069_v58 = vadd.f32 %v15855_v2, %v9915_v11  ;;  %10238 = vrot.lane.b32.xlu1 %v10171_v6, %s12909_s7  ;;  %v12222_v32 = vpop.f32.mrb[6].mxu1 }
 0x62e   : > { %v10142_v50 = vmul.f32 %v15860_v36, %v10071_v45  ;;  %v10072_v37 = vadd.f32 %v12222_v32, %v15855_v2  ;;  %10234 = vrot.lane.b32.xlu0 %v10169_v51, %s12909_s7  ;;  %v9918_v12 = vpop.f32.mrb[7].mxu1  ;;  %vm10103_vm5 = vcmp.ge.f32.partialorder %v10071_v45, 0.0 }
 0x62f   : > { %v10070_v14 = vadd.f32 %v15855_v2, %v9918_v12  ;;  %v10140_v30 = vmul.f32 %v15860_v36, %v10069_v58  ;;  %vm10101_vm8 = vcmp.ge.f32.partialorder %v10069_v58, 0.0 }
 0x630   : > { %v10143_v61 = vmul.f32 %v15860_v36, %v10072_v37  ;;  %v10174_v34 = vsel %vm10103_vm5, %v10071_v45, %v10142_v50  ;;  %vm10104_vm6 = vcmp.ge.f32.partialorder %v10072_v37, 0.0 }
 0x631   : > { %v10141_v3 = vmul.f32 %v15860_v36, %v10070_v14  ;;  %vm10102_vm9 = vcmp.ge.f32.partialorder %v10070_v14, 0.0  ;;  %v10172_v62 = vsel %vm10101_vm8, %v10069_v58, %v10140_v30 }
 0x632   : > { %10244 = vrot.lane.b32.xlu0 %v10174_v34, %s12909_s7  ;;  %v10175_v13 = vsel %vm10104_vm6, %v10072_v37, %v10143_v61 }
 0x633   : > { %10246 = vrot.lane.b32.xlu1 %v10175_v13, %s12909_s7  ;;  %v12225_v29 = vpop.f32.mrb[8].mxu1  ;;  %v10173_v18 = vsel %vm10102_vm9, %v10070_v14, %v10141_v3 }
 0x634   : > { %v10075_v55 = vadd.f32 %v12225_v29, %v15855_v2  ;;  %v9931_v43 = vpop.f32.mrb[9].mxu1 }
 0x635   : > { %v10073_v31 = vadd.f32 %v15855_v2, %v9931_v43  ;;  %v12226_v33 = vpop.f32.mrb[10].mxu1 }
 0x636   : > { %v10146_v56 = vmul.f32 %v15860_v36, %v10075_v55  ;;  %v10076_v39 = vadd.f32 %v12226_v33, %v15855_v2  ;;  %10240 = vrot.lane.b32.xlu0 %v10172_v62, %s12909_s7  ;;  %v9934_v5 = vpop.f32.mrb[11].mxu1  ;;  %vm10107_vm10 = vcmp.ge.f32.partialorder %v10075_v55, 0.0 }
 0x637   : > { %v10074_v17 = vadd.f32 %v15855_v2, %v9934_v5  ;;  %10242 = vrot.lane.b32.xlu1 %v10173_v18, %s12909_s7  ;;  %v10144_v22 = vmul.f32 %v15860_v36, %v10073_v31  ;;  %vm10105_vm12 = vcmp.ge.f32.partialorder %v10073_v31, 0.0 }
 0x638   : > { %v10147_v38 = vmul.f32 %v15860_v36, %v10076_v39  ;;  %v10178_v10 = vsel %vm10107_vm10, %v10075_v55, %v10146_v56  ;;  %vm10108_vm11 = vcmp.ge.f32.partialorder %v10076_v39, 0.0 }
 0x639   : > { %v10145_v53 = vmul.f32 %v15860_v36, %v10074_v17  ;;  %vm10106_vm13 = vcmp.ge.f32.partialorder %v10074_v17, 0.0  ;;  %v10176_v57 = vsel %vm10105_vm12, %v10073_v31, %v10144_v22 }
 0x63a   : > { %10252 = vrot.lane.b32.xlu0 %v10178_v10, %s12909_s7  ;;  %v10179_v27 = vsel %vm10108_vm11, %v10076_v39, %v10147_v38 }
 0x63b   : > { %10254 = vrot.lane.b32.xlu1 %v10179_v27, %s12909_s7  ;;  %v12229_v25 = vpop.f32.mrb[12].mxu1  ;;  %v10177_v4 = vsel %vm10106_vm13, %v10074_v17, %v10145_v53 }
 0x63c   : > { %v10079_v52 = vadd.f32 %v12229_v25, %v15855_v2  ;;  %v9947_v63 = vpop.f32.mrb[13].mxu1 }
 0x63d   : > { %v10077_v24 = vadd.f32 %v15855_v2, %v9947_v63  ;;  %v12230_v49 = vpop.f32.mrb[14].mxu1 }
 0x63e   : > { %v10150_v60 = vmul.f32 %v15860_v36, %v10079_v52  ;;  %v10080_v0 = vadd.f32 %v12230_v49, %v15855_v2  ;;  %10248 = vrot.lane.b32.xlu0 %v10176_v57, %s12909_s7  ;;  %v9950_v42 = vpop.f32.mrb[15].mxu1  ;;  %vm10111_vm3 = vcmp.ge.f32.partialorder %v10079_v52, 0.0 }
 0x63f   : > { %v10078_v23 = vadd.f32 %v15855_v2, %v9950_v42  ;;  %10250 = vrot.lane.b32.xlu1 %v10177_v4, %s12909_s7  ;;  %v10148_v48 = vmul.f32 %v15860_v36, %v10077_v24  ;;  %vm10109_vm1 = vcmp.ge.f32.partialorder %v10077_v24, 0.0 }
 0x640   : > { %v10151_v15 = vmul.f32 %v15860_v36, %v10080_v0  ;;  %v10182_v44 = vsel %vm10111_vm3, %v10079_v52, %v10150_v60  ;;  %vm10112_vm14 = vcmp.ge.f32.partialorder %v10080_v0, 0.0 }
 0x641   : > { %v10149_v26 = vmul.f32 %v15860_v36, %v10078_v23  ;;  %vm10110_vm15 = vcmp.ge.f32.partialorder %v10078_v23, 0.0  ;;  %v10180_v47 = vsel %vm10109_vm1, %v10077_v24, %v10148_v48 }
 0x642   : > { %10260 = vrot.lane.b32.xlu0 %v10182_v44, %s12909_s7  ;;  %v10183_v35 = vsel %vm10112_vm14, %v10080_v0, %v10151_v15 }
 0x643   : > { %10262 = vrot.lane.b32.xlu1 %v10183_v35, %s12909_s7  ;;  %v12233_v41 = vpop.f32.mrb[16].mxu1  ;;  %v10181_v28 = vsel %vm10110_vm15, %v10078_v23, %v10149_v26 }
 0x644   : > { %v10083_v54 = vadd.f32 %v12233_v41, %v15855_v2  ;;  %v9963_v9 = vpop.f32.mrb[17].mxu1 }
 0x645   : > { %v10081_v1 = vadd.f32 %v15855_v2, %v9963_v9  ;;  %v12234_v59 = vpop.f32.mrb[18].mxu1 }
 0x646   : > { %v10154_v19 = vmul.f32 %v15860_v36, %v10083_v54  ;;  %v10084_v40 = vadd.f32 %v12234_v59, %v15855_v2  ;;  %10256 = vrot.lane.b32.xlu0 %v10180_v47, %s12909_s7  ;;  %v9966_v46 = vpop.f32.mrb[19].mxu1  ;;  %vm10115_vm0 = vcmp.ge.f32.partialorder %v10083_v54, 0.0  ;;  %v12868_v59 = vld [vmem:[%s12956_s27 + $0x10] sm:$0xff] }
 0x647   : > { %v10082_v21 = vadd.f32 %v15855_v2, %v9966_v46  ;;  %10258 = vrot.lane.b32.xlu1 %v10181_v28, %s12909_s7  ;;  %v10152_v7 = vmul.f32 %v15860_v36, %v10081_v1  ;;  %vm10113_vm4 = vcmp.ge.f32.partialorder %v10081_v1, 0.0  ;;  %v12870_v28 = vld [vmem:[%s12956_s27 + $0x18] sm:$0xff] }
 0x648   : > { %v10155_v8 = vmul.f32 %v15860_v36, %v10084_v40  ;;  %v10186_v16 = vsel %vm10115_vm0, %v10083_v54, %v10154_v19  ;;  %vm10116_vm2 = vcmp.ge.f32.partialorder %v10084_v40, 0.0  ;;  %v12869_v19 = vld [vmem:[%s12956_s27] sm:$0xff] }
 0x649   : > { %v10153_v20 = vmul.f32 %v15860_v36, %v10082_v21  ;;  %vm10114_vm5 = vcmp.ge.f32.partialorder %v10082_v21, 0.0  ;;  %v10184_v50 = vsel %vm10113_vm4, %v10081_v1, %v10152_v7 }
 0x64a   : > { %10268 = vrot.lane.b32.xlu0 %v10186_v16, %s12909_s7  ;;  %v10187_v45 = vsel %vm10116_vm2, %v10084_v40, %v10155_v8  ;;  %vm10360_vm2 = vcmask 97280   ;;  %v12871_v16 = vld [vmem:[%s12956_s27 + $0x8] sm:$0xff] }
 0x64b   : > { %10270 = vrot.lane.b32.xlu1 %v10187_v45, %s12909_s7  ;;  %v12237_v11 = vpop.f32.mrb[20].mxu1  ;;  %v10185_v61 = vsel %vm10114_vm5, %v10082_v21, %v10153_v20  ;;  %v12872_v45 = vld [vmem:[%s12956_s27 + $0x30] sm:$0xff] }
 0x64c   : > { %v10087_v6 = vadd.f32 %v12237_v11, %v15855_v2  ;;  %v9979_v58 = vpop.f32.mrb[21].mxu1 }
 0x64d   : > { %v10085_v32 = vadd.f32 %v15855_v2, %v9979_v58  ;;  %v12238_v51 = vpop.f32.mrb[22].mxu1  ;;  %v12873_v58 = vld [vmem:[%s12956_s27 + $0x38] sm:$0xff] }
 0x64e   : > { %v10158_v37 = vmul.f32 %v15860_v36, %v10087_v6  ;;  %v10088_v12 = vadd.f32 %v12238_v51, %v15855_v2  ;;  %10264 = vrot.lane.b32.xlu0 %v10184_v50, %s12909_s7  ;;  %v9982_v14 = vpop.f32.mrb[23].mxu1  ;;  %vm10119_vm6 = vcmp.ge.f32.partialorder %v10087_v6, 0.0  ;;  %v12874_v50 = vld [vmem:[%s12956_s27 + $0x20] sm:$0xff] }
 0x64f   : > { %v10086_v34 = vadd.f32 %v15855_v2, %v9982_v14  ;;  %10266 = vrot.lane.b32.xlu1 %v10185_v61, %s12909_s7  ;;  %v10156_v13 = vmul.f32 %v15860_v36, %v10085_v32  ;;  %vm10117_vm9 = vcmp.ge.f32.partialorder %v10085_v32, 0.0  ;;  %v12875_v14 = vld [vmem:[%s12956_s27 + $0x28] sm:$0xff] }
 0x650   : > { %v10159_v30 = vmul.f32 %v15860_v36, %v10088_v12  ;;  %v10190_v3 = vsel %vm10119_vm6, %v10087_v6, %v10158_v37  ;;  %vm10120_vm8 = vcmp.ge.f32.partialorder %v10088_v12, 0.0 }
 0x651   : > { %v10157_v29 = vmul.f32 %v15860_v36, %v10086_v34  ;;  %vm10118_vm10 = vcmp.ge.f32.partialorder %v10086_v34, 0.0  ;;  %v10188_v39 = vsel %vm10117_vm9, %v10085_v32, %v10156_v13 }
 0x652   : > { %10276 = vrot.lane.b32.xlu0 %v10190_v3, %s12909_s7  ;;  %v10191_v55 = vsel %vm10120_vm8, %v10088_v12, %v10159_v30  ;;  %v12876_v30 = vld [vmem:[%s12956_s27 + $0x50] sm:$0xff] }
 0x653   : > { %10278 = vrot.lane.b32.xlu1 %v10191_v55, %s12909_s7  ;;  %v12241_v43 = vpop.f32.mrb[24].mxu1  ;;  %v10189_v38 = vsel %vm10118_vm10, %v10086_v34, %v10157_v29  ;;  %v12877_v29 = vld [vmem:[%s12956_s27 + $0x58] sm:$0xff] }
 0x654   : > { %v10091_v31 = vadd.f32 %v12241_v43, %v15855_v2  ;;  %v9995_v33 = vpop.f32.mrb[25].mxu1 }
 0x655   : > { %v10089_v62 = vadd.f32 %v15855_v2, %v9995_v33  ;;  %v12242_v56 = vpop.f32.mrb[26].mxu1 }
 0x656   : > { %v10162_v5 = vmul.f32 %v15860_v36, %v10091_v31  ;;  %v10092_v18 = vadd.f32 %v12242_v56, %v15855_v2  ;;  %10272 = vrot.lane.b32.xlu0 %v10188_v39, %s12909_s7  ;;  %v9998_v17 = vpop.f32.mrb[27].mxu1  ;;  %vm10123_vm11 = vcmp.ge.f32.partialorder %v10091_v31, 0.0  ;;  %v12879_v56 = vld [vmem:[%s12956_s27 + $0x48] sm:$0xff] }
 0x657   : > { %v10090_v10 = vadd.f32 %v15855_v2, %v9998_v17  ;;  %10274 = vrot.lane.b32.xlu1 %v10189_v38, %s12909_s7  ;;  %v10160_v27 = vmul.f32 %v15860_v36, %v10089_v62  ;;  %vm10121_vm13 = vcmp.ge.f32.partialorder %v10089_v62, 0.0 }
 0x658   : > { %v10163_v22 = vmul.f32 %v15860_v36, %v10092_v18  ;;  %v10194_v53 = vsel %vm10123_vm11, %v10091_v31, %v10162_v5  ;;  %vm10124_vm12 = vcmp.ge.f32.partialorder %v10092_v18, 0.0  ;;  %v12878_v31 = vld [vmem:[%s12956_s27 + $0x40] sm:$0xff] }
 0x659   : > { %v10161_v25 = vmul.f32 %v15860_v36, %v10090_v10  ;;  %vm10122_vm3 = vcmp.ge.f32.partialorder %v10090_v10, 0.0  ;;  %v10192_v0 = vsel %vm10121_vm13, %v10089_v62, %v10160_v27  ;;  %v12882_v27 = vld [vmem:[%s12956_s27 + $0x60] sm:$0xff] }
 0x65a   : > { %10284 = vrot.lane.b32.xlu0 %v10194_v53, %s12909_s7  ;;  %v10195_v52 = vsel %vm10124_vm12, %v10092_v18, %v10163_v22  ;;  %v12880_v18 = vld [vmem:[%s12956_s27 + $0x70] sm:$0xff] }
 0x65b   : > { %10286 = vrot.lane.b32.xlu1 %v10195_v52, %s12909_s7  ;;  %v12245_v63 = vpop.f32.mrb[28].mxu1  ;;  %v10193_v4 = vsel %vm10122_vm3, %v10090_v10, %v10161_v25  ;;  %v12881_v10 = vld [vmem:[%s12956_s27 + $0x78] sm:$0xff] }
 0x65c   : > { %v10011_v24 = vpop.f32.mrb[29].mxu1  ;;  %v10095_v49 = vadd.f32 %v12245_v63, %v15855_v2  ;;  %v12883_v63 = vld [vmem:[%s12956_s27 + $0x68] sm:$0xff] }
 0x65d   : > { %v10093_v57 = vadd.f32 %v15855_v2, %v10011_v24  ;;  %v12246_v60 = vpop.f32.mrb[30].mxu1 }
 0x65e   : > { %10280 = vrot.lane.b32.xlu0 %v10192_v0, %s12909_s7  ;;  %v10014_v42 = vpop.f32.mrb[31].mxu1  ;;  %v10096_v15 = vadd.f32 %v12246_v60, %v15855_v2  ;;  %v10166_v48 = vmul.f32 %v15860_v36, %v10095_v49  ;;  %vm10127_vm15 = vcmp.ge.f32.partialorder %v10095_v49, 0.0 }
 0x65f   : > { %v10164_v23 = vmul.f32 %v15860_v36, %v10093_v57  ;;  %v10094_v44 = vadd.f32 %v15855_v2, %v10014_v42  ;;  %10282 = vrot.lane.b32.xlu1 %v10193_v4, %s12909_s7  ;;  %vm10125_vm14 = vcmp.ge.f32.partialorder %v10093_v57, 0.0  ;;  %v12885_v42 = vld [vmem:[%s12956_s27 + $0x98] sm:$0xff] }
 0x660   : > { %v10167_v41 = vmul.f32 %v15860_v36, %v10096_v15  ;;  %vm10128_vm0 = vcmp.ge.f32.partialorder %v10096_v15, 0.0  ;;  %v10198_v2 = vsel %vm10127_vm15, %v10095_v49, %v10166_v48 }
 0x661   : > { %v10165_v26 = vmul.f32 %v15860_v36, %v10094_v44  ;;  %v10196_v35 = vsel %vm10125_vm14, %v10093_v57, %v10164_v23  ;;  %vm10126_vm1 = vcmp.ge.f32.partialorder %v10094_v44, 0.0  ;;  %v12884_v57 = vld [vmem:[%s12956_s27 + $0x90] sm:$0xff] }
 0x662   : > { %10288 = vrot.lane.b32.xlu0 %v10196_v35, %s12909_s7  ;;  %v10199_v9 = vsel %vm10128_vm0, %v10096_v15, %v10167_v41  ;;  %v12886_v15 = vld [vmem:[%s12956_s27 + $0x80] sm:$0xff] }
 0x663   : > { %v10197_v54 = vsel %vm10126_vm1, %v10094_v44, %v10165_v26  ;;  %v12887_v26 = vld [vmem:[%s12956_s27 + $0x88] sm:$0xff] }
 0x664   : > { %10290 = vrot.lane.b32.xlu1 %v10197_v54, %s12909_s7  ;;  %v12888_v54 = vld [vmem:[%s12956_s27 + $0xb0] sm:$0xff] }
 0x666   : > { %10292 = vrot.lane.b32.xlu0 %v10198_v2, %s12909_s7 }
 0x668   : > { %10294 = vrot.lane.b32.xlu1 %v10199_v9, %s12909_s7 }
 0x69b   : > { %v10237_v1 = vpop.permute.xlu1 %10236 }
 0x69c   : > { %v10330_v36 = vsel %vm776_vm7, %v12868_v59, %v10237_v1  ;;  %v10233_v47 = vpop.permute.xlu0 %10232  ;;  %v12889_v1 = vld [vmem:[%s12956_s27 + $0xb8] sm:$0xff] }
 0x69d   : > { %10363 = vst.msk [vmem:[%s12961_s30 + $0x10] sm:$0xff] %vm10360_vm2, %v10330_v36  ;;  %v10328_v40 = vsel %vm776_vm7, %v12869_v19, %v10233_v47  ;;  %v12890_v47 = vld [vmem:[%s12956_s27 + $0xa0] sm:$0xff] }
 0x69e   : > { %10361 = vst.msk [vmem:[%s12961_s30] sm:$0xff] %vm10360_vm2, %v10328_v40 }
 0x69f   : > { %v10239_v46 = vpop.permute.xlu1 %10238 }
 0x6a0   : > { %v10331_v21 = vsel %vm776_vm7, %v12870_v28, %v10239_v46  ;;  %v10235_v8 = vpop.permute.xlu0 %10234  ;;  %v12891_v46 = vld [vmem:[%s12956_s27 + $0xa8] sm:$0xff] }
 0x6a1   : > { %10364 = vst.msk [vmem:[%s12961_s30 + $0x18] sm:$0xff] %vm10360_vm2, %v10331_v21  ;;  %v10329_v7 = vsel %vm776_vm7, %v12871_v16, %v10235_v8  ;;  %v12892_v8 = vld [vmem:[%s12956_s27 + $0xd0] sm:$0xff] }
 0x6a2   : > { %10362 = vst.msk [vmem:[%s12961_s30 + $0x8] sm:$0xff] %vm10360_vm2, %v10329_v7 }
 0x6a4   : > { %v10245_v20 = vpop.permute.xlu0 %10244 }
 0x6a5   : > { %v10334_v11 = vsel %vm776_vm7, %v12872_v45, %v10245_v20  ;;  %v10247_v6 = vpop.permute.xlu1 %10246  ;;  %v12893_v20 = vld [vmem:[%s12956_s27 + $0xd8] sm:$0xff] }
 0x6a6   : > { %10367 = vst.msk [vmem:[%s12961_s30 + $0x30] sm:$0xff] %vm10360_vm2, %v10334_v11  ;;  %v10335_v32 = vsel %vm776_vm7, %v12873_v58, %v10247_v6  ;;  %v12894_v6 = vld [vmem:[%s12956_s27 + $0xc0] sm:$0xff] }
 0x6a7   : > { %10368 = vst.msk [vmem:[%s12961_s30 + $0x38] sm:$0xff] %vm10360_vm2, %v10335_v32 }
 0x6a8   : > { %v10241_v51 = vpop.permute.xlu0 %10240 }
 0x6a9   : > { %v10332_v37 = vsel %vm776_vm7, %v12874_v50, %v10241_v51  ;;  %v10243_v12 = vpop.permute.xlu1 %10242  ;;  %v12895_v51 = vld [vmem:[%s12956_s27 + $0xc8] sm:$0xff] }
 0x6aa   : > { %10365 = vst.msk [vmem:[%s12961_s30 + $0x20] sm:$0xff] %vm10360_vm2, %v10332_v37  ;;  %v10333_v61 = vsel %vm776_vm7, %v12875_v14, %v10243_v12  ;;  %v12896_v12 = vld [vmem:[%s12956_s27 + $0xe0] sm:$0xff] }
 0x6ab   : > { %10366 = vst.msk [vmem:[%s12961_s30 + $0x28] sm:$0xff] %vm10360_vm2, %v10333_v61 }
 0x6ac   : > { %v10253_v34 = vpop.permute.xlu0 %10252 }
 0x6ad   : > { %v10338_v3 = vsel %vm776_vm7, %v12876_v30, %v10253_v34  ;;  %v10255_v13 = vpop.permute.xlu1 %10254  ;;  %v12897_v34 = vld [vmem:[%s12956_s27 + $0xe8] sm:$0xff] }
 0x6ae   : > { %10371 = vst.msk [vmem:[%s12961_s30 + $0x50] sm:$0xff] %vm10360_vm2, %v10338_v3  ;;  %v10339_v55 = vsel %vm776_vm7, %v12877_v29, %v10255_v13  ;;  %v12898_v13 = vld [vmem:[%s12956_s27 + $0xf0] sm:$0xff] }
 0x6af   : > { %10372 = vst.msk [vmem:[%s12961_s30 + $0x58] sm:$0xff] %vm10360_vm2, %v10339_v55 }
 0x6b0   : > { %v10249_v43 = vpop.permute.xlu0 %10248 }
 0x6b1   : > { %v10336_v33 = vsel %vm776_vm7, %v12878_v31, %v10249_v43  ;;  %v10251_v62 = vpop.permute.xlu1 %10250  ;;  %v12899_v43 = vld [vmem:[%s12956_s27 + $0xf8] sm:$0xff] }
 0x6b2   : > { %10369 = vst.msk [vmem:[%s12961_s30 + $0x40] sm:$0xff] %vm10360_vm2, %v10336_v33  ;;  %v10337_v39 = vsel %vm776_vm7, %v12879_v56, %v10251_v62 }
 0x6b3   : > { %10370 = vst.msk [vmem:[%s12961_s30 + $0x48] sm:$0xff] %vm10360_vm2, %v10337_v39 }
 0x6b4   : > { %v10261_v5 = vpop.permute.xlu0 %10260 }
 0x6b5   : > { %v10342_v17 = vsel %vm776_vm7, %v12880_v18, %v10261_v5  ;;  %v10263_v38 = vpop.permute.xlu1 %10262 }
 0x6b6   : > { %10375 = vst.msk [vmem:[%s12961_s30 + $0x70] sm:$0xff] %vm10360_vm2, %v10342_v17  ;;  %v10343_v22 = vsel %vm776_vm7, %v12881_v10, %v10263_v38 }
 0x6b7   : > { %10376 = vst.msk [vmem:[%s12961_s30 + $0x78] sm:$0xff] %vm10360_vm2, %v10343_v22 }
 0x6b8   : > { %v10257_v53 = vpop.permute.xlu0 %10256 }
 0x6b9   : > { %v10340_v25 = vsel %vm776_vm7, %v12882_v27, %v10257_v53  ;;  %v10259_v52 = vpop.permute.xlu1 %10258 }
 0x6ba   : > { %10373 = vst.msk [vmem:[%s12961_s30 + $0x60] sm:$0xff] %vm10360_vm2, %v10340_v25  ;;  %v10341_v24 = vsel %vm776_vm7, %v12883_v63, %v10259_v52 }
 0x6bb   : > { %10374 = vst.msk [vmem:[%s12961_s30 + $0x68] sm:$0xff] %vm10360_vm2, %v10341_v24 }
 0x6bc   : > { %v10269_v49 = vpop.permute.xlu0 %10268 }
 0x6bd   : > { %v10346_v60 = vsel %vm776_vm7, %v12884_v57, %v10269_v49  ;;  %v10271_v0 = vpop.permute.xlu1 %10270 }
 0x6be   : > { %10379 = vst.msk [vmem:[%s12961_s30 + $0x90] sm:$0xff] %vm10360_vm2, %v10346_v60  ;;  %v10347_v4 = vsel %vm776_vm7, %v12885_v42, %v10271_v0 }
 0x6bf   : > { %10380 = vst.msk [vmem:[%s12961_s30 + $0x98] sm:$0xff] %vm10360_vm2, %v10347_v4 }
 0x6c0   : > { %v10265_v23 = vpop.permute.xlu0 %10264 }
 0x6c1   : > { %v10344_v44 = vsel %vm776_vm7, %v12886_v15, %v10265_v23  ;;  %v10267_v48 = vpop.permute.xlu1 %10266 }
 0x6c2   : > { %10377 = vst.msk [vmem:[%s12961_s30 + $0x80] sm:$0xff] %vm10360_vm2, %v10344_v44  ;;  %v10345_v35 = vsel %vm776_vm7, %v12887_v26, %v10267_v48 }
 0x6c3   : > { %10378 = vst.msk [vmem:[%s12961_s30 + $0x88] sm:$0xff] %vm10360_vm2, %v10345_v35 }
 0x6c4   : > { %v10277_v41 = vpop.permute.xlu0 %10276 }
 0x6c5   : > { %v10350_v2 = vsel %vm776_vm7, %v12888_v54, %v10277_v41  ;;  %v10279_v9 = vpop.permute.xlu1 %10278 }
 0x6c6   : > { %10383 = vst.msk [vmem:[%s12961_s30 + $0xb0] sm:$0xff] %vm10360_vm2, %v10350_v2  ;;  %v10351_v59 = vsel %vm776_vm7, %v12889_v1, %v10279_v9 }
 0x6c7   : > { %10384 = vst.msk [vmem:[%s12961_s30 + $0xb8] sm:$0xff] %vm10360_vm2, %v10351_v59 }
 0x6c8   : > { %v10273_v36 = vpop.permute.xlu0 %10272 }
 0x6c9   : > { %v10348_v19 = vsel %vm776_vm7, %v12890_v47, %v10273_v36  ;;  %v10275_v40 = vpop.permute.xlu1 %10274 }
 0x6ca   : > { %10381 = vst.msk [vmem:[%s12961_s30 + $0xa0] sm:$0xff] %vm10360_vm2, %v10348_v19  ;;  %v10349_v28 = vsel %vm776_vm7, %v12891_v46, %v10275_v40 }
 0x6cb   : > { %10382 = vst.msk [vmem:[%s12961_s30 + $0xa8] sm:$0xff] %vm10360_vm2, %v10349_v28 }
 0x6cc   : > { %v10285_v21 = vpop.permute.xlu0 %10284 }
 0x6cd   : > { %v10354_v16 = vsel %vm776_vm7, %v12892_v8, %v10285_v21  ;;  %v10287_v7 = vpop.permute.xlu1 %10286 }
 0x6ce   : > { %10387 = vst.msk [vmem:[%s12961_s30 + $0xd0] sm:$0xff] %vm10360_vm2, %v10354_v16  ;;  %v10355_v45 = vsel %vm776_vm7, %v12893_v20, %v10287_v7 }
 0x6cf   : > { %10388 = vst.msk [vmem:[%s12961_s30 + $0xd8] sm:$0xff] %vm10360_vm2, %v10355_v45 }
 0x6d0   : > { %v10281_v11 = vpop.permute.xlu0 %10280 }
 0x6d1   : > { %v10352_v58 = vsel %vm776_vm7, %v12894_v6, %v10281_v11  ;;  %v10283_v32 = vpop.permute.xlu1 %10282 }
 0x6d2   : > { %10385 = vst.msk [vmem:[%s12961_s30 + $0xc0] sm:$0xff] %vm10360_vm2, %v10352_v58  ;;  %v10353_v50 = vsel %vm776_vm7, %v12895_v51, %v10283_v32 }
 0x6d3   : > { %10386 = vst.msk [vmem:[%s12961_s30 + $0xc8] sm:$0xff] %vm10360_vm2, %v10353_v50 }
 0x6d4   : > { %v10289_v37 = vpop.permute.xlu0 %10288 }
 0x6d5   : > { %v10356_v14 = vsel %vm776_vm7, %v12896_v12, %v10289_v37 }
 0x6d6   : > { %10389 = vst.msk [vmem:[%s12961_s30 + $0xe0] sm:$0xff] %vm10360_vm2, %v10356_v14  ;;  %v10291_v61 = vpop.permute.xlu1 %10290 }
 0x6d7   : > { %v10357_v30 = vsel %vm776_vm7, %v12897_v34, %v10291_v61 }
 0x6d8   : > { %10390 = vst.msk [vmem:[%s12961_s30 + $0xe8] sm:$0xff] %vm10360_vm2, %v10357_v30  ;;  %v10293_v3 = vpop.permute.xlu0 %10292 }
 0x6d9   : > { %v10358_v29 = vsel %vm776_vm7, %v12898_v13, %v10293_v3 }
 0x6da   : > { %10391 = vst.msk [vmem:[%s12961_s30 + $0xf0] sm:$0xff] %vm10360_vm2, %v10358_v29  ;;  %v10295_v55 = vpop.permute.xlu1 %10294 }
 0x6db   : > { %v10359_v31 = vsel %vm776_vm7, %v12899_v43, %v10295_v55 }
 0x6dc   : > { %10392 = vst.msk [vmem:[%s12961_s30 + $0xf8] sm:$0xff] %vm10360_vm2, %v10359_v31 }
 0x6dd PF: > { %s16_s21 = sadd.s32 1, %s12906_s21  }
 0x6de   : > { %p13_p5 = scmp.ge.s32.totalorder %s16_s21, 4  }
 0x6e0   :  { %15 = sbr.rel (!%p13_p5) target bundleno = 1 (0x1), region = 98 }

</bundles_post_ra>
